<compile_context>
chip_gen: v6e
topology: v6e:2x2x1
jax: 0.10.0
libtpu: 0.0.40
codegen_flags: <defaults>
</compile_context>

<pallas_src>
import jax
import jax.numpy as jnp
from jax import lax
from jax.experimental import pallas as pl
from jax.experimental.pallas import tpu as pltpu

PART_NUM = 50
PART_PAD = 64           # part_num padded to a multiple of 8 sublanes (f32)
NUM_CLASSES = 16
D_CAT = 4928            # pt_cat channel count implied by convs1 (4928 + 64 input channels)


# ----------------------------------------------------------------------------- kernel
def _pointnet_fc_head_kernel(x_ref, lb1_ref, w1_ref, w2_ref, b2_ref,
                             w3_ref, b3_ref, w4t_ref, b4_ref, out_ref):
    # Channels-major tiles: (C, TN), points on the lane axis.  Input is already bf16.
    x = x_ref[0]                                                           # (D_CAT, TN)

    # convs1 (+ folded BN1 + folded label-branch bias) + ReLU
    h1 = jnp.dot(w1_ref[...], x, preferred_element_type=jnp.float32)      # (256, TN)
    h1 = jnp.maximum(h1 + lb1_ref[0], 0.0).astype(jnp.bfloat16)

    # convs2 + BN2 + ReLU
    h2 = jnp.dot(w2_ref[...], h1, preferred_element_type=jnp.float32)
    h2 = jnp.maximum(h2 + b2_ref[...], 0.0).astype(jnp.bfloat16)

    # convs3 + BN3 + ReLU
    h3 = jnp.dot(w3_ref[...], h2, preferred_element_type=jnp.float32)
    h3 = jnp.maximum(h3 + b3_ref[...], 0.0).astype(jnp.bfloat16)          # (128, TN)

    # convs4: transposed-LHS matmul so the result is already points-major.
    #   h3 (128, TN) contracted on axis 0 with w4t (128, 64)  ->  (TN, 64)
    logits = lax.dot_general(h3, w4t_ref[...], (((0,), (0,)), ((), ())),
                             preferred_element_type=jnp.float32)
    logits = logits + b4_ref[...]                                          # (1, 64) bias

    # log_softmax over the (padded) part axis; pad channels (-1e30 bias) contribute 0.
    # Reduction is per-point (per sublane row), so any garbage in ragged-tail point rows
    # never contaminates valid rows.
    m = jnp.max(logits, axis=-1, keepdims=True)                            # (TN, 1)
    z = logits - m
    lse = jnp.log(jnp.sum(jnp.exp(z), axis=-1, keepdims=True))
    out_ref[0] = (z - lse)[:, :PART_NUM].astype(out_ref.dtype)             # (TN, 50)


# ----------------------------------------------------------------------------- wrapper
def pointnet_fc_forward(pt_feat, pt_cat, label, prep, *, tn=512, input_buffers=2,
                        vmem_limit_bytes=32 << 20):
    """Forward pass of get_model (eval-mode BN).  Returns (B, N, part_num) log-probs.

    Callers should pass pt_cat in bf16 (the dominant HBM stream); f32 input is accepted
    but incurs an extra full-HBM cast pass outside the kernel.
    On v6e, input_buffers=3 can absorb DMA jitter (kernel is DMA-limited there).
    """
    del pt_feat  # unused by the PyTorch forward as well
    B, D, N = pt_cat.shape
    assert D == D_CAT
    if pt_cat.dtype != jnp.bfloat16:
        pt_cat = pt_cat.astype(jnp.bfloat16)

    # Fold the label branch into a per-batch bias for convs1 (tiny, done in f32 by XLA).
    label = label.astype(jnp.float32)
    lab64 = jnp.maximum(label @ prep["wl_m"] + prep["bl"], 0.0)            # (B, 64)
    lab_b1 = (lab64 @ prep["w1b_m"] + prep["b1"]).reshape(B, 256, 1)       # (B, 256, 1)

    # Point tile: multiple of 128 lanes, or the full (small) N extent.
    tn_eff = N if N <= tn else tn
    if tn_eff != N:
        assert tn_eff % 128 == 0, "tn must be a multiple of 128"
    n_tiles = pl.cdiv(N, tn_eff)

    # Constant operands: single-buffered (DMA'd once — index map never changes).
    const = lambda a: pl.BlockSpec(a.shape, lambda b, j: (0, 0),
                                   pipeline_mode=pl.Buffered(1))

    out = pl.pallas_call(
        _pointnet_fc_head_kernel,
        out_shape=jax.ShapeDtypeStruct((B, N, PART_NUM), jnp.float32),
        grid_spec=pltpu.PrefetchScalarGridSpec(
            num_scalar_prefetch=0,
            grid=(B, n_tiles),
            in_specs=[
                pl.BlockSpec((1, D_CAT, tn_eff), lambda b, j: (b, 0, j),    # pt_cat tile
                             pipeline_mode=pl.Buffered(input_buffers)),
                pl.BlockSpec((1, 256, 1), lambda b, j: (b, 0, 0)),          # per-batch bias
                const(prep["w1a"]),
                const(prep["w2"]), const(prep["b2"]),
                const(prep["w3"]), const(prep["b3"]),
                const(prep["w4t"]), const(prep["b4"]),
            ],
            # Output is written already transposed to (B, N, part_num); last dim is the
            # full array extent, so no post-kernel XLA transpose/slice is needed.
            out_specs=pl.BlockSpec((1, tn_eff, PART_NUM), lambda b, j: (b, j, 0)),
        ),
        compiler_params=pltpu.CompilerParams(
            dimension_semantics=("parallel", "parallel"),
            vmem_limit_bytes=vmem_limit_bytes,
        ),
    )(pt_cat, lab_b1, prep["w1a"], prep["w2"], prep["b2"],
      prep["w3"], prep["b3"], prep["w4t"], prep["b4"])
    return out


# ----------------------------------------------------------------------------- params
def make_params(key):
    """Deterministic Conv1d / BatchNorm1d parameters in PyTorch layout."""
    ks = jax.random.split(key, 9)

    def conv(k, cout, cin):
        kw, kb = jax.random.split(k)
        w = jax.random.normal(kw, (cout, cin), jnp.float32) / jnp.sqrt(float(cin))
        b = 0.05 * jax.random.normal(kb, (cout,), jnp.float32)
        return w, b

    def bn(k, c):
        k1, k2, k3, k4 = jax.random.split(k, 4)
        gamma = 1.0 + 0.1 * jax.random.normal(k1, (c,), jnp.float32)
        beta = 0.1 * jax.random.normal(k2, (c,), jnp.float32)
        mean = 0.1 * jax.random.normal(k3, (c,), jnp.float32)
        var = jnp.abs(jax.random.normal(k4, (c,), jnp.float32)) + 0.5
        return gamma, beta, mean, var

    return dict(
        convs_label=conv(ks[0], 64, NUM_CLASSES), bns_label=bn(ks[1], 64),
        convs1=conv(ks[2], 256, D_CAT + 64),      bns1=bn(ks[3], 256),
        convs2=conv(ks[4], 256, 256),             bns2=bn(ks[5], 256),
        convs3=conv(ks[6], 128, 256),             bns3=bn(ks[7], 128),
        convs4=conv(ks[8], PART_NUM, 128),
    )


def prepare_params(raw):
    """Fold eval-mode BN, split/fold the label branch, pad+transpose convs4, cast to bf16."""
    def fold(wb, bnp, eps=1e-5):
        (w, b), (gamma, beta, mean, var) = wb, bnp
        s = gamma / jnp.sqrt(var + eps)
        return w * s[:, None], s * (b - mean) + beta

    wl, bl = fold(raw["convs_label"], raw["bns_label"])   # (64, 16), (64,)
    w1, b1 = fold(raw["convs1"], raw["bns1"])             # (256, 4992), (256,)
    w2, b2 = fold(raw["convs2"], raw["bns2"])             # (256, 256), (256,)
    w3, b3 = fold(raw["convs3"], raw["bns3"])             # (128, 256), (128,)
    w4, b4 = raw["convs4"]                                # (50, 128), (50,)

    # Pad part channels to 64 (zero weight, -1e30 bias) so log_softmax ignores the pad.
    w4p = jnp.zeros((PART_PAD, 128), jnp.float32).at[:PART_NUM].set(w4)
    b4p = jnp.full((PART_PAD,), -1e30, jnp.float32).at[:PART_NUM].set(b4)

    return dict(
        # label-branch fold pieces (f32, matmul layout) — used in the wrapper only
        wl_m=wl.T, bl=bl, w1b_m=w1[:, D_CAT:].T, b1=b1,
        # kernel weights, bf16 for the MXU
        w1a=w1[:, :D_CAT].astype(jnp.bfloat16),           # (256, 4928)
        w2=w2.astype(jnp.bfloat16),                        # (256, 256)
        w3=w3.astype(jnp.bfloat16),                        # (128, 256)
        w4t=w4p.T.astype(jnp.bfloat16),                    # (128, 64) — pre-transposed
        # kernel biases, f32
        b2=b2.reshape(-1, 1), b3=b3.reshape(-1, 1),        # column form (C, 1)
        b4=b4p.reshape(1, -1),                             # row form (1, 64)
    )


# ----------------------------------------------------------------------------- reference
def reference(pt_cat, label, prep):
    """Pure-JAX reference mirroring the kernel's precision (bf16 operands, f32 accum).

    With full-f32 weights/activations this is exactly the PyTorch eval-mode forward;
    bf16 operand quantization matches the kernel's MXU inputs, so the comparison
    tolerance only has to cover accumulation-order noise (note: not bit-exact vs an
    all-f32 PyTorch run, especially over the K=4928 contraction).
    """
    q = lambda a: a.astype(jnp.bfloat16).astype(jnp.float32)
    f = lambda a: a.astype(jnp.float32)

    lab64 = jnp.maximum(label.astype(jnp.float32) @ prep["wl_m"] + prep["bl"], 0.0)
    lab_b1 = (lab64 @ prep["w1b_m"] + prep["b1"])[:, :, None]              # (B, 256, 1)

    x = f(pt_cat)                                                          # bf16 -> f32
    h1 = q(jnp.maximum(jnp.einsum("od,bdn->bon", f(prep["w1a"]), x) + lab_b1, 0.0))
    h2 = q(jnp.maximum(jnp.einsum("oc,bcn->bon", f(prep["w2"]), h1) + prep["b2"], 0.0))
    h3 = q(jnp.maximum(jnp.einsum("oc,bcn->bon", f(prep["w3"]), h2) + prep["b3"], 0.0))
    logits = jnp.einsum("co,bcn->bno", f(prep["w4t"]), h3) + prep["b4"]    # (B, N, 64)
    logp = jax.nn.log_softmax(logits, axis=-1)
    return logp[:, :, :PART_NUM]                                           # (B, N, 50)


# ----------------------------------------------------------------------------- main
if __name__ == "__main__":
    key = jax.random.PRNGKey(0)
    kp, kx, kf, kl = jax.random.split(key, 4)

    B, N = 2, 256
    raw = make_params(kp)
    prep = prepare_params(raw)

    # Feed the big feature tensor in bf16 (the kernel's native input dtype).
    pt_cat = jax.random.normal(kx, (B, D_CAT, N), jnp.float32).astype(jnp.bfloat16)
    pt_feat = jax.random.normal(kf, (B, 64, N), jnp.float32)   # unused by forward
    cls = jax.random.randint(kl, (B,), 0, NUM_CLASSES)
    label = jax.nn.one_hot(cls, NUM_CLASSES, dtype=jnp.float32)

    # tn=128 at this small N exercises the (batch x point-tile) grid; production uses 512+.
    out = pointnet_fc_forward(pt_feat, pt_cat, label, prep, tn=128)
    out = jax.block_until_ready(out)
    assert out.shape == (B, N, PART_NUM)

    ref = reference(pt_cat, label, prep)
    # Tolerance covers f32 accumulation-order / bf16 intermediate-rounding noise only.
    assert bool(jnp.allclose(out, ref, atol=2e-2, rtol=2e-2)), "mismatch vs reference"
    print("KERNEL_OK")
</pallas_src>

<mosaic_0001>
module attributes {stable_mosaic.version = 11 : i64} {
  func.func @_pointnet_fc_head_kernel(%arg0: i32, %arg1: i32, %arg2: memref<1x4928x128xbf16, #tpu.memory_space<vmem>>, %arg3: memref<1x256x1xf32, #tpu.memory_space<vmem>>, %arg4: memref<256x4928xbf16, #tpu.memory_space<vmem>>, %arg5: memref<256x256xbf16, #tpu.memory_space<vmem>>, %arg6: memref<256x1xf32, #tpu.memory_space<vmem>>, %arg7: memref<128x256xbf16, #tpu.memory_space<vmem>>, %arg8: memref<128x1xf32, #tpu.memory_space<vmem>>, %arg9: memref<128x64xbf16, #tpu.memory_space<vmem>>, %arg10: memref<1x64xf32, #tpu.memory_space<vmem>>, %arg11: memref<1x128x50xf32, #tpu.memory_space<vmem>>) attributes {dimension_semantics = [#tpu.dimension_semantics<parallel>, #tpu.dimension_semantics<parallel>], iteration_bounds = array<i64: 2, 2>, scalar_prefetch = 0 : i64, scratch_operands = 0 : i64, tpu.core_type = #tpu.core_type<tc>, window_params = [{pipeline_mode = #tpu.pipeline_mode<double_buffered>, transform_indices = @transform_0, window_bounds = array<i64: 1, 4928, 128>}, {transform_indices = @transform_1, window_bounds = array<i64: 1, 256, 1>}, {pipeline_mode = #tpu.pipeline_mode<synchronous>, transform_indices = @transform_2, window_bounds = array<i64: 256, 4928>}, {pipeline_mode = #tpu.pipeline_mode<synchronous>, transform_indices = @transform_3, window_bounds = array<i64: 256, 256>}, {pipeline_mode = #tpu.pipeline_mode<synchronous>, transform_indices = @transform_4, window_bounds = array<i64: 256, 1>}, {pipeline_mode = #tpu.pipeline_mode<synchronous>, transform_indices = @transform_5, window_bounds = array<i64: 128, 256>}, {pipeline_mode = #tpu.pipeline_mode<synchronous>, transform_indices = @transform_6, window_bounds = array<i64: 128, 1>}, {pipeline_mode = #tpu.pipeline_mode<synchronous>, transform_indices = @transform_7, window_bounds = array<i64: 128, 64>}, {pipeline_mode = #tpu.pipeline_mode<synchronous>, transform_indices = @transform_8, window_bounds = array<i64: 1, 64>}, {transform_indices = @transform_9, window_bounds = array<i64: 1, 128, 50>}]} {
    %c0 = arith.constant 0 : index
    %c0_0 = arith.constant 0 : index
    %c0_1 = arith.constant 0 : index
    %0 = vector.load %arg2[%c0, %c0_0, %c0_1] : memref<1x4928x128xbf16, #tpu.memory_space<vmem>>, vector<1x4928x128xbf16>
    %1 = vector.shape_cast %0 : vector<1x4928x128xbf16> to vector<4928x128xbf16>
    %c0_2 = arith.constant 0 : index
    %c0_3 = arith.constant 0 : index
    %2 = vector.load %arg4[%c0_2, %c0_3] : memref<256x4928xbf16, #tpu.memory_space<vmem>>, vector<256x4928xbf16>
    %cst = arith.constant dense<0.000000e+00> : vector<256x128xf32>
    %3 = tpu.matmul %2, %1, %cst {dimension_numbers = #tpu.dot_dimension_numbers<[1], [0], [0], [1], [0, 0, 1, 1], [], []>} : vector<256x4928xbf16>, vector<4928x128xbf16>, vector<256x128xf32> -> vector<256x128xf32>
    %c0_4 = arith.constant 0 : index
    %c0_5 = arith.constant 0 : index
    %c0_6 = arith.constant 0 : index
    %4 = vector.load %arg3[%c0_4, %c0_5, %c0_6] : memref<1x256x1xf32, #tpu.memory_space<vmem>>, vector<1x256x1xf32>
    %5 = vector.shape_cast %4 : vector<1x256x1xf32> to vector<256x1xf32>
    %6 = vector.broadcast %5 : vector<256x1xf32> to vector<256x128xf32>
    %7 = arith.addf %3, %6 : vector<256x128xf32>
    %cst_7 = arith.constant 0.000000e+00 : f32
    %8 = vector.broadcast %cst_7 : f32 to vector<256x128xf32>
    %9 = arith.maximumf %7, %8 : vector<256x128xf32>
    %10 = arith.truncf %9 : vector<256x128xf32> to vector<256x128xbf16>
    %c0_8 = arith.constant 0 : index
    %c0_9 = arith.constant 0 : index
    %11 = vector.load %arg5[%c0_8, %c0_9] : memref<256x256xbf16, #tpu.memory_space<vmem>>, vector<256x256xbf16>
    %cst_10 = arith.constant dense<0.000000e+00> : vector<256x128xf32>
    %12 = tpu.matmul %11, %10, %cst_10 {dimension_numbers = #tpu.dot_dimension_numbers<[1], [0], [0], [1], [0, 0, 1, 1], [], []>} : vector<256x256xbf16>, vector<256x128xbf16>, vector<256x128xf32> -> vector<256x128xf32>
    %c0_11 = arith.constant 0 : index
    %c0_12 = arith.constant 0 : index
    %13 = vector.load %arg6[%c0_11, %c0_12] : memref<256x1xf32, #tpu.memory_space<vmem>>, vector<256x1xf32>
    %14 = vector.broadcast %13 : vector<256x1xf32> to vector<256x128xf32>
    %15 = arith.addf %12, %14 : vector<256x128xf32>
    %cst_13 = arith.constant 0.000000e+00 : f32
    %16 = vector.broadcast %cst_13 : f32 to vector<256x128xf32>
    %17 = arith.maximumf %15, %16 : vector<256x128xf32>
    %18 = arith.truncf %17 : vector<256x128xf32> to vector<256x128xbf16>
    %c0_14 = arith.constant 0 : index
    %c0_15 = arith.constant 0 : index
    %19 = vector.load %arg7[%c0_14, %c0_15] : memref<128x256xbf16, #tpu.memory_space<vmem>>, vector<128x256xbf16>
    %cst_16 = arith.constant dense<0.000000e+00> : vector<128x128xf32>
    %20 = tpu.matmul %19, %18, %cst_16 {dimension_numbers = #tpu.dot_dimension_numbers<[1], [0], [0], [1], [0, 0, 1, 1], [], []>} : vector<128x256xbf16>, vector<256x128xbf16>, vector<128x128xf32> -> vector<128x128xf32>
    %c0_17 = arith.constant 0 : index
    %c0_18 = arith.constant 0 : index
    %21 = vector.load %arg8[%c0_17, %c0_18] : memref<128x1xf32, #tpu.memory_space<vmem>>, vector<128x1xf32>
    %22 = vector.broadcast %21 : vector<128x1xf32> to vector<128x128xf32>
    %23 = arith.addf %20, %22 : vector<128x128xf32>
    %cst_19 = arith.constant 0.000000e+00 : f32
    %24 = vector.broadcast %cst_19 : f32 to vector<128x128xf32>
    %25 = arith.maximumf %23, %24 : vector<128x128xf32>
    %26 = arith.truncf %25 : vector<128x128xf32> to vector<128x128xbf16>
    %c0_20 = arith.constant 0 : index
    %c0_21 = arith.constant 0 : index
    %27 = vector.load %arg9[%c0_20, %c0_21] : memref<128x64xbf16, #tpu.memory_space<vmem>>, vector<128x64xbf16>
    %cst_22 = arith.constant dense<0.000000e+00> : vector<128x64xf32>
    %28 = tpu.matmul %26, %27, %cst_22 {dimension_numbers = #tpu.dot_dimension_numbers<[0], [0], [1], [1], [0, 1, 1, 1], [], []>} : vector<128x128xbf16>, vector<128x64xbf16>, vector<128x64xf32> -> vector<128x64xf32>
    %c0_23 = arith.constant 0 : index
    %c0_24 = arith.constant 0 : index
    %29 = vector.load %arg10[%c0_23, %c0_24] : memref<1x64xf32, #tpu.memory_space<vmem>>, vector<1x64xf32>
    %30 = vector.broadcast %29 : vector<1x64xf32> to vector<128x64xf32>
    %31 = arith.addf %28, %30 : vector<128x64xf32>
    %cst_25 = arith.constant dense<0xFF800000> : vector<128xf32>
    %32 = vector.multi_reduction <maximumf>, %31, %cst_25 [1] : vector<128x64xf32> to vector<128xf32>
    %33 = vector.shape_cast %32 : vector<128xf32> to vector<128x1xf32>
    %34 = vector.broadcast %33 : vector<128x1xf32> to vector<128x64xf32>
    %35 = arith.subf %31, %34 : vector<128x64xf32>
    %36 = math.exp %35 : vector<128x64xf32>
    %cst_26 = arith.constant dense<0.000000e+00> : vector<128xf32>
    %37 = vector.multi_reduction <add>, %36, %cst_26 [1] : vector<128x64xf32> to vector<128xf32>
    %38 = vector.shape_cast %37 : vector<128xf32> to vector<128x1xf32>
    %39 = math.log %38 : vector<128x1xf32>
    %40 = vector.broadcast %39 : vector<128x1xf32> to vector<128x64xf32>
    %41 = arith.subf %35, %40 : vector<128x64xf32>
    %42 = vector.extract_strided_slice %41 {offsets = [0, 0], sizes = [128, 50], strides = [1, 1]} : vector<128x64xf32> to vector<128x50xf32>
    %c0_27 = arith.constant 0 : index
    %c0_28 = arith.constant 0 : index
    %c0_29 = arith.constant 0 : index
    %43 = vector.load %arg11[%c0_27, %c0_28, %c0_29] : memref<1x128x50xf32, #tpu.memory_space<vmem>>, vector<1x128x50xf32>
    %44 = vector.shape_cast %43 : vector<1x128x50xf32> to vector<128x50xf32>
    %45 = vector.shape_cast %42 : vector<128x50xf32> to vector<1x128x50xf32>
    tpu.vector_store %arg11[%c0_27, %c0_28, %c0_29], %45 {strides = array<i32>} : memref<1x128x50xf32, #tpu.memory_space<vmem>>, vector<1x128x50xf32>,
    return
  }
  func.func @transform_0(%arg0: i32, %arg1: i32) -> (i32, i32, i32) {
    %c0_i32 = arith.constant 0 : i32
    %c0_i32_0 = arith.constant 0 : i32
    return %arg0, %c0_i32, %arg1 : i32, i32, i32
  }
  func.func @transform_1(%arg0: i32, %arg1: i32) -> (i32, i32, i32) {
    %c0_i32 = arith.constant 0 : i32
    %c0_i32_0 = arith.constant 0 : i32
    %c0_i32_1 = arith.constant 0 : i32
    return %arg0, %c0_i32, %c0_i32_0 : i32, i32, i32
  }
  func.func @transform_2(%arg0: i32, %arg1: i32) -> (i32, i32) {
    %c0_i32 = arith.constant 0 : i32
    %c0_i32_0 = arith.constant 0 : i32
    %c0_i32_1 = arith.constant 0 : i32
    return %c0_i32, %c0_i32_0 : i32, i32
  }
  func.func @transform_3(%arg0: i32, %arg1: i32) -> (i32, i32) {
    %c0_i32 = arith.constant 0 : i32
    %c0_i32_0 = arith.constant 0 : i32
    %c0_i32_1 = arith.constant 0 : i32
    return %c0_i32, %c0_i32_0 : i32, i32
  }
  func.func @transform_4(%arg0: i32, %arg1: i32) -> (i32, i32) {
    %c0_i32 = arith.constant 0 : i32
    %c0_i32_0 = arith.constant 0 : i32
    %c0_i32_1 = arith.constant 0 : i32
    return %c0_i32, %c0_i32_0 : i32, i32
  }
  func.func @transform_5(%arg0: i32, %arg1: i32) -> (i32, i32) {
    %c0_i32 = arith.constant 0 : i32
    %c0_i32_0 = arith.constant 0 : i32
    %c0_i32_1 = arith.constant 0 : i32
    return %c0_i32, %c0_i32_0 : i32, i32
  }
  func.func @transform_6(%arg0: i32, %arg1: i32) -> (i32, i32) {
    %c0_i32 = arith.constant 0 : i32
    %c0_i32_0 = arith.constant 0 : i32
    %c0_i32_1 = arith.constant 0 : i32
    return %c0_i32, %c0_i32_0 : i32, i32
  }
  func.func @transform_7(%arg0: i32, %arg1: i32) -> (i32, i32) {
    %c0_i32 = arith.constant 0 : i32
    %c0_i32_0 = arith.constant 0 : i32
    %c0_i32_1 = arith.constant 0 : i32
    return %c0_i32, %c0_i32_0 : i32, i32
  }
  func.func @transform_8(%arg0: i32, %arg1: i32) -> (i32, i32) {
    %c0_i32 = arith.constant 0 : i32
    %c0_i32_0 = arith.constant 0 : i32
    %c0_i32_1 = arith.constant 0 : i32
    return %c0_i32, %c0_i32_0 : i32, i32
  }
  func.func @transform_9(%arg0: i32, %arg1: i32) -> (i32, i32, i32) {
    %c0_i32 = arith.constant 0 : i32
    %c0_i32_0 = arith.constant 0 : i32
    return %arg0, %arg1, %c0_i32 : i32, i32, i32
  }
}

</mosaic_0001>

<bundles_post_ra>
// kernel: tpu_custom_call.1
= control target key start
LH: loop header
LB: loop body
LE: loop exit
PB: predicated region body
PF: predicated region fallthrough
CT: control target
= control target key end

     0   :  { %s21518_s30 = smov 0   ;;  %s21520_s10 = smov 0   ;;  %s26702_s0 = inlined_call_operand.vmem [shape: bf16[2,4928,256], index: 0, kind: input, shape index: {}]   ;;  %s26703_s1 = inlined_call_operand.vmem [shape: f32[2,256,1], index: 1, kind: input, shape index: {}]   ;;  %s26704_s2 = inlined_call_operand.vmem [shape: bf16[256,4928], index: 2, kind: input, shape index: {}]   ;;  %s26705_s3 = inlined_call_operand.vmem [shape: bf16[256,256], index: 3, kind: input, shape index: {}]   ;;  %s26706_s4 = inlined_call_operand.vmem [shape: f32[256,1], index: 4, kind: input, shape index: {}]   ;;  %s26707_s5 = inlined_call_operand.vmem [shape: bf16[128,256], index: 5, kind: input, shape index: {}]   ;;  %s26708_s6 = inlined_call_operand.vmem [shape: f32[128,1], index: 6, kind: input, shape index: {}]   ;;  %s26709_s7 = inlined_call_operand.vmem [shape: bf16[128,64], index: 7, kind: input, shape index: {}]   ;;  %s26710_s8 = inlined_call_operand.vmem [shape: f32[1,64], index: 8, kind: input, shape index: {}]   ;;  %s26711_s9 = inlined_call_operand.vmem [shape: f32[2,256,50], index: 9, kind: output, shape index: {}]  }
   0x1   :  { %s21522_s11 = smov 0   ;;  %s21524_s12 = smov 0  }
   0x2   :  { %s21526_s13 = smov 0   ;;  %s21528_s14 = smov 0  }
   0x3   :  { %s21530_s15 = smov 0  }
   0x4 LB: > { %s28_s16 = sadd.s32 1, %s21457_s13  ;;  %s31_s17 = sadd.s32 1, %s21461_s14  ;;  %s21465_s15 = sphi %s21530_s15, %s19_s15   ;;  %s21461_s14 = sphi %s21528_s14, %s26717_s14   ;;  %s21457_s13 = sphi %s21526_s13, %s26716_s13   ;;  %s21453_s12 = sphi %s21524_s12, %s26715_s12   ;;  %s21449_s11 = sphi %s21522_s11, %s26714_s11   ;;  %s21445_s10 = sphi %s21520_s10, %s26713_s10   ;;  %s21441_s30 = sphi %s21518_s30, %s26712_s30  }
   0x5   : > { %p29_p0 = scmp.ge.s32.totalorder %s28_s16, 2  ;;  %p47_p1 = scmp.ne.s32.totalorder %s21445_s10, %s21441_s30 }
   0x6   : > { %p48_p2 = scmp.eq.s32.totalorder %s21465_s15, 0  ;;  %s40_s21 = sadd.s32 1, %s21445_s10 }
   0x7   : > { %s26719_s16 = smov (%p29_p0, %s28_s16), 0  ;;  %s26721_s17 = smov (!%p29_p0, %s31_s17), %s21461_s14 }
   0x8   : > { %p49_p3 = por %p48_p2, %p47_p1  ;;  %p33_p4 = scmp.ge.s32.totalorder %s26721_s17, 2 }
   0x9   : > { %s36_s18 = ssub.s32 %s21457_s13, %s26719_s16  ;;  %p16525_p6 = scmp.ge.s32.totalorder %s21465_s15, 4 }
   0xa   : > { %s26723_s17 = smov (%p33_p4, %s26721_s17), 0 }
   0xb   : > { %s35_s19 = ssub.s32 %s21461_s14, %s26723_s17  ;;  %295 = sbr.rel (%p16525_p6) target bundleno = 433 (0x1b1), region = 44 }
   0xc   : > { %s37_s20 = sor.u32 %s36_s18, %s35_s19 }
   0xd   : > { %p38_p5 = scmp.eq.s32.totalorder %s37_s20, 0 }
   0xf   : > { %s21569_s22 = scalar_select %p38_p5, %s21445_s10, %s40_s21  }
  0x10   : > { %298 = sbr.rel (!%p49_p3) target bundleno = 433 (0x1b1), region = 48  ;;  %s300_s23 = sand.u32 (%p49_p3), 1, %s21445_s10  }
  0x11   : > { %s19970_s24 = smul.u32 (%p49_p3), 1232, %s21461_s14 }
  0x12   : > { %s19969_s25 = smul.u32 (%p49_p3), 2464, %s300_s23 }
  0x13   : > { %s304_s26 = sadd.s32 (%p49_p3), %s21457_s13, %s19970_s24 }
  0x14   : > { %s16526_s27 = sshll.u32 (%p49_p3), %s304_s26, 2  ;;  %s21583_s19 = scalar_lea.vmem (%p49_p3), [#allocation2], %s19969_s25 }
  0x15   : > { %s21578_s18 = scalar_lea.vmem %s26702_s0, %s16526_s27 }
  0x16   : > { %v323_v0 = vld [vmem:[%s21578_s18] sm:$0xf]  ;;  %v325_v1 = vld [vmem:[%s21578_s18 + $0x8] sm:$0xf]  ;;  %v327_v2 = vld [vmem:[%s21578_s18 + $0x10] sm:$0xf] }
  0x17   : > { %324 = vst [vmem:[%s21583_s19] sm:$0xf] %v323_v0  ;;  %326 = vst [vmem:[%s21583_s19 + $0x4] sm:$0xf] %v325_v1  ;;  %v329_v3 = vld [vmem:[%s21578_s18 + $0x18] sm:$0xf] }
  0x18   : > { %328 = vst [vmem:[%s21583_s19 + $0x8] sm:$0xf] %v327_v2  ;;  %v331_v4 = vld [vmem:[%s21578_s18 + $0x20] sm:$0xf]  ;;  %v333_v5 = vld [vmem:[%s21578_s18 + $0x28] sm:$0xf] }
  0x19   : > { %330 = vst [vmem:[%s21583_s19 + $0xc] sm:$0xf] %v329_v3  ;;  %332 = vst [vmem:[%s21583_s19 + $0x10] sm:$0xf] %v331_v4  ;;  %v335_v6 = vld [vmem:[%s21578_s18 + $0x30] sm:$0xf] }
  0x1a   : > { %334 = vst [vmem:[%s21583_s19 + $0x14] sm:$0xf] %v333_v5  ;;  %v337_v7 = vld [vmem:[%s21578_s18 + $0x38] sm:$0xf]  ;;  %v339_v8 = vld [vmem:[%s21578_s18 + $0x40] sm:$0xf] }
  0x1b   : > { %336 = vst [vmem:[%s21583_s19 + $0x18] sm:$0xf] %v335_v6  ;;  %338 = vst [vmem:[%s21583_s19 + $0x1c] sm:$0xf] %v337_v7  ;;  %v341_v9 = vld [vmem:[%s21578_s18 + $0x48] sm:$0xf] }
  0x1c   : > { %340 = vst [vmem:[%s21583_s19 + $0x20] sm:$0xf] %v339_v8  ;;  %v343_v10 = vld [vmem:[%s21578_s18 + $0x50] sm:$0xf]  ;;  %v345_v11 = vld [vmem:[%s21578_s18 + $0x58] sm:$0xf] }
  0x1d   : > { %342 = vst [vmem:[%s21583_s19 + $0x24] sm:$0xf] %v341_v9  ;;  %344 = vst [vmem:[%s21583_s19 + $0x28] sm:$0xf] %v343_v10  ;;  %v347_v12 = vld [vmem:[%s21578_s18 + $0x60] sm:$0xf] }
  0x1e   : > { %346 = vst [vmem:[%s21583_s19 + $0x2c] sm:$0xf] %v345_v11  ;;  %v349_v13 = vld [vmem:[%s21578_s18 + $0x68] sm:$0xf]  ;;  %v351_v14 = vld [vmem:[%s21578_s18 + $0x70] sm:$0xf] }
  0x1f   : > { %348 = vst [vmem:[%s21583_s19 + $0x30] sm:$0xf] %v347_v12  ;;  %350 = vst [vmem:[%s21583_s19 + $0x34] sm:$0xf] %v349_v13  ;;  %v353_v15 = vld [vmem:[%s21578_s18 + $0x78] sm:$0xf] }
  0x20   : > { %352 = vst [vmem:[%s21583_s19 + $0x38] sm:$0xf] %v351_v14  ;;  %v355_v16 = vld [vmem:[%s21578_s18 + $0x80] sm:$0xf]  ;;  %v357_v17 = vld [vmem:[%s21578_s18 + $0x88] sm:$0xf] }
  0x21   : > { %354 = vst [vmem:[%s21583_s19 + $0x3c] sm:$0xf] %v353_v15  ;;  %356 = vst [vmem:[%s21583_s19 + $0x40] sm:$0xf] %v355_v16  ;;  %v359_v18 = vld [vmem:[%s21578_s18 + $0x90] sm:$0xf] }
  0x22   : > { %358 = vst [vmem:[%s21583_s19 + $0x44] sm:$0xf] %v357_v17  ;;  %v361_v19 = vld [vmem:[%s21578_s18 + $0x98] sm:$0xf]  ;;  %v363_v20 = vld [vmem:[%s21578_s18 + $0xa0] sm:$0xf] }
  0x23   : > { %360 = vst [vmem:[%s21583_s19 + $0x48] sm:$0xf] %v359_v18  ;;  %362 = vst [vmem:[%s21583_s19 + $0x4c] sm:$0xf] %v361_v19  ;;  %v365_v21 = vld [vmem:[%s21578_s18 + $0xa8] sm:$0xf] }
  0x24   : > { %364 = vst [vmem:[%s21583_s19 + $0x50] sm:$0xf] %v363_v20  ;;  %v367_v22 = vld [vmem:[%s21578_s18 + $0xb0] sm:$0xf]  ;;  %v369_v23 = vld [vmem:[%s21578_s18 + $0xb8] sm:$0xf] }
  0x25   : > { %366 = vst [vmem:[%s21583_s19 + $0x54] sm:$0xf] %v365_v21  ;;  %368 = vst [vmem:[%s21583_s19 + $0x58] sm:$0xf] %v367_v22  ;;  %v371_v24 = vld [vmem:[%s21578_s18 + $0xc0] sm:$0xf] }
  0x26   : > { %370 = vst [vmem:[%s21583_s19 + $0x5c] sm:$0xf] %v369_v23  ;;  %v373_v25 = vld [vmem:[%s21578_s18 + $0xc8] sm:$0xf]  ;;  %v375_v26 = vld [vmem:[%s21578_s18 + $0xd0] sm:$0xf] }
  0x27   : > { %372 = vst [vmem:[%s21583_s19 + $0x60] sm:$0xf] %v371_v24  ;;  %374 = vst [vmem:[%s21583_s19 + $0x64] sm:$0xf] %v373_v25  ;;  %v377_v27 = vld [vmem:[%s21578_s18 + $0xd8] sm:$0xf] }
  0x28   : > { %376 = vst [vmem:[%s21583_s19 + $0x68] sm:$0xf] %v375_v26  ;;  %v379_v28 = vld [vmem:[%s21578_s18 + $0xe0] sm:$0xf]  ;;  %v381_v29 = vld [vmem:[%s21578_s18 + $0xe8] sm:$0xf] }
  0x29   : > { %378 = vst [vmem:[%s21583_s19 + $0x6c] sm:$0xf] %v377_v27  ;;  %380 = vst [vmem:[%s21583_s19 + $0x70] sm:$0xf] %v379_v28  ;;  %v383_v30 = vld [vmem:[%s21578_s18 + $0xf0] sm:$0xf] }
  0x2a   : > { %382 = vst [vmem:[%s21583_s19 + $0x74] sm:$0xf] %v381_v29  ;;  %v385_v31 = vld [vmem:[%s21578_s18 + $0xf8] sm:$0xf]  ;;  %v387_v32 = vld [vmem:[%s21578_s18 + $0x100] sm:$0xf] }
  0x2b   : > { %384 = vst [vmem:[%s21583_s19 + $0x78] sm:$0xf] %v383_v30  ;;  %386 = vst [vmem:[%s21583_s19 + $0x7c] sm:$0xf] %v385_v31  ;;  %v389_v33 = vld [vmem:[%s21578_s18 + $0x108] sm:$0xf] }
  0x2c   : > { %388 = vst [vmem:[%s21583_s19 + $0x80] sm:$0xf] %v387_v32  ;;  %v391_v34 = vld [vmem:[%s21578_s18 + $0x110] sm:$0xf]  ;;  %v393_v35 = vld [vmem:[%s21578_s18 + $0x118] sm:$0xf] }
  0x2d   : > { %390 = vst [vmem:[%s21583_s19 + $0x84] sm:$0xf] %v389_v33  ;;  %392 = vst [vmem:[%s21583_s19 + $0x88] sm:$0xf] %v391_v34  ;;  %v395_v36 = vld [vmem:[%s21578_s18 + $0x120] sm:$0xf] }
  0x2e   : > { %394 = vst [vmem:[%s21583_s19 + $0x8c] sm:$0xf] %v393_v35  ;;  %v397_v37 = vld [vmem:[%s21578_s18 + $0x128] sm:$0xf]  ;;  %v399_v38 = vld [vmem:[%s21578_s18 + $0x130] sm:$0xf] }
  0x2f   : > { %396 = vst [vmem:[%s21583_s19 + $0x90] sm:$0xf] %v395_v36  ;;  %398 = vst [vmem:[%s21583_s19 + $0x94] sm:$0xf] %v397_v37  ;;  %v401_v39 = vld [vmem:[%s21578_s18 + $0x138] sm:$0xf] }
  0x30   : > { %400 = vst [vmem:[%s21583_s19 + $0x98] sm:$0xf] %v399_v38  ;;  %v403_v40 = vld [vmem:[%s21578_s18 + $0x140] sm:$0xf]  ;;  %v405_v41 = vld [vmem:[%s21578_s18 + $0x148] sm:$0xf] }
  0x31   : > { %402 = vst [vmem:[%s21583_s19 + $0x9c] sm:$0xf] %v401_v39  ;;  %404 = vst [vmem:[%s21583_s19 + $0xa0] sm:$0xf] %v403_v40  ;;  %v407_v42 = vld [vmem:[%s21578_s18 + $0x150] sm:$0xf] }
  0x32   : > { %406 = vst [vmem:[%s21583_s19 + $0xa4] sm:$0xf] %v405_v41  ;;  %v409_v43 = vld [vmem:[%s21578_s18 + $0x158] sm:$0xf]  ;;  %v411_v44 = vld [vmem:[%s21578_s18 + $0x160] sm:$0xf] }
  0x33   : > { %408 = vst [vmem:[%s21583_s19 + $0xa8] sm:$0xf] %v407_v42  ;;  %410 = vst [vmem:[%s21583_s19 + $0xac] sm:$0xf] %v409_v43  ;;  %v413_v45 = vld [vmem:[%s21578_s18 + $0x168] sm:$0xf] }
  0x34   : > { %412 = vst [vmem:[%s21583_s19 + $0xb0] sm:$0xf] %v411_v44  ;;  %v415_v46 = vld [vmem:[%s21578_s18 + $0x170] sm:$0xf]  ;;  %v417_v47 = vld [vmem:[%s21578_s18 + $0x178] sm:$0xf] }
  0x35   : > { %414 = vst [vmem:[%s21583_s19 + $0xb4] sm:$0xf] %v413_v45  ;;  %416 = vst [vmem:[%s21583_s19 + $0xb8] sm:$0xf] %v415_v46  ;;  %v419_v48 = vld [vmem:[%s21578_s18 + $0x180] sm:$0xf] }
  0x36   : > { %418 = vst [vmem:[%s21583_s19 + $0xbc] sm:$0xf] %v417_v47  ;;  %v421_v49 = vld [vmem:[%s21578_s18 + $0x188] sm:$0xf]  ;;  %v423_v50 = vld [vmem:[%s21578_s18 + $0x190] sm:$0xf] }
  0x37   : > { %420 = vst [vmem:[%s21583_s19 + $0xc0] sm:$0xf] %v419_v48  ;;  %422 = vst [vmem:[%s21583_s19 + $0xc4] sm:$0xf] %v421_v49  ;;  %v425_v51 = vld [vmem:[%s21578_s18 + $0x198] sm:$0xf] }
  0x38   : > { %424 = vst [vmem:[%s21583_s19 + $0xc8] sm:$0xf] %v423_v50  ;;  %v427_v52 = vld [vmem:[%s21578_s18 + $0x1a0] sm:$0xf]  ;;  %v429_v53 = vld [vmem:[%s21578_s18 + $0x1a8] sm:$0xf] }
  0x39   : > { %426 = vst [vmem:[%s21583_s19 + $0xcc] sm:$0xf] %v425_v51  ;;  %428 = vst [vmem:[%s21583_s19 + $0xd0] sm:$0xf] %v427_v52  ;;  %v431_v54 = vld [vmem:[%s21578_s18 + $0x1b0] sm:$0xf] }
  0x3a   : > { %430 = vst [vmem:[%s21583_s19 + $0xd4] sm:$0xf] %v429_v53  ;;  %v433_v55 = vld [vmem:[%s21578_s18 + $0x1b8] sm:$0xf]  ;;  %v435_v56 = vld [vmem:[%s21578_s18 + $0x1c0] sm:$0xf] }
  0x3b   : > { %432 = vst [vmem:[%s21583_s19 + $0xd8] sm:$0xf] %v431_v54  ;;  %434 = vst [vmem:[%s21583_s19 + $0xdc] sm:$0xf] %v433_v55  ;;  %v437_v57 = vld [vmem:[%s21578_s18 + $0x1c8] sm:$0xf] }
  0x3c   : > { %436 = vst [vmem:[%s21583_s19 + $0xe0] sm:$0xf] %v435_v56  ;;  %v439_v58 = vld [vmem:[%s21578_s18 + $0x1d0] sm:$0xf]  ;;  %v441_v59 = vld [vmem:[%s21578_s18 + $0x1d8] sm:$0xf] }
  0x3d   : > { %438 = vst [vmem:[%s21583_s19 + $0xe4] sm:$0xf] %v437_v57  ;;  %440 = vst [vmem:[%s21583_s19 + $0xe8] sm:$0xf] %v439_v58  ;;  %v443_v60 = vld [vmem:[%s21578_s18 + $0x1e0] sm:$0xf] }
  0x3e   : > { %442 = vst [vmem:[%s21583_s19 + $0xec] sm:$0xf] %v441_v59  ;;  %v445_v61 = vld [vmem:[%s21578_s18 + $0x1e8] sm:$0xf]  ;;  %v447_v62 = vld [vmem:[%s21578_s18 + $0x1f0] sm:$0xf] }
  0x3f   : > { %444 = vst [vmem:[%s21583_s19 + $0xf0] sm:$0xf] %v443_v60  ;;  %446 = vst [vmem:[%s21583_s19 + $0xf4] sm:$0xf] %v445_v61  ;;  %v449_v63 = vld [vmem:[%s21578_s18 + $0x1f8] sm:$0xf] }
  0x40   : > { %448 = vst [vmem:[%s21583_s19 + $0xf8] sm:$0xf] %v447_v62  ;;  %v451_v0 = vld [vmem:[%s21578_s18 + $0x200] sm:$0xf]  ;;  %v453_v1 = vld [vmem:[%s21578_s18 + $0x208] sm:$0xf] }
  0x41   : > { %450 = vst [vmem:[%s21583_s19 + $0xfc] sm:$0xf] %v449_v63  ;;  %452 = vst [vmem:[%s21583_s19 + $0x100] sm:$0xf] %v451_v0  ;;  %v455_v2 = vld [vmem:[%s21578_s18 + $0x210] sm:$0xf] }
  0x42   : > { %454 = vst [vmem:[%s21583_s19 + $0x104] sm:$0xf] %v453_v1  ;;  %v457_v3 = vld [vmem:[%s21578_s18 + $0x218] sm:$0xf]  ;;  %v459_v4 = vld [vmem:[%s21578_s18 + $0x220] sm:$0xf] }
  0x43   : > { %456 = vst [vmem:[%s21583_s19 + $0x108] sm:$0xf] %v455_v2  ;;  %458 = vst [vmem:[%s21583_s19 + $0x10c] sm:$0xf] %v457_v3  ;;  %v461_v5 = vld [vmem:[%s21578_s18 + $0x228] sm:$0xf] }
  0x44   : > { %460 = vst [vmem:[%s21583_s19 + $0x110] sm:$0xf] %v459_v4  ;;  %v463_v6 = vld [vmem:[%s21578_s18 + $0x230] sm:$0xf]  ;;  %v465_v7 = vld [vmem:[%s21578_s18 + $0x238] sm:$0xf] }
  0x45   : > { %462 = vst [vmem:[%s21583_s19 + $0x114] sm:$0xf] %v461_v5  ;;  %464 = vst [vmem:[%s21583_s19 + $0x118] sm:$0xf] %v463_v6  ;;  %v467_v8 = vld [vmem:[%s21578_s18 + $0x240] sm:$0xf] }
  0x46   : > { %466 = vst [vmem:[%s21583_s19 + $0x11c] sm:$0xf] %v465_v7  ;;  %v469_v9 = vld [vmem:[%s21578_s18 + $0x248] sm:$0xf]  ;;  %v471_v10 = vld [vmem:[%s21578_s18 + $0x250] sm:$0xf] }
  0x47   : > { %468 = vst [vmem:[%s21583_s19 + $0x120] sm:$0xf] %v467_v8  ;;  %470 = vst [vmem:[%s21583_s19 + $0x124] sm:$0xf] %v469_v9  ;;  %v473_v11 = vld [vmem:[%s21578_s18 + $0x258] sm:$0xf] }
  0x48   : > { %472 = vst [vmem:[%s21583_s19 + $0x128] sm:$0xf] %v471_v10  ;;  %v475_v12 = vld [vmem:[%s21578_s18 + $0x260] sm:$0xf]  ;;  %v477_v13 = vld [vmem:[%s21578_s18 + $0x268] sm:$0xf] }
  0x49   : > { %474 = vst [vmem:[%s21583_s19 + $0x12c] sm:$0xf] %v473_v11  ;;  %476 = vst [vmem:[%s21583_s19 + $0x130] sm:$0xf] %v475_v12  ;;  %v479_v14 = vld [vmem:[%s21578_s18 + $0x270] sm:$0xf] }
  0x4a   : > { %478 = vst [vmem:[%s21583_s19 + $0x134] sm:$0xf] %v477_v13  ;;  %v481_v15 = vld [vmem:[%s21578_s18 + $0x278] sm:$0xf]  ;;  %v483_v16 = vld [vmem:[%s21578_s18 + $0x280] sm:$0xf] }
  0x4b   : > { %480 = vst [vmem:[%s21583_s19 + $0x138] sm:$0xf] %v479_v14  ;;  %482 = vst [vmem:[%s21583_s19 + $0x13c] sm:$0xf] %v481_v15  ;;  %v485_v17 = vld [vmem:[%s21578_s18 + $0x288] sm:$0xf] }
  0x4c   : > { %484 = vst [vmem:[%s21583_s19 + $0x140] sm:$0xf] %v483_v16  ;;  %v487_v18 = vld [vmem:[%s21578_s18 + $0x290] sm:$0xf]  ;;  %v489_v19 = vld [vmem:[%s21578_s18 + $0x298] sm:$0xf] }
  0x4d   : > { %486 = vst [vmem:[%s21583_s19 + $0x144] sm:$0xf] %v485_v17  ;;  %488 = vst [vmem:[%s21583_s19 + $0x148] sm:$0xf] %v487_v18  ;;  %v491_v20 = vld [vmem:[%s21578_s18 + $0x2a0] sm:$0xf] }
  0x4e   : > { %490 = vst [vmem:[%s21583_s19 + $0x14c] sm:$0xf] %v489_v19  ;;  %v493_v21 = vld [vmem:[%s21578_s18 + $0x2a8] sm:$0xf]  ;;  %v495_v22 = vld [vmem:[%s21578_s18 + $0x2b0] sm:$0xf] }
  0x4f   : > { %492 = vst [vmem:[%s21583_s19 + $0x150] sm:$0xf] %v491_v20  ;;  %494 = vst [vmem:[%s21583_s19 + $0x154] sm:$0xf] %v493_v21  ;;  %v497_v23 = vld [vmem:[%s21578_s18 + $0x2b8] sm:$0xf] }
  0x50   : > { %496 = vst [vmem:[%s21583_s19 + $0x158] sm:$0xf] %v495_v22  ;;  %v499_v24 = vld [vmem:[%s21578_s18 + $0x2c0] sm:$0xf]  ;;  %v501_v25 = vld [vmem:[%s21578_s18 + $0x2c8] sm:$0xf] }
  0x51   : > { %498 = vst [vmem:[%s21583_s19 + $0x15c] sm:$0xf] %v497_v23  ;;  %500 = vst [vmem:[%s21583_s19 + $0x160] sm:$0xf] %v499_v24  ;;  %v503_v26 = vld [vmem:[%s21578_s18 + $0x2d0] sm:$0xf] }
  0x52   : > { %502 = vst [vmem:[%s21583_s19 + $0x164] sm:$0xf] %v501_v25  ;;  %v505_v27 = vld [vmem:[%s21578_s18 + $0x2d8] sm:$0xf]  ;;  %v507_v28 = vld [vmem:[%s21578_s18 + $0x2e0] sm:$0xf] }
  0x53   : > { %504 = vst [vmem:[%s21583_s19 + $0x168] sm:$0xf] %v503_v26  ;;  %506 = vst [vmem:[%s21583_s19 + $0x16c] sm:$0xf] %v505_v27  ;;  %v509_v29 = vld [vmem:[%s21578_s18 + $0x2e8] sm:$0xf] }
  0x54   : > { %508 = vst [vmem:[%s21583_s19 + $0x170] sm:$0xf] %v507_v28  ;;  %v511_v30 = vld [vmem:[%s21578_s18 + $0x2f0] sm:$0xf]  ;;  %v513_v31 = vld [vmem:[%s21578_s18 + $0x2f8] sm:$0xf] }
  0x55   : > { %510 = vst [vmem:[%s21583_s19 + $0x174] sm:$0xf] %v509_v29  ;;  %512 = vst [vmem:[%s21583_s19 + $0x178] sm:$0xf] %v511_v30  ;;  %v515_v32 = vld [vmem:[%s21578_s18 + $0x300] sm:$0xf] }
  0x56   : > { %514 = vst [vmem:[%s21583_s19 + $0x17c] sm:$0xf] %v513_v31  ;;  %v517_v33 = vld [vmem:[%s21578_s18 + $0x308] sm:$0xf]  ;;  %v519_v34 = vld [vmem:[%s21578_s18 + $0x310] sm:$0xf] }
  0x57   : > { %516 = vst [vmem:[%s21583_s19 + $0x180] sm:$0xf] %v515_v32  ;;  %518 = vst [vmem:[%s21583_s19 + $0x184] sm:$0xf] %v517_v33  ;;  %v521_v35 = vld [vmem:[%s21578_s18 + $0x318] sm:$0xf] }
  0x58   : > { %520 = vst [vmem:[%s21583_s19 + $0x188] sm:$0xf] %v519_v34  ;;  %v523_v36 = vld [vmem:[%s21578_s18 + $0x320] sm:$0xf]  ;;  %v525_v37 = vld [vmem:[%s21578_s18 + $0x328] sm:$0xf] }
  0x59   : > { %522 = vst [vmem:[%s21583_s19 + $0x18c] sm:$0xf] %v521_v35  ;;  %524 = vst [vmem:[%s21583_s19 + $0x190] sm:$0xf] %v523_v36  ;;  %v527_v38 = vld [vmem:[%s21578_s18 + $0x330] sm:$0xf] }
  0x5a   : > { %526 = vst [vmem:[%s21583_s19 + $0x194] sm:$0xf] %v525_v37  ;;  %v529_v39 = vld [vmem:[%s21578_s18 + $0x338] sm:$0xf]  ;;  %v531_v40 = vld [vmem:[%s21578_s18 + $0x340] sm:$0xf] }
  0x5b   : > { %528 = vst [vmem:[%s21583_s19 + $0x198] sm:$0xf] %v527_v38  ;;  %530 = vst [vmem:[%s21583_s19 + $0x19c] sm:$0xf] %v529_v39  ;;  %v533_v41 = vld [vmem:[%s21578_s18 + $0x348] sm:$0xf] }
  0x5c   : > { %532 = vst [vmem:[%s21583_s19 + $0x1a0] sm:$0xf] %v531_v40  ;;  %v535_v42 = vld [vmem:[%s21578_s18 + $0x350] sm:$0xf]  ;;  %v537_v43 = vld [vmem:[%s21578_s18 + $0x358] sm:$0xf] }
  0x5d   : > { %534 = vst [vmem:[%s21583_s19 + $0x1a4] sm:$0xf] %v533_v41  ;;  %536 = vst [vmem:[%s21583_s19 + $0x1a8] sm:$0xf] %v535_v42  ;;  %v539_v44 = vld [vmem:[%s21578_s18 + $0x360] sm:$0xf] }
  0x5e   : > { %538 = vst [vmem:[%s21583_s19 + $0x1ac] sm:$0xf] %v537_v43  ;;  %v541_v45 = vld [vmem:[%s21578_s18 + $0x368] sm:$0xf]  ;;  %v543_v46 = vld [vmem:[%s21578_s18 + $0x370] sm:$0xf] }
  0x5f   : > { %540 = vst [vmem:[%s21583_s19 + $0x1b0] sm:$0xf] %v539_v44  ;;  %542 = vst [vmem:[%s21583_s19 + $0x1b4] sm:$0xf] %v541_v45  ;;  %v545_v47 = vld [vmem:[%s21578_s18 + $0x378] sm:$0xf] }
  0x60   : > { %544 = vst [vmem:[%s21583_s19 + $0x1b8] sm:$0xf] %v543_v46  ;;  %v547_v48 = vld [vmem:[%s21578_s18 + $0x380] sm:$0xf]  ;;  %v549_v49 = vld [vmem:[%s21578_s18 + $0x388] sm:$0xf] }
  0x61   : > { %546 = vst [vmem:[%s21583_s19 + $0x1bc] sm:$0xf] %v545_v47  ;;  %548 = vst [vmem:[%s21583_s19 + $0x1c0] sm:$0xf] %v547_v48  ;;  %v551_v50 = vld [vmem:[%s21578_s18 + $0x390] sm:$0xf] }
  0x62   : > { %550 = vst [vmem:[%s21583_s19 + $0x1c4] sm:$0xf] %v549_v49  ;;  %v553_v51 = vld [vmem:[%s21578_s18 + $0x398] sm:$0xf]  ;;  %v555_v52 = vld [vmem:[%s21578_s18 + $0x3a0] sm:$0xf] }
  0x63   : > { %552 = vst [vmem:[%s21583_s19 + $0x1c8] sm:$0xf] %v551_v50  ;;  %554 = vst [vmem:[%s21583_s19 + $0x1cc] sm:$0xf] %v553_v51  ;;  %v557_v53 = vld [vmem:[%s21578_s18 + $0x3a8] sm:$0xf] }
  0x64   : > { %556 = vst [vmem:[%s21583_s19 + $0x1d0] sm:$0xf] %v555_v52  ;;  %v559_v54 = vld [vmem:[%s21578_s18 + $0x3b0] sm:$0xf]  ;;  %v561_v55 = vld [vmem:[%s21578_s18 + $0x3b8] sm:$0xf] }
  0x65   : > { %558 = vst [vmem:[%s21583_s19 + $0x1d4] sm:$0xf] %v557_v53  ;;  %560 = vst [vmem:[%s21583_s19 + $0x1d8] sm:$0xf] %v559_v54  ;;  %v563_v56 = vld [vmem:[%s21578_s18 + $0x3c0] sm:$0xf] }
  0x66   : > { %562 = vst [vmem:[%s21583_s19 + $0x1dc] sm:$0xf] %v561_v55  ;;  %v565_v57 = vld [vmem:[%s21578_s18 + $0x3c8] sm:$0xf]  ;;  %v567_v58 = vld [vmem:[%s21578_s18 + $0x3d0] sm:$0xf] }
  0x67   : > { %564 = vst [vmem:[%s21583_s19 + $0x1e0] sm:$0xf] %v563_v56  ;;  %566 = vst [vmem:[%s21583_s19 + $0x1e4] sm:$0xf] %v565_v57  ;;  %v569_v59 = vld [vmem:[%s21578_s18 + $0x3d8] sm:$0xf] }
  0x68   : > { %568 = vst [vmem:[%s21583_s19 + $0x1e8] sm:$0xf] %v567_v58  ;;  %v571_v60 = vld [vmem:[%s21578_s18 + $0x3e0] sm:$0xf]  ;;  %v573_v61 = vld [vmem:[%s21578_s18 + $0x3e8] sm:$0xf] }
  0x69   : > { %570 = vst [vmem:[%s21583_s19 + $0x1ec] sm:$0xf] %v569_v59  ;;  %572 = vst [vmem:[%s21583_s19 + $0x1f0] sm:$0xf] %v571_v60  ;;  %v575_v62 = vld [vmem:[%s21578_s18 + $0x3f0] sm:$0xf] }
  0x6a   : > { %574 = vst [vmem:[%s21583_s19 + $0x1f4] sm:$0xf] %v573_v61  ;;  %v577_v63 = vld [vmem:[%s21578_s18 + $0x3f8] sm:$0xf]  ;;  %v579_v0 = vld [vmem:[%s21578_s18 + $0x400] sm:$0xf] }
  0x6b   : > { %576 = vst [vmem:[%s21583_s19 + $0x1f8] sm:$0xf] %v575_v62  ;;  %578 = vst [vmem:[%s21583_s19 + $0x1fc] sm:$0xf] %v577_v63  ;;  %v581_v1 = vld [vmem:[%s21578_s18 + $0x408] sm:$0xf] }
  0x6c   : > { %580 = vst [vmem:[%s21583_s19 + $0x200] sm:$0xf] %v579_v0  ;;  %v583_v2 = vld [vmem:[%s21578_s18 + $0x410] sm:$0xf]  ;;  %v585_v3 = vld [vmem:[%s21578_s18 + $0x418] sm:$0xf] }
  0x6d   : > { %582 = vst [vmem:[%s21583_s19 + $0x204] sm:$0xf] %v581_v1  ;;  %584 = vst [vmem:[%s21583_s19 + $0x208] sm:$0xf] %v583_v2  ;;  %v587_v4 = vld [vmem:[%s21578_s18 + $0x420] sm:$0xf] }
  0x6e   : > { %586 = vst [vmem:[%s21583_s19 + $0x20c] sm:$0xf] %v585_v3  ;;  %v589_v5 = vld [vmem:[%s21578_s18 + $0x428] sm:$0xf]  ;;  %v591_v6 = vld [vmem:[%s21578_s18 + $0x430] sm:$0xf] }
  0x6f   : > { %588 = vst [vmem:[%s21583_s19 + $0x210] sm:$0xf] %v587_v4  ;;  %590 = vst [vmem:[%s21583_s19 + $0x214] sm:$0xf] %v589_v5  ;;  %v593_v7 = vld [vmem:[%s21578_s18 + $0x438] sm:$0xf] }
  0x70   : > { %592 = vst [vmem:[%s21583_s19 + $0x218] sm:$0xf] %v591_v6  ;;  %v595_v8 = vld [vmem:[%s21578_s18 + $0x440] sm:$0xf]  ;;  %v597_v9 = vld [vmem:[%s21578_s18 + $0x448] sm:$0xf] }
  0x71   : > { %594 = vst [vmem:[%s21583_s19 + $0x21c] sm:$0xf] %v593_v7  ;;  %596 = vst [vmem:[%s21583_s19 + $0x220] sm:$0xf] %v595_v8  ;;  %v599_v10 = vld [vmem:[%s21578_s18 + $0x450] sm:$0xf] }
  0x72   : > { %598 = vst [vmem:[%s21583_s19 + $0x224] sm:$0xf] %v597_v9  ;;  %v601_v11 = vld [vmem:[%s21578_s18 + $0x458] sm:$0xf]  ;;  %v603_v12 = vld [vmem:[%s21578_s18 + $0x460] sm:$0xf] }
  0x73   : > { %600 = vst [vmem:[%s21583_s19 + $0x228] sm:$0xf] %v599_v10  ;;  %602 = vst [vmem:[%s21583_s19 + $0x22c] sm:$0xf] %v601_v11  ;;  %v605_v13 = vld [vmem:[%s21578_s18 + $0x468] sm:$0xf] }
  0x74   : > { %604 = vst [vmem:[%s21583_s19 + $0x230] sm:$0xf] %v603_v12  ;;  %v607_v14 = vld [vmem:[%s21578_s18 + $0x470] sm:$0xf]  ;;  %v609_v15 = vld [vmem:[%s21578_s18 + $0x478] sm:$0xf] }
  0x75   : > { %606 = vst [vmem:[%s21583_s19 + $0x234] sm:$0xf] %v605_v13  ;;  %608 = vst [vmem:[%s21583_s19 + $0x238] sm:$0xf] %v607_v14  ;;  %v611_v16 = vld [vmem:[%s21578_s18 + $0x480] sm:$0xf] }
  0x76   : > { %610 = vst [vmem:[%s21583_s19 + $0x23c] sm:$0xf] %v609_v15  ;;  %v613_v17 = vld [vmem:[%s21578_s18 + $0x488] sm:$0xf]  ;;  %v615_v18 = vld [vmem:[%s21578_s18 + $0x490] sm:$0xf] }
  0x77   : > { %612 = vst [vmem:[%s21583_s19 + $0x240] sm:$0xf] %v611_v16  ;;  %614 = vst [vmem:[%s21583_s19 + $0x244] sm:$0xf] %v613_v17  ;;  %v617_v19 = vld [vmem:[%s21578_s18 + $0x498] sm:$0xf] }
  0x78   : > { %616 = vst [vmem:[%s21583_s19 + $0x248] sm:$0xf] %v615_v18  ;;  %v619_v20 = vld [vmem:[%s21578_s18 + $0x4a0] sm:$0xf]  ;;  %v621_v21 = vld [vmem:[%s21578_s18 + $0x4a8] sm:$0xf] }
  0x79   : > { %618 = vst [vmem:[%s21583_s19 + $0x24c] sm:$0xf] %v617_v19  ;;  %620 = vst [vmem:[%s21583_s19 + $0x250] sm:$0xf] %v619_v20  ;;  %v623_v22 = vld [vmem:[%s21578_s18 + $0x4b0] sm:$0xf] }
  0x7a   : > { %622 = vst [vmem:[%s21583_s19 + $0x254] sm:$0xf] %v621_v21  ;;  %v625_v23 = vld [vmem:[%s21578_s18 + $0x4b8] sm:$0xf]  ;;  %v627_v24 = vld [vmem:[%s21578_s18 + $0x4c0] sm:$0xf] }
  0x7b   : > { %624 = vst [vmem:[%s21583_s19 + $0x258] sm:$0xf] %v623_v22  ;;  %626 = vst [vmem:[%s21583_s19 + $0x25c] sm:$0xf] %v625_v23  ;;  %v629_v25 = vld [vmem:[%s21578_s18 + $0x4c8] sm:$0xf] }
  0x7c   : > { %628 = vst [vmem:[%s21583_s19 + $0x260] sm:$0xf] %v627_v24  ;;  %v631_v26 = vld [vmem:[%s21578_s18 + $0x4d0] sm:$0xf]  ;;  %v633_v27 = vld [vmem:[%s21578_s18 + $0x4d8] sm:$0xf] }
  0x7d   : > { %630 = vst [vmem:[%s21583_s19 + $0x264] sm:$0xf] %v629_v25  ;;  %632 = vst [vmem:[%s21583_s19 + $0x268] sm:$0xf] %v631_v26  ;;  %v635_v28 = vld [vmem:[%s21578_s18 + $0x4e0] sm:$0xf] }
  0x7e   : > { %634 = vst [vmem:[%s21583_s19 + $0x26c] sm:$0xf] %v633_v27  ;;  %v637_v29 = vld [vmem:[%s21578_s18 + $0x4e8] sm:$0xf]  ;;  %v639_v30 = vld [vmem:[%s21578_s18 + $0x4f0] sm:$0xf] }
  0x7f   : > { %636 = vst [vmem:[%s21583_s19 + $0x270] sm:$0xf] %v635_v28  ;;  %638 = vst [vmem:[%s21583_s19 + $0x274] sm:$0xf] %v637_v29  ;;  %v641_v31 = vld [vmem:[%s21578_s18 + $0x4f8] sm:$0xf] }
  0x80   : > { %640 = vst [vmem:[%s21583_s19 + $0x278] sm:$0xf] %v639_v30  ;;  %v643_v32 = vld [vmem:[%s21578_s18 + $0x500] sm:$0xf]  ;;  %v645_v33 = vld [vmem:[%s21578_s18 + $0x508] sm:$0xf] }
  0x81   : > { %642 = vst [vmem:[%s21583_s19 + $0x27c] sm:$0xf] %v641_v31  ;;  %644 = vst [vmem:[%s21583_s19 + $0x280] sm:$0xf] %v643_v32  ;;  %v647_v34 = vld [vmem:[%s21578_s18 + $0x510] sm:$0xf] }
  0x82   : > { %646 = vst [vmem:[%s21583_s19 + $0x284] sm:$0xf] %v645_v33  ;;  %v649_v35 = vld [vmem:[%s21578_s18 + $0x518] sm:$0xf]  ;;  %v651_v36 = vld [vmem:[%s21578_s18 + $0x520] sm:$0xf] }
  0x83   : > { %648 = vst [vmem:[%s21583_s19 + $0x288] sm:$0xf] %v647_v34  ;;  %650 = vst [vmem:[%s21583_s19 + $0x28c] sm:$0xf] %v649_v35  ;;  %v653_v37 = vld [vmem:[%s21578_s18 + $0x528] sm:$0xf] }
  0x84   : > { %652 = vst [vmem:[%s21583_s19 + $0x290] sm:$0xf] %v651_v36  ;;  %v655_v38 = vld [vmem:[%s21578_s18 + $0x530] sm:$0xf]  ;;  %v657_v39 = vld [vmem:[%s21578_s18 + $0x538] sm:$0xf] }
  0x85   : > { %654 = vst [vmem:[%s21583_s19 + $0x294] sm:$0xf] %v653_v37  ;;  %656 = vst [vmem:[%s21583_s19 + $0x298] sm:$0xf] %v655_v38  ;;  %v659_v40 = vld [vmem:[%s21578_s18 + $0x540] sm:$0xf] }
  0x86   : > { %658 = vst [vmem:[%s21583_s19 + $0x29c] sm:$0xf] %v657_v39  ;;  %v661_v41 = vld [vmem:[%s21578_s18 + $0x548] sm:$0xf]  ;;  %v663_v42 = vld [vmem:[%s21578_s18 + $0x550] sm:$0xf] }
  0x87   : > { %660 = vst [vmem:[%s21583_s19 + $0x2a0] sm:$0xf] %v659_v40  ;;  %662 = vst [vmem:[%s21583_s19 + $0x2a4] sm:$0xf] %v661_v41  ;;  %v665_v43 = vld [vmem:[%s21578_s18 + $0x558] sm:$0xf] }
  0x88   : > { %664 = vst [vmem:[%s21583_s19 + $0x2a8] sm:$0xf] %v663_v42  ;;  %v667_v44 = vld [vmem:[%s21578_s18 + $0x560] sm:$0xf]  ;;  %v669_v45 = vld [vmem:[%s21578_s18 + $0x568] sm:$0xf] }
  0x89   : > { %666 = vst [vmem:[%s21583_s19 + $0x2ac] sm:$0xf] %v665_v43  ;;  %668 = vst [vmem:[%s21583_s19 + $0x2b0] sm:$0xf] %v667_v44  ;;  %v671_v46 = vld [vmem:[%s21578_s18 + $0x570] sm:$0xf] }
  0x8a   : > { %670 = vst [vmem:[%s21583_s19 + $0x2b4] sm:$0xf] %v669_v45  ;;  %v673_v47 = vld [vmem:[%s21578_s18 + $0x578] sm:$0xf]  ;;  %v675_v48 = vld [vmem:[%s21578_s18 + $0x580] sm:$0xf] }
  0x8b   : > { %672 = vst [vmem:[%s21583_s19 + $0x2b8] sm:$0xf] %v671_v46  ;;  %674 = vst [vmem:[%s21583_s19 + $0x2bc] sm:$0xf] %v673_v47  ;;  %v677_v49 = vld [vmem:[%s21578_s18 + $0x588] sm:$0xf] }
  0x8c   : > { %676 = vst [vmem:[%s21583_s19 + $0x2c0] sm:$0xf] %v675_v48  ;;  %v679_v50 = vld [vmem:[%s21578_s18 + $0x590] sm:$0xf]  ;;  %v681_v51 = vld [vmem:[%s21578_s18 + $0x598] sm:$0xf] }
  0x8d   : > { %678 = vst [vmem:[%s21583_s19 + $0x2c4] sm:$0xf] %v677_v49  ;;  %680 = vst [vmem:[%s21583_s19 + $0x2c8] sm:$0xf] %v679_v50  ;;  %v683_v52 = vld [vmem:[%s21578_s18 + $0x5a0] sm:$0xf] }
  0x8e   : > { %682 = vst [vmem:[%s21583_s19 + $0x2cc] sm:$0xf] %v681_v51  ;;  %v685_v53 = vld [vmem:[%s21578_s18 + $0x5a8] sm:$0xf]  ;;  %v687_v54 = vld [vmem:[%s21578_s18 + $0x5b0] sm:$0xf] }
  0x8f   : > { %684 = vst [vmem:[%s21583_s19 + $0x2d0] sm:$0xf] %v683_v52  ;;  %686 = vst [vmem:[%s21583_s19 + $0x2d4] sm:$0xf] %v685_v53  ;;  %v689_v55 = vld [vmem:[%s21578_s18 + $0x5b8] sm:$0xf] }
  0x90   : > { %688 = vst [vmem:[%s21583_s19 + $0x2d8] sm:$0xf] %v687_v54  ;;  %v691_v56 = vld [vmem:[%s21578_s18 + $0x5c0] sm:$0xf]  ;;  %v693_v57 = vld [vmem:[%s21578_s18 + $0x5c8] sm:$0xf] }
  0x91   : > { %690 = vst [vmem:[%s21583_s19 + $0x2dc] sm:$0xf] %v689_v55  ;;  %692 = vst [vmem:[%s21583_s19 + $0x2e0] sm:$0xf] %v691_v56  ;;  %v695_v58 = vld [vmem:[%s21578_s18 + $0x5d0] sm:$0xf] }
  0x92   : > { %694 = vst [vmem:[%s21583_s19 + $0x2e4] sm:$0xf] %v693_v57  ;;  %v697_v59 = vld [vmem:[%s21578_s18 + $0x5d8] sm:$0xf]  ;;  %v699_v60 = vld [vmem:[%s21578_s18 + $0x5e0] sm:$0xf] }
  0x93   : > { %696 = vst [vmem:[%s21583_s19 + $0x2e8] sm:$0xf] %v695_v58  ;;  %698 = vst [vmem:[%s21583_s19 + $0x2ec] sm:$0xf] %v697_v59  ;;  %v701_v61 = vld [vmem:[%s21578_s18 + $0x5e8] sm:$0xf] }
  0x94   : > { %700 = vst [vmem:[%s21583_s19 + $0x2f0] sm:$0xf] %v699_v60  ;;  %v703_v62 = vld [vmem:[%s21578_s18 + $0x5f0] sm:$0xf]  ;;  %v705_v63 = vld [vmem:[%s21578_s18 + $0x5f8] sm:$0xf] }
  0x95   : > { %702 = vst [vmem:[%s21583_s19 + $0x2f4] sm:$0xf] %v701_v61  ;;  %704 = vst [vmem:[%s21583_s19 + $0x2f8] sm:$0xf] %v703_v62  ;;  %v707_v0 = vld [vmem:[%s21578_s18 + $0x600] sm:$0xf] }
  0x96   : > { %706 = vst [vmem:[%s21583_s19 + $0x2fc] sm:$0xf] %v705_v63  ;;  %v709_v1 = vld [vmem:[%s21578_s18 + $0x608] sm:$0xf]  ;;  %v711_v2 = vld [vmem:[%s21578_s18 + $0x610] sm:$0xf] }
  0x97   : > { %708 = vst [vmem:[%s21583_s19 + $0x300] sm:$0xf] %v707_v0  ;;  %710 = vst [vmem:[%s21583_s19 + $0x304] sm:$0xf] %v709_v1  ;;  %v713_v3 = vld [vmem:[%s21578_s18 + $0x618] sm:$0xf] }
  0x98   : > { %712 = vst [vmem:[%s21583_s19 + $0x308] sm:$0xf] %v711_v2  ;;  %v715_v4 = vld [vmem:[%s21578_s18 + $0x620] sm:$0xf]  ;;  %v717_v5 = vld [vmem:[%s21578_s18 + $0x628] sm:$0xf] }
  0x99   : > { %714 = vst [vmem:[%s21583_s19 + $0x30c] sm:$0xf] %v713_v3  ;;  %716 = vst [vmem:[%s21583_s19 + $0x310] sm:$0xf] %v715_v4  ;;  %v719_v6 = vld [vmem:[%s21578_s18 + $0x630] sm:$0xf] }
  0x9a   : > { %718 = vst [vmem:[%s21583_s19 + $0x314] sm:$0xf] %v717_v5  ;;  %v721_v7 = vld [vmem:[%s21578_s18 + $0x638] sm:$0xf]  ;;  %v723_v8 = vld [vmem:[%s21578_s18 + $0x640] sm:$0xf] }
  0x9b   : > { %720 = vst [vmem:[%s21583_s19 + $0x318] sm:$0xf] %v719_v6  ;;  %722 = vst [vmem:[%s21583_s19 + $0x31c] sm:$0xf] %v721_v7  ;;  %v725_v9 = vld [vmem:[%s21578_s18 + $0x648] sm:$0xf] }
  0x9c   : > { %724 = vst [vmem:[%s21583_s19 + $0x320] sm:$0xf] %v723_v8  ;;  %v727_v10 = vld [vmem:[%s21578_s18 + $0x650] sm:$0xf]  ;;  %v729_v11 = vld [vmem:[%s21578_s18 + $0x658] sm:$0xf] }
  0x9d   : > { %726 = vst [vmem:[%s21583_s19 + $0x324] sm:$0xf] %v725_v9  ;;  %728 = vst [vmem:[%s21583_s19 + $0x328] sm:$0xf] %v727_v10  ;;  %v731_v12 = vld [vmem:[%s21578_s18 + $0x660] sm:$0xf] }
  0x9e   : > { %730 = vst [vmem:[%s21583_s19 + $0x32c] sm:$0xf] %v729_v11  ;;  %v733_v13 = vld [vmem:[%s21578_s18 + $0x668] sm:$0xf]  ;;  %v735_v14 = vld [vmem:[%s21578_s18 + $0x670] sm:$0xf] }
  0x9f   : > { %732 = vst [vmem:[%s21583_s19 + $0x330] sm:$0xf] %v731_v12  ;;  %734 = vst [vmem:[%s21583_s19 + $0x334] sm:$0xf] %v733_v13  ;;  %v737_v15 = vld [vmem:[%s21578_s18 + $0x678] sm:$0xf] }
  0xa0   : > { %736 = vst [vmem:[%s21583_s19 + $0x338] sm:$0xf] %v735_v14  ;;  %v739_v16 = vld [vmem:[%s21578_s18 + $0x680] sm:$0xf]  ;;  %v741_v17 = vld [vmem:[%s21578_s18 + $0x688] sm:$0xf] }
  0xa1   : > { %738 = vst [vmem:[%s21583_s19 + $0x33c] sm:$0xf] %v737_v15  ;;  %740 = vst [vmem:[%s21583_s19 + $0x340] sm:$0xf] %v739_v16  ;;  %v743_v18 = vld [vmem:[%s21578_s18 + $0x690] sm:$0xf] }
  0xa2   : > { %742 = vst [vmem:[%s21583_s19 + $0x344] sm:$0xf] %v741_v17  ;;  %v745_v19 = vld [vmem:[%s21578_s18 + $0x698] sm:$0xf]  ;;  %v747_v20 = vld [vmem:[%s21578_s18 + $0x6a0] sm:$0xf] }
  0xa3   : > { %744 = vst [vmem:[%s21583_s19 + $0x348] sm:$0xf] %v743_v18  ;;  %746 = vst [vmem:[%s21583_s19 + $0x34c] sm:$0xf] %v745_v19  ;;  %v749_v21 = vld [vmem:[%s21578_s18 + $0x6a8] sm:$0xf] }
  0xa4   : > { %748 = vst [vmem:[%s21583_s19 + $0x350] sm:$0xf] %v747_v20  ;;  %v751_v22 = vld [vmem:[%s21578_s18 + $0x6b0] sm:$0xf]  ;;  %v753_v23 = vld [vmem:[%s21578_s18 + $0x6b8] sm:$0xf] }
  0xa5   : > { %750 = vst [vmem:[%s21583_s19 + $0x354] sm:$0xf] %v749_v21  ;;  %752 = vst [vmem:[%s21583_s19 + $0x358] sm:$0xf] %v751_v22  ;;  %v755_v24 = vld [vmem:[%s21578_s18 + $0x6c0] sm:$0xf] }
  0xa6   : > { %754 = vst [vmem:[%s21583_s19 + $0x35c] sm:$0xf] %v753_v23  ;;  %v757_v25 = vld [vmem:[%s21578_s18 + $0x6c8] sm:$0xf]  ;;  %v759_v26 = vld [vmem:[%s21578_s18 + $0x6d0] sm:$0xf] }
  0xa7   : > { %756 = vst [vmem:[%s21583_s19 + $0x360] sm:$0xf] %v755_v24  ;;  %758 = vst [vmem:[%s21583_s19 + $0x364] sm:$0xf] %v757_v25  ;;  %v761_v27 = vld [vmem:[%s21578_s18 + $0x6d8] sm:$0xf] }
  0xa8   : > { %760 = vst [vmem:[%s21583_s19 + $0x368] sm:$0xf] %v759_v26  ;;  %v763_v28 = vld [vmem:[%s21578_s18 + $0x6e0] sm:$0xf]  ;;  %v765_v29 = vld [vmem:[%s21578_s18 + $0x6e8] sm:$0xf] }
  0xa9   : > { %762 = vst [vmem:[%s21583_s19 + $0x36c] sm:$0xf] %v761_v27  ;;  %764 = vst [vmem:[%s21583_s19 + $0x370] sm:$0xf] %v763_v28  ;;  %v767_v30 = vld [vmem:[%s21578_s18 + $0x6f0] sm:$0xf] }
  0xaa   : > { %766 = vst [vmem:[%s21583_s19 + $0x374] sm:$0xf] %v765_v29  ;;  %v769_v31 = vld [vmem:[%s21578_s18 + $0x6f8] sm:$0xf]  ;;  %v771_v32 = vld [vmem:[%s21578_s18 + $0x700] sm:$0xf] }
  0xab   : > { %768 = vst [vmem:[%s21583_s19 + $0x378] sm:$0xf] %v767_v30  ;;  %770 = vst [vmem:[%s21583_s19 + $0x37c] sm:$0xf] %v769_v31  ;;  %v773_v33 = vld [vmem:[%s21578_s18 + $0x708] sm:$0xf] }
  0xac   : > { %772 = vst [vmem:[%s21583_s19 + $0x380] sm:$0xf] %v771_v32  ;;  %v775_v34 = vld [vmem:[%s21578_s18 + $0x710] sm:$0xf]  ;;  %v777_v35 = vld [vmem:[%s21578_s18 + $0x718] sm:$0xf] }
  0xad   : > { %774 = vst [vmem:[%s21583_s19 + $0x384] sm:$0xf] %v773_v33  ;;  %776 = vst [vmem:[%s21583_s19 + $0x388] sm:$0xf] %v775_v34  ;;  %v779_v36 = vld [vmem:[%s21578_s18 + $0x720] sm:$0xf] }
  0xae   : > { %778 = vst [vmem:[%s21583_s19 + $0x38c] sm:$0xf] %v777_v35  ;;  %v781_v37 = vld [vmem:[%s21578_s18 + $0x728] sm:$0xf]  ;;  %v783_v38 = vld [vmem:[%s21578_s18 + $0x730] sm:$0xf] }
  0xaf   : > { %780 = vst [vmem:[%s21583_s19 + $0x390] sm:$0xf] %v779_v36  ;;  %782 = vst [vmem:[%s21583_s19 + $0x394] sm:$0xf] %v781_v37  ;;  %v785_v39 = vld [vmem:[%s21578_s18 + $0x738] sm:$0xf] }
  0xb0   : > { %784 = vst [vmem:[%s21583_s19 + $0x398] sm:$0xf] %v783_v38  ;;  %v787_v40 = vld [vmem:[%s21578_s18 + $0x740] sm:$0xf]  ;;  %v789_v41 = vld [vmem:[%s21578_s18 + $0x748] sm:$0xf] }
  0xb1   : > { %786 = vst [vmem:[%s21583_s19 + $0x39c] sm:$0xf] %v785_v39  ;;  %788 = vst [vmem:[%s21583_s19 + $0x3a0] sm:$0xf] %v787_v40  ;;  %v791_v42 = vld [vmem:[%s21578_s18 + $0x750] sm:$0xf] }
  0xb2   : > { %790 = vst [vmem:[%s21583_s19 + $0x3a4] sm:$0xf] %v789_v41  ;;  %v793_v43 = vld [vmem:[%s21578_s18 + $0x758] sm:$0xf]  ;;  %v795_v44 = vld [vmem:[%s21578_s18 + $0x760] sm:$0xf] }
  0xb3   : > { %792 = vst [vmem:[%s21583_s19 + $0x3a8] sm:$0xf] %v791_v42  ;;  %794 = vst [vmem:[%s21583_s19 + $0x3ac] sm:$0xf] %v793_v43  ;;  %v797_v45 = vld [vmem:[%s21578_s18 + $0x768] sm:$0xf] }
  0xb4   : > { %796 = vst [vmem:[%s21583_s19 + $0x3b0] sm:$0xf] %v795_v44  ;;  %v799_v46 = vld [vmem:[%s21578_s18 + $0x770] sm:$0xf]  ;;  %v801_v47 = vld [vmem:[%s21578_s18 + $0x778] sm:$0xf] }
  0xb5   : > { %798 = vst [vmem:[%s21583_s19 + $0x3b4] sm:$0xf] %v797_v45  ;;  %800 = vst [vmem:[%s21583_s19 + $0x3b8] sm:$0xf] %v799_v46  ;;  %v803_v48 = vld [vmem:[%s21578_s18 + $0x780] sm:$0xf] }
  0xb6   : > { %802 = vst [vmem:[%s21583_s19 + $0x3bc] sm:$0xf] %v801_v47  ;;  %v805_v49 = vld [vmem:[%s21578_s18 + $0x788] sm:$0xf]  ;;  %v807_v50 = vld [vmem:[%s21578_s18 + $0x790] sm:$0xf] }
  0xb7   : > { %804 = vst [vmem:[%s21583_s19 + $0x3c0] sm:$0xf] %v803_v48  ;;  %806 = vst [vmem:[%s21583_s19 + $0x3c4] sm:$0xf] %v805_v49  ;;  %v809_v51 = vld [vmem:[%s21578_s18 + $0x798] sm:$0xf] }
  0xb8   : > { %808 = vst [vmem:[%s21583_s19 + $0x3c8] sm:$0xf] %v807_v50  ;;  %v811_v52 = vld [vmem:[%s21578_s18 + $0x7a0] sm:$0xf]  ;;  %v813_v53 = vld [vmem:[%s21578_s18 + $0x7a8] sm:$0xf] }
  0xb9   : > { %810 = vst [vmem:[%s21583_s19 + $0x3cc] sm:$0xf] %v809_v51  ;;  %812 = vst [vmem:[%s21583_s19 + $0x3d0] sm:$0xf] %v811_v52  ;;  %v815_v54 = vld [vmem:[%s21578_s18 + $0x7b0] sm:$0xf] }
  0xba   : > { %814 = vst [vmem:[%s21583_s19 + $0x3d4] sm:$0xf] %v813_v53  ;;  %v817_v55 = vld [vmem:[%s21578_s18 + $0x7b8] sm:$0xf]  ;;  %v819_v56 = vld [vmem:[%s21578_s18 + $0x7c0] sm:$0xf] }
  0xbb   : > { %816 = vst [vmem:[%s21583_s19 + $0x3d8] sm:$0xf] %v815_v54  ;;  %818 = vst [vmem:[%s21583_s19 + $0x3dc] sm:$0xf] %v817_v55  ;;  %v821_v57 = vld [vmem:[%s21578_s18 + $0x7c8] sm:$0xf] }
  0xbc   : > { %820 = vst [vmem:[%s21583_s19 + $0x3e0] sm:$0xf] %v819_v56  ;;  %v823_v58 = vld [vmem:[%s21578_s18 + $0x7d0] sm:$0xf]  ;;  %v825_v59 = vld [vmem:[%s21578_s18 + $0x7d8] sm:$0xf] }
  0xbd   : > { %822 = vst [vmem:[%s21583_s19 + $0x3e4] sm:$0xf] %v821_v57  ;;  %824 = vst [vmem:[%s21583_s19 + $0x3e8] sm:$0xf] %v823_v58  ;;  %v827_v60 = vld [vmem:[%s21578_s18 + $0x7e0] sm:$0xf] }
  0xbe   : > { %826 = vst [vmem:[%s21583_s19 + $0x3ec] sm:$0xf] %v825_v59  ;;  %v829_v61 = vld [vmem:[%s21578_s18 + $0x7e8] sm:$0xf]  ;;  %v831_v62 = vld [vmem:[%s21578_s18 + $0x7f0] sm:$0xf] }
  0xbf   : > { %828 = vst [vmem:[%s21583_s19 + $0x3f0] sm:$0xf] %v827_v60  ;;  %830 = vst [vmem:[%s21583_s19 + $0x3f4] sm:$0xf] %v829_v61  ;;  %v833_v63 = vld [vmem:[%s21578_s18 + $0x7f8] sm:$0xf] }
  0xc0   : > { %832 = vst [vmem:[%s21583_s19 + $0x3f8] sm:$0xf] %v831_v62  ;;  %v835_v0 = vld [vmem:[%s21578_s18 + $0x800] sm:$0xf]  ;;  %v837_v1 = vld [vmem:[%s21578_s18 + $0x808] sm:$0xf] }
  0xc1   : > { %834 = vst [vmem:[%s21583_s19 + $0x3fc] sm:$0xf] %v833_v63  ;;  %836 = vst [vmem:[%s21583_s19 + $0x400] sm:$0xf] %v835_v0  ;;  %v839_v2 = vld [vmem:[%s21578_s18 + $0x810] sm:$0xf] }
  0xc2   : > { %838 = vst [vmem:[%s21583_s19 + $0x404] sm:$0xf] %v837_v1  ;;  %v841_v3 = vld [vmem:[%s21578_s18 + $0x818] sm:$0xf]  ;;  %v843_v4 = vld [vmem:[%s21578_s18 + $0x820] sm:$0xf] }
  0xc3   : > { %840 = vst [vmem:[%s21583_s19 + $0x408] sm:$0xf] %v839_v2  ;;  %842 = vst [vmem:[%s21583_s19 + $0x40c] sm:$0xf] %v841_v3  ;;  %v845_v5 = vld [vmem:[%s21578_s18 + $0x828] sm:$0xf] }
  0xc4   : > { %844 = vst [vmem:[%s21583_s19 + $0x410] sm:$0xf] %v843_v4  ;;  %v847_v6 = vld [vmem:[%s21578_s18 + $0x830] sm:$0xf]  ;;  %v849_v7 = vld [vmem:[%s21578_s18 + $0x838] sm:$0xf] }
  0xc5   : > { %846 = vst [vmem:[%s21583_s19 + $0x414] sm:$0xf] %v845_v5  ;;  %848 = vst [vmem:[%s21583_s19 + $0x418] sm:$0xf] %v847_v6  ;;  %v851_v8 = vld [vmem:[%s21578_s18 + $0x840] sm:$0xf] }
  0xc6   : > { %850 = vst [vmem:[%s21583_s19 + $0x41c] sm:$0xf] %v849_v7  ;;  %v853_v9 = vld [vmem:[%s21578_s18 + $0x848] sm:$0xf]  ;;  %v855_v10 = vld [vmem:[%s21578_s18 + $0x850] sm:$0xf] }
  0xc7   : > { %852 = vst [vmem:[%s21583_s19 + $0x420] sm:$0xf] %v851_v8  ;;  %854 = vst [vmem:[%s21583_s19 + $0x424] sm:$0xf] %v853_v9  ;;  %v857_v11 = vld [vmem:[%s21578_s18 + $0x858] sm:$0xf] }
  0xc8   : > { %856 = vst [vmem:[%s21583_s19 + $0x428] sm:$0xf] %v855_v10  ;;  %v859_v12 = vld [vmem:[%s21578_s18 + $0x860] sm:$0xf]  ;;  %v861_v13 = vld [vmem:[%s21578_s18 + $0x868] sm:$0xf] }
  0xc9   : > { %858 = vst [vmem:[%s21583_s19 + $0x42c] sm:$0xf] %v857_v11  ;;  %860 = vst [vmem:[%s21583_s19 + $0x430] sm:$0xf] %v859_v12  ;;  %v863_v14 = vld [vmem:[%s21578_s18 + $0x870] sm:$0xf] }
  0xca   : > { %862 = vst [vmem:[%s21583_s19 + $0x434] sm:$0xf] %v861_v13  ;;  %v865_v15 = vld [vmem:[%s21578_s18 + $0x878] sm:$0xf]  ;;  %v867_v16 = vld [vmem:[%s21578_s18 + $0x880] sm:$0xf] }
  0xcb   : > { %864 = vst [vmem:[%s21583_s19 + $0x438] sm:$0xf] %v863_v14  ;;  %866 = vst [vmem:[%s21583_s19 + $0x43c] sm:$0xf] %v865_v15  ;;  %v869_v17 = vld [vmem:[%s21578_s18 + $0x888] sm:$0xf] }
  0xcc   : > { %868 = vst [vmem:[%s21583_s19 + $0x440] sm:$0xf] %v867_v16  ;;  %v871_v18 = vld [vmem:[%s21578_s18 + $0x890] sm:$0xf]  ;;  %v873_v19 = vld [vmem:[%s21578_s18 + $0x898] sm:$0xf] }
  0xcd   : > { %870 = vst [vmem:[%s21583_s19 + $0x444] sm:$0xf] %v869_v17  ;;  %872 = vst [vmem:[%s21583_s19 + $0x448] sm:$0xf] %v871_v18  ;;  %v875_v20 = vld [vmem:[%s21578_s18 + $0x8a0] sm:$0xf] }
  0xce   : > { %874 = vst [vmem:[%s21583_s19 + $0x44c] sm:$0xf] %v873_v19  ;;  %v877_v21 = vld [vmem:[%s21578_s18 + $0x8a8] sm:$0xf]  ;;  %v879_v22 = vld [vmem:[%s21578_s18 + $0x8b0] sm:$0xf] }
  0xcf   : > { %876 = vst [vmem:[%s21583_s19 + $0x450] sm:$0xf] %v875_v20  ;;  %878 = vst [vmem:[%s21583_s19 + $0x454] sm:$0xf] %v877_v21  ;;  %v881_v23 = vld [vmem:[%s21578_s18 + $0x8b8] sm:$0xf] }
  0xd0   : > { %880 = vst [vmem:[%s21583_s19 + $0x458] sm:$0xf] %v879_v22  ;;  %v883_v24 = vld [vmem:[%s21578_s18 + $0x8c0] sm:$0xf]  ;;  %v885_v25 = vld [vmem:[%s21578_s18 + $0x8c8] sm:$0xf] }
  0xd1   : > { %882 = vst [vmem:[%s21583_s19 + $0x45c] sm:$0xf] %v881_v23  ;;  %884 = vst [vmem:[%s21583_s19 + $0x460] sm:$0xf] %v883_v24  ;;  %v887_v26 = vld [vmem:[%s21578_s18 + $0x8d0] sm:$0xf] }
  0xd2   : > { %886 = vst [vmem:[%s21583_s19 + $0x464] sm:$0xf] %v885_v25  ;;  %v889_v27 = vld [vmem:[%s21578_s18 + $0x8d8] sm:$0xf]  ;;  %v891_v28 = vld [vmem:[%s21578_s18 + $0x8e0] sm:$0xf] }
  0xd3   : > { %888 = vst [vmem:[%s21583_s19 + $0x468] sm:$0xf] %v887_v26  ;;  %890 = vst [vmem:[%s21583_s19 + $0x46c] sm:$0xf] %v889_v27  ;;  %v893_v29 = vld [vmem:[%s21578_s18 + $0x8e8] sm:$0xf] }
  0xd4   : > { %892 = vst [vmem:[%s21583_s19 + $0x470] sm:$0xf] %v891_v28  ;;  %v895_v30 = vld [vmem:[%s21578_s18 + $0x8f0] sm:$0xf]  ;;  %v897_v31 = vld [vmem:[%s21578_s18 + $0x8f8] sm:$0xf] }
  0xd5   : > { %894 = vst [vmem:[%s21583_s19 + $0x474] sm:$0xf] %v893_v29  ;;  %896 = vst [vmem:[%s21583_s19 + $0x478] sm:$0xf] %v895_v30  ;;  %v899_v32 = vld [vmem:[%s21578_s18 + $0x900] sm:$0xf] }
  0xd6   : > { %898 = vst [vmem:[%s21583_s19 + $0x47c] sm:$0xf] %v897_v31  ;;  %v901_v33 = vld [vmem:[%s21578_s18 + $0x908] sm:$0xf]  ;;  %v903_v34 = vld [vmem:[%s21578_s18 + $0x910] sm:$0xf] }
  0xd7   : > { %900 = vst [vmem:[%s21583_s19 + $0x480] sm:$0xf] %v899_v32  ;;  %902 = vst [vmem:[%s21583_s19 + $0x484] sm:$0xf] %v901_v33  ;;  %v905_v35 = vld [vmem:[%s21578_s18 + $0x918] sm:$0xf] }
  0xd8   : > { %904 = vst [vmem:[%s21583_s19 + $0x488] sm:$0xf] %v903_v34  ;;  %v907_v36 = vld [vmem:[%s21578_s18 + $0x920] sm:$0xf]  ;;  %v909_v37 = vld [vmem:[%s21578_s18 + $0x928] sm:$0xf] }
  0xd9   : > { %906 = vst [vmem:[%s21583_s19 + $0x48c] sm:$0xf] %v905_v35  ;;  %908 = vst [vmem:[%s21583_s19 + $0x490] sm:$0xf] %v907_v36  ;;  %v911_v38 = vld [vmem:[%s21578_s18 + $0x930] sm:$0xf] }
  0xda   : > { %910 = vst [vmem:[%s21583_s19 + $0x494] sm:$0xf] %v909_v37  ;;  %v913_v39 = vld [vmem:[%s21578_s18 + $0x938] sm:$0xf]  ;;  %v915_v40 = vld [vmem:[%s21578_s18 + $0x940] sm:$0xf] }
  0xdb   : > { %912 = vst [vmem:[%s21583_s19 + $0x498] sm:$0xf] %v911_v38  ;;  %914 = vst [vmem:[%s21583_s19 + $0x49c] sm:$0xf] %v913_v39  ;;  %v917_v41 = vld [vmem:[%s21578_s18 + $0x948] sm:$0xf] }
  0xdc   : > { %916 = vst [vmem:[%s21583_s19 + $0x4a0] sm:$0xf] %v915_v40  ;;  %v919_v42 = vld [vmem:[%s21578_s18 + $0x950] sm:$0xf]  ;;  %v921_v43 = vld [vmem:[%s21578_s18 + $0x958] sm:$0xf] }
  0xdd   : > { %918 = vst [vmem:[%s21583_s19 + $0x4a4] sm:$0xf] %v917_v41  ;;  %920 = vst [vmem:[%s21583_s19 + $0x4a8] sm:$0xf] %v919_v42  ;;  %v923_v44 = vld [vmem:[%s21578_s18 + $0x960] sm:$0xf] }
  0xde   : > { %922 = vst [vmem:[%s21583_s19 + $0x4ac] sm:$0xf] %v921_v43  ;;  %v925_v45 = vld [vmem:[%s21578_s18 + $0x968] sm:$0xf]  ;;  %v927_v46 = vld [vmem:[%s21578_s18 + $0x970] sm:$0xf] }
  0xdf   : > { %924 = vst [vmem:[%s21583_s19 + $0x4b0] sm:$0xf] %v923_v44  ;;  %926 = vst [vmem:[%s21583_s19 + $0x4b4] sm:$0xf] %v925_v45  ;;  %v929_v47 = vld [vmem:[%s21578_s18 + $0x978] sm:$0xf] }
  0xe0   : > { %928 = vst [vmem:[%s21583_s19 + $0x4b8] sm:$0xf] %v927_v46  ;;  %v931_v48 = vld [vmem:[%s21578_s18 + $0x980] sm:$0xf]  ;;  %v933_v49 = vld [vmem:[%s21578_s18 + $0x988] sm:$0xf] }
  0xe1   : > { %930 = vst [vmem:[%s21583_s19 + $0x4bc] sm:$0xf] %v929_v47  ;;  %932 = vst [vmem:[%s21583_s19 + $0x4c0] sm:$0xf] %v931_v48  ;;  %v935_v50 = vld [vmem:[%s21578_s18 + $0x990] sm:$0xf] }
  0xe2   : > { %934 = vst [vmem:[%s21583_s19 + $0x4c4] sm:$0xf] %v933_v49  ;;  %v937_v51 = vld [vmem:[%s21578_s18 + $0x998] sm:$0xf]  ;;  %v939_v52 = vld [vmem:[%s21578_s18 + $0x9a0] sm:$0xf] }
  0xe3   : > { %936 = vst [vmem:[%s21583_s19 + $0x4c8] sm:$0xf] %v935_v50  ;;  %938 = vst [vmem:[%s21583_s19 + $0x4cc] sm:$0xf] %v937_v51  ;;  %v941_v53 = vld [vmem:[%s21578_s18 + $0x9a8] sm:$0xf] }
  0xe4   : > { %940 = vst [vmem:[%s21583_s19 + $0x4d0] sm:$0xf] %v939_v52  ;;  %v943_v54 = vld [vmem:[%s21578_s18 + $0x9b0] sm:$0xf]  ;;  %v945_v55 = vld [vmem:[%s21578_s18 + $0x9b8] sm:$0xf] }
  0xe5   : > { %942 = vst [vmem:[%s21583_s19 + $0x4d4] sm:$0xf] %v941_v53  ;;  %944 = vst [vmem:[%s21583_s19 + $0x4d8] sm:$0xf] %v943_v54  ;;  %v947_v56 = vld [vmem:[%s21578_s18 + $0x9c0] sm:$0xf] }
  0xe6   : > { %946 = vst [vmem:[%s21583_s19 + $0x4dc] sm:$0xf] %v945_v55  ;;  %v949_v57 = vld [vmem:[%s21578_s18 + $0x9c8] sm:$0xf]  ;;  %v951_v58 = vld [vmem:[%s21578_s18 + $0x9d0] sm:$0xf] }
  0xe7   : > { %948 = vst [vmem:[%s21583_s19 + $0x4e0] sm:$0xf] %v947_v56  ;;  %950 = vst [vmem:[%s21583_s19 + $0x4e4] sm:$0xf] %v949_v57  ;;  %v953_v59 = vld [vmem:[%s21578_s18 + $0x9d8] sm:$0xf] }
  0xe8   : > { %952 = vst [vmem:[%s21583_s19 + $0x4e8] sm:$0xf] %v951_v58  ;;  %v955_v60 = vld [vmem:[%s21578_s18 + $0x9e0] sm:$0xf]  ;;  %v957_v61 = vld [vmem:[%s21578_s18 + $0x9e8] sm:$0xf] }
  0xe9   : > { %954 = vst [vmem:[%s21583_s19 + $0x4ec] sm:$0xf] %v953_v59  ;;  %956 = vst [vmem:[%s21583_s19 + $0x4f0] sm:$0xf] %v955_v60  ;;  %v959_v62 = vld [vmem:[%s21578_s18 + $0x9f0] sm:$0xf] }
  0xea   : > { %958 = vst [vmem:[%s21583_s19 + $0x4f4] sm:$0xf] %v957_v61  ;;  %v961_v63 = vld [vmem:[%s21578_s18 + $0x9f8] sm:$0xf]  ;;  %v963_v0 = vld [vmem:[%s21578_s18 + $0xa00] sm:$0xf] }
  0xeb   : > { %960 = vst [vmem:[%s21583_s19 + $0x4f8] sm:$0xf] %v959_v62  ;;  %962 = vst [vmem:[%s21583_s19 + $0x4fc] sm:$0xf] %v961_v63  ;;  %v965_v1 = vld [vmem:[%s21578_s18 + $0xa08] sm:$0xf] }
  0xec   : > { %964 = vst [vmem:[%s21583_s19 + $0x500] sm:$0xf] %v963_v0  ;;  %v967_v2 = vld [vmem:[%s21578_s18 + $0xa10] sm:$0xf]  ;;  %v969_v3 = vld [vmem:[%s21578_s18 + $0xa18] sm:$0xf] }
  0xed   : > { %966 = vst [vmem:[%s21583_s19 + $0x504] sm:$0xf] %v965_v1  ;;  %968 = vst [vmem:[%s21583_s19 + $0x508] sm:$0xf] %v967_v2  ;;  %v971_v4 = vld [vmem:[%s21578_s18 + $0xa20] sm:$0xf] }
  0xee   : > { %970 = vst [vmem:[%s21583_s19 + $0x50c] sm:$0xf] %v969_v3  ;;  %v973_v5 = vld [vmem:[%s21578_s18 + $0xa28] sm:$0xf]  ;;  %v975_v6 = vld [vmem:[%s21578_s18 + $0xa30] sm:$0xf] }
  0xef   : > { %972 = vst [vmem:[%s21583_s19 + $0x510] sm:$0xf] %v971_v4  ;;  %974 = vst [vmem:[%s21583_s19 + $0x514] sm:$0xf] %v973_v5  ;;  %v977_v7 = vld [vmem:[%s21578_s18 + $0xa38] sm:$0xf] }
  0xf0   : > { %976 = vst [vmem:[%s21583_s19 + $0x518] sm:$0xf] %v975_v6  ;;  %v979_v8 = vld [vmem:[%s21578_s18 + $0xa40] sm:$0xf]  ;;  %v981_v9 = vld [vmem:[%s21578_s18 + $0xa48] sm:$0xf] }
  0xf1   : > { %978 = vst [vmem:[%s21583_s19 + $0x51c] sm:$0xf] %v977_v7  ;;  %980 = vst [vmem:[%s21583_s19 + $0x520] sm:$0xf] %v979_v8  ;;  %v983_v10 = vld [vmem:[%s21578_s18 + $0xa50] sm:$0xf] }
  0xf2   : > { %982 = vst [vmem:[%s21583_s19 + $0x524] sm:$0xf] %v981_v9  ;;  %v985_v11 = vld [vmem:[%s21578_s18 + $0xa58] sm:$0xf]  ;;  %v987_v12 = vld [vmem:[%s21578_s18 + $0xa60] sm:$0xf] }
  0xf3   : > { %984 = vst [vmem:[%s21583_s19 + $0x528] sm:$0xf] %v983_v10  ;;  %986 = vst [vmem:[%s21583_s19 + $0x52c] sm:$0xf] %v985_v11  ;;  %v989_v13 = vld [vmem:[%s21578_s18 + $0xa68] sm:$0xf] }
  0xf4   : > { %988 = vst [vmem:[%s21583_s19 + $0x530] sm:$0xf] %v987_v12  ;;  %v991_v14 = vld [vmem:[%s21578_s18 + $0xa70] sm:$0xf]  ;;  %v993_v15 = vld [vmem:[%s21578_s18 + $0xa78] sm:$0xf] }
  0xf5   : > { %990 = vst [vmem:[%s21583_s19 + $0x534] sm:$0xf] %v989_v13  ;;  %992 = vst [vmem:[%s21583_s19 + $0x538] sm:$0xf] %v991_v14  ;;  %v995_v16 = vld [vmem:[%s21578_s18 + $0xa80] sm:$0xf] }
  0xf6   : > { %994 = vst [vmem:[%s21583_s19 + $0x53c] sm:$0xf] %v993_v15  ;;  %v997_v17 = vld [vmem:[%s21578_s18 + $0xa88] sm:$0xf]  ;;  %v999_v18 = vld [vmem:[%s21578_s18 + $0xa90] sm:$0xf] }
  0xf7   : > { %996 = vst [vmem:[%s21583_s19 + $0x540] sm:$0xf] %v995_v16  ;;  %998 = vst [vmem:[%s21583_s19 + $0x544] sm:$0xf] %v997_v17  ;;  %v1001_v19 = vld [vmem:[%s21578_s18 + $0xa98] sm:$0xf] }
  0xf8   : > { %1000 = vst [vmem:[%s21583_s19 + $0x548] sm:$0xf] %v999_v18  ;;  %v1003_v20 = vld [vmem:[%s21578_s18 + $0xaa0] sm:$0xf]  ;;  %v1005_v21 = vld [vmem:[%s21578_s18 + $0xaa8] sm:$0xf] }
  0xf9   : > { %1002 = vst [vmem:[%s21583_s19 + $0x54c] sm:$0xf] %v1001_v19  ;;  %1004 = vst [vmem:[%s21583_s19 + $0x550] sm:$0xf] %v1003_v20  ;;  %v1007_v22 = vld [vmem:[%s21578_s18 + $0xab0] sm:$0xf] }
  0xfa   : > { %1006 = vst [vmem:[%s21583_s19 + $0x554] sm:$0xf] %v1005_v21  ;;  %v1009_v23 = vld [vmem:[%s21578_s18 + $0xab8] sm:$0xf]  ;;  %v1011_v24 = vld [vmem:[%s21578_s18 + $0xac0] sm:$0xf] }
  0xfb   : > { %1008 = vst [vmem:[%s21583_s19 + $0x558] sm:$0xf] %v1007_v22  ;;  %1010 = vst [vmem:[%s21583_s19 + $0x55c] sm:$0xf] %v1009_v23  ;;  %v1013_v25 = vld [vmem:[%s21578_s18 + $0xac8] sm:$0xf] }
  0xfc   : > { %1012 = vst [vmem:[%s21583_s19 + $0x560] sm:$0xf] %v1011_v24  ;;  %v1015_v26 = vld [vmem:[%s21578_s18 + $0xad0] sm:$0xf]  ;;  %v1017_v27 = vld [vmem:[%s21578_s18 + $0xad8] sm:$0xf] }
  0xfd   : > { %1014 = vst [vmem:[%s21583_s19 + $0x564] sm:$0xf] %v1013_v25  ;;  %1016 = vst [vmem:[%s21583_s19 + $0x568] sm:$0xf] %v1015_v26  ;;  %v1019_v28 = vld [vmem:[%s21578_s18 + $0xae0] sm:$0xf] }
  0xfe   : > { %1018 = vst [vmem:[%s21583_s19 + $0x56c] sm:$0xf] %v1017_v27  ;;  %v1021_v29 = vld [vmem:[%s21578_s18 + $0xae8] sm:$0xf]  ;;  %v1023_v30 = vld [vmem:[%s21578_s18 + $0xaf0] sm:$0xf] }
  0xff   : > { %1020 = vst [vmem:[%s21583_s19 + $0x570] sm:$0xf] %v1019_v28  ;;  %1022 = vst [vmem:[%s21583_s19 + $0x574] sm:$0xf] %v1021_v29  ;;  %v1025_v31 = vld [vmem:[%s21578_s18 + $0xaf8] sm:$0xf] }
 0x100   : > { %1024 = vst [vmem:[%s21583_s19 + $0x578] sm:$0xf] %v1023_v30  ;;  %v1027_v32 = vld [vmem:[%s21578_s18 + $0xb00] sm:$0xf]  ;;  %v1029_v33 = vld [vmem:[%s21578_s18 + $0xb08] sm:$0xf] }
 0x101   : > { %1026 = vst [vmem:[%s21583_s19 + $0x57c] sm:$0xf] %v1025_v31  ;;  %1028 = vst [vmem:[%s21583_s19 + $0x580] sm:$0xf] %v1027_v32  ;;  %v1031_v34 = vld [vmem:[%s21578_s18 + $0xb10] sm:$0xf] }
 0x102   : > { %1030 = vst [vmem:[%s21583_s19 + $0x584] sm:$0xf] %v1029_v33  ;;  %v1033_v35 = vld [vmem:[%s21578_s18 + $0xb18] sm:$0xf]  ;;  %v1035_v36 = vld [vmem:[%s21578_s18 + $0xb20] sm:$0xf] }
 0x103   : > { %1032 = vst [vmem:[%s21583_s19 + $0x588] sm:$0xf] %v1031_v34  ;;  %1034 = vst [vmem:[%s21583_s19 + $0x58c] sm:$0xf] %v1033_v35  ;;  %v1037_v37 = vld [vmem:[%s21578_s18 + $0xb28] sm:$0xf] }
 0x104   : > { %1036 = vst [vmem:[%s21583_s19 + $0x590] sm:$0xf] %v1035_v36  ;;  %v1039_v38 = vld [vmem:[%s21578_s18 + $0xb30] sm:$0xf]  ;;  %v1041_v39 = vld [vmem:[%s21578_s18 + $0xb38] sm:$0xf] }
 0x105   : > { %1038 = vst [vmem:[%s21583_s19 + $0x594] sm:$0xf] %v1037_v37  ;;  %1040 = vst [vmem:[%s21583_s19 + $0x598] sm:$0xf] %v1039_v38  ;;  %v1043_v40 = vld [vmem:[%s21578_s18 + $0xb40] sm:$0xf] }
 0x106   : > { %1042 = vst [vmem:[%s21583_s19 + $0x59c] sm:$0xf] %v1041_v39  ;;  %v1045_v41 = vld [vmem:[%s21578_s18 + $0xb48] sm:$0xf]  ;;  %v1047_v42 = vld [vmem:[%s21578_s18 + $0xb50] sm:$0xf] }
 0x107   : > { %1044 = vst [vmem:[%s21583_s19 + $0x5a0] sm:$0xf] %v1043_v40  ;;  %1046 = vst [vmem:[%s21583_s19 + $0x5a4] sm:$0xf] %v1045_v41  ;;  %v1049_v43 = vld [vmem:[%s21578_s18 + $0xb58] sm:$0xf] }
 0x108   : > { %1048 = vst [vmem:[%s21583_s19 + $0x5a8] sm:$0xf] %v1047_v42  ;;  %v1051_v44 = vld [vmem:[%s21578_s18 + $0xb60] sm:$0xf]  ;;  %v1053_v45 = vld [vmem:[%s21578_s18 + $0xb68] sm:$0xf] }
 0x109   : > { %1050 = vst [vmem:[%s21583_s19 + $0x5ac] sm:$0xf] %v1049_v43  ;;  %1052 = vst [vmem:[%s21583_s19 + $0x5b0] sm:$0xf] %v1051_v44  ;;  %v1055_v46 = vld [vmem:[%s21578_s18 + $0xb70] sm:$0xf] }
 0x10a   : > { %1054 = vst [vmem:[%s21583_s19 + $0x5b4] sm:$0xf] %v1053_v45  ;;  %v1057_v47 = vld [vmem:[%s21578_s18 + $0xb78] sm:$0xf]  ;;  %v1059_v48 = vld [vmem:[%s21578_s18 + $0xb80] sm:$0xf] }
 0x10b   : > { %1056 = vst [vmem:[%s21583_s19 + $0x5b8] sm:$0xf] %v1055_v46  ;;  %1058 = vst [vmem:[%s21583_s19 + $0x5bc] sm:$0xf] %v1057_v47  ;;  %v1061_v49 = vld [vmem:[%s21578_s18 + $0xb88] sm:$0xf] }
 0x10c   : > { %1060 = vst [vmem:[%s21583_s19 + $0x5c0] sm:$0xf] %v1059_v48  ;;  %v1063_v50 = vld [vmem:[%s21578_s18 + $0xb90] sm:$0xf]  ;;  %v1065_v51 = vld [vmem:[%s21578_s18 + $0xb98] sm:$0xf] }
 0x10d   : > { %1062 = vst [vmem:[%s21583_s19 + $0x5c4] sm:$0xf] %v1061_v49  ;;  %1064 = vst [vmem:[%s21583_s19 + $0x5c8] sm:$0xf] %v1063_v50  ;;  %v1067_v52 = vld [vmem:[%s21578_s18 + $0xba0] sm:$0xf] }
 0x10e   : > { %1066 = vst [vmem:[%s21583_s19 + $0x5cc] sm:$0xf] %v1065_v51  ;;  %v1069_v53 = vld [vmem:[%s21578_s18 + $0xba8] sm:$0xf]  ;;  %v1071_v54 = vld [vmem:[%s21578_s18 + $0xbb0] sm:$0xf] }
 0x10f   : > { %1068 = vst [vmem:[%s21583_s19 + $0x5d0] sm:$0xf] %v1067_v52  ;;  %1070 = vst [vmem:[%s21583_s19 + $0x5d4] sm:$0xf] %v1069_v53  ;;  %v1073_v55 = vld [vmem:[%s21578_s18 + $0xbb8] sm:$0xf] }
 0x110   : > { %1072 = vst [vmem:[%s21583_s19 + $0x5d8] sm:$0xf] %v1071_v54  ;;  %v1075_v56 = vld [vmem:[%s21578_s18 + $0xbc0] sm:$0xf]  ;;  %v1077_v57 = vld [vmem:[%s21578_s18 + $0xbc8] sm:$0xf] }
 0x111   : > { %1074 = vst [vmem:[%s21583_s19 + $0x5dc] sm:$0xf] %v1073_v55  ;;  %1076 = vst [vmem:[%s21583_s19 + $0x5e0] sm:$0xf] %v1075_v56  ;;  %v1079_v58 = vld [vmem:[%s21578_s18 + $0xbd0] sm:$0xf] }
 0x112   : > { %1078 = vst [vmem:[%s21583_s19 + $0x5e4] sm:$0xf] %v1077_v57  ;;  %v1081_v59 = vld [vmem:[%s21578_s18 + $0xbd8] sm:$0xf]  ;;  %v1083_v60 = vld [vmem:[%s21578_s18 + $0xbe0] sm:$0xf] }
 0x113   : > { %1080 = vst [vmem:[%s21583_s19 + $0x5e8] sm:$0xf] %v1079_v58  ;;  %1082 = vst [vmem:[%s21583_s19 + $0x5ec] sm:$0xf] %v1081_v59  ;;  %v1085_v61 = vld [vmem:[%s21578_s18 + $0xbe8] sm:$0xf] }
 0x114   : > { %1084 = vst [vmem:[%s21583_s19 + $0x5f0] sm:$0xf] %v1083_v60  ;;  %v1087_v62 = vld [vmem:[%s21578_s18 + $0xbf0] sm:$0xf]  ;;  %v1089_v63 = vld [vmem:[%s21578_s18 + $0xbf8] sm:$0xf] }
 0x115   : > { %1086 = vst [vmem:[%s21583_s19 + $0x5f4] sm:$0xf] %v1085_v61  ;;  %1088 = vst [vmem:[%s21583_s19 + $0x5f8] sm:$0xf] %v1087_v62  ;;  %v1091_v0 = vld [vmem:[%s21578_s18 + $0xc00] sm:$0xf] }
 0x116   : > { %1090 = vst [vmem:[%s21583_s19 + $0x5fc] sm:$0xf] %v1089_v63  ;;  %v1093_v1 = vld [vmem:[%s21578_s18 + $0xc08] sm:$0xf]  ;;  %v1095_v2 = vld [vmem:[%s21578_s18 + $0xc10] sm:$0xf] }
 0x117   : > { %1092 = vst [vmem:[%s21583_s19 + $0x600] sm:$0xf] %v1091_v0  ;;  %1094 = vst [vmem:[%s21583_s19 + $0x604] sm:$0xf] %v1093_v1  ;;  %v1097_v3 = vld [vmem:[%s21578_s18 + $0xc18] sm:$0xf] }
 0x118   : > { %1096 = vst [vmem:[%s21583_s19 + $0x608] sm:$0xf] %v1095_v2  ;;  %v1099_v4 = vld [vmem:[%s21578_s18 + $0xc20] sm:$0xf]  ;;  %v1101_v5 = vld [vmem:[%s21578_s18 + $0xc28] sm:$0xf] }
 0x119   : > { %1098 = vst [vmem:[%s21583_s19 + $0x60c] sm:$0xf] %v1097_v3  ;;  %1100 = vst [vmem:[%s21583_s19 + $0x610] sm:$0xf] %v1099_v4  ;;  %v1103_v6 = vld [vmem:[%s21578_s18 + $0xc30] sm:$0xf] }
 0x11a   : > { %1102 = vst [vmem:[%s21583_s19 + $0x614] sm:$0xf] %v1101_v5  ;;  %v1105_v7 = vld [vmem:[%s21578_s18 + $0xc38] sm:$0xf]  ;;  %v1107_v8 = vld [vmem:[%s21578_s18 + $0xc40] sm:$0xf] }
 0x11b   : > { %1104 = vst [vmem:[%s21583_s19 + $0x618] sm:$0xf] %v1103_v6  ;;  %1106 = vst [vmem:[%s21583_s19 + $0x61c] sm:$0xf] %v1105_v7  ;;  %v1109_v9 = vld [vmem:[%s21578_s18 + $0xc48] sm:$0xf] }
 0x11c   : > { %1108 = vst [vmem:[%s21583_s19 + $0x620] sm:$0xf] %v1107_v8  ;;  %v1111_v10 = vld [vmem:[%s21578_s18 + $0xc50] sm:$0xf]  ;;  %v1113_v11 = vld [vmem:[%s21578_s18 + $0xc58] sm:$0xf] }
 0x11d   : > { %1110 = vst [vmem:[%s21583_s19 + $0x624] sm:$0xf] %v1109_v9  ;;  %1112 = vst [vmem:[%s21583_s19 + $0x628] sm:$0xf] %v1111_v10  ;;  %v1115_v12 = vld [vmem:[%s21578_s18 + $0xc60] sm:$0xf] }
 0x11e   : > { %1114 = vst [vmem:[%s21583_s19 + $0x62c] sm:$0xf] %v1113_v11  ;;  %v1117_v13 = vld [vmem:[%s21578_s18 + $0xc68] sm:$0xf]  ;;  %v1119_v14 = vld [vmem:[%s21578_s18 + $0xc70] sm:$0xf] }
 0x11f   : > { %1116 = vst [vmem:[%s21583_s19 + $0x630] sm:$0xf] %v1115_v12  ;;  %1118 = vst [vmem:[%s21583_s19 + $0x634] sm:$0xf] %v1117_v13  ;;  %v1121_v15 = vld [vmem:[%s21578_s18 + $0xc78] sm:$0xf] }
 0x120   : > { %1120 = vst [vmem:[%s21583_s19 + $0x638] sm:$0xf] %v1119_v14  ;;  %v1123_v16 = vld [vmem:[%s21578_s18 + $0xc80] sm:$0xf]  ;;  %v1125_v17 = vld [vmem:[%s21578_s18 + $0xc88] sm:$0xf] }
 0x121   : > { %1122 = vst [vmem:[%s21583_s19 + $0x63c] sm:$0xf] %v1121_v15  ;;  %1124 = vst [vmem:[%s21583_s19 + $0x640] sm:$0xf] %v1123_v16  ;;  %v1127_v18 = vld [vmem:[%s21578_s18 + $0xc90] sm:$0xf] }
 0x122   : > { %1126 = vst [vmem:[%s21583_s19 + $0x644] sm:$0xf] %v1125_v17  ;;  %v1129_v19 = vld [vmem:[%s21578_s18 + $0xc98] sm:$0xf]  ;;  %v1131_v20 = vld [vmem:[%s21578_s18 + $0xca0] sm:$0xf] }
 0x123   : > { %1128 = vst [vmem:[%s21583_s19 + $0x648] sm:$0xf] %v1127_v18  ;;  %1130 = vst [vmem:[%s21583_s19 + $0x64c] sm:$0xf] %v1129_v19  ;;  %v1133_v21 = vld [vmem:[%s21578_s18 + $0xca8] sm:$0xf] }
 0x124   : > { %1132 = vst [vmem:[%s21583_s19 + $0x650] sm:$0xf] %v1131_v20  ;;  %v1135_v22 = vld [vmem:[%s21578_s18 + $0xcb0] sm:$0xf]  ;;  %v1137_v23 = vld [vmem:[%s21578_s18 + $0xcb8] sm:$0xf] }
 0x125   : > { %1134 = vst [vmem:[%s21583_s19 + $0x654] sm:$0xf] %v1133_v21  ;;  %1136 = vst [vmem:[%s21583_s19 + $0x658] sm:$0xf] %v1135_v22  ;;  %v1139_v24 = vld [vmem:[%s21578_s18 + $0xcc0] sm:$0xf] }
 0x126   : > { %1138 = vst [vmem:[%s21583_s19 + $0x65c] sm:$0xf] %v1137_v23  ;;  %v1141_v25 = vld [vmem:[%s21578_s18 + $0xcc8] sm:$0xf]  ;;  %v1143_v26 = vld [vmem:[%s21578_s18 + $0xcd0] sm:$0xf] }
 0x127   : > { %1140 = vst [vmem:[%s21583_s19 + $0x660] sm:$0xf] %v1139_v24  ;;  %1142 = vst [vmem:[%s21583_s19 + $0x664] sm:$0xf] %v1141_v25  ;;  %v1145_v27 = vld [vmem:[%s21578_s18 + $0xcd8] sm:$0xf] }
 0x128   : > { %1144 = vst [vmem:[%s21583_s19 + $0x668] sm:$0xf] %v1143_v26  ;;  %v1147_v28 = vld [vmem:[%s21578_s18 + $0xce0] sm:$0xf]  ;;  %v1149_v29 = vld [vmem:[%s21578_s18 + $0xce8] sm:$0xf] }
 0x129   : > { %1146 = vst [vmem:[%s21583_s19 + $0x66c] sm:$0xf] %v1145_v27  ;;  %1148 = vst [vmem:[%s21583_s19 + $0x670] sm:$0xf] %v1147_v28  ;;  %v1151_v30 = vld [vmem:[%s21578_s18 + $0xcf0] sm:$0xf] }
 0x12a   : > { %1150 = vst [vmem:[%s21583_s19 + $0x674] sm:$0xf] %v1149_v29  ;;  %v1153_v31 = vld [vmem:[%s21578_s18 + $0xcf8] sm:$0xf]  ;;  %v1155_v32 = vld [vmem:[%s21578_s18 + $0xd00] sm:$0xf] }
 0x12b   : > { %1152 = vst [vmem:[%s21583_s19 + $0x678] sm:$0xf] %v1151_v30  ;;  %1154 = vst [vmem:[%s21583_s19 + $0x67c] sm:$0xf] %v1153_v31  ;;  %v1157_v33 = vld [vmem:[%s21578_s18 + $0xd08] sm:$0xf] }
 0x12c   : > { %1156 = vst [vmem:[%s21583_s19 + $0x680] sm:$0xf] %v1155_v32  ;;  %v1159_v34 = vld [vmem:[%s21578_s18 + $0xd10] sm:$0xf]  ;;  %v1161_v35 = vld [vmem:[%s21578_s18 + $0xd18] sm:$0xf] }
 0x12d   : > { %1158 = vst [vmem:[%s21583_s19 + $0x684] sm:$0xf] %v1157_v33  ;;  %1160 = vst [vmem:[%s21583_s19 + $0x688] sm:$0xf] %v1159_v34  ;;  %v1163_v36 = vld [vmem:[%s21578_s18 + $0xd20] sm:$0xf] }
 0x12e   : > { %1162 = vst [vmem:[%s21583_s19 + $0x68c] sm:$0xf] %v1161_v35  ;;  %v1165_v37 = vld [vmem:[%s21578_s18 + $0xd28] sm:$0xf]  ;;  %v1167_v38 = vld [vmem:[%s21578_s18 + $0xd30] sm:$0xf] }
 0x12f   : > { %1164 = vst [vmem:[%s21583_s19 + $0x690] sm:$0xf] %v1163_v36  ;;  %1166 = vst [vmem:[%s21583_s19 + $0x694] sm:$0xf] %v1165_v37  ;;  %v1169_v39 = vld [vmem:[%s21578_s18 + $0xd38] sm:$0xf] }
 0x130   : > { %1168 = vst [vmem:[%s21583_s19 + $0x698] sm:$0xf] %v1167_v38  ;;  %v1171_v40 = vld [vmem:[%s21578_s18 + $0xd40] sm:$0xf]  ;;  %v1173_v41 = vld [vmem:[%s21578_s18 + $0xd48] sm:$0xf] }
 0x131   : > { %1170 = vst [vmem:[%s21583_s19 + $0x69c] sm:$0xf] %v1169_v39  ;;  %1172 = vst [vmem:[%s21583_s19 + $0x6a0] sm:$0xf] %v1171_v40  ;;  %v1175_v42 = vld [vmem:[%s21578_s18 + $0xd50] sm:$0xf] }
 0x132   : > { %1174 = vst [vmem:[%s21583_s19 + $0x6a4] sm:$0xf] %v1173_v41  ;;  %v1177_v43 = vld [vmem:[%s21578_s18 + $0xd58] sm:$0xf]  ;;  %v1179_v44 = vld [vmem:[%s21578_s18 + $0xd60] sm:$0xf] }
 0x133   : > { %1176 = vst [vmem:[%s21583_s19 + $0x6a8] sm:$0xf] %v1175_v42  ;;  %1178 = vst [vmem:[%s21583_s19 + $0x6ac] sm:$0xf] %v1177_v43  ;;  %v1181_v45 = vld [vmem:[%s21578_s18 + $0xd68] sm:$0xf] }
 0x134   : > { %1180 = vst [vmem:[%s21583_s19 + $0x6b0] sm:$0xf] %v1179_v44  ;;  %v1183_v46 = vld [vmem:[%s21578_s18 + $0xd70] sm:$0xf]  ;;  %v1185_v47 = vld [vmem:[%s21578_s18 + $0xd78] sm:$0xf] }
 0x135   : > { %1182 = vst [vmem:[%s21583_s19 + $0x6b4] sm:$0xf] %v1181_v45  ;;  %1184 = vst [vmem:[%s21583_s19 + $0x6b8] sm:$0xf] %v1183_v46  ;;  %v1187_v48 = vld [vmem:[%s21578_s18 + $0xd80] sm:$0xf] }
 0x136   : > { %1186 = vst [vmem:[%s21583_s19 + $0x6bc] sm:$0xf] %v1185_v47  ;;  %v1189_v49 = vld [vmem:[%s21578_s18 + $0xd88] sm:$0xf]  ;;  %v1191_v50 = vld [vmem:[%s21578_s18 + $0xd90] sm:$0xf] }
 0x137   : > { %1188 = vst [vmem:[%s21583_s19 + $0x6c0] sm:$0xf] %v1187_v48  ;;  %1190 = vst [vmem:[%s21583_s19 + $0x6c4] sm:$0xf] %v1189_v49  ;;  %v1193_v51 = vld [vmem:[%s21578_s18 + $0xd98] sm:$0xf] }
 0x138   : > { %1192 = vst [vmem:[%s21583_s19 + $0x6c8] sm:$0xf] %v1191_v50  ;;  %v1195_v52 = vld [vmem:[%s21578_s18 + $0xda0] sm:$0xf]  ;;  %v1197_v53 = vld [vmem:[%s21578_s18 + $0xda8] sm:$0xf] }
 0x139   : > { %1194 = vst [vmem:[%s21583_s19 + $0x6cc] sm:$0xf] %v1193_v51  ;;  %1196 = vst [vmem:[%s21583_s19 + $0x6d0] sm:$0xf] %v1195_v52  ;;  %v1199_v54 = vld [vmem:[%s21578_s18 + $0xdb0] sm:$0xf] }
 0x13a   : > { %1198 = vst [vmem:[%s21583_s19 + $0x6d4] sm:$0xf] %v1197_v53  ;;  %v1201_v55 = vld [vmem:[%s21578_s18 + $0xdb8] sm:$0xf]  ;;  %v1203_v56 = vld [vmem:[%s21578_s18 + $0xdc0] sm:$0xf] }
 0x13b   : > { %1200 = vst [vmem:[%s21583_s19 + $0x6d8] sm:$0xf] %v1199_v54  ;;  %1202 = vst [vmem:[%s21583_s19 + $0x6dc] sm:$0xf] %v1201_v55  ;;  %v1205_v57 = vld [vmem:[%s21578_s18 + $0xdc8] sm:$0xf] }
 0x13c   : > { %1204 = vst [vmem:[%s21583_s19 + $0x6e0] sm:$0xf] %v1203_v56  ;;  %v1207_v58 = vld [vmem:[%s21578_s18 + $0xdd0] sm:$0xf]  ;;  %v1209_v59 = vld [vmem:[%s21578_s18 + $0xdd8] sm:$0xf] }
 0x13d   : > { %1206 = vst [vmem:[%s21583_s19 + $0x6e4] sm:$0xf] %v1205_v57  ;;  %1208 = vst [vmem:[%s21583_s19 + $0x6e8] sm:$0xf] %v1207_v58  ;;  %v1211_v60 = vld [vmem:[%s21578_s18 + $0xde0] sm:$0xf] }
 0x13e   : > { %1210 = vst [vmem:[%s21583_s19 + $0x6ec] sm:$0xf] %v1209_v59  ;;  %v1213_v61 = vld [vmem:[%s21578_s18 + $0xde8] sm:$0xf]  ;;  %v1215_v62 = vld [vmem:[%s21578_s18 + $0xdf0] sm:$0xf] }
 0x13f   : > { %1212 = vst [vmem:[%s21583_s19 + $0x6f0] sm:$0xf] %v1211_v60  ;;  %1214 = vst [vmem:[%s21583_s19 + $0x6f4] sm:$0xf] %v1213_v61  ;;  %v1217_v63 = vld [vmem:[%s21578_s18 + $0xdf8] sm:$0xf] }
 0x140   : > { %1216 = vst [vmem:[%s21583_s19 + $0x6f8] sm:$0xf] %v1215_v62  ;;  %v1219_v0 = vld [vmem:[%s21578_s18 + $0xe00] sm:$0xf]  ;;  %v1221_v1 = vld [vmem:[%s21578_s18 + $0xe08] sm:$0xf] }
 0x141   : > { %1218 = vst [vmem:[%s21583_s19 + $0x6fc] sm:$0xf] %v1217_v63  ;;  %1220 = vst [vmem:[%s21583_s19 + $0x700] sm:$0xf] %v1219_v0  ;;  %v1223_v2 = vld [vmem:[%s21578_s18 + $0xe10] sm:$0xf] }
 0x142   : > { %1222 = vst [vmem:[%s21583_s19 + $0x704] sm:$0xf] %v1221_v1  ;;  %v1225_v3 = vld [vmem:[%s21578_s18 + $0xe18] sm:$0xf]  ;;  %v1227_v4 = vld [vmem:[%s21578_s18 + $0xe20] sm:$0xf] }
 0x143   : > { %1224 = vst [vmem:[%s21583_s19 + $0x708] sm:$0xf] %v1223_v2  ;;  %1226 = vst [vmem:[%s21583_s19 + $0x70c] sm:$0xf] %v1225_v3  ;;  %v1229_v5 = vld [vmem:[%s21578_s18 + $0xe28] sm:$0xf] }
 0x144   : > { %1228 = vst [vmem:[%s21583_s19 + $0x710] sm:$0xf] %v1227_v4  ;;  %v1231_v6 = vld [vmem:[%s21578_s18 + $0xe30] sm:$0xf]  ;;  %v1233_v7 = vld [vmem:[%s21578_s18 + $0xe38] sm:$0xf] }
 0x145   : > { %1230 = vst [vmem:[%s21583_s19 + $0x714] sm:$0xf] %v1229_v5  ;;  %1232 = vst [vmem:[%s21583_s19 + $0x718] sm:$0xf] %v1231_v6  ;;  %v1235_v8 = vld [vmem:[%s21578_s18 + $0xe40] sm:$0xf] }
 0x146   : > { %1234 = vst [vmem:[%s21583_s19 + $0x71c] sm:$0xf] %v1233_v7  ;;  %v1237_v9 = vld [vmem:[%s21578_s18 + $0xe48] sm:$0xf]  ;;  %v1239_v10 = vld [vmem:[%s21578_s18 + $0xe50] sm:$0xf] }
 0x147   : > { %1236 = vst [vmem:[%s21583_s19 + $0x720] sm:$0xf] %v1235_v8  ;;  %1238 = vst [vmem:[%s21583_s19 + $0x724] sm:$0xf] %v1237_v9  ;;  %v1241_v11 = vld [vmem:[%s21578_s18 + $0xe58] sm:$0xf] }
 0x148   : > { %1240 = vst [vmem:[%s21583_s19 + $0x728] sm:$0xf] %v1239_v10  ;;  %v1243_v12 = vld [vmem:[%s21578_s18 + $0xe60] sm:$0xf]  ;;  %v1245_v13 = vld [vmem:[%s21578_s18 + $0xe68] sm:$0xf] }
 0x149   : > { %1242 = vst [vmem:[%s21583_s19 + $0x72c] sm:$0xf] %v1241_v11  ;;  %1244 = vst [vmem:[%s21583_s19 + $0x730] sm:$0xf] %v1243_v12  ;;  %v1247_v14 = vld [vmem:[%s21578_s18 + $0xe70] sm:$0xf] }
 0x14a   : > { %1246 = vst [vmem:[%s21583_s19 + $0x734] sm:$0xf] %v1245_v13  ;;  %v1249_v15 = vld [vmem:[%s21578_s18 + $0xe78] sm:$0xf]  ;;  %v1251_v16 = vld [vmem:[%s21578_s18 + $0xe80] sm:$0xf] }
 0x14b   : > { %1248 = vst [vmem:[%s21583_s19 + $0x738] sm:$0xf] %v1247_v14  ;;  %1250 = vst [vmem:[%s21583_s19 + $0x73c] sm:$0xf] %v1249_v15  ;;  %v1253_v17 = vld [vmem:[%s21578_s18 + $0xe88] sm:$0xf] }
 0x14c   : > { %1252 = vst [vmem:[%s21583_s19 + $0x740] sm:$0xf] %v1251_v16  ;;  %v1255_v18 = vld [vmem:[%s21578_s18 + $0xe90] sm:$0xf]  ;;  %v1257_v19 = vld [vmem:[%s21578_s18 + $0xe98] sm:$0xf] }
 0x14d   : > { %1254 = vst [vmem:[%s21583_s19 + $0x744] sm:$0xf] %v1253_v17  ;;  %1256 = vst [vmem:[%s21583_s19 + $0x748] sm:$0xf] %v1255_v18  ;;  %v1259_v20 = vld [vmem:[%s21578_s18 + $0xea0] sm:$0xf] }
 0x14e   : > { %1258 = vst [vmem:[%s21583_s19 + $0x74c] sm:$0xf] %v1257_v19  ;;  %v1261_v21 = vld [vmem:[%s21578_s18 + $0xea8] sm:$0xf]  ;;  %v1263_v22 = vld [vmem:[%s21578_s18 + $0xeb0] sm:$0xf] }
 0x14f   : > { %1260 = vst [vmem:[%s21583_s19 + $0x750] sm:$0xf] %v1259_v20  ;;  %1262 = vst [vmem:[%s21583_s19 + $0x754] sm:$0xf] %v1261_v21  ;;  %v1265_v23 = vld [vmem:[%s21578_s18 + $0xeb8] sm:$0xf] }
 0x150   : > { %1264 = vst [vmem:[%s21583_s19 + $0x758] sm:$0xf] %v1263_v22  ;;  %v1267_v24 = vld [vmem:[%s21578_s18 + $0xec0] sm:$0xf]  ;;  %v1269_v25 = vld [vmem:[%s21578_s18 + $0xec8] sm:$0xf] }
 0x151   : > { %1266 = vst [vmem:[%s21583_s19 + $0x75c] sm:$0xf] %v1265_v23  ;;  %1268 = vst [vmem:[%s21583_s19 + $0x760] sm:$0xf] %v1267_v24  ;;  %v1271_v26 = vld [vmem:[%s21578_s18 + $0xed0] sm:$0xf] }
 0x152   : > { %1270 = vst [vmem:[%s21583_s19 + $0x764] sm:$0xf] %v1269_v25  ;;  %v1273_v27 = vld [vmem:[%s21578_s18 + $0xed8] sm:$0xf]  ;;  %v1275_v28 = vld [vmem:[%s21578_s18 + $0xee0] sm:$0xf] }
 0x153   : > { %1272 = vst [vmem:[%s21583_s19 + $0x768] sm:$0xf] %v1271_v26  ;;  %1274 = vst [vmem:[%s21583_s19 + $0x76c] sm:$0xf] %v1273_v27  ;;  %v1277_v29 = vld [vmem:[%s21578_s18 + $0xee8] sm:$0xf] }
 0x154   : > { %1276 = vst [vmem:[%s21583_s19 + $0x770] sm:$0xf] %v1275_v28  ;;  %v1279_v30 = vld [vmem:[%s21578_s18 + $0xef0] sm:$0xf]  ;;  %v1281_v31 = vld [vmem:[%s21578_s18 + $0xef8] sm:$0xf] }
 0x155   : > { %1278 = vst [vmem:[%s21583_s19 + $0x774] sm:$0xf] %v1277_v29  ;;  %1280 = vst [vmem:[%s21583_s19 + $0x778] sm:$0xf] %v1279_v30  ;;  %v1283_v32 = vld [vmem:[%s21578_s18 + $0xf00] sm:$0xf] }
 0x156   : > { %1282 = vst [vmem:[%s21583_s19 + $0x77c] sm:$0xf] %v1281_v31  ;;  %v1285_v33 = vld [vmem:[%s21578_s18 + $0xf08] sm:$0xf]  ;;  %v1287_v34 = vld [vmem:[%s21578_s18 + $0xf10] sm:$0xf] }
 0x157   : > { %1284 = vst [vmem:[%s21583_s19 + $0x780] sm:$0xf] %v1283_v32  ;;  %1286 = vst [vmem:[%s21583_s19 + $0x784] sm:$0xf] %v1285_v33  ;;  %v1289_v35 = vld [vmem:[%s21578_s18 + $0xf18] sm:$0xf] }
 0x158   : > { %1288 = vst [vmem:[%s21583_s19 + $0x788] sm:$0xf] %v1287_v34  ;;  %v1291_v36 = vld [vmem:[%s21578_s18 + $0xf20] sm:$0xf]  ;;  %v1293_v37 = vld [vmem:[%s21578_s18 + $0xf28] sm:$0xf] }
 0x159   : > { %1290 = vst [vmem:[%s21583_s19 + $0x78c] sm:$0xf] %v1289_v35  ;;  %1292 = vst [vmem:[%s21583_s19 + $0x790] sm:$0xf] %v1291_v36  ;;  %v1295_v38 = vld [vmem:[%s21578_s18 + $0xf30] sm:$0xf] }
 0x15a   : > { %1294 = vst [vmem:[%s21583_s19 + $0x794] sm:$0xf] %v1293_v37  ;;  %v1297_v39 = vld [vmem:[%s21578_s18 + $0xf38] sm:$0xf]  ;;  %v1299_v40 = vld [vmem:[%s21578_s18 + $0xf40] sm:$0xf] }
 0x15b   : > { %1296 = vst [vmem:[%s21583_s19 + $0x798] sm:$0xf] %v1295_v38  ;;  %1298 = vst [vmem:[%s21583_s19 + $0x79c] sm:$0xf] %v1297_v39  ;;  %v1301_v41 = vld [vmem:[%s21578_s18 + $0xf48] sm:$0xf] }
 0x15c   : > { %1300 = vst [vmem:[%s21583_s19 + $0x7a0] sm:$0xf] %v1299_v40  ;;  %v1303_v42 = vld [vmem:[%s21578_s18 + $0xf50] sm:$0xf]  ;;  %v1305_v43 = vld [vmem:[%s21578_s18 + $0xf58] sm:$0xf] }
 0x15d   : > { %1302 = vst [vmem:[%s21583_s19 + $0x7a4] sm:$0xf] %v1301_v41  ;;  %1304 = vst [vmem:[%s21583_s19 + $0x7a8] sm:$0xf] %v1303_v42  ;;  %v1307_v44 = vld [vmem:[%s21578_s18 + $0xf60] sm:$0xf] }
 0x15e   : > { %1306 = vst [vmem:[%s21583_s19 + $0x7ac] sm:$0xf] %v1305_v43  ;;  %v1309_v45 = vld [vmem:[%s21578_s18 + $0xf68] sm:$0xf]  ;;  %v1311_v46 = vld [vmem:[%s21578_s18 + $0xf70] sm:$0xf] }
 0x15f   : > { %1308 = vst [vmem:[%s21583_s19 + $0x7b0] sm:$0xf] %v1307_v44  ;;  %1310 = vst [vmem:[%s21583_s19 + $0x7b4] sm:$0xf] %v1309_v45  ;;  %v1313_v47 = vld [vmem:[%s21578_s18 + $0xf78] sm:$0xf] }
 0x160   : > { %1312 = vst [vmem:[%s21583_s19 + $0x7b8] sm:$0xf] %v1311_v46  ;;  %v1315_v48 = vld [vmem:[%s21578_s18 + $0xf80] sm:$0xf]  ;;  %v1317_v49 = vld [vmem:[%s21578_s18 + $0xf88] sm:$0xf] }
 0x161   : > { %1314 = vst [vmem:[%s21583_s19 + $0x7bc] sm:$0xf] %v1313_v47  ;;  %1316 = vst [vmem:[%s21583_s19 + $0x7c0] sm:$0xf] %v1315_v48  ;;  %v1319_v50 = vld [vmem:[%s21578_s18 + $0xf90] sm:$0xf] }
 0x162   : > { %1318 = vst [vmem:[%s21583_s19 + $0x7c4] sm:$0xf] %v1317_v49  ;;  %v1321_v51 = vld [vmem:[%s21578_s18 + $0xf98] sm:$0xf]  ;;  %v1323_v52 = vld [vmem:[%s21578_s18 + $0xfa0] sm:$0xf] }
 0x163   : > { %1320 = vst [vmem:[%s21583_s19 + $0x7c8] sm:$0xf] %v1319_v50  ;;  %1322 = vst [vmem:[%s21583_s19 + $0x7cc] sm:$0xf] %v1321_v51  ;;  %v1325_v53 = vld [vmem:[%s21578_s18 + $0xfa8] sm:$0xf] }
 0x164   : > { %1324 = vst [vmem:[%s21583_s19 + $0x7d0] sm:$0xf] %v1323_v52  ;;  %v1327_v54 = vld [vmem:[%s21578_s18 + $0xfb0] sm:$0xf]  ;;  %v1329_v55 = vld [vmem:[%s21578_s18 + $0xfb8] sm:$0xf] }
 0x165   : > { %1326 = vst [vmem:[%s21583_s19 + $0x7d4] sm:$0xf] %v1325_v53  ;;  %1328 = vst [vmem:[%s21583_s19 + $0x7d8] sm:$0xf] %v1327_v54  ;;  %v1331_v56 = vld [vmem:[%s21578_s18 + $0xfc0] sm:$0xf] }
 0x166   : > { %1330 = vst [vmem:[%s21583_s19 + $0x7dc] sm:$0xf] %v1329_v55  ;;  %v1333_v57 = vld [vmem:[%s21578_s18 + $0xfc8] sm:$0xf]  ;;  %v1335_v58 = vld [vmem:[%s21578_s18 + $0xfd0] sm:$0xf] }
 0x167   : > { %1332 = vst [vmem:[%s21583_s19 + $0x7e0] sm:$0xf] %v1331_v56  ;;  %1334 = vst [vmem:[%s21583_s19 + $0x7e4] sm:$0xf] %v1333_v57  ;;  %v1337_v59 = vld [vmem:[%s21578_s18 + $0xfd8] sm:$0xf] }
 0x168   : > { %1336 = vst [vmem:[%s21583_s19 + $0x7e8] sm:$0xf] %v1335_v58  ;;  %v1339_v60 = vld [vmem:[%s21578_s18 + $0xfe0] sm:$0xf]  ;;  %v1341_v61 = vld [vmem:[%s21578_s18 + $0xfe8] sm:$0xf] }
 0x169   : > { %1338 = vst [vmem:[%s21583_s19 + $0x7ec] sm:$0xf] %v1337_v59  ;;  %1340 = vst [vmem:[%s21583_s19 + $0x7f0] sm:$0xf] %v1339_v60  ;;  %v1343_v62 = vld [vmem:[%s21578_s18 + $0xff0] sm:$0xf] }
 0x16a   : > { %1342 = vst [vmem:[%s21583_s19 + $0x7f4] sm:$0xf] %v1341_v61  ;;  %v1345_v63 = vld [vmem:[%s21578_s18 + $0xff8] sm:$0xf]  ;;  %v1347_v0 = vld [vmem:[%s21578_s18 + $0x1000] sm:$0xf] }
 0x16b   : > { %1344 = vst [vmem:[%s21583_s19 + $0x7f8] sm:$0xf] %v1343_v62  ;;  %1346 = vst [vmem:[%s21583_s19 + $0x7fc] sm:$0xf] %v1345_v63  ;;  %v1349_v1 = vld [vmem:[%s21578_s18 + $0x1008] sm:$0xf] }
 0x16c   : > { %1348 = vst [vmem:[%s21583_s19 + $0x800] sm:$0xf] %v1347_v0  ;;  %v1351_v2 = vld [vmem:[%s21578_s18 + $0x1010] sm:$0xf]  ;;  %v1353_v3 = vld [vmem:[%s21578_s18 + $0x1018] sm:$0xf] }
 0x16d   : > { %1350 = vst [vmem:[%s21583_s19 + $0x804] sm:$0xf] %v1349_v1  ;;  %1352 = vst [vmem:[%s21583_s19 + $0x808] sm:$0xf] %v1351_v2  ;;  %v1355_v4 = vld [vmem:[%s21578_s18 + $0x1020] sm:$0xf] }
 0x16e   : > { %1354 = vst [vmem:[%s21583_s19 + $0x80c] sm:$0xf] %v1353_v3  ;;  %v1357_v5 = vld [vmem:[%s21578_s18 + $0x1028] sm:$0xf]  ;;  %v1359_v6 = vld [vmem:[%s21578_s18 + $0x1030] sm:$0xf] }
 0x16f   : > { %1356 = vst [vmem:[%s21583_s19 + $0x810] sm:$0xf] %v1355_v4  ;;  %1358 = vst [vmem:[%s21583_s19 + $0x814] sm:$0xf] %v1357_v5  ;;  %v1361_v7 = vld [vmem:[%s21578_s18 + $0x1038] sm:$0xf] }
 0x170   : > { %1360 = vst [vmem:[%s21583_s19 + $0x818] sm:$0xf] %v1359_v6  ;;  %v1363_v8 = vld [vmem:[%s21578_s18 + $0x1040] sm:$0xf]  ;;  %v1365_v9 = vld [vmem:[%s21578_s18 + $0x1048] sm:$0xf] }
 0x171   : > { %1362 = vst [vmem:[%s21583_s19 + $0x81c] sm:$0xf] %v1361_v7  ;;  %1364 = vst [vmem:[%s21583_s19 + $0x820] sm:$0xf] %v1363_v8  ;;  %v1367_v10 = vld [vmem:[%s21578_s18 + $0x1050] sm:$0xf] }
 0x172   : > { %1366 = vst [vmem:[%s21583_s19 + $0x824] sm:$0xf] %v1365_v9  ;;  %v1369_v11 = vld [vmem:[%s21578_s18 + $0x1058] sm:$0xf]  ;;  %v1371_v12 = vld [vmem:[%s21578_s18 + $0x1060] sm:$0xf] }
 0x173   : > { %1368 = vst [vmem:[%s21583_s19 + $0x828] sm:$0xf] %v1367_v10  ;;  %1370 = vst [vmem:[%s21583_s19 + $0x82c] sm:$0xf] %v1369_v11  ;;  %v1373_v13 = vld [vmem:[%s21578_s18 + $0x1068] sm:$0xf] }
 0x174   : > { %1372 = vst [vmem:[%s21583_s19 + $0x830] sm:$0xf] %v1371_v12  ;;  %v1375_v14 = vld [vmem:[%s21578_s18 + $0x1070] sm:$0xf]  ;;  %v1377_v15 = vld [vmem:[%s21578_s18 + $0x1078] sm:$0xf] }
 0x175   : > { %1374 = vst [vmem:[%s21583_s19 + $0x834] sm:$0xf] %v1373_v13  ;;  %1376 = vst [vmem:[%s21583_s19 + $0x838] sm:$0xf] %v1375_v14  ;;  %v1379_v16 = vld [vmem:[%s21578_s18 + $0x1080] sm:$0xf] }
 0x176   : > { %1378 = vst [vmem:[%s21583_s19 + $0x83c] sm:$0xf] %v1377_v15  ;;  %v1381_v17 = vld [vmem:[%s21578_s18 + $0x1088] sm:$0xf]  ;;  %v1383_v18 = vld [vmem:[%s21578_s18 + $0x1090] sm:$0xf] }
 0x177   : > { %1380 = vst [vmem:[%s21583_s19 + $0x840] sm:$0xf] %v1379_v16  ;;  %1382 = vst [vmem:[%s21583_s19 + $0x844] sm:$0xf] %v1381_v17  ;;  %v1385_v19 = vld [vmem:[%s21578_s18 + $0x1098] sm:$0xf] }
 0x178   : > { %1384 = vst [vmem:[%s21583_s19 + $0x848] sm:$0xf] %v1383_v18  ;;  %v1387_v20 = vld [vmem:[%s21578_s18 + $0x10a0] sm:$0xf]  ;;  %v1389_v21 = vld [vmem:[%s21578_s18 + $0x10a8] sm:$0xf] }
 0x179   : > { %1386 = vst [vmem:[%s21583_s19 + $0x84c] sm:$0xf] %v1385_v19  ;;  %1388 = vst [vmem:[%s21583_s19 + $0x850] sm:$0xf] %v1387_v20  ;;  %v1391_v22 = vld [vmem:[%s21578_s18 + $0x10b0] sm:$0xf] }
 0x17a   : > { %1390 = vst [vmem:[%s21583_s19 + $0x854] sm:$0xf] %v1389_v21  ;;  %v1393_v23 = vld [vmem:[%s21578_s18 + $0x10b8] sm:$0xf]  ;;  %v1395_v24 = vld [vmem:[%s21578_s18 + $0x10c0] sm:$0xf] }
 0x17b   : > { %1392 = vst [vmem:[%s21583_s19 + $0x858] sm:$0xf] %v1391_v22  ;;  %1394 = vst [vmem:[%s21583_s19 + $0x85c] sm:$0xf] %v1393_v23  ;;  %v1397_v25 = vld [vmem:[%s21578_s18 + $0x10c8] sm:$0xf] }
 0x17c   : > { %1396 = vst [vmem:[%s21583_s19 + $0x860] sm:$0xf] %v1395_v24  ;;  %v1399_v26 = vld [vmem:[%s21578_s18 + $0x10d0] sm:$0xf]  ;;  %v1401_v27 = vld [vmem:[%s21578_s18 + $0x10d8] sm:$0xf] }
 0x17d   : > { %1398 = vst [vmem:[%s21583_s19 + $0x864] sm:$0xf] %v1397_v25  ;;  %1400 = vst [vmem:[%s21583_s19 + $0x868] sm:$0xf] %v1399_v26  ;;  %v1403_v28 = vld [vmem:[%s21578_s18 + $0x10e0] sm:$0xf] }
 0x17e   : > { %1402 = vst [vmem:[%s21583_s19 + $0x86c] sm:$0xf] %v1401_v27  ;;  %v1405_v29 = vld [vmem:[%s21578_s18 + $0x10e8] sm:$0xf]  ;;  %v1407_v30 = vld [vmem:[%s21578_s18 + $0x10f0] sm:$0xf] }
 0x17f   : > { %1404 = vst [vmem:[%s21583_s19 + $0x870] sm:$0xf] %v1403_v28  ;;  %1406 = vst [vmem:[%s21583_s19 + $0x874] sm:$0xf] %v1405_v29  ;;  %v1409_v31 = vld [vmem:[%s21578_s18 + $0x10f8] sm:$0xf] }
 0x180   : > { %1408 = vst [vmem:[%s21583_s19 + $0x878] sm:$0xf] %v1407_v30  ;;  %v1411_v32 = vld [vmem:[%s21578_s18 + $0x1100] sm:$0xf]  ;;  %v1413_v33 = vld [vmem:[%s21578_s18 + $0x1108] sm:$0xf] }
 0x181   : > { %1410 = vst [vmem:[%s21583_s19 + $0x87c] sm:$0xf] %v1409_v31  ;;  %1412 = vst [vmem:[%s21583_s19 + $0x880] sm:$0xf] %v1411_v32  ;;  %v1415_v34 = vld [vmem:[%s21578_s18 + $0x1110] sm:$0xf] }
 0x182   : > { %1414 = vst [vmem:[%s21583_s19 + $0x884] sm:$0xf] %v1413_v33  ;;  %v1417_v35 = vld [vmem:[%s21578_s18 + $0x1118] sm:$0xf]  ;;  %v1419_v36 = vld [vmem:[%s21578_s18 + $0x1120] sm:$0xf] }
 0x183   : > { %1416 = vst [vmem:[%s21583_s19 + $0x888] sm:$0xf] %v1415_v34  ;;  %1418 = vst [vmem:[%s21583_s19 + $0x88c] sm:$0xf] %v1417_v35  ;;  %v1421_v37 = vld [vmem:[%s21578_s18 + $0x1128] sm:$0xf] }
 0x184   : > { %1420 = vst [vmem:[%s21583_s19 + $0x890] sm:$0xf] %v1419_v36  ;;  %v1423_v38 = vld [vmem:[%s21578_s18 + $0x1130] sm:$0xf]  ;;  %v1425_v39 = vld [vmem:[%s21578_s18 + $0x1138] sm:$0xf] }
 0x185   : > { %1422 = vst [vmem:[%s21583_s19 + $0x894] sm:$0xf] %v1421_v37  ;;  %1424 = vst [vmem:[%s21583_s19 + $0x898] sm:$0xf] %v1423_v38  ;;  %v1427_v40 = vld [vmem:[%s21578_s18 + $0x1140] sm:$0xf] }
 0x186   : > { %1426 = vst [vmem:[%s21583_s19 + $0x89c] sm:$0xf] %v1425_v39  ;;  %v1429_v41 = vld [vmem:[%s21578_s18 + $0x1148] sm:$0xf]  ;;  %v1431_v42 = vld [vmem:[%s21578_s18 + $0x1150] sm:$0xf] }
 0x187   : > { %1428 = vst [vmem:[%s21583_s19 + $0x8a0] sm:$0xf] %v1427_v40  ;;  %1430 = vst [vmem:[%s21583_s19 + $0x8a4] sm:$0xf] %v1429_v41  ;;  %v1433_v43 = vld [vmem:[%s21578_s18 + $0x1158] sm:$0xf] }
 0x188   : > { %1432 = vst [vmem:[%s21583_s19 + $0x8a8] sm:$0xf] %v1431_v42  ;;  %v1435_v44 = vld [vmem:[%s21578_s18 + $0x1160] sm:$0xf]  ;;  %v1437_v45 = vld [vmem:[%s21578_s18 + $0x1168] sm:$0xf] }
 0x189   : > { %1434 = vst [vmem:[%s21583_s19 + $0x8ac] sm:$0xf] %v1433_v43  ;;  %1436 = vst [vmem:[%s21583_s19 + $0x8b0] sm:$0xf] %v1435_v44  ;;  %v1439_v46 = vld [vmem:[%s21578_s18 + $0x1170] sm:$0xf] }
 0x18a   : > { %1438 = vst [vmem:[%s21583_s19 + $0x8b4] sm:$0xf] %v1437_v45  ;;  %v1441_v47 = vld [vmem:[%s21578_s18 + $0x1178] sm:$0xf]  ;;  %v1443_v48 = vld [vmem:[%s21578_s18 + $0x1180] sm:$0xf] }
 0x18b   : > { %1440 = vst [vmem:[%s21583_s19 + $0x8b8] sm:$0xf] %v1439_v46  ;;  %1442 = vst [vmem:[%s21583_s19 + $0x8bc] sm:$0xf] %v1441_v47  ;;  %v1445_v49 = vld [vmem:[%s21578_s18 + $0x1188] sm:$0xf] }
 0x18c   : > { %1444 = vst [vmem:[%s21583_s19 + $0x8c0] sm:$0xf] %v1443_v48  ;;  %v1447_v50 = vld [vmem:[%s21578_s18 + $0x1190] sm:$0xf]  ;;  %v1449_v51 = vld [vmem:[%s21578_s18 + $0x1198] sm:$0xf] }
 0x18d   : > { %1446 = vst [vmem:[%s21583_s19 + $0x8c4] sm:$0xf] %v1445_v49  ;;  %1448 = vst [vmem:[%s21583_s19 + $0x8c8] sm:$0xf] %v1447_v50  ;;  %v1451_v52 = vld [vmem:[%s21578_s18 + $0x11a0] sm:$0xf] }
 0x18e   : > { %1450 = vst [vmem:[%s21583_s19 + $0x8cc] sm:$0xf] %v1449_v51  ;;  %v1453_v53 = vld [vmem:[%s21578_s18 + $0x11a8] sm:$0xf]  ;;  %v1455_v54 = vld [vmem:[%s21578_s18 + $0x11b0] sm:$0xf] }
 0x18f   : > { %1452 = vst [vmem:[%s21583_s19 + $0x8d0] sm:$0xf] %v1451_v52  ;;  %1454 = vst [vmem:[%s21583_s19 + $0x8d4] sm:$0xf] %v1453_v53  ;;  %v1457_v55 = vld [vmem:[%s21578_s18 + $0x11b8] sm:$0xf] }
 0x190   : > { %1456 = vst [vmem:[%s21583_s19 + $0x8d8] sm:$0xf] %v1455_v54  ;;  %v1459_v56 = vld [vmem:[%s21578_s18 + $0x11c0] sm:$0xf]  ;;  %v1461_v57 = vld [vmem:[%s21578_s18 + $0x11c8] sm:$0xf] }
 0x191   : > { %1458 = vst [vmem:[%s21583_s19 + $0x8dc] sm:$0xf] %v1457_v55  ;;  %1460 = vst [vmem:[%s21583_s19 + $0x8e0] sm:$0xf] %v1459_v56  ;;  %v1463_v58 = vld [vmem:[%s21578_s18 + $0x11d0] sm:$0xf] }
 0x192   : > { %1462 = vst [vmem:[%s21583_s19 + $0x8e4] sm:$0xf] %v1461_v57  ;;  %v1465_v59 = vld [vmem:[%s21578_s18 + $0x11d8] sm:$0xf]  ;;  %v1467_v60 = vld [vmem:[%s21578_s18 + $0x11e0] sm:$0xf] }
 0x193   : > { %1464 = vst [vmem:[%s21583_s19 + $0x8e8] sm:$0xf] %v1463_v58  ;;  %1466 = vst [vmem:[%s21583_s19 + $0x8ec] sm:$0xf] %v1465_v59  ;;  %v1469_v61 = vld [vmem:[%s21578_s18 + $0x11e8] sm:$0xf] }
 0x194   : > { %1468 = vst [vmem:[%s21583_s19 + $0x8f0] sm:$0xf] %v1467_v60  ;;  %v1471_v62 = vld [vmem:[%s21578_s18 + $0x11f0] sm:$0xf]  ;;  %v1473_v63 = vld [vmem:[%s21578_s18 + $0x11f8] sm:$0xf] }
 0x195   : > { %1470 = vst [vmem:[%s21583_s19 + $0x8f4] sm:$0xf] %v1469_v61  ;;  %1472 = vst [vmem:[%s21583_s19 + $0x8f8] sm:$0xf] %v1471_v62  ;;  %v1475_v0 = vld [vmem:[%s21578_s18 + $0x1200] sm:$0xf] }
 0x196   : > { %1474 = vst [vmem:[%s21583_s19 + $0x8fc] sm:$0xf] %v1473_v63  ;;  %v1477_v1 = vld [vmem:[%s21578_s18 + $0x1208] sm:$0xf]  ;;  %v1479_v2 = vld [vmem:[%s21578_s18 + $0x1210] sm:$0xf] }
 0x197   : > { %1476 = vst [vmem:[%s21583_s19 + $0x900] sm:$0xf] %v1475_v0  ;;  %1478 = vst [vmem:[%s21583_s19 + $0x904] sm:$0xf] %v1477_v1  ;;  %v1481_v3 = vld [vmem:[%s21578_s18 + $0x1218] sm:$0xf] }
 0x198   : > { %1480 = vst [vmem:[%s21583_s19 + $0x908] sm:$0xf] %v1479_v2  ;;  %v1483_v4 = vld [vmem:[%s21578_s18 + $0x1220] sm:$0xf]  ;;  %v1485_v5 = vld [vmem:[%s21578_s18 + $0x1228] sm:$0xf] }
 0x199   : > { %1482 = vst [vmem:[%s21583_s19 + $0x90c] sm:$0xf] %v1481_v3  ;;  %1484 = vst [vmem:[%s21583_s19 + $0x910] sm:$0xf] %v1483_v4  ;;  %v1487_v6 = vld [vmem:[%s21578_s18 + $0x1230] sm:$0xf] }
 0x19a   : > { %1486 = vst [vmem:[%s21583_s19 + $0x914] sm:$0xf] %v1485_v5  ;;  %v1489_v7 = vld [vmem:[%s21578_s18 + $0x1238] sm:$0xf]  ;;  %v1491_v8 = vld [vmem:[%s21578_s18 + $0x1240] sm:$0xf] }
 0x19b   : > { %1488 = vst [vmem:[%s21583_s19 + $0x918] sm:$0xf] %v1487_v6  ;;  %1490 = vst [vmem:[%s21583_s19 + $0x91c] sm:$0xf] %v1489_v7  ;;  %v1493_v9 = vld [vmem:[%s21578_s18 + $0x1248] sm:$0xf] }
 0x19c   : > { %1492 = vst [vmem:[%s21583_s19 + $0x920] sm:$0xf] %v1491_v8  ;;  %v1495_v10 = vld [vmem:[%s21578_s18 + $0x1250] sm:$0xf]  ;;  %v1497_v11 = vld [vmem:[%s21578_s18 + $0x1258] sm:$0xf] }
 0x19d   : > { %1494 = vst [vmem:[%s21583_s19 + $0x924] sm:$0xf] %v1493_v9  ;;  %1496 = vst [vmem:[%s21583_s19 + $0x928] sm:$0xf] %v1495_v10  ;;  %v1499_v12 = vld [vmem:[%s21578_s18 + $0x1260] sm:$0xf] }
 0x19e   : > { %1498 = vst [vmem:[%s21583_s19 + $0x92c] sm:$0xf] %v1497_v11  ;;  %v1501_v13 = vld [vmem:[%s21578_s18 + $0x1268] sm:$0xf]  ;;  %v1503_v14 = vld [vmem:[%s21578_s18 + $0x1270] sm:$0xf] }
 0x19f   : > { %1500 = vst [vmem:[%s21583_s19 + $0x930] sm:$0xf] %v1499_v12  ;;  %1502 = vst [vmem:[%s21583_s19 + $0x934] sm:$0xf] %v1501_v13  ;;  %v1505_v15 = vld [vmem:[%s21578_s18 + $0x1278] sm:$0xf] }
 0x1a0   : > { %1504 = vst [vmem:[%s21583_s19 + $0x938] sm:$0xf] %v1503_v14  ;;  %v1507_v16 = vld [vmem:[%s21578_s18 + $0x1280] sm:$0xf]  ;;  %v1509_v17 = vld [vmem:[%s21578_s18 + $0x1288] sm:$0xf] }
 0x1a1   : > { %1506 = vst [vmem:[%s21583_s19 + $0x93c] sm:$0xf] %v1505_v15  ;;  %1508 = vst [vmem:[%s21583_s19 + $0x940] sm:$0xf] %v1507_v16  ;;  %v1511_v18 = vld [vmem:[%s21578_s18 + $0x1290] sm:$0xf] }
 0x1a2   : > { %1510 = vst [vmem:[%s21583_s19 + $0x944] sm:$0xf] %v1509_v17  ;;  %v1513_v19 = vld [vmem:[%s21578_s18 + $0x1298] sm:$0xf]  ;;  %v1515_v20 = vld [vmem:[%s21578_s18 + $0x12a0] sm:$0xf] }
 0x1a3   : > { %1512 = vst [vmem:[%s21583_s19 + $0x948] sm:$0xf] %v1511_v18  ;;  %1514 = vst [vmem:[%s21583_s19 + $0x94c] sm:$0xf] %v1513_v19  ;;  %v1517_v21 = vld [vmem:[%s21578_s18 + $0x12a8] sm:$0xf] }
 0x1a4   : > { %1516 = vst [vmem:[%s21583_s19 + $0x950] sm:$0xf] %v1515_v20  ;;  %v1519_v22 = vld [vmem:[%s21578_s18 + $0x12b0] sm:$0xf]  ;;  %v1521_v23 = vld [vmem:[%s21578_s18 + $0x12b8] sm:$0xf] }
 0x1a5   : > { %1518 = vst [vmem:[%s21583_s19 + $0x954] sm:$0xf] %v1517_v21  ;;  %1520 = vst [vmem:[%s21583_s19 + $0x958] sm:$0xf] %v1519_v22  ;;  %v1523_v24 = vld [vmem:[%s21578_s18 + $0x12c0] sm:$0xf] }
 0x1a6   : > { %1522 = vst [vmem:[%s21583_s19 + $0x95c] sm:$0xf] %v1521_v23  ;;  %v1525_v25 = vld [vmem:[%s21578_s18 + $0x12c8] sm:$0xf]  ;;  %v1527_v26 = vld [vmem:[%s21578_s18 + $0x12d0] sm:$0xf] }
 0x1a7   : > { %1524 = vst [vmem:[%s21583_s19 + $0x960] sm:$0xf] %v1523_v24  ;;  %1526 = vst [vmem:[%s21583_s19 + $0x964] sm:$0xf] %v1525_v25  ;;  %v1529_v27 = vld [vmem:[%s21578_s18 + $0x12d8] sm:$0xf] }
 0x1a8   : > { %1528 = vst [vmem:[%s21583_s19 + $0x968] sm:$0xf] %v1527_v26  ;;  %v1531_v28 = vld [vmem:[%s21578_s18 + $0x12e0] sm:$0xf]  ;;  %v1533_v29 = vld [vmem:[%s21578_s18 + $0x12e8] sm:$0xf] }
 0x1a9   : > { %1530 = vst [vmem:[%s21583_s19 + $0x96c] sm:$0xf] %v1529_v27  ;;  %1532 = vst [vmem:[%s21583_s19 + $0x970] sm:$0xf] %v1531_v28  ;;  %v1535_v30 = vld [vmem:[%s21578_s18 + $0x12f0] sm:$0xf] }
 0x1aa   : > { %1534 = vst [vmem:[%s21583_s19 + $0x974] sm:$0xf] %v1533_v29  ;;  %v1537_v31 = vld [vmem:[%s21578_s18 + $0x12f8] sm:$0xf]  ;;  %v1539_v32 = vld [vmem:[%s21578_s18 + $0x1300] sm:$0xf] }
 0x1ab   : > { %1536 = vst [vmem:[%s21583_s19 + $0x978] sm:$0xf] %v1535_v30  ;;  %1538 = vst [vmem:[%s21583_s19 + $0x97c] sm:$0xf] %v1537_v31  ;;  %v1541_v33 = vld [vmem:[%s21578_s18 + $0x1308] sm:$0xf] }
 0x1ac   : > { %1540 = vst [vmem:[%s21583_s19 + $0x980] sm:$0xf] %v1539_v32  ;;  %v1543_v34 = vld [vmem:[%s21578_s18 + $0x1310] sm:$0xf]  ;;  %v1545_v35 = vld [vmem:[%s21578_s18 + $0x1318] sm:$0xf] }
 0x1ad   : > { %1542 = vst [vmem:[%s21583_s19 + $0x984] sm:$0xf] %v1541_v33  ;;  %1544 = vst [vmem:[%s21583_s19 + $0x988] sm:$0xf] %v1543_v34  ;;  %v1547_v36 = vld [vmem:[%s21578_s18 + $0x1320] sm:$0xf] }
 0x1ae   : > { %1546 = vst [vmem:[%s21583_s19 + $0x98c] sm:$0xf] %v1545_v35  ;;  %v1549_v37 = vld [vmem:[%s21578_s18 + $0x1328] sm:$0xf]  ;;  %v1551_v38 = vld [vmem:[%s21578_s18 + $0x1330] sm:$0xf] }
 0x1af   : > { %1548 = vst [vmem:[%s21583_s19 + $0x990] sm:$0xf] %v1547_v36  ;;  %1550 = vst [vmem:[%s21583_s19 + $0x994] sm:$0xf] %v1549_v37  ;;  %v1553_v39 = vld [vmem:[%s21578_s18 + $0x1338] sm:$0xf] }
 0x1b0   : > { %1552 = vst [vmem:[%s21583_s19 + $0x998] sm:$0xf] %v1551_v38  ;;  %1554 = vst [vmem:[%s21583_s19 + $0x99c] sm:$0xf] %v1553_v39 }
 0x1b1 PF: > { %p16527_p7 = scmp.ge.s32.totalorder %s21465_s15, 1  ;;  %p5311_p8 = scmp.lt.s32.totalorder %s21465_s15, 5 }
 0x1b3   : > { %p5312_p9 = pnand %p16527_p7, %p5311_p8 }
 0x1b4   : > { %s5318_s20 = sand.u32 (!%p5312_p9), 1, %s21441_s30   ;;  %p5362_p10 = scmp.lt.s32.totalorder (!%p5312_p9), %s21453_s12, 1 }
 0x1b5   : > { %5315 = sbr.rel (%p5312_p9) target bundleno = 3218 (0xc92), region = 104  ;;  %s16530_s23 = sshll.u32 (!%p5312_p9), %s21449_s11, 4 }
 0x1b6   : > { %s19971_s21 = smul.u32 (!%p5312_p9), 2464, %s5318_s20  ;;  %p5370_p11 = scmp.lt.s32.totalorder (!%p5312_p9), %s16530_s23, 31 }
 0x1b8   : > { %s22823_s27 = scalar_lea.vmem (!%p5312_p9), [#allocation2], %s19971_s21 }
 0x1ba   : > { %v20065_v40 = vld [vmem:[%s26704_s2 + $0x4] ss:$156 sps:$4 sm:$0xff]   ;;  %v21467_v41 = vmov 0   ;;  %v20068_v42 = vld [vmem:[%s26704_s2 + $0xc] ss:$156 sps:$4 sm:$0xff]   ;;  %v20031_v43 = vld [vmem:[%s22823_s27 + $0x78] sm:$0xff]  }
 0x1bb   : > { %20029 = vset.pattern.permute.xlu0 %v21467_v41  ;;  %20030 = vset.pattern.permute.xlu1 %v21467_v41  ;;  %v20032_v44 = vld [vmem:[%s22823_s27 + $0xf8] sm:$0xff]   ;;  %v20035_v47 = vld [vmem:[%s22823_s27 + $0x70] sm:$0xff]   ;;  %v20039_v51 = vld [vmem:[%s22823_s27 + $0x68] sm:$0xff]   ;;  %s26725_s12 = smov (!%p5362_p10, %s21453_s12), 1  ;;  %vm11794_vm0 = vcmask 523264   ;;  %s26727_s23 = smov (!%p5370_p11, %s16530_s23), 31 }
 0x1bc   : > { %11875 = vmatprep.mubr.bf16.mxu0 %v20065_v40  ;;  %12036 = vmatprep.mubr.bf16.mxu1 %v20068_v42  ;;  %v20033_v45 = vld [vmem:[%s22823_s27 + $0x38] sm:$0xff]   ;;  %v20036_v48 = vld [vmem:[%s22823_s27 + $0xf0] sm:$0xff]   ;;  %v20040_v52 = vld [vmem:[%s22823_s27 + $0xe8] sm:$0xff]   ;;  %s17540_s30 = sshll.u32 %s26725_s12, 8  ;;  %s16531_s24 = sshll.u32 %s26725_s12, 5  ;;  %vm16393_vm1 = vcmask 408576  }
 0x1bd   : > { %17541 = vmatprep.subr.bf16.mxu0 %v20031_v43  ;;  %17653 = vmatprep.subr.bf16.mxu1 %v20032_v44  ;;  %v20034_v46 = vld [vmem:[%s22823_s27 + $0xb8] sm:$0xff]   ;;  %v20037_v49 = vld [vmem:[%s22823_s27 + $0x30] sm:$0xff]   ;;  %v20041_v53 = vld [vmem:[%s22823_s27 + $0x28] sm:$0xff]   ;;  %s22867_s20 = scalar_lea.vmem %s26703_s1, %s17540_s30 }
 0x1be   : > { %17542 = vmatpush3.bf16.msra.mxu0 %v20033_v45  ;;  %17654 = vmatpush3.bf16.msra.mxu1 %v20034_v46  ;;  %v20038_v50 = vld [vmem:[%s22823_s27 + $0xb0] sm:$0xff]   ;;  %v20042_v54 = vld [vmem:[%s22823_s27 + $0xa8] sm:$0xff]   ;;  %v20043_v55 = vld [vmem:[%s22823_s27 + $0x60] sm:$0xff]  }
 0x1bf   : > { %17543 = vmatprep.subr.bf16.mxu0 %v20035_v47  ;;  %17655 = vmatprep.subr.bf16.mxu1 %v20036_v48  ;;  %v20044_v56 = vld [vmem:[%s22823_s27 + $0xe0] sm:$0xff]   ;;  %v20047_v59 = vld [vmem:[%s22823_s27 + $0x58] sm:$0xff]   ;;  %v20051_v63 = vld [vmem:[%s22823_s27 + $0x50] sm:$0xff]  }
 0x1c0   : > { %v20045_v57 = vld [vmem:[%s22823_s27 + $0x20] sm:$0xff]   ;;  %v20048_v60 = vld [vmem:[%s22823_s27 + $0xd8] sm:$0xff]   ;;  %v20052_v0 = vld [vmem:[%s22823_s27 + $0xd0] sm:$0xff]  }
 0x1c1   : > { %v20046_v58 = vld [vmem:[%s22823_s27 + $0xa0] sm:$0xff]   ;;  %v20049_v61 = vld [vmem:[%s22823_s27 + $0x18] sm:$0xff]   ;;  %v20053_v1 = vld [vmem:[%s22823_s27 + $0x10] sm:$0xff]  }
 0x1c2   : > { %17544 = vmatpush3.bf16.msra.mxu0 %v20037_v49  ;;  %17656 = vmatpush3.bf16.msra.mxu1 %v20038_v50  ;;  %v20050_v62 = vld [vmem:[%s22823_s27 + $0x98] sm:$0xff]   ;;  %v20054_v2 = vld [vmem:[%s22823_s27 + $0x90] sm:$0xff]   ;;  %v20055_v3 = vld [vmem:[%s22823_s27 + $0x48] sm:$0xff]  }
 0x1c3   : > { %17545 = vmatprep.subr.bf16.mxu0 %v20039_v51  ;;  %17657 = vmatprep.subr.bf16.mxu1 %v20040_v52  ;;  %v20056_v4 = vld [vmem:[%s22823_s27 + $0xc8] sm:$0xff]   ;;  %v20059_v7 = vld [vmem:[%s22823_s27 + $0x40] sm:$0xff]   ;;  %v20069_v13 = vld [vmem:[%s26704_s2 + $0x13c] ss:$156 sps:$4 sm:$0xff]  }
 0x1c4   : > { %v20057_v5 = vld [vmem:[%s22823_s27 + $0x8] sm:$0xff]   ;;  %v20060_v8 = vld [vmem:[%s22823_s27 + $0xc0] sm:$0xff]   ;;  %v6664_v15 = vld [vmem:[%s22867_s20 + $0xf0] sm:$0xff] }
 0x1c5   : > { %v20058_v6 = vld [vmem:[%s22823_s27 + $0x88] sm:$0xff]   ;;  %v20063_v9 = vld [vmem:[%s26704_s2] ss:$156 sps:$4 sm:$0xff]   ;;  %6818 = vperm.xlu0 %20029, %v6664_v15   ;;  %v6648_v17 = vld [vmem:[%s22867_s20 + $0x70] sm:$0xff] }
 0x1c6   : > { %17546 = vmatpush3.bf16.msra.mxu0 %v20041_v53  ;;  %17658 = vmatpush3.bf16.msra.mxu1 %v20042_v54  ;;  %v20061_v10 = vld [vmem:[%s22823_s27] sm:$0xff]   ;;  %v6665_v16 = vld [vmem:[%s22867_s20 + $0xf8] sm:$0xff]  ;;  %v20075_v22 = vld [vmem:[%s26704_s2 + $0x274] ss:$156 sps:$4 sm:$0xff]  }
 0x1c7   : > { %17547 = vmatprep.subr.bf16.mxu0 %v20043_v55  ;;  %17659 = vmatprep.subr.bf16.mxu1 %v20044_v56  ;;  %v20062_v11 = vld [vmem:[%s22823_s27 + $0x80] sm:$0xff]   ;;  %v6649_v18 = vld [vmem:[%s22867_s20 + $0x78] sm:$0xff]  ;;  %v6663_v24 = vld [vmem:[%s22867_s20 + $0xe8] sm:$0xff] }
 0x1c8   : > { %v20066_v12 = vld [vmem:[%s26704_s2 + $0x8] ss:$156 sps:$4 sm:$0xff]   ;;  %6738 = vperm.xlu1 %20030, %v6648_v17   ;;  %v20073_v19 = vld [vmem:[%s26704_s2 + $0x138] ss:$156 sps:$4 sm:$0xff]   ;;  %v20074_v21 = vld [vmem:[%s26704_s2 + $0x140] ss:$156 sps:$4 sm:$0xff]  }
 0x1c9   : > { %v20071_v14 = vld [vmem:[%s26704_s2 + $0x144] ss:$156 sps:$4 sm:$0xff]   ;;  %6823 = vperm.xlu0 %20029, %v6665_v16   ;;  %v20077_v23 = vld [vmem:[%s26704_s2 + $0x27c] ss:$156 sps:$4 sm:$0xff]   ;;  %v6647_v26 = vld [vmem:[%s22867_s20 + $0x68] sm:$0xff] }
 0x1ca   : > { %17548 = vmatpush3.bf16.msra.mxu0 %v20045_v57  ;;  %17660 = vmatpush3.bf16.msra.mxu1 %v20046_v58  ;;  %v6662_v20 = vld [vmem:[%s22867_s20 + $0xe0] sm:$0xff]  ;;  %v20079_v27 = vld [vmem:[%s26704_s2 + $0x270] ss:$156 sps:$4 sm:$0xff]   ;;  %v20080_v29 = vld [vmem:[%s26704_s2 + $0x278] ss:$156 sps:$4 sm:$0xff]  }
 0x1cb   : > { %17549 = vmatprep.subr.bf16.mxu0 %v20047_v59  ;;  %17661 = vmatprep.subr.bf16.mxu1 %v20048_v60  ;;  %v6646_v25 = vld [vmem:[%s22867_s20 + $0x60] sm:$0xff]  ;;  %v6660_v28 = vld [vmem:[%s22867_s20 + $0xd0] sm:$0xff]  ;;  %v20081_v30 = vld [vmem:[%s26704_s2 + $0x3ac] ss:$156 sps:$4 sm:$0xff]  }
 0x1cc   : > { %6743 = vperm.xlu1 %20030, %v6649_v18   ;;  %v20083_v31 = vld [vmem:[%s26704_s2 + $0x3b4] ss:$156 sps:$4 sm:$0xff]   ;;  %v6661_v32 = vld [vmem:[%s22867_s20 + $0xd8] sm:$0xff]  ;;  %v20085_v35 = vld [vmem:[%s26704_s2 + $0x3a8] ss:$156 sps:$4 sm:$0xff]  }
 0x1cd   : > { %6808 = vperm.xlu0 %20029, %v6662_v20   ;;  %v6644_v33 = vld [vmem:[%s22867_s20 + $0x50] sm:$0xff]  ;;  %v6645_v34 = vld [vmem:[%s22867_s20 + $0x58] sm:$0xff]  ;;  %v6658_v36 = vld [vmem:[%s22867_s20 + $0xc0] sm:$0xff] }
 0x1ce   : > { %17550 = vmatpush3.bf16.msra.mxu0 %v20049_v61  ;;  %17662 = vmatpush3.bf16.msra.mxu1 %v20050_v62  ;;  %v20086_v37 = vld [vmem:[%s26704_s2 + $0x3b0] ss:$156 sps:$4 sm:$0xff]   ;;  %v20087_v38 = vld [vmem:[%s26704_s2 + $0x4e4] ss:$156 sps:$4 sm:$0xff]   ;;  %v20093_v46 = vld [vmem:[%s26704_s2 + $0x61c] ss:$156 sps:$4 sm:$0xff]  }
 0x1cf   : > { %17551 = vmatprep.subr.bf16.mxu0 %v20051_v63  ;;  %17663 = vmatprep.subr.bf16.mxu1 %v20052_v0  ;;  %v20089_v39 = vld [vmem:[%s26704_s2 + $0x4ec] ss:$156 sps:$4 sm:$0xff]   ;;  %v6642_v41 = vld [vmem:[%s22867_s20 + $0x40] sm:$0xff]  ;;  %v6656_v44 = vld [vmem:[%s22867_s20 + $0xb0] sm:$0xff] }
 0x1d0   : > { %6813 = vperm.xlu1 %20030, %v6663_v24   ;;  %v6659_v40 = vld [vmem:[%s22867_s20 + $0xc8] sm:$0xff]  ;;  %v20091_v43 = vld [vmem:[%s26704_s2 + $0x4e0] ss:$156 sps:$4 sm:$0xff]   ;;  %v6640_v49 = vld [vmem:[%s22867_s20 + $0x30] sm:$0xff] }
 0x1d1   : > { %6728 = vperm.xlu0 %20029, %v6646_v25   ;;  %v6643_v42 = vld [vmem:[%s22867_s20 + $0x48] sm:$0xff]  ;;  %v20095_v47 = vld [vmem:[%s26704_s2 + $0x624] ss:$156 sps:$4 sm:$0xff]   ;;  %v6657_v48 = vld [vmem:[%s22867_s20 + $0xb8] sm:$0xff] }
 0x1d2   : > { %17552 = vmatpush3.bf16.msra.mxu0 %v20053_v1  ;;  %17664 = vmatpush3.bf16.msra.mxu1 %v20054_v2  ;;  %v20092_v45 = vld [vmem:[%s26704_s2 + $0x4e8] ss:$156 sps:$4 sm:$0xff]   ;;  %v20129_v50 = vld [vmem:[%s22823_s27 + $0x178] sm:$0xff]   ;;  %v20099_v56 = vld [vmem:[%s26704_s2 + $0x754] ss:$156 sps:$4 sm:$0xff]  }
 0x1d3   : > { %17553 = vmatprep.subr.bf16.mxu0 %v20055_v3  ;;  %17665 = vmatprep.subr.bf16.mxu1 %v20056_v4  ;;  %v20097_v51 = vld [vmem:[%s26704_s2 + $0x618] ss:$156 sps:$4 sm:$0xff]   ;;  %v6654_v54 = vld [vmem:[%s22867_s20 + $0xa0] sm:$0xff]  ;;  %v6655_v58 = vld [vmem:[%s22867_s20 + $0xa8] sm:$0xff] }
 0x1d4   : > { %6733 = vperm.xlu1 %20030, %v6647_v26   ;;  %v20130_v52 = vld [vmem:[%s22823_s27 + $0x138] sm:$0xff]   ;;  %v6638_v59 = vld [vmem:[%s22867_s20 + $0x20] sm:$0xff]  ;;  %v6639_v60 = vld [vmem:[%s22867_s20 + $0x28] sm:$0xff] }
 0x1d5   : > { %6798 = vperm.xlu0 %20029, %v6660_v28   ;;  %v6641_v53 = vld [vmem:[%s22867_s20 + $0x38] sm:$0xff]  ;;  %v20143_v61 = vld [vmem:[%s22823_s27 + $0x170] sm:$0xff]   ;;  %v20105_v2 = vld [vmem:[%s26704_s2 + $0x88c] ss:$156 sps:$4 sm:$0xff]  }
 0x1d6   : > { %17554 = vmatpush3.bf16.msra.mxu0 %v20057_v5  ;;  %17666 = vmatpush3.bf16.msra.mxu1 %v20058_v6  ;;  %v20098_v55 = vld [vmem:[%s26704_s2 + $0x620] ss:$156 sps:$4 sm:$0xff]   ;;  %v20103_v62 = vld [vmem:[%s26704_s2 + $0x750] ss:$156 sps:$4 sm:$0xff]   ;;  %v20104_v1 = vld [vmem:[%s26704_s2 + $0x758] ss:$156 sps:$4 sm:$0xff]  }
 0x1d7   : > { %17555 = vmatprep.subr.bf16.mxu0 %v20059_v7  ;;  %17667 = vmatprep.subr.bf16.mxu1 %v20060_v8  ;;  %v20101_v57 = vld [vmem:[%s26704_s2 + $0x75c] ss:$156 sps:$4 sm:$0xff]   ;;  %v6652_v63 = vld [vmem:[%s22867_s20 + $0x90] sm:$0xff]  ;;  %v20111_v16 = vld [vmem:[%s26704_s2 + $0x9c4] ss:$156 sps:$4 sm:$0xff]  }
 0x1d8   : > { %6803 = vperm.xlu1 %20030, %v6661_v32   ;;  %v20144_v0 = vld [vmem:[%s22823_s27 + $0x1f8] sm:$0xff]   ;;  %v20145_v3 = vld [vmem:[%s22823_s27 + $0x130] sm:$0xff]   ;;  %v20157_v17 = vld [vmem:[%s22823_s27 + $0x128] sm:$0xff]  }
 0x1d9   : > { %6718 = vperm.xlu0 %20029, %v6644_v33   ;;  %v20107_v4 = vld [vmem:[%s26704_s2 + $0x894] ss:$156 sps:$4 sm:$0xff]   ;;  %v20146_v5 = vld [vmem:[%s22823_s27 + $0x1b8] sm:$0xff]   ;;  %v20113_v18 = vld [vmem:[%s26704_s2 + $0x9cc] ss:$156 sps:$4 sm:$0xff]  }
 0x1da   : > { %17556 = vmatpush3.bf16.msra.mxu0 %v20061_v10  ;;  %17668 = vmatpush3.bf16.msra.mxu1 %v20062_v11  ;;  %v20147_v6 = vld [vmem:[%s22823_s27 + $0x1f0] sm:$0xff]   ;;  %v6653_v7 = vld [vmem:[%s22867_s20 + $0x98] sm:$0xff]  ;;  %v20155_v11 = vld [vmem:[%s22823_s27 + $0x168] sm:$0xff]  }
 0x1db   : > { %17765 = vmatprep.subr.bf16.mxu0 %v20129_v50  ;;  %17877 = vmatprep.subr.bf16.mxu1 %v20144_v0  ;;  %v20148_v8 = vld [vmem:[%s22823_s27 + $0x1b0] sm:$0xff]   ;;  %v6637_v10 = vld [vmem:[%s22867_s20 + $0x18] sm:$0xff]  ;;  %v6651_v20 = vld [vmem:[%s22867_s20 + $0x88] sm:$0xff] }
 0x1dc   : > { %6723 = vperm.xlu1 %20030, %v6645_v34   ;;  %v20110_v15 = vld [vmem:[%s26704_s2 + $0x890] ss:$156 sps:$4 sm:$0xff]   ;;  %v20161_v24 = vld [vmem:[%s22823_s27 + $0x120] sm:$0xff]   ;;  %v20117_v28 = vld [vmem:[%s26704_s2 + $0xafc] ss:$156 sps:$4 sm:$0xff]  }
 0x1dd   : > { %11876 = vmatmul.mubr.bf16.vlgmr.msra.gmra.mxu0 %v20063_v9  ;;  %12037 = vmatmul.mubr.bf16.vlgmr.msra.gmra.mxu1 %v20066_v12  ;;  %v6636_v9 = vld [vmem:[%s22867_s20 + $0x10] sm:$0xff]  ;;  %v20109_v12 = vld [vmem:[%s26704_s2 + $0x888] ss:$156 sps:$4 sm:$0xff]   ;;  %v20115_v26 = vld [vmem:[%s26704_s2 + $0x9c0] ss:$156 sps:$4 sm:$0xff]  }
 0x1de   : > { %11883 = vmatprep.mubr.bf16.mxu0 %v20069_v13  ;;  %12044 = vmatprep.mubr.bf16.mxu1 %v20071_v14  ;;  %v6650_v13 = vld [vmem:[%s22867_s20 + $0x80] sm:$0xff]  ;;  %v20156_v14 = vld [vmem:[%s22823_s27 + $0x1e8] sm:$0xff]   ;;  %v20170_v32 = vld [vmem:[%s22823_s27 + $0x1d8] sm:$0xff]  }
 0x1df   : > { %6788 = vperm.xlu0 %20029, %v6658_v36   ;;  %17766 = vmatpush3.bf16.msra.mxu0 %v20130_v52  ;;  %v20162_v25 = vld [vmem:[%s22823_s27 + $0x1a0] sm:$0xff]   ;;  %v20171_v33 = vld [vmem:[%s22823_s27 + $0x118] sm:$0xff]   ;;  %v20174_v36 = vld [vmem:[%s22823_s27 + $0x1d0] sm:$0xff]  }
 0x1e0   : > { %6793 = vperm.xlu1 %20030, %v6659_v40   ;;  %17767 = vmatprep.subr.bf16.mxu0 %v20143_v61  ;;  %v20172_v34 = vld [vmem:[%s22823_s27 + $0x198] sm:$0xff]   ;;  %v20187_v50 = vld [vmem:[%s22823_s27 + $0x140] sm:$0xff]  }
 0x1e1   : > { %17878 = vmatpush3.bf16.msra.mxu1 %v20146_v5  ;;  %v20122_v40 = vld [vmem:[%s26704_s2 + $0xb00] ss:$156 sps:$4 sm:$0xff]  }
 0x1e2   : > { %17879 = vmatprep.subr.bf16.mxu1 %v20147_v6  ;;  %v20188_v52 = vld [vmem:[%s22823_s27 + $0x1c0] sm:$0xff]   ;;  %v20149_v61 = vld [vmem:[%s26704_s2 + $0xfdc] ss:$156 sps:$4 sm:$0xff]   ;;  %v20177_v6 = vld [vmem:[%s26704_s2 + $0x124c] ss:$156 sps:$4 sm:$0xff]  }
 0x1e3   : > { %6708 = vperm.xlu0 %20029, %v6642_v41   ;;  %17768 = vmatpush3.bf16.msra.mxu0 %v20145_v3  ;;  %v20123_v41 = vld [vmem:[%s26704_s2 + $0xc34] ss:$156 sps:$4 sm:$0xff]   ;;  %v20154_v0 = vld [vmem:[%s26704_s2 + $0xfe0] ss:$156 sps:$4 sm:$0xff]  }
 0x1e4   : > { %6713 = vperm.xlu1 %20030, %v6643_v42   ;;  %17769 = vmatprep.subr.bf16.mxu0 %v20155_v11  ;;  %v20125_v42 = vld [vmem:[%s26704_s2 + $0xc3c] ss:$156 sps:$4 sm:$0xff]   ;;  %v20167_v3 = vld [vmem:[%s26704_s2 + $0x1110] ss:$156 sps:$4 sm:$0xff]  }
 0x1e5   : > { %11884 = vmatmul.mubr.bf16.gmra.mxu0 %v20073_v19  ;;  %12045 = vmatmul.mubr.bf16.gmra.mxu1 %v20074_v21  ;;  %v20158_v19 = vld [vmem:[%s22823_s27 + $0x1a8] sm:$0xff]   ;;  %v20159_v21 = vld [vmem:[%s22823_s27 + $0x160] sm:$0xff]   ;;  %v20257_v5 = vld [vmem:[%s22823_s27 + $0x278] sm:$0xff]  }
 0x1e6   : > { %11891 = vmatprep.mubr.bf16.mxu0 %v20075_v22  ;;  %12052 = vmatprep.mubr.bf16.mxu1 %v20077_v23  ;;  %v6634_v22 = vld [vmem:[%s22867_s20] sm:$0xff]  ;;  %v20193_v11 = vld [vmem:[%s26704_s2 + $0x14] ss:$156 sps:$4 sm:$0xff]  }
 0x1e7   : > { %6778 = vperm.xlu0 %20029, %v6656_v44   ;;  %17880 = vmatpush3.bf16.msra.mxu1 %v20148_v8  ;;  %v20160_v23 = vld [vmem:[%s22823_s27 + $0x1e0] sm:$0xff]   ;;  %v20184_v44 = vld [vmem:[%s22823_s27 + $0x1c8] sm:$0xff]  }
 0x1e8   : > { %6783 = vperm.xlu1 %20030, %v6657_v48   ;;  %17881 = vmatprep.subr.bf16.mxu1 %v20156_v14  ;;  %v20128_v48 = vld [vmem:[%s26704_s2 + $0xc38] ss:$156 sps:$4 sm:$0xff]   ;;  %v20181_v8 = vld [vmem:[%s26704_s2 + $0x1248] ss:$156 sps:$4 sm:$0xff]  }
 0x1e9   : > { %17770 = vmatpush3.bf16.msra.mxu0 %v20157_v17  ;;  %v20199_v17 = vld [vmem:[%s26704_s2 + $0x154] ss:$156 sps:$4 sm:$0xff]  }
 0x1ea   : > { %17771 = vmatprep.subr.bf16.mxu0 %v20159_v21  ;;  %v20271_v21 = vld [vmem:[%s22823_s27 + $0x270] sm:$0xff]  }
 0x1eb   : > { %6698 = vperm.xlu0 %20029, %v6640_v49   ;;  %17882 = vmatpush3.bf16.msra.mxu1 %v20158_v19  ;;  %v20131_v49 = vld [vmem:[%s26704_s2 + $0xd6c] ss:$156 sps:$4 sm:$0xff]   ;;  %v20258_v19 = vld [vmem:[%s22823_s27 + $0x238] sm:$0xff]  }
 0x1ec   : > { %6703 = vperm.xlu1 %20030, %v6641_v53   ;;  %17883 = vmatprep.subr.bf16.mxu1 %v20160_v23  ;;  %v20189_v53 = vld [vmem:[%s22823_s27 + $0x100] sm:$0xff]   ;;  %v20275_v23 = vld [vmem:[%s22823_s27 + $0x2f0] sm:$0xff]  }
 0x1ed   : > { %11892 = vmatmul.mubr.bf16.gmra.mxu0 %v20079_v27  ;;  %12053 = vmatmul.mubr.bf16.gmra.mxu1 %v20080_v29  ;;  %v20116_v27 = vld [vmem:[%s26704_s2 + $0x9c8] ss:$156 sps:$4 sm:$0xff]  }
 0x1ee   : > { %11899 = vmatprep.mubr.bf16.mxu0 %v20081_v30  ;;  %12060 = vmatprep.mubr.bf16.mxu1 %v20083_v31  ;;  %v6635_v29 = vld [vmem:[%s22867_s20 + $0x8] sm:$0xff]  ;;  %v20119_v30 = vld [vmem:[%s26704_s2 + $0xb04] ss:$156 sps:$4 sm:$0xff]   ;;  %v20169_v31 = vld [vmem:[%s22823_s27 + $0x158] sm:$0xff]  }
 0x1ef   : > { %6768 = vperm.xlu0 %20029, %v6654_v54   ;;  %17772 = vmatpush3.bf16.msra.mxu0 %v20161_v24  ;;  %v20190_v54 = vld [vmem:[%s22823_s27 + $0x180] sm:$0xff]  }
 0x1f0   : > { %6773 = vperm.xlu1 %20030, %v6655_v58   ;;  %17884 = vmatpush3.bf16.msra.mxu1 %v20162_v25  ;;  %v20139_v58 = vld [vmem:[%s26704_s2 + $0xeac] ss:$156 sps:$4 sm:$0xff]   ;;  %v20273_v25 = vld [vmem:[%s22823_s27 + $0x230] sm:$0xff]  }
 0x1f1   : > { %17773 = vmatprep.subr.bf16.mxu0 %v20169_v31  ;;  %17885 = vmatprep.subr.bf16.mxu1 %v20170_v32  ;;  %v20283_v31 = vld [vmem:[%s22823_s27 + $0x268] sm:$0xff]  }
 0x1f2   : > { %v20205_v32 = vld [vmem:[%s26704_s2 + $0x28c] ss:$156 sps:$4 sm:$0xff]  }
 0x1f3   : > { %6688 = vperm.xlu0 %20029, %v6638_v59   ;;  %17774 = vmatpush3.bf16.msra.mxu0 %v20171_v33  ;;  %v20141_v59 = vld [vmem:[%s26704_s2 + $0xea0] ss:$156 sps:$4 sm:$0xff]   ;;  %v20284_v33 = vld [vmem:[%s22823_s27 + $0x2e8] sm:$0xff]  }
 0x1f4   : > { %6693 = vperm.xlu1 %20030, %v6639_v60   ;;  %17886 = vmatpush3.bf16.msra.mxu1 %v20172_v34  ;;  %v20142_v60 = vld [vmem:[%s26704_s2 + $0xea8] ss:$156 sps:$4 sm:$0xff]  }
 0x1f5   : > { %11900 = vmatmul.mubr.bf16.gmra.mxu0 %v20085_v35  ;;  %12061 = vmatmul.mubr.bf16.gmra.mxu1 %v20086_v37  ;;  %v20173_v35 = vld [vmem:[%s22823_s27 + $0x150] sm:$0xff]  }
 0x1f6   : > { %11907 = vmatprep.mubr.bf16.mxu0 %v20087_v38  ;;  %12068 = vmatprep.mubr.bf16.mxu1 %v20089_v39  ;;  %v20175_v37 = vld [vmem:[%s22823_s27 + $0x110] sm:$0xff]  }
 0x1f7   : > { %6758 = vperm.xlu0 %20029, %v6652_v63   ;;  %17775 = vmatprep.subr.bf16.mxu0 %v20173_v35  ;;  %v20176_v38 = vld [vmem:[%s22823_s27 + $0x190] sm:$0xff]   ;;  %v20285_v35 = vld [vmem:[%s22823_s27 + $0x228] sm:$0xff]  }
 0x1f8   : > { %6763 = vperm.xlu1 %20030, %v6653_v7   ;;  %v20121_v39 = vld [vmem:[%s26704_s2 + $0xaf8] ss:$156 sps:$4 sm:$0xff]   ;;  %17887 = vmatprep.subr.bf16.mxu1 %v20174_v36 }
 0x1f9   : > { %17776 = vmatpush3.bf16.msra.mxu0 %v20175_v37  ;;  %17888 = vmatpush3.bf16.msra.mxu1 %v20176_v38  ;;  %v20153_v63 = vld [vmem:[%s26704_s2 + $0xfd8] ss:$156 sps:$4 sm:$0xff]   ;;  %v20286_v37 = vld [vmem:[%s22823_s27 + $0x2a8] sm:$0xff]   ;;  %v20287_v38 = vld [vmem:[%s22823_s27 + $0x260] sm:$0xff]  }
 0x1fa   : > { %17889 = vmatprep.subr.bf16.mxu1 %v20184_v44  ;;  %v20179_v7 = vld [vmem:[%s26704_s2 + $0x1254] ss:$156 sps:$4 sm:$0xff]   ;;  %v20290_v44 = vld [vmem:[%s22823_s27 + $0x2a0] sm:$0xff]  }
 0x1fb   : > { %6678 = vperm.xlu0 %20029, %v6636_v9   ;;  %v20182_v9 = vld [vmem:[%s26704_s2 + $0x1250] ss:$156 sps:$4 sm:$0xff]  }
 0x1fc   : > { %6683 = vperm.xlu1 %20030, %v6637_v10   ;;  %v20272_v10 = vld [vmem:[%s22823_s27 + $0x2f8] sm:$0xff]  }
 0x1fd   : > { %11908 = vmatmul.mubr.bf16.gmra.mxu0 %v20091_v43  ;;  %12069 = vmatmul.mubr.bf16.gmra.mxu1 %v20092_v45  ;;  %v20183_v43 = vld [vmem:[%s22823_s27 + $0x148] sm:$0xff]  }
 0x1fe   : > { %11915 = vmatprep.mubr.bf16.mxu0 %v20093_v46  ;;  %12076 = vmatprep.mubr.bf16.mxu1 %v20095_v47  ;;  %v20185_v45 = vld [vmem:[%s22823_s27 + $0x108] sm:$0xff]  }
 0x1ff   : > { %6748 = vperm.xlu0 %20029, %v6650_v13   ;;  %v20127_v46 = vld [vmem:[%s26704_s2 + $0xc30] ss:$156 sps:$4 sm:$0xff]   ;;  %17777 = vmatprep.subr.bf16.mxu0 %v20183_v43 }
 0x200   : > { %6753 = vperm.xlu1 %20030, %v6651_v20   ;;  %v20186_v47 = vld [vmem:[%s22823_s27 + $0x188] sm:$0xff]   ;;  %17778 = vmatpush3.bf16.msra.mxu0 %v20185_v45 }
 0x201   : > { %17890 = vmatpush3.bf16.msra.mxu1 %v20186_v47  ;;  %17779 = vmatprep.subr.bf16.mxu0 %v20187_v50  ;;  %v20191_v13 = vld [vmem:[%s26704_s2 + $0x10] ss:$156 sps:$4 sm:$0xff]   ;;  %v20208_v45 = vld [vmem:[%s26704_s2 + $0x288] ss:$156 sps:$4 sm:$0xff]   ;;  %v20297_v47 = vld [vmem:[%s22823_s27 + $0x258] sm:$0xff]  }
 0x202   : > { %17891 = vmatprep.subr.bf16.mxu1 %v20188_v52  ;;  %v20299_v52 = vld [vmem:[%s22823_s27 + $0x218] sm:$0xff]  }
 0x203   : > { %6668 = vperm.xlu0 %20029, %v6634_v22   ;;  %v20274_v22 = vld [vmem:[%s22823_s27 + $0x2b8] sm:$0xff]  }
 0x204   : > { %6673 = vperm.xlu1 %20030, %v6635_v29   ;;  %17780 = vmatpush3.bf16.msra.mxu0 %v20189_v53  ;;  %v20202_v29 = vld [vmem:[%s26704_s2 + $0x150] ss:$156 sps:$4 sm:$0xff]   ;;  %v20300_v53 = vld [vmem:[%s22823_s27 + $0x298] sm:$0xff]  }
 0x205   : > { %11916 = vmatmul.mubr.bf16.gmra.mxu0 %v20097_v51  ;;  %12077 = vmatmul.mubr.bf16.gmra.mxu1 %v20098_v55  ;;  %v20133_v51 = vld [vmem:[%s26704_s2 + $0xd74] ss:$156 sps:$4 sm:$0xff]   ;;  %v20135_v55 = vld [vmem:[%s26704_s2 + $0xd68] ss:$156 sps:$4 sm:$0xff]  }
 0x206   : > { %11923 = vmatprep.mubr.bf16.mxu0 %v20099_v56  ;;  %12084 = vmatprep.mubr.bf16.mxu1 %v20101_v57  ;;  %v20136_v56 = vld [vmem:[%s26704_s2 + $0xd70] ss:$156 sps:$4 sm:$0xff]   ;;  %v20137_v57 = vld [vmem:[%s26704_s2 + $0xea4] ss:$156 sps:$4 sm:$0xff]  }
 0x207   : > { %17892 = vmatpush3.bf16.msra.mxu1 %v20190_v54  ;;  %17989 = vmatprep.subr.bf16.mxu0 %v20257_v5  ;;  %v20301_v54 = vld [vmem:[%s22823_s27 + $0x250] sm:$0xff]   ;;  %v20314_v5 = vld [vmem:[%s22823_s27 + $0x288] sm:$0xff]  }
 0x208   : > { %18101 = vmatprep.subr.bf16.mxu1 %v20272_v10  ;;  %v20317_v10 = vld [vmem:[%s22823_s27 + $0x200] sm:$0xff]  }
 0x20d   : > { %11924 = vmatmul.mubr.bf16.gmra.mxu0 %v20103_v62  ;;  %12085 = vmatmul.mubr.bf16.gmra.mxu1 %v20104_v1  ;;  %v20151_v62 = vld [vmem:[%s26704_s2 + $0xfe4] ss:$156 sps:$4 sm:$0xff]   ;;  %v20163_v1 = vld [vmem:[%s26704_s2 + $0x1114] ss:$156 sps:$4 sm:$0xff]  }
 0x20e   : > { %11931 = vmatprep.mubr.bf16.mxu0 %v20105_v2  ;;  %12092 = vmatprep.mubr.bf16.mxu1 %v20107_v4  ;;  %v20165_v2 = vld [vmem:[%s26704_s2 + $0x111c] ss:$156 sps:$4 sm:$0xff]  }
 0x20f   : > { %v20168_v4 = vld [vmem:[%s26704_s2 + $0x1118] ss:$156 sps:$4 sm:$0xff]  }
 0x215   : > { %11932 = vmatmul.mubr.bf16.gmra.mxu0 %v20109_v12  ;;  %12093 = vmatmul.mubr.bf16.gmra.mxu1 %v20110_v15  ;;  %v20196_v12 = vld [vmem:[%s26704_s2 + $0x1c] ss:$156 sps:$4 sm:$0xff]  }
 0x216   : > { %11939 = vmatprep.mubr.bf16.mxu0 %v20111_v16  ;;  %12100 = vmatprep.mubr.bf16.mxu1 %v20113_v18  ;;  %v20194_v15 = vld [vmem:[%s26704_s2 + $0x18] ss:$156 sps:$4 sm:$0xff]   ;;  %v20197_v16 = vld [vmem:[%s26704_s2 + $0x14c] ss:$156 sps:$4 sm:$0xff]  }
 0x21d   : > { %11940 = vmatmul.mubr.bf16.gmra.mxu0 %v20115_v26  ;;  %12101 = vmatmul.mubr.bf16.gmra.mxu1 %v20116_v27  ;;  %v20201_v26 = vld [vmem:[%s26704_s2 + $0x148] ss:$156 sps:$4 sm:$0xff]  }
 0x21e   : > { %11947 = vmatprep.mubr.bf16.mxu0 %v20117_v28  ;;  %12108 = vmatprep.mubr.bf16.mxu1 %v20119_v30  ;;  %v20276_v28 = vld [vmem:[%s22823_s27 + $0x2b0] sm:$0xff]   ;;  %v20203_v30 = vld [vmem:[%s26704_s2 + $0x284] ss:$156 sps:$4 sm:$0xff]  }
 0x225   : > { %11948 = vmatmul.mubr.bf16.gmra.mxu0 %v20121_v39  ;;  %12109 = vmatmul.mubr.bf16.gmra.mxu1 %v20122_v40  ;;  %v20288_v39 = vld [vmem:[%s22823_s27 + $0x2e0] sm:$0xff]  }
 0x226   : > { %11955 = vmatprep.mubr.bf16.mxu0 %v20123_v41  ;;  %12116 = vmatprep.mubr.bf16.mxu1 %v20125_v42  ;;  %v20289_v41 = vld [vmem:[%s22823_s27 + $0x220] sm:$0xff]  }
 0x227   : > { %v20207_v42 = vld [vmem:[%s26704_s2 + $0x280] ss:$156 sps:$4 sm:$0xff]  }
 0x22d   : > { %11956 = vmatmul.mubr.bf16.gmra.mxu0 %v20127_v46  ;;  %12117 = vmatmul.mubr.bf16.gmra.mxu1 %v20128_v48  ;;  %v20209_v46 = vld [vmem:[%s26704_s2 + $0x3bc] ss:$156 sps:$4 sm:$0xff]  }
 0x22e   : > { %11963 = vmatprep.mubr.bf16.mxu0 %v20131_v49  ;;  %12124 = vmatprep.mubr.bf16.mxu1 %v20133_v51  ;;  %v20298_v48 = vld [vmem:[%s22823_s27 + $0x2d8] sm:$0xff]   ;;  %v20211_v49 = vld [vmem:[%s26704_s2 + $0x3c4] ss:$156 sps:$4 sm:$0xff]  }
 0x235   : > { %11964 = vmatmul.mubr.bf16.gmra.mxu0 %v20135_v55  ;;  %12125 = vmatmul.mubr.bf16.gmra.mxu1 %v20136_v56  ;;  %v20302_v55 = vld [vmem:[%s22823_s27 + $0x2d0] sm:$0xff]  }
 0x236   : > { %11971 = vmatprep.mubr.bf16.mxu0 %v20137_v57  ;;  %12132 = vmatprep.mubr.bf16.mxu1 %v20139_v58  ;;  %v20303_v57 = vld [vmem:[%s22823_s27 + $0x210] sm:$0xff]  }
 0x237   : > { %v20213_v58 = vld [vmem:[%s26704_s2 + $0x3b8] ss:$156 sps:$4 sm:$0xff]  }
 0x23d   : > { %11972 = vmatmul.mubr.bf16.gmra.mxu0 %v20141_v59  ;;  %12133 = vmatmul.mubr.bf16.gmra.mxu1 %v20142_v60  ;;  %v20304_v60 = vld [vmem:[%s22823_s27 + $0x290] sm:$0xff]  }
 0x23e   : > { %11979 = vmatprep.mubr.bf16.mxu0 %v20149_v61  ;;  %12140 = vmatprep.mubr.bf16.mxu1 %v20151_v62  ;;  %v20214_v61 = vld [vmem:[%s26704_s2 + $0x3c0] ss:$156 sps:$4 sm:$0xff]   ;;  %v20215_v62 = vld [vmem:[%s26704_s2 + $0x4f4] ss:$156 sps:$4 sm:$0xff]  }
 0x240   : > { %v23128_v14 = vpop.permute.xlu0 %6818 }
 0x243   : > { %v23139_v18 = vpop.permute.xlu1 %6738 }
 0x244   : > { %v23142_v20 = vpop.permute.xlu0 %6823 }
 0x245   : > { %11980 = vmatmul.mubr.bf16.gmra.mxu0 %v20153_v63  ;;  %12141 = vmatmul.mubr.bf16.gmra.mxu1 %v20154_v0  ;;  %v20311_v63 = vld [vmem:[%s22823_s27 + $0x248] sm:$0xff]   ;;  %v20217_v0 = vld [vmem:[%s26704_s2 + $0x4fc] ss:$156 sps:$4 sm:$0xff]  }
 0x246   : > { %11987 = vmatprep.mubr.bf16.mxu0 %v20163_v1  ;;  %12148 = vmatprep.mubr.bf16.mxu1 %v20165_v2  ;;  %v20312_v1 = vld [vmem:[%s22823_s27 + $0x2c8] sm:$0xff]  }
 0x247   : > { %v23147_v24 = vpop.permute.xlu1 %6743 }
 0x248   : > { %v23153_v27 = vpop.permute.xlu0 %6808 }
 0x24b   : > { %v23167_v34 = vpop.permute.xlu1 %6813 }
 0x24c   : > { %v23170_v36 = vpop.permute.xlu0 %6728 }
 0x24d   : > { %11988 = vmatmul.mubr.bf16.gmra.mxu0 %v20167_v3  ;;  %12149 = vmatmul.mubr.bf16.gmra.mxu1 %v20168_v4  ;;  %v20313_v3 = vld [vmem:[%s22823_s27 + $0x208] sm:$0xff]  }
 0x24e   : > { %11995 = vmatprep.mubr.bf16.mxu0 %v20177_v6  ;;  %12156 = vmatprep.mubr.bf16.mxu1 %v20179_v7  ;;  %v20315_v6 = vld [vmem:[%s22823_s27 + $0x240] sm:$0xff]  }
 0x24f   : > { %v23175_v40 = vpop.permute.xlu1 %6733  ;;  %v20316_v7 = vld [vmem:[%s22823_s27 + $0x2c0] sm:$0xff]  }
 0x250   : > { %v23181_v43 = vpop.permute.xlu0 %6798 }
 0x253   : > { %v23195_v50 = vpop.permute.xlu1 %6803 }
 0x254   : > { %v23197_v51 = vpop.permute.xlu0 %6718 }
 0x255   : > { %11996 = vmatmul.mubr.bf16.gmra.mxu0 %v20181_v8  ;;  %12157 = vmatmul.mubr.bf16.gmra.mxu1 %v20182_v9 }
 0x256   : > { %12197 = vmatprep.mubr.bf16.mxu0 %v20193_v11  ;;  %12358 = vmatprep.mubr.bf16.mxu1 %v20196_v12  ;;  %v20318_v11 = vld [vmem:[%s22823_s27 + $0x280] sm:$0xff]   ;;  %v20219_v12 = vld [vmem:[%s26704_s2 + $0x4f0] ss:$156 sps:$4 sm:$0xff]  }
 0x257   : > { %v23203_v56 = vpop.permute.xlu1 %6723 }
 0x25a   : > { %v23209_v59 = vpop.permute.xlu0 %6788 }
 0x25b   : > { %v23223_v2 = vpop.permute.xlu1 %6793 }
 0x25d   : > { %12198 = vmatmul.mubr.bf16.vlgmr.msra.gmra.mxu0 %v20191_v13  ;;  %12359 = vmatmul.mubr.bf16.vlgmr.msra.gmra.mxu1 %v20194_v15  ;;  %v20220_v13 = vld [vmem:[%s26704_s2 + $0x4f8] ss:$156 sps:$4 sm:$0xff]   ;;  %v20221_v15 = vld [vmem:[%s26704_s2 + $0x62c] ss:$156 sps:$4 sm:$0xff]  }
 0x25e   : > { %12205 = vmatprep.mubr.bf16.mxu0 %v20197_v16  ;;  %12366 = vmatprep.mubr.bf16.mxu1 %v20199_v17  ;;  %v23226_v4 = vpop.permute.xlu0 %6708  ;;  %v20223_v17 = vld [vmem:[%s26704_s2 + $0x634] ss:$156 sps:$4 sm:$0xff]  }
 0x25f   : > { %17990 = vmatpush3.bf16.msra.mxu0 %v20258_v19  ;;  %18102 = vmatpush3.bf16.msra.mxu1 %v20274_v22  ;;  %v23231_v8 = vpop.permute.xlu1 %6713  ;;  %v20225_v22 = vld [vmem:[%s26704_s2 + $0x628] ss:$156 sps:$4 sm:$0xff]  }
 0x260   : > { %17991 = vmatprep.subr.bf16.mxu0 %v20271_v21  ;;  %18103 = vmatprep.subr.bf16.mxu1 %v20275_v23  ;;  %v20226_v23 = vld [vmem:[%s26704_s2 + $0x630] ss:$156 sps:$4 sm:$0xff]  }
 0x262   : > { %v23233_v9 = vpop.permute.xlu0 %6778 }
 0x263   : > { %17992 = vmatpush3.bf16.msra.mxu0 %v20273_v25  ;;  %18104 = vmatpush3.bf16.msra.mxu1 %v20276_v28  ;;  %v23246_v16 = vpop.permute.xlu1 %6783  ;;  %v20229_v28 = vld [vmem:[%s26704_s2 + $0x76c] ss:$156 sps:$4 sm:$0xff]  }
 0x264   : > { %17993 = vmatprep.subr.bf16.mxu0 %v20283_v31  ;;  %18105 = vmatprep.subr.bf16.mxu1 %v20284_v33  ;;  %v20233_v33 = vld [vmem:[%s26704_s2 + $0x89c] ss:$156 sps:$4 sm:$0xff]  }
 0x265   : > { %12206 = vmatmul.mubr.bf16.gmra.mxu0 %v20201_v26  ;;  %12367 = vmatmul.mubr.bf16.gmra.mxu1 %v20202_v29  ;;  %v20227_v26 = vld [vmem:[%s26704_s2 + $0x764] ss:$156 sps:$4 sm:$0xff]  }
 0x266   : > { %12213 = vmatprep.mubr.bf16.mxu0 %v20203_v30  ;;  %12374 = vmatprep.mubr.bf16.mxu1 %v20205_v32  ;;  %v23251_v19 = vpop.permute.xlu0 %6698  ;;  %v20231_v30 = vld [vmem:[%s26704_s2 + $0x760] ss:$156 sps:$4 sm:$0xff]   ;;  %v20232_v32 = vld [vmem:[%s26704_s2 + $0x768] ss:$156 sps:$4 sm:$0xff]  }
 0x267   : > { %17994 = vmatpush3.bf16.msra.mxu0 %v20285_v35  ;;  %18106 = vmatpush3.bf16.msra.mxu1 %v20286_v37  ;;  %v23253_v21 = vpop.permute.xlu1 %6703  ;;  %v20235_v35 = vld [vmem:[%s26704_s2 + $0x8a4] ss:$156 sps:$4 sm:$0xff]  }
 0x268   : > { %17995 = vmatprep.subr.bf16.mxu0 %v20287_v38  ;;  %18107 = vmatprep.subr.bf16.mxu1 %v20288_v39  ;;  %v20237_v39 = vld [vmem:[%s26704_s2 + $0x898] ss:$156 sps:$4 sm:$0xff]  }
 0x26a   : > { %v23261_v25 = vpop.permute.xlu0 %6768 }
 0x26b   : > { %17996 = vmatpush3.bf16.msra.mxu0 %v20289_v41  ;;  %18108 = vmatpush3.bf16.msra.mxu1 %v20290_v44  ;;  %v23269_v29 = vpop.permute.xlu1 %6773  ;;  %v20238_v41 = vld [vmem:[%s26704_s2 + $0x8a0] ss:$156 sps:$4 sm:$0xff]  }
 0x26c   : > { %17997 = vmatprep.subr.bf16.mxu0 %v20297_v47  ;;  %18109 = vmatprep.subr.bf16.mxu1 %v20298_v48  ;;  %v20243_v48 = vld [vmem:[%s26704_s2 + $0x9d0] ss:$156 sps:$4 sm:$0xff]  }
 0x26d   : > { %12214 = vmatmul.mubr.bf16.gmra.mxu0 %v20207_v42  ;;  %12375 = vmatmul.mubr.bf16.gmra.mxu1 %v20208_v45  ;;  %v20239_v42 = vld [vmem:[%s26704_s2 + $0x9d4] ss:$156 sps:$4 sm:$0xff]  }
 0x26e   : > { %12221 = vmatprep.mubr.bf16.mxu0 %v20209_v46  ;;  %12382 = vmatprep.mubr.bf16.mxu1 %v20211_v49  ;;  %v23274_v31 = vpop.permute.xlu0 %6688  ;;  %v20241_v46 = vld [vmem:[%s26704_s2 + $0x9dc] ss:$156 sps:$4 sm:$0xff]  }
 0x26f   : > { %17998 = vmatpush3.bf16.msra.mxu0 %v20299_v52  ;;  %18110 = vmatpush3.bf16.msra.mxu1 %v20300_v53  ;;  %v23285_v37 = vpop.permute.xlu1 %6693  ;;  %v20244_v49 = vld [vmem:[%s26704_s2 + $0x9d8] ss:$156 sps:$4 sm:$0xff]   ;;  %v20245_v52 = vld [vmem:[%s26704_s2 + $0xb0c] ss:$156 sps:$4 sm:$0xff]  }
 0x270   : > { %17999 = vmatprep.subr.bf16.mxu0 %v20301_v54  ;;  %18111 = vmatprep.subr.bf16.mxu1 %v20302_v55  ;;  %v20247_v54 = vld [vmem:[%s26704_s2 + $0xb14] ss:$156 sps:$4 sm:$0xff]  }
 0x272   : > { %v23287_v38 = vpop.permute.xlu0 %6758 }
 0x273   : > { %18000 = vmatpush3.bf16.msra.mxu0 %v20303_v57  ;;  %18112 = vmatpush3.bf16.msra.mxu1 %v20304_v60  ;;  %v23298_v44 = vpop.permute.xlu1 %6763 }
 0x274   : > { %18001 = vmatprep.subr.bf16.mxu0 %v20311_v63  ;;  %18113 = vmatprep.subr.bf16.mxu1 %v20312_v1  ;;  %v20250_v1 = vld [vmem:[%s26704_s2 + $0xb10] ss:$156 sps:$4 sm:$0xff]  }
 0x275   : > { %12222 = vmatmul.mubr.bf16.gmra.mxu0 %v20213_v58  ;;  %12383 = vmatmul.mubr.bf16.gmra.mxu1 %v20214_v61 }
 0x276   : > { %12229 = vmatprep.mubr.bf16.mxu0 %v20215_v62  ;;  %12390 = vmatprep.mubr.bf16.mxu1 %v20217_v0  ;;  %v6679_v45 = vpop.permute.xlu0 %6678  ;;  %v20249_v62 = vld [vmem:[%s26704_s2 + $0xb08] ss:$156 sps:$4 sm:$0xff]  }
 0x277   : > { %18002 = vmatpush3.bf16.msra.mxu0 %v20313_v3  ;;  %18114 = vmatpush3.bf16.msra.mxu1 %v20314_v5  ;;  %v6684_v47 = vpop.permute.xlu1 %6683  ;;  %v20251_v3 = vld [vmem:[%s26704_s2 + $0xc44] ss:$156 sps:$4 sm:$0xff]  }
 0x278   : > { %18003 = vmatprep.subr.bf16.mxu0 %v20315_v6  ;;  %18115 = vmatprep.subr.bf16.mxu1 %v20316_v7 }
 0x27a   : > { %v23312_v53 = vpop.permute.xlu0 %6748 }
 0x27b   : > { %18004 = vmatpush3.bf16.msra.mxu0 %v20317_v10  ;;  %18116 = vmatpush3.bf16.msra.mxu1 %v20318_v11  ;;  %v23317_v57 = vpop.permute.xlu1 %6753 }
 0x27d   : > { %12230 = vmatmul.mubr.bf16.gmra.mxu0 %v20219_v12  ;;  %12391 = vmatmul.mubr.bf16.gmra.mxu1 %v20220_v13  ;;  %v20253_v13 = vld [vmem:[%s26704_s2 + $0xc4c] ss:$156 sps:$4 sm:$0xff]  }
 0x27e   : > { %12237 = vmatprep.mubr.bf16.mxu0 %v20221_v15  ;;  %12398 = vmatprep.mubr.bf16.mxu1 %v20223_v17  ;;  %v6669_v61 = vpop.permute.xlu0 %6668 }
 0x27f   : > { %v6674_v12 = vpop.permute.xlu1 %6673 }
 0x285   : > { %12238 = vmatmul.mubr.bf16.gmra.mxu0 %v20225_v22  ;;  %12399 = vmatmul.mubr.bf16.gmra.mxu1 %v20226_v23 }
 0x286   : > { %12245 = vmatprep.mubr.bf16.mxu0 %v20227_v26  ;;  %12406 = vmatprep.mubr.bf16.mxu1 %v20229_v28 }
 0x28d   : > { %12246 = vmatmul.mubr.bf16.gmra.mxu0 %v20231_v30  ;;  %12407 = vmatmul.mubr.bf16.gmra.mxu1 %v20232_v32 }
 0x28e   : > { %12253 = vmatprep.mubr.bf16.mxu0 %v20233_v33  ;;  %12414 = vmatprep.mubr.bf16.mxu1 %v20235_v35  ;;  %v20255_v33 = vld [vmem:[%s26704_s2 + $0xc40] ss:$156 sps:$4 sm:$0xff]  }
 0x295   : > { %12254 = vmatmul.mubr.bf16.gmra.mxu0 %v20237_v39  ;;  %12415 = vmatmul.mubr.bf16.gmra.mxu1 %v20238_v41 }
 0x296   : > { %12261 = vmatprep.mubr.bf16.mxu0 %v20239_v42  ;;  %12422 = vmatprep.mubr.bf16.mxu1 %v20241_v46  ;;  %v20256_v42 = vld [vmem:[%s26704_s2 + $0xc48] ss:$156 sps:$4 sm:$0xff]   ;;  %v20259_v46 = vld [vmem:[%s26704_s2 + $0xd7c] ss:$156 sps:$4 sm:$0xff]  }
 0x29d   : > { %v17557_v55 = vpop.f32.mrf.mxu0  ;;  %12262 = vmatmul.mubr.bf16.gmra.mxu0 %v20243_v48  ;;  %v17669_v58 = vpop.f32.mrf.mxu1  ;;  %12423 = vmatmul.mubr.bf16.gmra.mxu1 %v20244_v49 }
 0x29e   : > { %12269 = vmatprep.mubr.bf16.mxu0 %v20245_v52  ;;  %12430 = vmatprep.mubr.bf16.mxu1 %v20247_v54 }
 0x29f   : > { %v17558_v60 = vpop.f32.mrf.mxu0  ;;  %v17670_v0 = vpop.f32.mrf.mxu1 }
 0x2a0   : > { %v17559_v63 = vadd.f32 %v17558_v60, %v17557_v55  ;;  %v17671_v5 = vadd.f32 %v17670_v0, %v17669_v58  ;;  %v20261_v58 = vld [vmem:[%s26704_s2 + $0xd84] ss:$156 sps:$4 sm:$0xff]  }
 0x2a1   : > { %v17560_v6 = vpop.f32.mrf.mxu0  ;;  %v17672_v10 = vpop.f32.mrf.mxu1 }
 0x2a2   : > { %v11878_v7 = vadd.f32 %v17559_v63, %v6669_v61 }
 0x2a3   : > { %v17561_v11 = vpop.f32.mrf.mxu0  ;;  %v17673_v22 = vpop.f32.mrf.mxu1 }
 0x2a4   : > { %v23331_v15 = vadd.f32 %v17671_v5, %v11878_v7  ;;  %v17562_v17 = vadd.f32 %v17561_v11, %v17560_v6  ;;  %v17674_v23 = vadd.f32 %v17673_v22, %v17672_v10  ;;  %v20264_v11 = vld [vmem:[%s26704_s2 + $0xd80] ss:$156 sps:$4 sm:$0xff]  }
 0x2a5   : > { %v17563_v26 = vpop.f32.mrf.mxu0  ;;  %12270 = vmatmul.mubr.bf16.gmra.mxu0 %v20249_v62  ;;  %v17675_v30 = vpop.f32.mrf.mxu1  ;;  %12431 = vmatmul.mubr.bf16.gmra.mxu1 %v20250_v1 }
 0x2a6   : > { %v11881_v28 = vadd.f32 %v17562_v17, %v6674_v12  ;;  %12277 = vmatprep.mubr.bf16.mxu0 %v20251_v3  ;;  %12438 = vmatprep.mubr.bf16.mxu1 %v20253_v13  ;;  %v20385_v12 = vld [vmem:[%s22823_s27 + $0x378] sm:$0xff]  }
 0x2a7   : > { %v17564_v32 = vpop.f32.mrf.mxu0  ;;  %v17676_v41 = vpop.f32.mrf.mxu1  ;;  %18213 = vmatprep.subr.bf16.mxu0 %v20385_v12 }
 0x2a8   : > { %v23336_v35 = vadd.f32 %v17674_v23, %v11881_v28  ;;  %v17565_v39 = vadd.f32 %v17564_v32, %v17563_v26  ;;  %v17677_v48 = vadd.f32 %v17676_v41, %v17675_v30  ;;  %v20270_v28 = vld [vmem:[%s26704_s2 + $0xebc] ss:$156 sps:$4 sm:$0xff]  }
 0x2a9   : > { %v17566_v49 = vpop.f32.mrf.mxu0  ;;  %v17678_v54 = vpop.f32.mrf.mxu1 }
 0x2aa   : > { %v11886_v52 = vadd.f32 %v17565_v39, %v6679_v45  ;;  %v20263_v45 = vld [vmem:[%s26704_s2 + $0xd78] ss:$156 sps:$4 sm:$0xff]  }
 0x2ab   : > { %v17567_v55 = vpop.f32.mrf.mxu0  ;;  %v17679_v62 = vpop.f32.mrf.mxu1 }
 0x2ac   : > { %v23347_v60 = vadd.f32 %v17677_v48, %v11886_v52  ;;  %v17568_v61 = vadd.f32 %v17567_v55, %v17566_v49  ;;  %v17680_v63 = vadd.f32 %v17679_v62, %v17678_v54  ;;  %v20265_v48 = vld [vmem:[%s26704_s2 + $0xeb0] ss:$156 sps:$4 sm:$0xff]   ;;  %v20268_v55 = vld [vmem:[%s26704_s2 + $0xeb8] ss:$156 sps:$4 sm:$0xff]  }
 0x2ad   : > { %v17569_v0 = vpop.f32.mrf.mxu0  ;;  %12278 = vmatmul.mubr.bf16.gmra.mxu0 %v20255_v33  ;;  %v17681_v3 = vpop.f32.mrf.mxu1  ;;  %12439 = vmatmul.mubr.bf16.gmra.mxu1 %v20256_v42 }
 0x2ae   : > { %v11889_v1 = vadd.f32 %v17568_v61, %v6684_v47  ;;  %12285 = vmatprep.mubr.bf16.mxu0 %v20259_v46  ;;  %12446 = vmatprep.mubr.bf16.mxu1 %v20261_v58  ;;  %v20267_v47 = vld [vmem:[%s26704_s2 + $0xeb4] ss:$156 sps:$4 sm:$0xff]  }
 0x2af   : > { %v17570_v5 = vpop.f32.mrf.mxu0  ;;  %v17682_v10 = vpop.f32.mrf.mxu1 }
 0x2b0   : > { %v23352_v6 = vadd.f32 %v17680_v63, %v11889_v1  ;;  %v17571_v7 = vadd.f32 %v17570_v5, %v17569_v0  ;;  %v17683_v13 = vadd.f32 %v17682_v10, %v17681_v3  ;;  %v20282_v1 = vld [vmem:[%s26704_s2 + $0xff4] ss:$156 sps:$4 sm:$0xff]  }
 0x2b1   : > { %v17572_v17 = vpop.f32.mrf.mxu0  ;;  %v17684_v23 = vpop.f32.mrf.mxu1 }
 0x2b2   : > { %v11894_v22 = vadd.f32 %v17571_v7, %v23274_v31  ;;  %v20400_v7 = vld [vmem:[%s22823_s27 + $0x3f8] sm:$0xff]  }
 0x2b3   : > { %v17573_v26 = vpop.f32.mrf.mxu0  ;;  %v17685_v33 = vpop.f32.mrf.mxu1  ;;  %18325 = vmatprep.subr.bf16.mxu1 %v20400_v7 }
 0x2b4   : > { %v23365_v30 = vadd.f32 %v17683_v13, %v11894_v22  ;;  %v17574_v32 = vadd.f32 %v17573_v26, %v17572_v17  ;;  %v17686_v39 = vadd.f32 %v17685_v33, %v17684_v23  ;;  %v20277_v23 = vld [vmem:[%s26704_s2 + $0xfe8] ss:$156 sps:$4 sm:$0xff]   ;;  %v20280_v26 = vld [vmem:[%s26704_s2 + $0xff0] ss:$156 sps:$4 sm:$0xff]  }
 0x2b5   : > { %v17575_v41 = vpop.f32.mrf.mxu0  ;;  %12286 = vmatmul.mubr.bf16.gmra.mxu0 %v20263_v45  ;;  %v17687_v46 = vpop.f32.mrf.mxu1  ;;  %12447 = vmatmul.mubr.bf16.gmra.mxu1 %v20264_v11 }
 0x2b6   : > { %v11897_v42 = vadd.f32 %v17574_v32, %v23285_v37  ;;  %12293 = vmatprep.mubr.bf16.mxu0 %v20267_v47  ;;  %12454 = vmatprep.mubr.bf16.mxu1 %v20270_v28  ;;  %v20279_v37 = vld [vmem:[%s26704_s2 + $0xfec] ss:$156 sps:$4 sm:$0xff]   ;;  %v20293_v32 = vld [vmem:[%s26704_s2 + $0x1124] ss:$156 sps:$4 sm:$0xff]  }
 0x2b7   : > { %v17576_v31 = vpop.f32.mrf.mxu0  ;;  %v17688_v54 = vpop.f32.mrf.mxu1 }
 0x2b8   : > { %v23371_v49 = vadd.f32 %v17686_v39, %v11897_v42  ;;  %v17577_v52 = vadd.f32 %v17576_v31, %v17575_v41  ;;  %v17689_v58 = vadd.f32 %v17688_v54, %v17687_v46  ;;  %v20296_v42 = vld [vmem:[%s26704_s2 + $0x112c] ss:$156 sps:$4 sm:$0xff]  }
 0x2b9   : > { %v17578_v61 = vpop.f32.mrf.mxu0  ;;  %v17690_v63 = vpop.f32.mrf.mxu1 }
 0x2ba   : > { %v11902_v62 = vadd.f32 %v17577_v52, %v23251_v19 }
 0x2bb   : > { %v17579_v0 = vpop.f32.mrf.mxu0  ;;  %v17691_v45 = vpop.f32.mrf.mxu1 }
 0x2bc   : > { %v23383_v3 = vadd.f32 %v17689_v58, %v11902_v62  ;;  %v17580_v5 = vadd.f32 %v17579_v0, %v17578_v61  ;;  %v17692_v10 = vadd.f32 %v17691_v45, %v17690_v63  ;;  %v20291_v63 = vld [vmem:[%s26704_s2 + $0x1120] ss:$156 sps:$4 sm:$0xff]  }
 0x2bd   : > { %v17581_v11 = vpop.f32.mrf.mxu0  ;;  %12294 = vmatmul.mubr.bf16.gmra.mxu0 %v20265_v48  ;;  %v17693_v12 = vpop.f32.mrf.mxu1  ;;  %12455 = vmatmul.mubr.bf16.gmra.mxu1 %v20268_v55 }
 0x2be   : > { %v11905_v47 = vadd.f32 %v17580_v5, %v23253_v21  ;;  %12301 = vmatprep.mubr.bf16.mxu0 %v20279_v37  ;;  %12462 = vmatprep.mubr.bf16.mxu1 %v20282_v1  ;;  %v20294_v5 = vld [vmem:[%s26704_s2 + $0x1128] ss:$156 sps:$4 sm:$0xff]  }
 0x2bf   : > { %v17582_v19 = vpop.f32.mrf.mxu0  ;;  %v17694_v22 = vpop.f32.mrf.mxu1 }
 0x2c0   : > { %v23387_v13 = vadd.f32 %v17692_v10, %v11905_v47  ;;  %v17583_v17 = vadd.f32 %v17582_v19, %v17581_v11  ;;  %v17695_v28 = vadd.f32 %v17694_v22, %v17693_v12  ;;  %v20310_v11 = vld [vmem:[%s26704_s2 + $0x1264] ss:$156 sps:$4 sm:$0xff]  }
 0x2c1   : > { %v17584_v21 = vpop.f32.mrf.mxu0  ;;  %v17696_v39 = vpop.f32.mrf.mxu1 }
 0x2c2   : > { %v11910_v33 = vadd.f32 %v17583_v17, %v23226_v4 }
 0x2c3   : > { %v17585_v41 = vpop.f32.mrf.mxu0  ;;  %v17697_v48 = vpop.f32.mrf.mxu1 }
 0x2c4   : > { %v23402_v46 = vadd.f32 %v17695_v28, %v11910_v33  ;;  %v17586_v31 = vadd.f32 %v17585_v41, %v17584_v21  ;;  %v17698_v52 = vadd.f32 %v17697_v48, %v17696_v39  ;;  %v20305_v33 = vld [vmem:[%s26704_s2 + $0x1258] ss:$156 sps:$4 sm:$0xff]  }
 0x2c5   : > { %v17587_v54 = vpop.f32.mrf.mxu0  ;;  %12302 = vmatmul.mubr.bf16.gmra.mxu0 %v20277_v23  ;;  %v17699_v37 = vpop.f32.mrf.mxu1  ;;  %12463 = vmatmul.mubr.bf16.gmra.mxu1 %v20280_v26 }
 0x2c6   : > { %v11913_v55 = vadd.f32 %v17586_v31, %v23231_v8  ;;  %12309 = vmatprep.mubr.bf16.mxu0 %v20293_v32  ;;  %12470 = vmatprep.mubr.bf16.mxu1 %v20296_v42  ;;  %v20307_v8 = vld [vmem:[%s26704_s2 + $0x125c] ss:$156 sps:$4 sm:$0xff]  }
 0x2c7   : > { %v17588_v58 = vpop.f32.mrf.mxu0  ;;  %v17700_v62 = vpop.f32.mrf.mxu1  ;;  %v20308_v42 = vld [vmem:[%s26704_s2 + $0x1260] ss:$156 sps:$4 sm:$0xff]  }
 0x2c8   : > { %v23405_v4 = vadd.f32 %v17698_v52, %v11913_v55  ;;  %v17589_v61 = vadd.f32 %v17588_v58, %v17587_v54  ;;  %v17701_v0 = vadd.f32 %v17700_v62, %v17699_v37  ;;  %v20324_v54 = vld [vmem:[%s26704_s2 + $0x2c] ss:$156 sps:$4 sm:$0xff]  }
 0x2c9   : > { %v17590_v1 = vpop.f32.mrf.mxu0  ;;  %v17702_v7 = vpop.f32.mrf.mxu1 }
 0x2ca   : > { %v11918_v45 = vadd.f32 %v17589_v61, %v23197_v51 }
 0x2cb   : > { %v17591_v10 = vpop.f32.mrf.mxu0  ;;  %v17703_v19 = vpop.f32.mrf.mxu1 }
 0x2cc   : > { %v23420_v47 = vadd.f32 %v17701_v0, %v11918_v45  ;;  %v17592_v12 = vadd.f32 %v17591_v10, %v17590_v1  ;;  %v17704_v17 = vadd.f32 %v17703_v19, %v17702_v7  ;;  %v20319_v45 = vld [vmem:[%s26704_s2 + $0x20] ss:$156 sps:$4 sm:$0xff]  }
 0x2cd   : > { %v17593_v22 = vpop.f32.mrf.mxu0  ;;  %12310 = vmatmul.mubr.bf16.gmra.mxu0 %v20291_v63  ;;  %v17705_v26 = vpop.f32.mrf.mxu1  ;;  %12471 = vmatmul.mubr.bf16.gmra.mxu1 %v20294_v5 }
 0x2ce   : > { %v11921_v23 = vadd.f32 %v17592_v12, %v23203_v56  ;;  %12317 = vmatprep.mubr.bf16.mxu0 %v20307_v8  ;;  %12478 = vmatprep.mubr.bf16.mxu1 %v20310_v11  ;;  %v20321_v56 = vld [vmem:[%s26704_s2 + $0x24] ss:$156 sps:$4 sm:$0xff]   ;;  %v20327_v11 = vld [vmem:[%s26704_s2 + $0x15c] ss:$156 sps:$4 sm:$0xff]  }
 0x2cf   : > { %v17594_v28 = vpop.f32.mrf.mxu0  ;;  %v17706_v32 = vpop.f32.mrf.mxu1  ;;  %v20330_v12 = vld [vmem:[%s26704_s2 + $0x164] ss:$156 sps:$4 sm:$0xff]  }
 0x2d0   : > { %v23423_v51 = vadd.f32 %v17704_v17, %v11921_v23  ;;  %v17595_v21 = vadd.f32 %v17594_v28, %v17593_v22  ;;  %v17707_v39 = vadd.f32 %v17706_v32, %v17705_v26  ;;  %v20386_v23 = vld [vmem:[%s22823_s27 + $0x338] sm:$0xff]  }
 0x2d1   : > { %v17596_v41 = vpop.f32.mrf.mxu0  ;;  %v17708_v48 = vpop.f32.mrf.mxu1  ;;  %v20402_v26 = vld [vmem:[%s22823_s27 + $0x3b8] sm:$0xff]  }
 0x2d2   : > { %v11926_v31 = vadd.f32 %v17595_v21, %v23170_v36 }
 0x2d3   : > { %v17597_v52 = vpop.f32.mrf.mxu0  ;;  %v17709_v58 = vpop.f32.mrf.mxu1 }
 0x2d4   : > { %v23438_v55 = vadd.f32 %v17707_v39, %v11926_v31  ;;  %v17598_v37 = vadd.f32 %v17597_v52, %v17596_v41  ;;  %v17710_v61 = vadd.f32 %v17709_v58, %v17708_v48  ;;  %v20403_v39 = vld [vmem:[%s22823_s27 + $0x3f0] sm:$0xff]   ;;  %v20411_v52 = vld [vmem:[%s22823_s27 + $0x368] sm:$0xff]  }
 0x2d5   : > { %v17599_v62 = vpop.f32.mrf.mxu0  ;;  %12318 = vmatmul.mubr.bf16.gmra.mxu0 %v20305_v33  ;;  %v17711_v0 = vpop.f32.mrf.mxu1  ;;  %12479 = vmatmul.mubr.bf16.gmra.mxu1 %v20308_v42  ;;  %v20399_v33 = vld [vmem:[%s22823_s27 + $0x370] sm:$0xff]   ;;  %v20412_v58 = vld [vmem:[%s22823_s27 + $0x3e8] sm:$0xff]  }
 0x2d6   : > { %v11929_v63 = vadd.f32 %v17598_v37, %v23175_v40  ;;  %12519 = vmatprep.mubr.bf16.mxu0 %v20321_v56  ;;  %12680 = vmatprep.mubr.bf16.mxu1 %v20324_v54  ;;  %v20322_v40 = vld [vmem:[%s26704_s2 + $0x28] ss:$156 sps:$4 sm:$0xff]   ;;  %v20401_v56 = vld [vmem:[%s22823_s27 + $0x330] sm:$0xff]  }
 0x2d7   : > { %v17600_v36 = vpop.f32.mrf.mxu0  ;;  %v17712_v8 = vpop.f32.mrf.mxu1  ;;  %v20404_v48 = vld [vmem:[%s22823_s27 + $0x3b0] sm:$0xff]  }
 0x2d8   : > { %v23441_v1 = vadd.f32 %v17710_v61, %v11929_v63  ;;  %v17601_v5 = vadd.f32 %v17600_v36, %v17599_v62  ;;  %v17713_v7 = vadd.f32 %v17712_v8, %v17711_v0  ;;  %v20325_v37 = vld [vmem:[%s26704_s2 + $0x158] ss:$156 sps:$4 sm:$0xff]  }
 0x2d9   : > { %v17602_v10 = vpop.f32.mrf.mxu0  ;;  %v17714_v17 = vpop.f32.mrf.mxu1  ;;  %v20333_v0 = vld [vmem:[%s26704_s2 + $0x294] ss:$156 sps:$4 sm:$0xff]   ;;  %v20336_v8 = vld [vmem:[%s26704_s2 + $0x29c] ss:$156 sps:$4 sm:$0xff]  }
 0x2da   : > { %v11934_v19 = vadd.f32 %v17601_v5, %v23139_v18 }
 0x2db   : > { %v17603_v22 = vpop.f32.mrf.mxu0  ;;  %v17715_v32 = vpop.f32.mrf.mxu1 }
 0x2dc   : > { %v23458_v28 = vadd.f32 %v17713_v7, %v11934_v19  ;;  %v17604_v21 = vadd.f32 %v17603_v22, %v17602_v10  ;;  %v17716_v41 = vadd.f32 %v17715_v32, %v17714_v17  ;;  %v20413_v10 = vld [vmem:[%s22823_s27 + $0x328] sm:$0xff]   ;;  %v20415_v22 = vld [vmem:[%s22823_s27 + $0x360] sm:$0xff]  }
 0x2dd   : > { %v17605_v42 = vpop.f32.mrf.mxu0  ;;  %12520 = vmatmul.mubr.bf16.vlgmr.msra.gmra.mxu0 %v20319_v45  ;;  %v17717_v18 = vpop.f32.mrf.mxu1  ;;  %12681 = vmatmul.mubr.bf16.vlgmr.msra.gmra.mxu1 %v20322_v40 }
 0x2de   : > { %v11937_v31 = vadd.f32 %v17604_v21, %v23147_v24  ;;  %12527 = vmatprep.mubr.bf16.mxu0 %v20327_v11  ;;  %12688 = vmatprep.mubr.bf16.mxu1 %v20330_v12  ;;  %v20328_v24 = vld [vmem:[%s26704_s2 + $0x160] ss:$156 sps:$4 sm:$0xff]   ;;  %v20414_v11 = vld [vmem:[%s22823_s27 + $0x3a8] sm:$0xff]  }
 0x2df   : > { %v17606_v54 = vpop.f32.mrf.mxu0  ;;  %18214 = vmatpush3.bf16.msra.mxu0 %v20386_v23  ;;  %v17718_v63 = vpop.f32.mrf.mxu1  ;;  %18326 = vmatpush3.bf16.msra.mxu1 %v20402_v26  ;;  %v20416_v23 = vld [vmem:[%s22823_s27 + $0x3e0] sm:$0xff]  }
 0x2e0   : > { %v23470_v61 = vadd.f32 %v17716_v41, %v11937_v31  ;;  %v17607_v62 = vadd.f32 %v17606_v54, %v17605_v42  ;;  %18215 = vmatprep.subr.bf16.mxu0 %v20399_v33  ;;  %v17719_v36 = vadd.f32 %v17718_v63, %v17717_v18  ;;  %18327 = vmatprep.subr.bf16.mxu1 %v20403_v39  ;;  %v20418_v39 = vld [vmem:[%s22823_s27 + $0x3a0] sm:$0xff]   ;;  %v20425_v41 = vld [vmem:[%s22823_s27 + $0x358] sm:$0xff]   ;;  %v20339_v54 = vld [vmem:[%s26704_s2 + $0x3cc] ss:$156 sps:$4 sm:$0xff]  }
 0x2e1   : > { %v17608_v5 = vpop.f32.mrf.mxu0  ;;  %v17720_v40 = vpop.f32.mrf.mxu1  ;;  %v20426_v31 = vld [vmem:[%s22823_s27 + $0x3d8] sm:$0xff]  }
 0x2e2   : > { %v11942_v45 = vadd.f32 %v17607_v62, %v23312_v53  ;;  %v20417_v53 = vld [vmem:[%s22823_s27 + $0x320] sm:$0xff]   ;;  %v20342_v62 = vld [vmem:[%s26704_s2 + $0x3d4] ss:$156 sps:$4 sm:$0xff]  }
 0x2e3   : > { %v17609_v7 = vpop.f32.mrf.mxu0  ;;  %18216 = vmatpush3.bf16.msra.mxu0 %v20401_v56  ;;  %v17721_v17 = vpop.f32.mrf.mxu1  ;;  %18328 = vmatpush3.bf16.msra.mxu1 %v20404_v48  ;;  %v20331_v56 = vld [vmem:[%s26704_s2 + $0x290] ss:$156 sps:$4 sm:$0xff]  }
 0x2e4   : > { %v23484_v12 = vadd.f32 %v17719_v36, %v11942_v45  ;;  %v17610_v19 = vadd.f32 %v17609_v7, %v17608_v5  ;;  %18217 = vmatprep.subr.bf16.mxu0 %v20411_v52  ;;  %v17722_v26 = vadd.f32 %v17721_v17, %v17720_v40  ;;  %18329 = vmatprep.subr.bf16.mxu1 %v20412_v58  ;;  %v20427_v36 = vld [vmem:[%s22823_s27 + $0x318] sm:$0xff]   ;;  %v20429_v7 = vld [vmem:[%s22823_s27 + $0x350] sm:$0xff]  }
 0x2e5   : > { %v17611_v21 = vpop.f32.mrf.mxu0  ;;  %12528 = vmatmul.mubr.bf16.gmra.mxu0 %v20325_v37  ;;  %v17723_v33 = vpop.f32.mrf.mxu1  ;;  %12689 = vmatmul.mubr.bf16.gmra.mxu1 %v20328_v24  ;;  %v20428_v5 = vld [vmem:[%s22823_s27 + $0x398] sm:$0xff]  }
 0x2e6   : > { %v11945_v32 = vadd.f32 %v17610_v19, %v23317_v57  ;;  %12535 = vmatprep.mubr.bf16.mxu0 %v20333_v0  ;;  %12696 = vmatprep.mubr.bf16.mxu1 %v20336_v8  ;;  %v20334_v57 = vld [vmem:[%s26704_s2 + $0x298] ss:$156 sps:$4 sm:$0xff]  }
 0x2e7   : > { %v17612_v42 = vpop.f32.mrf.mxu0  ;;  %18218 = vmatpush3.bf16.msra.mxu0 %v20413_v10  ;;  %v17724_v52 = vpop.f32.mrf.mxu1  ;;  %18330 = vmatpush3.bf16.msra.mxu1 %v20414_v11  ;;  %v20430_v10 = vld [vmem:[%s22823_s27 + $0x3d0] sm:$0xff]  }
 0x2e8   : > { %v23496_v18 = vadd.f32 %v17722_v26, %v11945_v32  ;;  %v17613_v48 = vadd.f32 %v17612_v42, %v17611_v21  ;;  %18219 = vmatprep.subr.bf16.mxu0 %v20415_v22  ;;  %v17725_v37 = vadd.f32 %v17724_v52, %v17723_v33  ;;  %18331 = vmatprep.subr.bf16.mxu1 %v20416_v23  ;;  %v20432_v23 = vld [vmem:[%s22823_s27 + $0x390] sm:$0xff]   ;;  %v20439_v26 = vld [vmem:[%s22823_s27 + $0x348] sm:$0xff]   ;;  %v20345_v42 = vld [vmem:[%s26704_s2 + $0x504] ss:$156 sps:$4 sm:$0xff]  }
 0x2e9   : > { %v17614_v58 = vpop.f32.mrf.mxu0  ;;  %v17726_v24 = vpop.f32.mrf.mxu1  ;;  %v20440_v32 = vld [vmem:[%s22823_s27 + $0x3c8] sm:$0xff]  }
 0x2ea   : > { %v11950_v63 = vadd.f32 %v17613_v48, %v23287_v38  ;;  %v20431_v38 = vld [vmem:[%s22823_s27 + $0x310] sm:$0xff]   ;;  %v20348_v48 = vld [vmem:[%s26704_s2 + $0x50c] ss:$156 sps:$4 sm:$0xff]  }
 0x2eb   : > { %v17615_v0 = vpop.f32.mrf.mxu0  ;;  %18220 = vmatpush3.bf16.msra.mxu0 %v20417_v53  ;;  %v17727_v40 = vpop.f32.mrf.mxu1  ;;  %18332 = vmatpush3.bf16.msra.mxu1 %v20418_v39  ;;  %v20337_v53 = vld [vmem:[%s26704_s2 + $0x3c8] ss:$156 sps:$4 sm:$0xff]  }
 0x2ec   : > { %v23510_v8 = vadd.f32 %v17725_v37, %v11950_v63  ;;  %v17616_v45 = vadd.f32 %v17615_v0, %v17614_v58  ;;  %18221 = vmatprep.subr.bf16.mxu0 %v20425_v41  ;;  %v17728_v11 = vadd.f32 %v17727_v40, %v17726_v24  ;;  %18333 = vmatprep.subr.bf16.mxu1 %v20426_v31  ;;  %v20441_v37 = vld [vmem:[%s22823_s27 + $0x308] sm:$0xff]   ;;  %v20443_v0 = vld [vmem:[%s22823_s27 + $0x340] sm:$0xff]  }
 0x2ed   : > { %v17617_v19 = vpop.f32.mrf.mxu0  ;;  %12536 = vmatmul.mubr.bf16.gmra.mxu0 %v20331_v56  ;;  %v17729_v22 = vpop.f32.mrf.mxu1  ;;  %12697 = vmatmul.mubr.bf16.gmra.mxu1 %v20334_v57  ;;  %v20442_v58 = vld [vmem:[%s22823_s27 + $0x388] sm:$0xff]  }
 0x2ee   : > { %v11953_v17 = vadd.f32 %v17616_v45, %v23298_v44  ;;  %12543 = vmatprep.mubr.bf16.mxu0 %v20339_v54  ;;  %12704 = vmatprep.mubr.bf16.mxu1 %v20342_v62  ;;  %v20340_v44 = vld [vmem:[%s26704_s2 + $0x3d0] ss:$156 sps:$4 sm:$0xff]  }
 0x2ef   : > { %v17618_v21 = vpop.f32.mrf.mxu0  ;;  %18222 = vmatpush3.bf16.msra.mxu0 %v20427_v36  ;;  %v17730_v41 = vpop.f32.mrf.mxu1  ;;  %18334 = vmatpush3.bf16.msra.mxu1 %v20428_v5  ;;  %v20444_v36 = vld [vmem:[%s22823_s27 + $0x3c0] sm:$0xff]  }
 0x2f0   : > { %v23522_v33 = vadd.f32 %v17728_v11, %v11953_v17  ;;  %v17619_v39 = vadd.f32 %v17618_v21, %v17617_v19  ;;  %18223 = vmatprep.subr.bf16.mxu0 %v20429_v7  ;;  %v17731_v56 = vadd.f32 %v17730_v41, %v17729_v22  ;;  %18335 = vmatprep.subr.bf16.mxu1 %v20430_v10  ;;  %v20446_v10 = vld [vmem:[%s22823_s27 + $0x380] sm:$0xff]  }
 0x2f1   : > { %v17620_v31 = vpop.f32.mrf.mxu0  ;;  %v17732_v57 = vpop.f32.mrf.mxu1  ;;  %v20343_v19 = vld [vmem:[%s26704_s2 + $0x500] ss:$156 sps:$4 sm:$0xff]  }
 0x2f2   : > { %v11958_v52 = vadd.f32 %v17619_v39, %v23261_v25  ;;  %v20445_v25 = vld [vmem:[%s22823_s27 + $0x300] sm:$0xff]  }
 0x2f3   : > { %v17621_v54 = vpop.f32.mrf.mxu0  ;;  %18224 = vmatpush3.bf16.msra.mxu0 %v20431_v38  ;;  %v17733_v24 = vpop.f32.mrf.mxu1  ;;  %18336 = vmatpush3.bf16.msra.mxu1 %v20432_v23  ;;  %v20346_v23 = vld [vmem:[%s26704_s2 + $0x508] ss:$156 sps:$4 sm:$0xff]  }
 0x2f4   : > { %v23536_v62 = vadd.f32 %v17731_v56, %v11958_v52  ;;  %v17622_v63 = vadd.f32 %v17621_v54, %v17620_v31  ;;  %18225 = vmatprep.subr.bf16.mxu0 %v20439_v26  ;;  %v17734_v5 = vadd.f32 %v17733_v24, %v17732_v57  ;;  %18337 = vmatprep.subr.bf16.mxu1 %v20440_v32  ;;  %v20354_v41 = vld [vmem:[%s26704_s2 + $0x644] ss:$156 sps:$4 sm:$0xff]   ;;  %v20349_v54 = vld [vmem:[%s26704_s2 + $0x638] ss:$156 sps:$4 sm:$0xff]  }
 0x2f5   : > { %v17623_v45 = vpop.f32.mrf.mxu0  ;;  %12544 = vmatmul.mubr.bf16.gmra.mxu0 %v20337_v53  ;;  %v17735_v7 = vpop.f32.mrf.mxu1  ;;  %12705 = vmatmul.mubr.bf16.gmra.mxu1 %v20340_v44  ;;  %v20352_v24 = vld [vmem:[%s26704_s2 + $0x640] ss:$156 sps:$4 sm:$0xff]  }
 0x2f6   : > { %v11961_v40 = vadd.f32 %v17622_v63, %v23269_v29  ;;  %12551 = vmatprep.mubr.bf16.mxu0 %v20345_v42  ;;  %12712 = vmatprep.mubr.bf16.mxu1 %v20348_v48  ;;  %v20351_v29 = vld [vmem:[%s26704_s2 + $0x63c] ss:$156 sps:$4 sm:$0xff]  }
 0x2f7   : > { %v17624_v11 = vpop.f32.mrf.mxu0  ;;  %18226 = vmatpush3.bf16.msra.mxu0 %v20441_v37  ;;  %v17736_v22 = vpop.f32.mrf.mxu1  ;;  %18338 = vmatpush3.bf16.msra.mxu1 %v20442_v58 }
 0x2f8   : > { %v23546_v38 = vadd.f32 %v17734_v5, %v11961_v40  ;;  %v17625_v17 = vadd.f32 %v17624_v11, %v17623_v45  ;;  %18227 = vmatprep.subr.bf16.mxu0 %v20443_v0  ;;  %v17737_v26 = vadd.f32 %v17736_v22, %v17735_v7  ;;  %18339 = vmatprep.subr.bf16.mxu1 %v20444_v36  ;;  %v20360_v40 = vld [vmem:[%s26704_s2 + $0x77c] ss:$156 sps:$4 sm:$0xff]  }
 0x2f9   : > { %v17626_v21 = vpop.f32.mrf.mxu0  ;;  %v17738_v32 = vpop.f32.mrf.mxu1 }
 0x2fa   : > { %v11966_v53 = vadd.f32 %v17625_v17, %v23233_v9 }
 0x2fb   : > { %v17627_v39 = vpop.f32.mrf.mxu0  ;;  %18228 = vmatpush3.bf16.msra.mxu0 %v20445_v25  ;;  %v17739_v56 = vpop.f32.mrf.mxu1  ;;  %18340 = vmatpush3.bf16.msra.mxu1 %v20446_v10 }
 0x2fc   : > { %v23558_v44 = vadd.f32 %v17737_v26, %v11966_v53  ;;  %v17628_v42 = vadd.f32 %v17627_v39, %v17626_v21  ;;  %v17740_v31 = vadd.f32 %v17739_v56, %v17738_v32  ;;  %v20358_v32 = vld [vmem:[%s26704_s2 + $0x778] ss:$156 sps:$4 sm:$0xff]  }
 0x2fd   : > { %v17629_v48 = vpop.f32.mrf.mxu0  ;;  %12552 = vmatmul.mubr.bf16.gmra.mxu0 %v20343_v19  ;;  %v17741_v57 = vpop.f32.mrf.mxu1  ;;  %12713 = vmatmul.mubr.bf16.gmra.mxu1 %v20346_v23 }
 0x2fe   : > { %v11969_v52 = vadd.f32 %v17628_v42, %v23246_v16  ;;  %12559 = vmatprep.mubr.bf16.mxu0 %v20351_v29  ;;  %12720 = vmatprep.mubr.bf16.mxu1 %v20354_v41  ;;  %v20357_v16 = vld [vmem:[%s26704_s2 + $0x774] ss:$156 sps:$4 sm:$0xff]  }
 0x2ff   : > { %v17630_v9 = vpop.f32.mrf.mxu0  ;;  %v17742_v63 = vpop.f32.mrf.mxu1 }
 0x300   : > { %v23564_v37 = vadd.f32 %v17740_v31, %v11969_v52  ;;  %v17631_v58 = vadd.f32 %v17630_v9, %v17629_v48  ;;  %v17743_v0 = vadd.f32 %v17742_v63, %v17741_v57  ;;  %v20366_v48 = vld [vmem:[%s26704_s2 + $0x8b4] ss:$156 sps:$4 sm:$0xff]  }
 0x301   : > { %v17632_v36 = vpop.f32.mrf.mxu0  ;;  %v17744_v45 = vpop.f32.mrf.mxu1 }
 0x302   : > { %v11974_v5 = vadd.f32 %v17631_v58, %v23209_v59  ;;  %v20355_v59 = vld [vmem:[%s26704_s2 + $0x770] ss:$156 sps:$4 sm:$0xff]  }
 0x303   : > { %v17633_v25 = vpop.f32.mrf.mxu0  ;;  %v17745_v11 = vpop.f32.mrf.mxu1 }
 0x304   : > { %v23576_v7 = vadd.f32 %v17743_v0, %v11974_v5  ;;  %v17634_v10 = vadd.f32 %v17633_v25, %v17632_v36  ;;  %v17746_v19 = vadd.f32 %v17745_v11, %v17744_v45  ;;  %v20364_v45 = vld [vmem:[%s26704_s2 + $0x8b0] ss:$156 sps:$4 sm:$0xff]  }
 0x305   : > { %v17635_v17 = vpop.f32.mrf.mxu0  ;;  %12560 = vmatmul.mubr.bf16.gmra.mxu0 %v20349_v54  ;;  %v17747_v23 = vpop.f32.mrf.mxu1  ;;  %12721 = vmatmul.mubr.bf16.gmra.mxu1 %v20352_v24 }
 0x306   : > { %v11977_v22 = vadd.f32 %v17634_v10, %v23223_v2  ;;  %12567 = vmatprep.mubr.bf16.mxu0 %v20357_v16  ;;  %12728 = vmatprep.mubr.bf16.mxu1 %v20360_v40  ;;  %v20363_v2 = vld [vmem:[%s26704_s2 + $0x8ac] ss:$156 sps:$4 sm:$0xff]  }
 0x307   : > { %v17636_v29 = vpop.f32.mrf.mxu0  ;;  %v17748_v53 = vpop.f32.mrf.mxu1 }
 0x308   : > { %v23582_v26 = vadd.f32 %v17746_v19, %v11977_v22  ;;  %v17637_v21 = vadd.f32 %v17636_v29, %v17635_v17  ;;  %v17749_v39 = vadd.f32 %v17748_v53, %v17747_v23  ;;  %v20372_v17 = vld [vmem:[%s26704_s2 + $0x9ec] ss:$156 sps:$4 sm:$0xff]  }
 0x309   : > { %v17638_v41 = vpop.f32.mrf.mxu0  ;;  %v17750_v56 = vpop.f32.mrf.mxu1 }
 0x30a   : > { %v11982_v42 = vadd.f32 %v17637_v21, %v23181_v43  ;;  %v20361_v43 = vld [vmem:[%s26704_s2 + $0x8a8] ss:$156 sps:$4 sm:$0xff]  }
 0x30b   : > { %v17639_v31 = vpop.f32.mrf.mxu0  ;;  %v17751_v9 = vpop.f32.mrf.mxu1 }
 0x30c   : > { %v23594_v52 = vadd.f32 %v17749_v39, %v11982_v42  ;;  %v17640_v57 = vadd.f32 %v17639_v31, %v17638_v41  ;;  %v17752_v54 = vadd.f32 %v17751_v9, %v17750_v56  ;;  %v20370_v56 = vld [vmem:[%s26704_s2 + $0x9e8] ss:$156 sps:$4 sm:$0xff]  }
 0x30d   : > { %v17641_v58 = vpop.f32.mrf.mxu0  ;;  %12568 = vmatmul.mubr.bf16.gmra.mxu0 %v20355_v59  ;;  %v17753_v24 = vpop.f32.mrf.mxu1  ;;  %12729 = vmatmul.mubr.bf16.gmra.mxu1 %v20358_v32 }
 0x30e   : > { %v11985_v63 = vadd.f32 %v17640_v57, %v23195_v50  ;;  %12575 = vmatprep.mubr.bf16.mxu0 %v20363_v2  ;;  %12736 = vmatprep.mubr.bf16.mxu1 %v20366_v48  ;;  %v20369_v50 = vld [vmem:[%s26704_s2 + $0x9e4] ss:$156 sps:$4 sm:$0xff]  }
 0x30f   : > { %v17642_v16 = vpop.f32.mrf.mxu0  ;;  %v17754_v5 = vpop.f32.mrf.mxu1 }
 0x310   : > { %v23600_v0 = vadd.f32 %v17752_v54, %v11985_v63  ;;  %v17643_v36 = vadd.f32 %v17642_v16, %v17641_v58  ;;  %v17755_v25 = vadd.f32 %v17754_v5, %v17753_v24  ;;  %v20378_v58 = vld [vmem:[%s26704_s2 + $0xb24] ss:$156 sps:$4 sm:$0xff]  }
 0x311   : > { %v17644_v40 = vpop.f32.mrf.mxu0  ;;  %v17756_v11 = vpop.f32.mrf.mxu1 }
 0x312   : > { %v11990_v10 = vadd.f32 %v17643_v36, %v23153_v27  ;;  %v20367_v27 = vld [vmem:[%s26704_s2 + $0x9e0] ss:$156 sps:$4 sm:$0xff]  }
 0x313   : > { %v17645_v19 = vpop.f32.mrf.mxu0  ;;  %v17757_v29 = vpop.f32.mrf.mxu1 }
 0x314   : > { %v23612_v22 = vadd.f32 %v17755_v25, %v11990_v10  ;;  %v17646_v23 = vadd.f32 %v17645_v19, %v17644_v40  ;;  %v17758_v59 = vadd.f32 %v17757_v29, %v17756_v11  ;;  %v20376_v11 = vld [vmem:[%s26704_s2 + $0xb20] ss:$156 sps:$4 sm:$0xff]  }
 0x315   : > { %v17647_v21 = vpop.f32.mrf.mxu0  ;;  %12576 = vmatmul.mubr.bf16.gmra.mxu0 %v20361_v43  ;;  %v17759_v32 = vpop.f32.mrf.mxu1  ;;  %12737 = vmatmul.mubr.bf16.gmra.mxu1 %v20364_v45 }
 0x316   : > { %v11993_v53 = vadd.f32 %v17646_v23, %v23167_v34  ;;  %12583 = vmatprep.mubr.bf16.mxu0 %v20369_v50  ;;  %12744 = vmatprep.mubr.bf16.mxu1 %v20372_v17  ;;  %v20375_v34 = vld [vmem:[%s26704_s2 + $0xb1c] ss:$156 sps:$4 sm:$0xff]  }
 0x317   : > { %v17648_v2 = vpop.f32.mrf.mxu0  ;;  %v17760_v42 = vpop.f32.mrf.mxu1 }
 0x318   : > { %v23618_v39 = vadd.f32 %v17758_v59, %v11993_v53  ;;  %v17649_v41 = vadd.f32 %v17648_v2, %v17647_v21  ;;  %v17761_v31 = vadd.f32 %v17760_v42, %v17759_v32  ;;  %v20384_v21 = vld [vmem:[%s26704_s2 + $0xc5c] ss:$156 sps:$4 sm:$0xff]  }
 0x319   : > { %v17650_v48 = vpop.f32.mrf.mxu0  ;;  %v17762_v9 = vpop.f32.mrf.mxu1 }
 0x31a   : > { %v11998_v57 = vadd.f32 %v17649_v41, %v23128_v14  ;;  %v20373_v14 = vld [vmem:[%s26704_s2 + $0xb18] ss:$156 sps:$4 sm:$0xff]  }
 0x31b   : > { %v17651_v54 = vpop.f32.mrf.mxu0  ;;  %v17763_v16 = vpop.f32.mrf.mxu1 }
 0x31c   : > { %v23630_v63 = vadd.f32 %v17761_v31, %v11998_v57  ;;  %v17652_v24 = vadd.f32 %v17651_v54, %v17650_v48  ;;  %v17764_v43 = vadd.f32 %v17763_v16, %v17762_v9  ;;  %v20382_v9 = vld [vmem:[%s26704_s2 + $0xc58] ss:$156 sps:$4 sm:$0xff]  }
 0x31d   : > { %v17781_v36 = vpop.f32.mrf.mxu0  ;;  %12584 = vmatmul.mubr.bf16.gmra.mxu0 %v20367_v27  ;;  %v17893_v45 = vpop.f32.mrf.mxu1  ;;  %12745 = vmatmul.mubr.bf16.gmra.mxu1 %v20370_v56 }
 0x31e   : > { %v12001_v5 = vadd.f32 %v17652_v24, %v23142_v20  ;;  %12591 = vmatprep.mubr.bf16.mxu0 %v20375_v34  ;;  %12752 = vmatprep.mubr.bf16.mxu1 %v20378_v58  ;;  %v20381_v20 = vld [vmem:[%s26704_s2 + $0xc54] ss:$156 sps:$4 sm:$0xff]  }
 0x31f   : > { %v17782_v50 = vpop.f32.mrf.mxu0  ;;  %v17894_v10 = vpop.f32.mrf.mxu1 }
 0x320   : > { %v23636_v25 = vadd.f32 %v17764_v43, %v12001_v5  ;;  %v17783_v40 = vadd.f32 %v17782_v50, %v17781_v36  ;;  %v17895_v19 = vadd.f32 %v17894_v10, %v17893_v45  ;;  %v20392_v36 = vld [vmem:[%s26704_s2 + $0xd94] ss:$156 sps:$4 sm:$0xff]  }
 0x321   : > { %v17784_v17 = vpop.f32.mrf.mxu0  ;;  %v17896_v29 = vpop.f32.mrf.mxu1 }
 0x322   : > { %v12200_v23 = vadd.f32 %v17783_v40, %v23331_v15  ;;  %v20379_v15 = vld [vmem:[%s26704_s2 + $0xc50] ss:$156 sps:$4 sm:$0xff]  }
 0x323   : > { %v17785_v59 = vpop.f32.mrf.mxu0  ;;  %v17897_v2 = vpop.f32.mrf.mxu1 }
 0x324   : > { %v23648_v53 = vadd.f32 %v17895_v19, %v12200_v23  ;;  %v17786_v32 = vadd.f32 %v17785_v59, %v17784_v17  ;;  %v17898_v27 = vadd.f32 %v17897_v2, %v17896_v29  ;;  %v20390_v29 = vld [vmem:[%s26704_s2 + $0xd90] ss:$156 sps:$4 sm:$0xff]   ;;  %v20513_v59 = vld [vmem:[%s22823_s27 + $0x478] sm:$0xff]  }
 0x325   : > { %v17787_v41 = vpop.f32.mrf.mxu0  ;;  %12592 = vmatmul.mubr.bf16.gmra.mxu0 %v20373_v14  ;;  %v17899_v56 = vpop.f32.mrf.mxu1  ;;  %12753 = vmatmul.mubr.bf16.gmra.mxu1 %v20376_v11 }
 0x326   : > { %v12203_v42 = vadd.f32 %v17786_v32, %v23336_v35  ;;  %12599 = vmatprep.mubr.bf16.mxu0 %v20381_v20  ;;  %12760 = vmatprep.mubr.bf16.mxu1 %v20384_v21  ;;  %v20389_v35 = vld [vmem:[%s26704_s2 + $0xd8c] ss:$156 sps:$4 sm:$0xff]  }
 0x327   : > { %v17788_v34 = vpop.f32.mrf.mxu0  ;;  %v17900_v57 = vpop.f32.mrf.mxu1  ;;  %v20387_v20 = vld [vmem:[%s26704_s2 + $0xd88] ss:$156 sps:$4 sm:$0xff]   ;;  %18437 = vmatprep.subr.bf16.mxu0 %v20513_v59 }
 0x328   : > { %v23654_v31 = vadd.f32 %v17898_v27, %v12203_v42  ;;  %v17789_v48 = vadd.f32 %v17788_v34, %v17787_v41  ;;  %v17901_v54 = vadd.f32 %v17900_v57, %v17899_v56  ;;  %v20398_v42 = vld [vmem:[%s26704_s2 + $0xecc] ss:$156 sps:$4 sm:$0xff]  }
 0x329   : > { %v17790_v58 = vpop.f32.mrf.mxu0  ;;  %v17902_v16 = vpop.f32.mrf.mxu1 }
 0x32a   : > { %v12208_v24 = vadd.f32 %v17789_v48, %v23347_v60 }
 0x32b   : > { %v17791_v43 = vpop.f32.mrf.mxu0  ;;  %v17903_v50 = vpop.f32.mrf.mxu1 }
 0x32c   : > { %v23666_v5 = vadd.f32 %v17901_v54, %v12208_v24  ;;  %v17792_v45 = vadd.f32 %v17791_v43, %v17790_v58  ;;  %v17904_v14 = vadd.f32 %v17903_v50, %v17902_v16  ;;  %v20393_v54 = vld [vmem:[%s26704_s2 + $0xec0] ss:$156 sps:$4 sm:$0xff]   ;;  %v20396_v43 = vld [vmem:[%s26704_s2 + $0xec8] ss:$156 sps:$4 sm:$0xff]  }
 0x32d   : > { %v17793_v40 = vpop.f32.mrf.mxu0  ;;  %12600 = vmatmul.mubr.bf16.gmra.mxu0 %v20379_v15  ;;  %v17905_v11 = vpop.f32.mrf.mxu1  ;;  %12761 = vmatmul.mubr.bf16.gmra.mxu1 %v20382_v9 }
 0x32e   : > { %v12211_v10 = vadd.f32 %v17792_v45, %v23352_v6  ;;  %12607 = vmatprep.mubr.bf16.mxu0 %v20389_v35  ;;  %12768 = vmatprep.mubr.bf16.mxu1 %v20392_v36  ;;  %v20395_v6 = vld [vmem:[%s26704_s2 + $0xec4] ss:$156 sps:$4 sm:$0xff]  }
 0x32f   : > { %v17794_v60 = vpop.f32.mrf.mxu0  ;;  %v17906_v23 = vpop.f32.mrf.mxu1 }
 0x330   : > { %v23672_v19 = vadd.f32 %v17904_v14, %v12211_v10  ;;  %v17795_v17 = vadd.f32 %v17794_v60, %v17793_v40  ;;  %v17907_v21 = vadd.f32 %v17906_v23, %v17905_v11  ;;  %v20410_v10 = vld [vmem:[%s26704_s2 + $0x1004] ss:$156 sps:$4 sm:$0xff]  }
 0x331   : > { %v17796_v32 = vpop.f32.mrf.mxu0  ;;  %v17908_v27 = vpop.f32.mrf.mxu1 }
 0x332   : > { %v12216_v2 = vadd.f32 %v17795_v17, %v23365_v30  ;;  %v20528_v17 = vld [vmem:[%s22823_s27 + $0x4f8] sm:$0xff]  }
 0x333   : > { %v17797_v41 = vpop.f32.mrf.mxu0  ;;  %v17909_v15 = vpop.f32.mrf.mxu1  ;;  %18549 = vmatprep.subr.bf16.mxu1 %v20528_v17 }
 0x334   : > { %v23685_v56 = vadd.f32 %v17907_v21, %v12216_v2  ;;  %v17798_v34 = vadd.f32 %v17797_v41, %v17796_v32  ;;  %v17910_v48 = vadd.f32 %v17909_v15, %v17908_v27  ;;  %v20405_v27 = vld [vmem:[%s26704_s2 + $0xff8] ss:$156 sps:$4 sm:$0xff]   ;;  %v20408_v41 = vld [vmem:[%s26704_s2 + $0x1000] ss:$156 sps:$4 sm:$0xff]  }
 0x335   : > { %v17799_v57 = vpop.f32.mrf.mxu0  ;;  %12608 = vmatmul.mubr.bf16.gmra.mxu0 %v20387_v20  ;;  %v17911_v35 = vpop.f32.mrf.mxu1  ;;  %12769 = vmatmul.mubr.bf16.gmra.mxu1 %v20390_v29 }
 0x336   : > { %v12219_v9 = vadd.f32 %v17798_v34, %v23371_v49  ;;  %12615 = vmatprep.mubr.bf16.mxu0 %v20395_v6  ;;  %12776 = vmatprep.mubr.bf16.mxu1 %v20398_v42  ;;  %v20407_v49 = vld [vmem:[%s26704_s2 + $0xffc] ss:$156 sps:$4 sm:$0xff]   ;;  %v20421_v34 = vld [vmem:[%s26704_s2 + $0x1134] ss:$156 sps:$4 sm:$0xff]  }
 0x337   : > { %v17800_v30 = vpop.f32.mrf.mxu0  ;;  %v17912_v16 = vpop.f32.mrf.mxu1 }
 0x338   : > { %v23691_v58 = vadd.f32 %v17910_v48, %v12219_v9  ;;  %v17801_v24 = vadd.f32 %v17800_v30, %v17799_v57  ;;  %v17913_v36 = vadd.f32 %v17912_v16, %v17911_v35  ;;  %v20424_v9 = vld [vmem:[%s26704_s2 + $0x113c] ss:$156 sps:$4 sm:$0xff]  }
 0x339   : > { %v17802_v45 = vpop.f32.mrf.mxu0  ;;  %v17914_v14 = vpop.f32.mrf.mxu1 }
 0x33a   : > { %v12224_v50 = vadd.f32 %v17801_v24, %v23383_v3 }
 0x33b   : > { %v17803_v40 = vpop.f32.mrf.mxu0  ;;  %v17915_v20 = vpop.f32.mrf.mxu1 }
 0x33c   : > { %v23703_v11 = vadd.f32 %v17913_v36, %v12224_v50  ;;  %v17804_v60 = vadd.f32 %v17803_v40, %v17802_v45  ;;  %v17916_v23 = vadd.f32 %v17915_v20, %v17914_v14  ;;  %v20419_v14 = vld [vmem:[%s26704_s2 + $0x1130] ss:$156 sps:$4 sm:$0xff]  }
 0x33d   : > { %v17805_v29 = vpop.f32.mrf.mxu0  ;;  %12616 = vmatmul.mubr.bf16.gmra.mxu0 %v20393_v54  ;;  %v17917_v59 = vpop.f32.mrf.mxu1  ;;  %12777 = vmatmul.mubr.bf16.gmra.mxu1 %v20396_v43 }
 0x33e   : > { %v12227_v6 = vadd.f32 %v17804_v60, %v23387_v13  ;;  %12623 = vmatprep.mubr.bf16.mxu0 %v20407_v49  ;;  %12784 = vmatprep.mubr.bf16.mxu1 %v20410_v10  ;;  %v20422_v60 = vld [vmem:[%s26704_s2 + $0x1138] ss:$156 sps:$4 sm:$0xff]  }
 0x33f   : > { %v17806_v3 = vpop.f32.mrf.mxu0  ;;  %v17918_v2 = vpop.f32.mrf.mxu1 }
 0x340   : > { %v23707_v21 = vadd.f32 %v17916_v23, %v12227_v6  ;;  %v17807_v32 = vadd.f32 %v17806_v3, %v17805_v29  ;;  %v17919_v42 = vadd.f32 %v17918_v2, %v17917_v59  ;;  %v20438_v29 = vld [vmem:[%s26704_s2 + $0x1274] ss:$156 sps:$4 sm:$0xff]  }
 0x341   : > { %v17808_v13 = vpop.f32.mrf.mxu0  ;;  %v17920_v48 = vpop.f32.mrf.mxu1 }
 0x342   : > { %v12232_v15 = vadd.f32 %v17807_v32, %v23402_v46 }
 0x343   : > { %v17809_v57 = vpop.f32.mrf.mxu0  ;;  %v17921_v54 = vpop.f32.mrf.mxu1 }
 0x344   : > { %v23722_v35 = vadd.f32 %v17919_v42, %v12232_v15  ;;  %v17810_v30 = vadd.f32 %v17809_v57, %v17808_v13  ;;  %v17922_v24 = vadd.f32 %v17921_v54, %v17920_v48  ;;  %v20433_v15 = vld [vmem:[%s26704_s2 + $0x1268] ss:$156 sps:$4 sm:$0xff]  }
 0x345   : > { %v17811_v16 = vpop.f32.mrf.mxu0  ;;  %12624 = vmatmul.mubr.bf16.gmra.mxu0 %v20405_v27  ;;  %v17923_v49 = vpop.f32.mrf.mxu1  ;;  %12785 = vmatmul.mubr.bf16.gmra.mxu1 %v20408_v41 }
 0x346   : > { %v12235_v43 = vadd.f32 %v17810_v30, %v23405_v4  ;;  %12631 = vmatprep.mubr.bf16.mxu0 %v20421_v34  ;;  %12792 = vmatprep.mubr.bf16.mxu1 %v20424_v9  ;;  %v20435_v4 = vld [vmem:[%s26704_s2 + $0x126c] ss:$156 sps:$4 sm:$0xff]  }
 0x347   : > { %v17812_v36 = vpop.f32.mrf.mxu0  ;;  %v17924_v50 = vpop.f32.mrf.mxu1  ;;  %v20436_v9 = vld [vmem:[%s26704_s2 + $0x1270] ss:$156 sps:$4 sm:$0xff]  }
 0x348   : > { %v23725_v46 = vadd.f32 %v17922_v24, %v12235_v43  ;;  %v17813_v45 = vadd.f32 %v17812_v36, %v17811_v16  ;;  %v17925_v40 = vadd.f32 %v17924_v50, %v17923_v49  ;;  %v20452_v16 = vld [vmem:[%s26704_s2 + $0x3c] ss:$156 sps:$4 sm:$0xff]  }
 0x349   : > { %v17814_v10 = vpop.f32.mrf.mxu0  ;;  %v17926_v17 = vpop.f32.mrf.mxu1 }
 0x34a   : > { %v12240_v20 = vadd.f32 %v17813_v45, %v23420_v47 }
 0x34b   : > { %v17815_v23 = vpop.f32.mrf.mxu0  ;;  %v17927_v3 = vpop.f32.mrf.mxu1 }
 0x34c   : > { %v23740_v6 = vadd.f32 %v17925_v40, %v12240_v20  ;;  %v17816_v59 = vadd.f32 %v17815_v23, %v17814_v10  ;;  %v17928_v32 = vadd.f32 %v17927_v3, %v17926_v17  ;;  %v20447_v20 = vld [vmem:[%s26704_s2 + $0x30] ss:$156 sps:$4 sm:$0xff]  }
 0x34d   : > { %v17817_v2 = vpop.f32.mrf.mxu0  ;;  %12632 = vmatmul.mubr.bf16.gmra.mxu0 %v20419_v14  ;;  %v17929_v41 = vpop.f32.mrf.mxu1  ;;  %12793 = vmatmul.mubr.bf16.gmra.mxu1 %v20422_v60 }
 0x34e   : > { %v12243_v27 = vadd.f32 %v17816_v59, %v23423_v51  ;;  %12639 = vmatprep.mubr.bf16.mxu0 %v20435_v4  ;;  %12800 = vmatprep.mubr.bf16.mxu1 %v20438_v29  ;;  %v20449_v51 = vld [vmem:[%s26704_s2 + $0x34] ss:$156 sps:$4 sm:$0xff]   ;;  %v20455_v29 = vld [vmem:[%s26704_s2 + $0x16c] ss:$156 sps:$4 sm:$0xff]  }
 0x34f   : > { %v17818_v42 = vpop.f32.mrf.mxu0  ;;  %v17930_v34 = vpop.f32.mrf.mxu1  ;;  %v20458_v59 = vld [vmem:[%s26704_s2 + $0x174] ss:$156 sps:$4 sm:$0xff]  }
 0x350   : > { %v23743_v47 = vadd.f32 %v17928_v32, %v12243_v27  ;;  %v17819_v13 = vadd.f32 %v17818_v42, %v17817_v2  ;;  %v17931_v48 = vadd.f32 %v17930_v34, %v17929_v41  ;;  %v20514_v27 = vld [vmem:[%s22823_s27 + $0x438] sm:$0xff]  }
 0x351   : > { %v17820_v57 = vpop.f32.mrf.mxu0  ;;  %v17932_v54 = vpop.f32.mrf.mxu1  ;;  %v20530_v41 = vld [vmem:[%s22823_s27 + $0x4b8] sm:$0xff]  }
 0x352   : > { %v12248_v30 = vadd.f32 %v17819_v13, %v23438_v55 }
 0x353   : > { %v17821_v24 = vpop.f32.mrf.mxu0  ;;  %v17933_v36 = vpop.f32.mrf.mxu1 }
 0x354   : > { %v23758_v43 = vadd.f32 %v17931_v48, %v12248_v30  ;;  %v17822_v49 = vadd.f32 %v17821_v24, %v17820_v57  ;;  %v17934_v45 = vadd.f32 %v17933_v36, %v17932_v54  ;;  %v20531_v48 = vld [vmem:[%s22823_s27 + $0x4f0] sm:$0xff]   ;;  %v20539_v24 = vld [vmem:[%s22823_s27 + $0x468] sm:$0xff]  }
 0x355   : > { %v17823_v50 = vpop.f32.mrf.mxu0  ;;  %12640 = vmatmul.mubr.bf16.gmra.mxu0 %v20433_v15  ;;  %v17935_v40 = vpop.f32.mrf.mxu1  ;;  %12801 = vmatmul.mubr.bf16.gmra.mxu1 %v20436_v9  ;;  %v20527_v15 = vld [vmem:[%s22823_s27 + $0x470] sm:$0xff]   ;;  %v20540_v36 = vld [vmem:[%s22823_s27 + $0x4e8] sm:$0xff]  }
 0x356   : > { %v12251_v14 = vadd.f32 %v17822_v49, %v23441_v1  ;;  %12841 = vmatprep.mubr.bf16.mxu0 %v20449_v51  ;;  %13002 = vmatprep.mubr.bf16.mxu1 %v20452_v16  ;;  %v20450_v1 = vld [vmem:[%s26704_s2 + $0x38] ss:$156 sps:$4 sm:$0xff]   ;;  %v20453_v49 = vld [vmem:[%s26704_s2 + $0x168] ss:$156 sps:$4 sm:$0xff]  }
 0x357   : > { %v17824_v55 = vpop.f32.mrf.mxu0  ;;  %v17936_v4 = vpop.f32.mrf.mxu1  ;;  %v20529_v51 = vld [vmem:[%s22823_s27 + $0x430] sm:$0xff]  }
 0x358   : > { %v23761_v10 = vadd.f32 %v17934_v45, %v12251_v14  ;;  %v17825_v60 = vadd.f32 %v17824_v55, %v17823_v50  ;;  %v17937_v17 = vadd.f32 %v17936_v4, %v17935_v40  ;;  %v20532_v54 = vld [vmem:[%s22823_s27 + $0x4b0] sm:$0xff]   ;;  %v20461_v40 = vld [vmem:[%s26704_s2 + $0x2a4] ss:$156 sps:$4 sm:$0xff]   ;;  %v20464_v4 = vld [vmem:[%s26704_s2 + $0x2ac] ss:$156 sps:$4 sm:$0xff]  }
 0x359   : > { %v17826_v23 = vpop.f32.mrf.mxu0  ;;  %v17938_v32 = vpop.f32.mrf.mxu1 }
 0x35a   : > { %v12256_v3 = vadd.f32 %v17825_v60, %v23458_v28 }
 0x35b   : > { %v17827_v2 = vpop.f32.mrf.mxu0  ;;  %v17939_v34 = vpop.f32.mrf.mxu1 }
 0x35c   : > { %v23778_v42 = vadd.f32 %v17937_v17, %v12256_v3  ;;  %v17828_v13 = vadd.f32 %v17827_v2, %v17826_v23  ;;  %v17940_v57 = vadd.f32 %v17939_v34, %v17938_v32  ;;  %v20541_v23 = vld [vmem:[%s22823_s27 + $0x428] sm:$0xff]   ;;  %v20543_v2 = vld [vmem:[%s22823_s27 + $0x460] sm:$0xff]  }
 0x35d   : > { %v17829_v9 = vpop.f32.mrf.mxu0  ;;  %12842 = vmatmul.mubr.bf16.vlgmr.msra.gmra.mxu0 %v20447_v20  ;;  %v17941_v28 = vpop.f32.mrf.mxu1  ;;  %13003 = vmatmul.mubr.bf16.vlgmr.msra.gmra.mxu1 %v20450_v1 }
 0x35e   : > { %v12259_v30 = vadd.f32 %v17828_v13, %v23470_v61  ;;  %12849 = vmatprep.mubr.bf16.mxu0 %v20455_v29  ;;  %13010 = vmatprep.mubr.bf16.mxu1 %v20458_v59  ;;  %v20456_v61 = vld [vmem:[%s26704_s2 + $0x170] ss:$156 sps:$4 sm:$0xff]  }
 0x35f   : > { %v17830_v16 = vpop.f32.mrf.mxu0  ;;  %18438 = vmatpush3.bf16.msra.mxu0 %v20514_v27  ;;  %v17942_v14 = vpop.f32.mrf.mxu1  ;;  %18550 = vmatpush3.bf16.msra.mxu1 %v20530_v41  ;;  %v20542_v29 = vld [vmem:[%s22823_s27 + $0x4a8] sm:$0xff]   ;;  %v20544_v27 = vld [vmem:[%s22823_s27 + $0x4e0] sm:$0xff]  }
 0x360   : > { %v23790_v45 = vadd.f32 %v17940_v57, %v12259_v30  ;;  %v17831_v50 = vadd.f32 %v17830_v16, %v17829_v9  ;;  %18439 = vmatprep.subr.bf16.mxu0 %v20527_v15  ;;  %v17943_v55 = vadd.f32 %v17942_v14, %v17941_v28  ;;  %18551 = vmatprep.subr.bf16.mxu1 %v20531_v48  ;;  %v20546_v48 = vld [vmem:[%s22823_s27 + $0x4a0] sm:$0xff]   ;;  %v20553_v57 = vld [vmem:[%s22823_s27 + $0x458] sm:$0xff]  }
 0x361   : > { %v17832_v60 = vpop.f32.mrf.mxu0  ;;  %v17944_v1 = vpop.f32.mrf.mxu1  ;;  %v20554_v30 = vld [vmem:[%s22823_s27 + $0x4d8] sm:$0xff]  }
 0x362   : > { %v12264_v20 = vadd.f32 %v17831_v50, %v23484_v12  ;;  %v20545_v12 = vld [vmem:[%s22823_s27 + $0x420] sm:$0xff]   ;;  %v20467_v16 = vld [vmem:[%s26704_s2 + $0x3dc] ss:$156 sps:$4 sm:$0xff]  }
 0x363   : > { %v17833_v17 = vpop.f32.mrf.mxu0  ;;  %18440 = vmatpush3.bf16.msra.mxu0 %v20529_v51  ;;  %v17945_v32 = vpop.f32.mrf.mxu1  ;;  %18552 = vmatpush3.bf16.msra.mxu1 %v20532_v54  ;;  %v20459_v51 = vld [vmem:[%s26704_s2 + $0x2a0] ss:$156 sps:$4 sm:$0xff]  }
 0x364   : > { %v23804_v59 = vadd.f32 %v17943_v55, %v12264_v20  ;;  %v17834_v3 = vadd.f32 %v17833_v17, %v17832_v60  ;;  %18441 = vmatprep.subr.bf16.mxu0 %v20539_v24  ;;  %v17946_v41 = vadd.f32 %v17945_v32, %v17944_v1  ;;  %18553 = vmatprep.subr.bf16.mxu1 %v20540_v36  ;;  %v20470_v50 = vld [vmem:[%s26704_s2 + $0x3e4] ss:$156 sps:$4 sm:$0xff]   ;;  %v20555_v55 = vld [vmem:[%s22823_s27 + $0x418] sm:$0xff]   ;;  %v20557_v17 = vld [vmem:[%s22823_s27 + $0x450] sm:$0xff]  }
 0x365   : > { %v17835_v13 = vpop.f32.mrf.mxu0  ;;  %12850 = vmatmul.mubr.bf16.gmra.mxu0 %v20453_v49  ;;  %v17947_v15 = vpop.f32.mrf.mxu1  ;;  %13011 = vmatmul.mubr.bf16.gmra.mxu1 %v20456_v61  ;;  %v20556_v60 = vld [vmem:[%s22823_s27 + $0x498] sm:$0xff]  }
 0x366   : > { %v12267_v34 = vadd.f32 %v17834_v3, %v23496_v18  ;;  %12857 = vmatprep.mubr.bf16.mxu0 %v20461_v40  ;;  %13018 = vmatprep.mubr.bf16.mxu1 %v20464_v4  ;;  %v20462_v18 = vld [vmem:[%s26704_s2 + $0x2a8] ss:$156 sps:$4 sm:$0xff]  }
 0x367   : > { %v17836_v9 = vpop.f32.mrf.mxu0  ;;  %18442 = vmatpush3.bf16.msra.mxu0 %v20541_v23  ;;  %v17948_v24 = vpop.f32.mrf.mxu1  ;;  %18554 = vmatpush3.bf16.msra.mxu1 %v20542_v29  ;;  %v20558_v23 = vld [vmem:[%s22823_s27 + $0x4d0] sm:$0xff]  }
 0x368   : > { %v23816_v28 = vadd.f32 %v17946_v41, %v12267_v34  ;;  %v17837_v54 = vadd.f32 %v17836_v9, %v17835_v13  ;;  %18443 = vmatprep.subr.bf16.mxu0 %v20543_v2  ;;  %v17949_v49 = vadd.f32 %v17948_v24, %v17947_v15  ;;  %18555 = vmatprep.subr.bf16.mxu1 %v20544_v27  ;;  %v20560_v27 = vld [vmem:[%s22823_s27 + $0x490] sm:$0xff]   ;;  %v20567_v41 = vld [vmem:[%s22823_s27 + $0x448] sm:$0xff]  }
 0x369   : > { %v17838_v36 = vpop.f32.mrf.mxu0  ;;  %v17950_v61 = vpop.f32.mrf.mxu1  ;;  %v20568_v34 = vld [vmem:[%s22823_s27 + $0x4c8] sm:$0xff]   ;;  %v20473_v9 = vld [vmem:[%s26704_s2 + $0x514] ss:$156 sps:$4 sm:$0xff]  }
 0x36a   : > { %v12272_v14 = vadd.f32 %v17837_v54, %v23510_v8  ;;  %v20559_v8 = vld [vmem:[%s22823_s27 + $0x410] sm:$0xff]   ;;  %v20476_v54 = vld [vmem:[%s26704_s2 + $0x51c] ss:$156 sps:$4 sm:$0xff]  }
 0x36b   : > { %v17839_v40 = vpop.f32.mrf.mxu0  ;;  %18444 = vmatpush3.bf16.msra.mxu0 %v20545_v12  ;;  %v17951_v1 = vpop.f32.mrf.mxu1  ;;  %18556 = vmatpush3.bf16.msra.mxu1 %v20546_v48  ;;  %v20465_v12 = vld [vmem:[%s26704_s2 + $0x3d8] ss:$156 sps:$4 sm:$0xff]  }
 0x36c   : > { %v23830_v4 = vadd.f32 %v17949_v49, %v12272_v14  ;;  %v17840_v20 = vadd.f32 %v17839_v40, %v17838_v36  ;;  %18445 = vmatprep.subr.bf16.mxu0 %v20553_v57  ;;  %v17952_v29 = vadd.f32 %v17951_v1, %v17950_v61  ;;  %18557 = vmatprep.subr.bf16.mxu1 %v20554_v30  ;;  %v20569_v49 = vld [vmem:[%s22823_s27 + $0x408] sm:$0xff]   ;;  %v20571_v40 = vld [vmem:[%s22823_s27 + $0x440] sm:$0xff]  }
 0x36d   : > { %v17841_v3 = vpop.f32.mrf.mxu0  ;;  %12858 = vmatmul.mubr.bf16.gmra.mxu0 %v20459_v51  ;;  %v17953_v2 = vpop.f32.mrf.mxu1  ;;  %13019 = vmatmul.mubr.bf16.gmra.mxu1 %v20462_v18  ;;  %v20570_v36 = vld [vmem:[%s22823_s27 + $0x488] sm:$0xff]  }
 0x36e   : > { %v12275_v32 = vadd.f32 %v17840_v20, %v23522_v33  ;;  %12865 = vmatprep.mubr.bf16.mxu0 %v20467_v16  ;;  %13026 = vmatprep.mubr.bf16.mxu1 %v20470_v50  ;;  %v20468_v33 = vld [vmem:[%s26704_s2 + $0x3e0] ss:$156 sps:$4 sm:$0xff]  }
 0x36f   : > { %v17842_v13 = vpop.f32.mrf.mxu0  ;;  %18446 = vmatpush3.bf16.msra.mxu0 %v20555_v55  ;;  %v17954_v57 = vpop.f32.mrf.mxu1  ;;  %18558 = vmatpush3.bf16.msra.mxu1 %v20556_v60  ;;  %v20572_v55 = vld [vmem:[%s22823_s27 + $0x4c0] sm:$0xff]  }
 0x370   : > { %v23842_v15 = vadd.f32 %v17952_v29, %v12275_v32  ;;  %v17843_v48 = vadd.f32 %v17842_v13, %v17841_v3  ;;  %18447 = vmatprep.subr.bf16.mxu0 %v20557_v17  ;;  %v17955_v51 = vadd.f32 %v17954_v57, %v17953_v2  ;;  %18559 = vmatprep.subr.bf16.mxu1 %v20558_v23  ;;  %v20574_v23 = vld [vmem:[%s22823_s27 + $0x480] sm:$0xff]   ;;  %v20471_v3 = vld [vmem:[%s26704_s2 + $0x510] ss:$156 sps:$4 sm:$0xff]  }
 0x371   : > { %v17844_v30 = vpop.f32.mrf.mxu0  ;;  %v17956_v18 = vpop.f32.mrf.mxu1  ;;  %v20482_v57 = vld [vmem:[%s26704_s2 + $0x654] ss:$156 sps:$4 sm:$0xff]  }
 0x372   : > { %v12280_v24 = vadd.f32 %v17843_v48, %v23536_v62  ;;  %v20573_v62 = vld [vmem:[%s22823_s27 + $0x400] sm:$0xff]  }
 0x373   : > { %v17845_v16 = vpop.f32.mrf.mxu0  ;;  %18448 = vmatpush3.bf16.msra.mxu0 %v20559_v8  ;;  %v17957_v61 = vpop.f32.mrf.mxu1  ;;  %18560 = vmatpush3.bf16.msra.mxu1 %v20560_v27  ;;  %v20474_v27 = vld [vmem:[%s26704_s2 + $0x518] ss:$156 sps:$4 sm:$0xff]  }
 0x374   : > { %v23856_v50 = vadd.f32 %v17955_v51, %v12280_v24  ;;  %v17846_v14 = vadd.f32 %v17845_v16, %v17844_v30  ;;  %18449 = vmatprep.subr.bf16.mxu0 %v20567_v41  ;;  %v17958_v60 = vadd.f32 %v17957_v61, %v17956_v18  ;;  %18561 = vmatprep.subr.bf16.mxu1 %v20568_v34  ;;  %v20477_v16 = vld [vmem:[%s26704_s2 + $0x648] ss:$156 sps:$4 sm:$0xff]   ;;  %v20480_v61 = vld [vmem:[%s26704_s2 + $0x650] ss:$156 sps:$4 sm:$0xff]  }
 0x375   : > { %v17847_v20 = vpop.f32.mrf.mxu0  ;;  %12866 = vmatmul.mubr.bf16.gmra.mxu0 %v20465_v12  ;;  %v17959_v17 = vpop.f32.mrf.mxu1  ;;  %13027 = vmatmul.mubr.bf16.gmra.mxu1 %v20468_v33 }
 0x376   : > { %v12283_v1 = vadd.f32 %v17846_v14, %v23546_v38  ;;  %12873 = vmatprep.mubr.bf16.mxu0 %v20473_v9  ;;  %13034 = vmatprep.mubr.bf16.mxu1 %v20476_v54  ;;  %v20479_v38 = vld [vmem:[%s26704_s2 + $0x64c] ss:$156 sps:$4 sm:$0xff]  }
 0x377   : > { %v17848_v29 = vpop.f32.mrf.mxu0  ;;  %18450 = vmatpush3.bf16.msra.mxu0 %v20569_v49  ;;  %v17960_v2 = vpop.f32.mrf.mxu1  ;;  %18562 = vmatpush3.bf16.msra.mxu1 %v20570_v36 }
 0x378   : > { %v23866_v8 = vadd.f32 %v17958_v60, %v12283_v1  ;;  %v17849_v32 = vadd.f32 %v17848_v29, %v17847_v20  ;;  %18451 = vmatprep.subr.bf16.mxu0 %v20571_v40  ;;  %v17961_v41 = vadd.f32 %v17960_v2, %v17959_v17  ;;  %18563 = vmatprep.subr.bf16.mxu1 %v20572_v55  ;;  %v20488_v1 = vld [vmem:[%s26704_s2 + $0x78c] ss:$156 sps:$4 sm:$0xff]  }
 0x379   : > { %v17850_v13 = vpop.f32.mrf.mxu0  ;;  %v17962_v34 = vpop.f32.mrf.mxu1 }
 0x37a   : > { %v12288_v12 = vadd.f32 %v17849_v32, %v23558_v44 }
 0x37b   : > { %v17851_v48 = vpop.f32.mrf.mxu0  ;;  %18452 = vmatpush3.bf16.msra.mxu0 %v20573_v62  ;;  %v17963_v51 = vpop.f32.mrf.mxu1  ;;  %18564 = vmatpush3.bf16.msra.mxu1 %v20574_v23 }
 0x37c   : > { %v23878_v33 = vadd.f32 %v17961_v41, %v12288_v12  ;;  %v17852_v9 = vadd.f32 %v17851_v48, %v17850_v13  ;;  %v17964_v30 = vadd.f32 %v17963_v51, %v17962_v34  ;;  %v20486_v34 = vld [vmem:[%s26704_s2 + $0x788] ss:$156 sps:$4 sm:$0xff]  }
 0x37d   : > { %v17853_v54 = vpop.f32.mrf.mxu0  ;;  %12874 = vmatmul.mubr.bf16.gmra.mxu0 %v20471_v3  ;;  %v17965_v18 = vpop.f32.mrf.mxu1  ;;  %13035 = vmatmul.mubr.bf16.gmra.mxu1 %v20474_v27 }
 0x37e   : > { %v12291_v24 = vadd.f32 %v17852_v9, %v23564_v37  ;;  %12881 = vmatprep.mubr.bf16.mxu0 %v20479_v38  ;;  %13042 = vmatprep.mubr.bf16.mxu1 %v20482_v57  ;;  %v20485_v37 = vld [vmem:[%s26704_s2 + $0x784] ss:$156 sps:$4 sm:$0xff]  }
 0x37f   : > { %v17854_v44 = vpop.f32.mrf.mxu0  ;;  %v17966_v14 = vpop.f32.mrf.mxu1 }
 0x380   : > { %v23884_v49 = vadd.f32 %v17964_v30, %v12291_v24  ;;  %v17855_v36 = vadd.f32 %v17854_v44, %v17853_v54  ;;  %v17967_v40 = vadd.f32 %v17966_v14, %v17965_v18  ;;  %v20494_v54 = vld [vmem:[%s26704_s2 + $0x8c4] ss:$156 sps:$4 sm:$0xff]  }
 0x381   : > { %v17856_v55 = vpop.f32.mrf.mxu0  ;;  %v17968_v20 = vpop.f32.mrf.mxu1 }
 0x382   : > { %v12296_v60 = vadd.f32 %v17855_v36, %v23576_v7  ;;  %v20483_v7 = vld [vmem:[%s26704_s2 + $0x780] ss:$156 sps:$4 sm:$0xff]  }
 0x383   : > { %v17857_v62 = vpop.f32.mrf.mxu0  ;;  %v17969_v29 = vpop.f32.mrf.mxu1 }
 0x384   : > { %v23896_v17 = vadd.f32 %v17967_v40, %v12296_v60  ;;  %v17858_v23 = vadd.f32 %v17857_v62, %v17856_v55  ;;  %v17970_v3 = vadd.f32 %v17969_v29, %v17968_v20  ;;  %v20492_v20 = vld [vmem:[%s26704_s2 + $0x8c0] ss:$156 sps:$4 sm:$0xff]  }
 0x385   : > { %v17859_v32 = vpop.f32.mrf.mxu0  ;;  %12882 = vmatmul.mubr.bf16.gmra.mxu0 %v20477_v16  ;;  %v17971_v27 = vpop.f32.mrf.mxu1  ;;  %13043 = vmatmul.mubr.bf16.gmra.mxu1 %v20480_v61 }
 0x386   : > { %v12299_v2 = vadd.f32 %v17858_v23, %v23582_v26  ;;  %12889 = vmatprep.mubr.bf16.mxu0 %v20485_v37  ;;  %13050 = vmatprep.mubr.bf16.mxu1 %v20488_v1  ;;  %v20491_v26 = vld [vmem:[%s26704_s2 + $0x8bc] ss:$156 sps:$4 sm:$0xff]  }
 0x387   : > { %v17860_v38 = vpop.f32.mrf.mxu0  ;;  %v17972_v12 = vpop.f32.mrf.mxu1 }
 0x388   : > { %v23902_v41 = vadd.f32 %v17970_v3, %v12299_v2  ;;  %v17861_v13 = vadd.f32 %v17860_v38, %v17859_v32  ;;  %v17973_v48 = vadd.f32 %v17972_v12, %v17971_v27  ;;  %v20500_v32 = vld [vmem:[%s26704_s2 + $0x9fc] ss:$156 sps:$4 sm:$0xff]  }
 0x389   : > { %v17862_v57 = vpop.f32.mrf.mxu0  ;;  %v17974_v51 = vpop.f32.mrf.mxu1 }
 0x38a   : > { %v12304_v9 = vadd.f32 %v17861_v13, %v23594_v52  ;;  %v20489_v52 = vld [vmem:[%s26704_s2 + $0x8b8] ss:$156 sps:$4 sm:$0xff]  }
 0x38b   : > { %v17863_v30 = vpop.f32.mrf.mxu0  ;;  %v17975_v44 = vpop.f32.mrf.mxu1 }
 0x38c   : > { %v23914_v24 = vadd.f32 %v17973_v48, %v12304_v9  ;;  %v17864_v18 = vadd.f32 %v17863_v30, %v17862_v57  ;;  %v17976_v16 = vadd.f32 %v17975_v44, %v17974_v51  ;;  %v20498_v51 = vld [vmem:[%s26704_s2 + $0x9f8] ss:$156 sps:$4 sm:$0xff]  }
 0x38d   : > { %v17865_v36 = vpop.f32.mrf.mxu0  ;;  %12890 = vmatmul.mubr.bf16.gmra.mxu0 %v20483_v7  ;;  %v17977_v61 = vpop.f32.mrf.mxu1  ;;  %13051 = vmatmul.mubr.bf16.gmra.mxu1 %v20486_v34 }
 0x38e   : > { %v12307_v14 = vadd.f32 %v17864_v18, %v23600_v0  ;;  %12897 = vmatprep.mubr.bf16.mxu0 %v20491_v26  ;;  %13058 = vmatprep.mubr.bf16.mxu1 %v20494_v54  ;;  %v20497_v0 = vld [vmem:[%s26704_s2 + $0x9f4] ss:$156 sps:$4 sm:$0xff]  }
 0x38f   : > { %v17866_v37 = vpop.f32.mrf.mxu0  ;;  %v17978_v60 = vpop.f32.mrf.mxu1 }
 0x390   : > { %v23920_v40 = vadd.f32 %v17976_v16, %v12307_v14  ;;  %v17867_v55 = vadd.f32 %v17866_v37, %v17865_v36  ;;  %v17979_v62 = vadd.f32 %v17978_v60, %v17977_v61  ;;  %v20506_v36 = vld [vmem:[%s26704_s2 + $0xb34] ss:$156 sps:$4 sm:$0xff]  }
 0x391   : > { %v17868_v1 = vpop.f32.mrf.mxu0  ;;  %v17980_v29 = vpop.f32.mrf.mxu1 }
 0x392   : > { %v12312_v23 = vadd.f32 %v17867_v55, %v23612_v22  ;;  %v20495_v22 = vld [vmem:[%s26704_s2 + $0x9f0] ss:$156 sps:$4 sm:$0xff]  }
 0x393   : > { %v17869_v3 = vpop.f32.mrf.mxu0  ;;  %v17981_v38 = vpop.f32.mrf.mxu1 }
 0x394   : > { %v23932_v2 = vadd.f32 %v17979_v62, %v12312_v23  ;;  %v17870_v27 = vadd.f32 %v17869_v3, %v17868_v1  ;;  %v17982_v7 = vadd.f32 %v17981_v38, %v17980_v29  ;;  %v20504_v29 = vld [vmem:[%s26704_s2 + $0xb30] ss:$156 sps:$4 sm:$0xff]  }
 0x395   : > { %v17871_v13 = vpop.f32.mrf.mxu0  ;;  %12898 = vmatmul.mubr.bf16.gmra.mxu0 %v20489_v52  ;;  %v17983_v34 = vpop.f32.mrf.mxu1  ;;  %13059 = vmatmul.mubr.bf16.gmra.mxu1 %v20492_v20 }
 0x396   : > { %v12315_v12 = vadd.f32 %v17870_v27, %v23618_v39  ;;  %12905 = vmatprep.mubr.bf16.mxu0 %v20497_v0  ;;  %13066 = vmatprep.mubr.bf16.mxu1 %v20500_v32  ;;  %v20503_v39 = vld [vmem:[%s26704_s2 + $0xb2c] ss:$156 sps:$4 sm:$0xff]  }
 0x397   : > { %v17872_v26 = vpop.f32.mrf.mxu0  ;;  %v17984_v9 = vpop.f32.mrf.mxu1 }
 0x398   : > { %v23938_v48 = vadd.f32 %v17982_v7, %v12315_v12  ;;  %v17873_v57 = vadd.f32 %v17872_v26, %v17871_v13  ;;  %v17985_v30 = vadd.f32 %v17984_v9, %v17983_v34  ;;  %v20512_v13 = vld [vmem:[%s26704_s2 + $0xc6c] ss:$156 sps:$4 sm:$0xff]  }
 0x399   : > { %v17874_v54 = vpop.f32.mrf.mxu0  ;;  %v17986_v44 = vpop.f32.mrf.mxu1 }
 0x39a   : > { %v12320_v18 = vadd.f32 %v17873_v57, %v23630_v63  ;;  %v20501_v63 = vld [vmem:[%s26704_s2 + $0xb28] ss:$156 sps:$4 sm:$0xff]  }
 0x39b   : > { %v17875_v16 = vpop.f32.mrf.mxu0  ;;  %v17987_v37 = vpop.f32.mrf.mxu1 }
 0x39c   : > { %v23950_v14 = vadd.f32 %v17985_v30, %v12320_v18  ;;  %v17876_v61 = vadd.f32 %v17875_v16, %v17874_v54  ;;  %v17988_v52 = vadd.f32 %v17987_v37, %v17986_v44  ;;  %v20510_v44 = vld [vmem:[%s26704_s2 + $0xc68] ss:$156 sps:$4 sm:$0xff]  }
 0x39d   : > { %v18005_v55 = vpop.f32.mrf.mxu0  ;;  %12906 = vmatmul.mubr.bf16.gmra.mxu0 %v20495_v22  ;;  %v18117_v20 = vpop.f32.mrf.mxu1  ;;  %13067 = vmatmul.mubr.bf16.gmra.mxu1 %v20498_v51 }
 0x39e   : > { %v12323_v60 = vadd.f32 %v17876_v61, %v23636_v25  ;;  %12913 = vmatprep.mubr.bf16.mxu0 %v20503_v39  ;;  %13074 = vmatprep.mubr.bf16.mxu1 %v20506_v36  ;;  %v20509_v25 = vld [vmem:[%s26704_s2 + $0xc64] ss:$156 sps:$4 sm:$0xff]  }
 0x39f   : > { %v18006_v0 = vpop.f32.mrf.mxu0  ;;  %v18118_v23 = vpop.f32.mrf.mxu1 }
 0x3a0   : > { %v23956_v62 = vadd.f32 %v17988_v52, %v12323_v60  ;;  %v18007_v1 = vadd.f32 %v18006_v0, %v18005_v55  ;;  %v18119_v3 = vadd.f32 %v18118_v23, %v18117_v20  ;;  %v20520_v55 = vld [vmem:[%s26704_s2 + $0xda4] ss:$156 sps:$4 sm:$0xff]  }
 0x3a1   : > { %v18008_v32 = vpop.f32.mrf.mxu0  ;;  %v18120_v38 = vpop.f32.mrf.mxu1 }
 0x3a2   : > { %v12522_v27 = vadd.f32 %v18007_v1, %v23648_v53  ;;  %v20507_v53 = vld [vmem:[%s26704_s2 + $0xc60] ss:$156 sps:$4 sm:$0xff]  }
 0x3a3   : > { %v18009_v7 = vpop.f32.mrf.mxu0  ;;  %v18121_v26 = vpop.f32.mrf.mxu1 }
 0x3a4   : > { %v23968_v12 = vadd.f32 %v18119_v3, %v12522_v27  ;;  %v18010_v34 = vadd.f32 %v18009_v7, %v18008_v32  ;;  %v18122_v22 = vadd.f32 %v18121_v26, %v18120_v38  ;;  %v20518_v38 = vld [vmem:[%s26704_s2 + $0xda0] ss:$156 sps:$4 sm:$0xff]  }
 0x3a5   : > { %v18011_v57 = vpop.f32.mrf.mxu0  ;;  %12914 = vmatmul.mubr.bf16.gmra.mxu0 %v20501_v63  ;;  %v18123_v51 = vpop.f32.mrf.mxu1  ;;  %13075 = vmatmul.mubr.bf16.gmra.mxu1 %v20504_v29  ;;  %v20641_v7 = vld [vmem:[%s22823_s27 + $0x578] sm:$0xff]  }
 0x3a6   : > { %v12525_v9 = vadd.f32 %v18010_v34, %v23654_v31  ;;  %12921 = vmatprep.mubr.bf16.mxu0 %v20509_v25  ;;  %13082 = vmatprep.mubr.bf16.mxu1 %v20512_v13  ;;  %v20517_v31 = vld [vmem:[%s26704_s2 + $0xd9c] ss:$156 sps:$4 sm:$0xff]  }
 0x3a7   : > { %v18012_v39 = vpop.f32.mrf.mxu0  ;;  %v18124_v18 = vpop.f32.mrf.mxu1  ;;  %v20515_v25 = vld [vmem:[%s26704_s2 + $0xd98] ss:$156 sps:$4 sm:$0xff]   ;;  %18661 = vmatprep.subr.bf16.mxu0 %v20641_v7 }
 0x3a8   : > { %v23974_v30 = vadd.f32 %v18122_v22, %v12525_v9  ;;  %v18013_v54 = vadd.f32 %v18012_v39, %v18011_v57  ;;  %v18125_v16 = vadd.f32 %v18124_v18, %v18123_v51  ;;  %v20526_v9 = vld [vmem:[%s26704_s2 + $0xedc] ss:$156 sps:$4 sm:$0xff]  }
 0x3a9   : > { %v18014_v36 = vpop.f32.mrf.mxu0  ;;  %v18126_v37 = vpop.f32.mrf.mxu1 }
 0x3aa   : > { %v12530_v61 = vadd.f32 %v18013_v54, %v23666_v5 }
 0x3ab   : > { %v18015_v52 = vpop.f32.mrf.mxu0  ;;  %v18127_v0 = vpop.f32.mrf.mxu1 }
 0x3ac   : > { %v23986_v60 = vadd.f32 %v18125_v16, %v12530_v61  ;;  %v18016_v20 = vadd.f32 %v18015_v52, %v18014_v36  ;;  %v18128_v63 = vadd.f32 %v18127_v0, %v18126_v37  ;;  %v20521_v16 = vld [vmem:[%s26704_s2 + $0xed0] ss:$156 sps:$4 sm:$0xff]   ;;  %v20524_v52 = vld [vmem:[%s26704_s2 + $0xed8] ss:$156 sps:$4 sm:$0xff]  }
 0x3ad   : > { %v18017_v1 = vpop.f32.mrf.mxu0  ;;  %12922 = vmatmul.mubr.bf16.gmra.mxu0 %v20507_v53  ;;  %v18129_v29 = vpop.f32.mrf.mxu1  ;;  %13083 = vmatmul.mubr.bf16.gmra.mxu1 %v20510_v44 }
 0x3ae   : > { %v12533_v23 = vadd.f32 %v18016_v20, %v23672_v19  ;;  %12929 = vmatprep.mubr.bf16.mxu0 %v20517_v31  ;;  %13090 = vmatprep.mubr.bf16.mxu1 %v20520_v55  ;;  %v20523_v19 = vld [vmem:[%s26704_s2 + $0xed4] ss:$156 sps:$4 sm:$0xff]  }
 0x3af   : > { %v18018_v5 = vpop.f32.mrf.mxu0  ;;  %v18130_v27 = vpop.f32.mrf.mxu1 }
 0x3b0   : > { %v23992_v3 = vadd.f32 %v18128_v63, %v12533_v23  ;;  %v18019_v32 = vadd.f32 %v18018_v5, %v18017_v1  ;;  %v18131_v13 = vadd.f32 %v18130_v27, %v18129_v29  ;;  %v20538_v23 = vld [vmem:[%s26704_s2 + $0x1014] ss:$156 sps:$4 sm:$0xff]  }
 0x3b1   : > { %v18020_v34 = vpop.f32.mrf.mxu0  ;;  %v18132_v22 = vpop.f32.mrf.mxu1 }
 0x3b2   : > { %v12538_v26 = vadd.f32 %v18019_v32, %v23685_v56  ;;  %v20656_v32 = vld [vmem:[%s22823_s27 + $0x5f8] sm:$0xff]  }
 0x3b3   : > { %v18021_v57 = vpop.f32.mrf.mxu0  ;;  %v18133_v53 = vpop.f32.mrf.mxu1  ;;  %18773 = vmatprep.subr.bf16.mxu1 %v20656_v32 }
 0x3b4   : > { %v24005_v51 = vadd.f32 %v18131_v13, %v12538_v26  ;;  %v18022_v39 = vadd.f32 %v18021_v57, %v18020_v34  ;;  %v18134_v54 = vadd.f32 %v18133_v53, %v18132_v22  ;;  %v20533_v22 = vld [vmem:[%s26704_s2 + $0x1008] ss:$156 sps:$4 sm:$0xff]   ;;  %v20536_v57 = vld [vmem:[%s26704_s2 + $0x1010] ss:$156 sps:$4 sm:$0xff]  }
 0x3b5   : > { %v18023_v18 = vpop.f32.mrf.mxu0  ;;  %12930 = vmatmul.mubr.bf16.gmra.mxu0 %v20515_v25  ;;  %v18135_v31 = vpop.f32.mrf.mxu1  ;;  %13091 = vmatmul.mubr.bf16.gmra.mxu1 %v20518_v38 }
 0x3b6   : > { %v12541_v44 = vadd.f32 %v18022_v39, %v23691_v58  ;;  %12937 = vmatprep.mubr.bf16.mxu0 %v20523_v19  ;;  %13098 = vmatprep.mubr.bf16.mxu1 %v20526_v9  ;;  %v20535_v58 = vld [vmem:[%s26704_s2 + $0x100c] ss:$156 sps:$4 sm:$0xff]   ;;  %v20549_v39 = vld [vmem:[%s26704_s2 + $0x1144] ss:$156 sps:$4 sm:$0xff]  }
 0x3b7   : > { %v18024_v56 = vpop.f32.mrf.mxu0  ;;  %v18136_v37 = vpop.f32.mrf.mxu1 }
 0x3b8   : > { %v24011_v36 = vadd.f32 %v18134_v54, %v12541_v44  ;;  %v18025_v61 = vadd.f32 %v18024_v56, %v18023_v18  ;;  %v18137_v55 = vadd.f32 %v18136_v37, %v18135_v31  ;;  %v20552_v44 = vld [vmem:[%s26704_s2 + $0x114c] ss:$156 sps:$4 sm:$0xff]  }
 0x3b9   : > { %v18026_v20 = vpop.f32.mrf.mxu0  ;;  %v18138_v63 = vpop.f32.mrf.mxu1 }
 0x3ba   : > { %v12546_v0 = vadd.f32 %v18025_v61, %v23703_v11 }
 0x3bb   : > { %v18027_v1 = vpop.f32.mrf.mxu0  ;;  %v18139_v25 = vpop.f32.mrf.mxu1 }
 0x3bc   : > { %v24023_v29 = vadd.f32 %v18137_v55, %v12546_v0  ;;  %v18028_v5 = vadd.f32 %v18027_v1, %v18026_v20  ;;  %v18140_v27 = vadd.f32 %v18139_v25, %v18138_v63  ;;  %v20547_v63 = vld [vmem:[%s26704_s2 + $0x1140] ss:$156 sps:$4 sm:$0xff]  }
 0x3bd   : > { %v18029_v38 = vpop.f32.mrf.mxu0  ;;  %12938 = vmatmul.mubr.bf16.gmra.mxu0 %v20521_v16  ;;  %v18141_v7 = vpop.f32.mrf.mxu1  ;;  %13099 = vmatmul.mubr.bf16.gmra.mxu1 %v20524_v52 }
 0x3be   : > { %v12549_v19 = vadd.f32 %v18028_v5, %v23707_v21  ;;  %12945 = vmatprep.mubr.bf16.mxu0 %v20535_v58  ;;  %13106 = vmatprep.mubr.bf16.mxu1 %v20538_v23  ;;  %v20550_v5 = vld [vmem:[%s26704_s2 + $0x1148] ss:$156 sps:$4 sm:$0xff]  }
 0x3bf   : > { %v18030_v11 = vpop.f32.mrf.mxu0  ;;  %v18142_v26 = vpop.f32.mrf.mxu1 }
 0x3c0   : > { %v24027_v13 = vadd.f32 %v18140_v27, %v12549_v19  ;;  %v18031_v34 = vadd.f32 %v18030_v11, %v18029_v38  ;;  %v18143_v9 = vadd.f32 %v18142_v26, %v18141_v7  ;;  %v20566_v38 = vld [vmem:[%s26704_s2 + $0x1284] ss:$156 sps:$4 sm:$0xff]  }
 0x3c1   : > { %v18032_v21 = vpop.f32.mrf.mxu0  ;;  %v18144_v54 = vpop.f32.mrf.mxu1 }
 0x3c2   : > { %v12554_v53 = vadd.f32 %v18031_v34, %v23722_v35 }
 0x3c3   : > { %v18033_v18 = vpop.f32.mrf.mxu0  ;;  %v18145_v16 = vpop.f32.mrf.mxu1 }
 0x3c4   : > { %v24042_v31 = vadd.f32 %v18143_v9, %v12554_v53  ;;  %v18034_v56 = vadd.f32 %v18033_v18, %v18032_v21  ;;  %v18146_v61 = vadd.f32 %v18145_v16, %v18144_v54  ;;  %v20561_v53 = vld [vmem:[%s26704_s2 + $0x1278] ss:$156 sps:$4 sm:$0xff]  }
 0x3c5   : > { %v18035_v37 = vpop.f32.mrf.mxu0  ;;  %12946 = vmatmul.mubr.bf16.gmra.mxu0 %v20533_v22  ;;  %v18147_v58 = vpop.f32.mrf.mxu1  ;;  %13107 = vmatmul.mubr.bf16.gmra.mxu1 %v20536_v57 }
 0x3c6   : > { %v12557_v52 = vadd.f32 %v18034_v56, %v23725_v46  ;;  %12953 = vmatprep.mubr.bf16.mxu0 %v20549_v39  ;;  %13114 = vmatprep.mubr.bf16.mxu1 %v20552_v44  ;;  %v20563_v46 = vld [vmem:[%s26704_s2 + $0x127c] ss:$156 sps:$4 sm:$0xff]  }
 0x3c7   : > { %v18036_v55 = vpop.f32.mrf.mxu0  ;;  %v18148_v0 = vpop.f32.mrf.mxu1  ;;  %v20564_v44 = vld [vmem:[%s26704_s2 + $0x1280] ss:$156 sps:$4 sm:$0xff]  }
 0x3c8   : > { %v24045_v35 = vadd.f32 %v18146_v61, %v12557_v52  ;;  %v18037_v20 = vadd.f32 %v18036_v55, %v18035_v37  ;;  %v18149_v1 = vadd.f32 %v18148_v0, %v18147_v58  ;;  %v20580_v37 = vld [vmem:[%s26704_s2 + $0x4c] ss:$156 sps:$4 sm:$0xff]  }
 0x3c9   : > { %v18038_v23 = vpop.f32.mrf.mxu0  ;;  %v18150_v32 = vpop.f32.mrf.mxu1 }
 0x3ca   : > { %v12562_v25 = vadd.f32 %v18037_v20, %v23740_v6 }
 0x3cb   : > { %v18039_v27 = vpop.f32.mrf.mxu0  ;;  %v18151_v11 = vpop.f32.mrf.mxu1 }
 0x3cc   : > { %v24060_v19 = vadd.f32 %v18149_v1, %v12562_v25  ;;  %v18040_v7 = vadd.f32 %v18039_v27, %v18038_v23  ;;  %v18152_v34 = vadd.f32 %v18151_v11, %v18150_v32  ;;  %v20575_v25 = vld [vmem:[%s26704_s2 + $0x40] ss:$156 sps:$4 sm:$0xff]  }
 0x3cd   : > { %v18041_v26 = vpop.f32.mrf.mxu0  ;;  %12954 = vmatmul.mubr.bf16.gmra.mxu0 %v20547_v63  ;;  %v18153_v57 = vpop.f32.mrf.mxu1  ;;  %13115 = vmatmul.mubr.bf16.gmra.mxu1 %v20550_v5 }
 0x3ce   : > { %v12565_v22 = vadd.f32 %v18040_v7, %v23743_v47  ;;  %12961 = vmatprep.mubr.bf16.mxu0 %v20563_v46  ;;  %13122 = vmatprep.mubr.bf16.mxu1 %v20566_v38  ;;  %v20577_v47 = vld [vmem:[%s26704_s2 + $0x44] ss:$156 sps:$4 sm:$0xff]   ;;  %v20583_v38 = vld [vmem:[%s26704_s2 + $0x17c] ss:$156 sps:$4 sm:$0xff]  }
 0x3cf   : > { %v18042_v9 = vpop.f32.mrf.mxu0  ;;  %v18154_v39 = vpop.f32.mrf.mxu1  ;;  %v20586_v7 = vld [vmem:[%s26704_s2 + $0x184] ss:$156 sps:$4 sm:$0xff]  }
 0x3d0   : > { %v24063_v6 = vadd.f32 %v18152_v34, %v12565_v22  ;;  %v18043_v21 = vadd.f32 %v18042_v9, %v18041_v26  ;;  %v18155_v54 = vadd.f32 %v18154_v39, %v18153_v57  ;;  %v20642_v22 = vld [vmem:[%s22823_s27 + $0x538] sm:$0xff]  }
 0x3d1   : > { %v18044_v18 = vpop.f32.mrf.mxu0  ;;  %v18156_v16 = vpop.f32.mrf.mxu1  ;;  %v20658_v57 = vld [vmem:[%s22823_s27 + $0x5b8] sm:$0xff]  }
 0x3d2   : > { %v12570_v56 = vadd.f32 %v18043_v21, %v23758_v43 }
 0x3d3   : > { %v18045_v61 = vpop.f32.mrf.mxu0  ;;  %v18157_v55 = vpop.f32.mrf.mxu1 }
 0x3d4   : > { %v24078_v52 = vadd.f32 %v18155_v54, %v12570_v56  ;;  %v18046_v58 = vadd.f32 %v18045_v61, %v18044_v18  ;;  %v18158_v20 = vadd.f32 %v18157_v55, %v18156_v16  ;;  %v20659_v54 = vld [vmem:[%s22823_s27 + $0x5f0] sm:$0xff]   ;;  %v20667_v61 = vld [vmem:[%s22823_s27 + $0x568] sm:$0xff]  }
 0x3d5   : > { %v18047_v0 = vpop.f32.mrf.mxu0  ;;  %12962 = vmatmul.mubr.bf16.gmra.mxu0 %v20561_v53  ;;  %v18159_v1 = vpop.f32.mrf.mxu1  ;;  %13123 = vmatmul.mubr.bf16.gmra.mxu1 %v20564_v44  ;;  %v20655_v53 = vld [vmem:[%s22823_s27 + $0x570] sm:$0xff]   ;;  %v20668_v55 = vld [vmem:[%s22823_s27 + $0x5e8] sm:$0xff]  }
 0x3d6   : > { %v12573_v63 = vadd.f32 %v18046_v58, %v23761_v10  ;;  %13163 = vmatprep.mubr.bf16.mxu0 %v20577_v47  ;;  %13324 = vmatprep.mubr.bf16.mxu1 %v20580_v37  ;;  %v20578_v10 = vld [vmem:[%s26704_s2 + $0x48] ss:$156 sps:$4 sm:$0xff]   ;;  %v20657_v47 = vld [vmem:[%s22823_s27 + $0x530] sm:$0xff]  }
 0x3d7   : > { %v18048_v43 = vpop.f32.mrf.mxu0  ;;  %v18160_v46 = vpop.f32.mrf.mxu1  ;;  %v20660_v16 = vld [vmem:[%s22823_s27 + $0x5b0] sm:$0xff]  }
 0x3d8   : > { %v24081_v23 = vadd.f32 %v18158_v20, %v12573_v63  ;;  %v18049_v5 = vadd.f32 %v18048_v43, %v18047_v0  ;;  %v18161_v32 = vadd.f32 %v18160_v46, %v18159_v1  ;;  %v20581_v58 = vld [vmem:[%s26704_s2 + $0x178] ss:$156 sps:$4 sm:$0xff]  }
 0x3d9   : > { %v18050_v27 = vpop.f32.mrf.mxu0  ;;  %v18162_v34 = vpop.f32.mrf.mxu1  ;;  %v20589_v1 = vld [vmem:[%s26704_s2 + $0x2b4] ss:$156 sps:$4 sm:$0xff]   ;;  %v20592_v46 = vld [vmem:[%s26704_s2 + $0x2bc] ss:$156 sps:$4 sm:$0xff]  }
 0x3da   : > { %v12578_v11 = vadd.f32 %v18049_v5, %v23778_v42 }
 0x3db   : > { %v18051_v26 = vpop.f32.mrf.mxu0  ;;  %v18163_v39 = vpop.f32.mrf.mxu1 }
 0x3dc   : > { %v24098_v9 = vadd.f32 %v18161_v32, %v12578_v11  ;;  %v18052_v21 = vadd.f32 %v18051_v26, %v18050_v27  ;;  %v18164_v18 = vadd.f32 %v18163_v39, %v18162_v34  ;;  %v20669_v27 = vld [vmem:[%s22823_s27 + $0x528] sm:$0xff]   ;;  %v20671_v26 = vld [vmem:[%s22823_s27 + $0x560] sm:$0xff]  }
 0x3dd   : > { %v18053_v44 = vpop.f32.mrf.mxu0  ;;  %13164 = vmatmul.mubr.bf16.vlgmr.msra.gmra.mxu0 %v20575_v25  ;;  %v18165_v42 = vpop.f32.mrf.mxu1  ;;  %13325 = vmatmul.mubr.bf16.vlgmr.msra.gmra.mxu1 %v20578_v10 }
 0x3de   : > { %v12581_v56 = vadd.f32 %v18052_v21, %v23790_v45  ;;  %13171 = vmatprep.mubr.bf16.mxu0 %v20583_v38  ;;  %13332 = vmatprep.mubr.bf16.mxu1 %v20586_v7  ;;  %v20584_v45 = vld [vmem:[%s26704_s2 + $0x180] ss:$156 sps:$4 sm:$0xff]   ;;  %v20670_v38 = vld [vmem:[%s22823_s27 + $0x5a8] sm:$0xff]  }
 0x3df   : > { %v18054_v37 = vpop.f32.mrf.mxu0  ;;  %18662 = vmatpush3.bf16.msra.mxu0 %v20642_v22  ;;  %v18166_v63 = vpop.f32.mrf.mxu1  ;;  %18774 = vmatpush3.bf16.msra.mxu1 %v20658_v57  ;;  %v20672_v22 = vld [vmem:[%s22823_s27 + $0x5e0] sm:$0xff]  }
 0x3e0   : > { %v24110_v20 = vadd.f32 %v18164_v18, %v12581_v56  ;;  %v18055_v0 = vadd.f32 %v18054_v37, %v18053_v44  ;;  %18663 = vmatprep.subr.bf16.mxu0 %v20655_v53  ;;  %v18167_v43 = vadd.f32 %v18166_v63, %v18165_v42  ;;  %18775 = vmatprep.subr.bf16.mxu1 %v20659_v54  ;;  %v20674_v54 = vld [vmem:[%s22823_s27 + $0x5a0] sm:$0xff]   ;;  %v20681_v18 = vld [vmem:[%s22823_s27 + $0x558] sm:$0xff]   ;;  %v20595_v37 = vld [vmem:[%s26704_s2 + $0x3ec] ss:$156 sps:$4 sm:$0xff]  }
 0x3e1   : > { %v18056_v5 = vpop.f32.mrf.mxu0  ;;  %v18168_v10 = vpop.f32.mrf.mxu1  ;;  %v20682_v56 = vld [vmem:[%s22823_s27 + $0x5d8] sm:$0xff]  }
 0x3e2   : > { %v12586_v25 = vadd.f32 %v18055_v0, %v23804_v59  ;;  %v20673_v59 = vld [vmem:[%s22823_s27 + $0x520] sm:$0xff]   ;;  %v20598_v0 = vld [vmem:[%s26704_s2 + $0x3f4] ss:$156 sps:$4 sm:$0xff]  }
 0x3e3   : > { %v18057_v32 = vpop.f32.mrf.mxu0  ;;  %18664 = vmatpush3.bf16.msra.mxu0 %v20657_v47  ;;  %v18169_v34 = vpop.f32.mrf.mxu1  ;;  %18776 = vmatpush3.bf16.msra.mxu1 %v20660_v16  ;;  %v20587_v47 = vld [vmem:[%s26704_s2 + $0x2b0] ss:$156 sps:$4 sm:$0xff]  }
 0x3e4   : > { %v24124_v7 = vadd.f32 %v18167_v43, %v12586_v25  ;;  %v18058_v11 = vadd.f32 %v18057_v32, %v18056_v5  ;;  %18665 = vmatprep.subr.bf16.mxu0 %v20667_v61  ;;  %v18170_v57 = vadd.f32 %v18169_v34, %v18168_v10  ;;  %18777 = vmatprep.subr.bf16.mxu1 %v20668_v55  ;;  %v20683_v43 = vld [vmem:[%s22823_s27 + $0x518] sm:$0xff]   ;;  %v20685_v32 = vld [vmem:[%s22823_s27 + $0x550] sm:$0xff]  }
 0x3e5   : > { %v18059_v21 = vpop.f32.mrf.mxu0  ;;  %13172 = vmatmul.mubr.bf16.gmra.mxu0 %v20581_v58  ;;  %v18171_v53 = vpop.f32.mrf.mxu1  ;;  %13333 = vmatmul.mubr.bf16.gmra.mxu1 %v20584_v45  ;;  %v20684_v5 = vld [vmem:[%s22823_s27 + $0x598] sm:$0xff]  }
 0x3e6   : > { %v12589_v39 = vadd.f32 %v18058_v11, %v23816_v28  ;;  %13179 = vmatprep.mubr.bf16.mxu0 %v20589_v1  ;;  %13340 = vmatprep.mubr.bf16.mxu1 %v20592_v46  ;;  %v20590_v28 = vld [vmem:[%s26704_s2 + $0x2b8] ss:$156 sps:$4 sm:$0xff]  }
 0x3e7   : > { %v18060_v44 = vpop.f32.mrf.mxu0  ;;  %18666 = vmatpush3.bf16.msra.mxu0 %v20669_v27  ;;  %v18172_v61 = vpop.f32.mrf.mxu1  ;;  %18778 = vmatpush3.bf16.msra.mxu1 %v20670_v38  ;;  %v20686_v27 = vld [vmem:[%s22823_s27 + $0x5d0] sm:$0xff]  }
 0x3e8   : > { %v24136_v42 = vadd.f32 %v18170_v57, %v12589_v39  ;;  %v18061_v16 = vadd.f32 %v18060_v44, %v18059_v21  ;;  %18667 = vmatprep.subr.bf16.mxu0 %v20671_v26  ;;  %v18173_v58 = vadd.f32 %v18172_v61, %v18171_v53  ;;  %18779 = vmatprep.subr.bf16.mxu1 %v20672_v22  ;;  %v20688_v22 = vld [vmem:[%s22823_s27 + $0x590] sm:$0xff]   ;;  %v20695_v57 = vld [vmem:[%s22823_s27 + $0x548] sm:$0xff]   ;;  %v20601_v44 = vld [vmem:[%s26704_s2 + $0x524] ss:$156 sps:$4 sm:$0xff]  }
 0x3e9   : > { %v18062_v55 = vpop.f32.mrf.mxu0  ;;  %v18174_v45 = vpop.f32.mrf.mxu1  ;;  %v20696_v39 = vld [vmem:[%s22823_s27 + $0x5c8] sm:$0xff]  }
 0x3ea   : > { %v12594_v63 = vadd.f32 %v18061_v16, %v23830_v4  ;;  %v20687_v4 = vld [vmem:[%s22823_s27 + $0x510] sm:$0xff]   ;;  %v20604_v16 = vld [vmem:[%s26704_s2 + $0x52c] ss:$156 sps:$4 sm:$0xff]  }
 0x3eb   : > { %v18063_v1 = vpop.f32.mrf.mxu0  ;;  %18668 = vmatpush3.bf16.msra.mxu0 %v20673_v59  ;;  %v18175_v10 = vpop.f32.mrf.mxu1  ;;  %18780 = vmatpush3.bf16.msra.mxu1 %v20674_v54  ;;  %v20593_v59 = vld [vmem:[%s26704_s2 + $0x3e8] ss:$156 sps:$4 sm:$0xff]  }
 0x3ec   : > { %v24150_v46 = vadd.f32 %v18173_v58, %v12594_v63  ;;  %v18064_v25 = vadd.f32 %v18063_v1, %v18062_v55  ;;  %18669 = vmatprep.subr.bf16.mxu0 %v20681_v18  ;;  %v18176_v38 = vadd.f32 %v18175_v10, %v18174_v45  ;;  %18781 = vmatprep.subr.bf16.mxu1 %v20682_v56  ;;  %v20697_v58 = vld [vmem:[%s22823_s27 + $0x508] sm:$0xff]   ;;  %v20699_v1 = vld [vmem:[%s22823_s27 + $0x540] sm:$0xff]  }
 0x3ed   : > { %v18065_v11 = vpop.f32.mrf.mxu0  ;;  %13180 = vmatmul.mubr.bf16.gmra.mxu0 %v20587_v47  ;;  %v18177_v26 = vpop.f32.mrf.mxu1  ;;  %13341 = vmatmul.mubr.bf16.gmra.mxu1 %v20590_v28  ;;  %v20698_v55 = vld [vmem:[%s22823_s27 + $0x588] sm:$0xff]  }
 0x3ee   : > { %v12597_v34 = vadd.f32 %v18064_v25, %v23842_v15  ;;  %13187 = vmatprep.mubr.bf16.mxu0 %v20595_v37  ;;  %13348 = vmatprep.mubr.bf16.mxu1 %v20598_v0  ;;  %v20596_v15 = vld [vmem:[%s26704_s2 + $0x3f0] ss:$156 sps:$4 sm:$0xff]  }
 0x3ef   : > { %v18066_v21 = vpop.f32.mrf.mxu0  ;;  %18670 = vmatpush3.bf16.msra.mxu0 %v20683_v43  ;;  %v18178_v18 = vpop.f32.mrf.mxu1  ;;  %18782 = vmatpush3.bf16.msra.mxu1 %v20684_v5  ;;  %v20700_v43 = vld [vmem:[%s22823_s27 + $0x5c0] sm:$0xff]  }
 0x3f0   : > { %v24162_v53 = vadd.f32 %v18176_v38, %v12597_v34  ;;  %v18067_v54 = vadd.f32 %v18066_v21, %v18065_v11  ;;  %18671 = vmatprep.subr.bf16.mxu0 %v20685_v32  ;;  %v18179_v47 = vadd.f32 %v18178_v18, %v18177_v26  ;;  %18783 = vmatprep.subr.bf16.mxu1 %v20686_v27  ;;  %v20702_v27 = vld [vmem:[%s22823_s27 + $0x580] sm:$0xff]  }
 0x3f1   : > { %v18068_v56 = vpop.f32.mrf.mxu0  ;;  %v18180_v28 = vpop.f32.mrf.mxu1  ;;  %v20599_v11 = vld [vmem:[%s26704_s2 + $0x520] ss:$156 sps:$4 sm:$0xff]  }
 0x3f2   : > { %v12602_v61 = vadd.f32 %v18067_v54, %v23856_v50  ;;  %v20701_v50 = vld [vmem:[%s22823_s27 + $0x500] sm:$0xff]  }
 0x3f3   : > { %v18069_v37 = vpop.f32.mrf.mxu0  ;;  %18672 = vmatpush3.bf16.msra.mxu0 %v20687_v4  ;;  %v18181_v45 = vpop.f32.mrf.mxu1  ;;  %18784 = vmatpush3.bf16.msra.mxu1 %v20688_v22  ;;  %v20602_v22 = vld [vmem:[%s26704_s2 + $0x528] ss:$156 sps:$4 sm:$0xff]  }
 0x3f4   : > { %v24176_v0 = vadd.f32 %v18179_v47, %v12602_v61  ;;  %v18070_v63 = vadd.f32 %v18069_v37, %v18068_v56  ;;  %18673 = vmatprep.subr.bf16.mxu0 %v20695_v57  ;;  %v18182_v5 = vadd.f32 %v18181_v45, %v18180_v28  ;;  %18785 = vmatprep.subr.bf16.mxu1 %v20696_v39  ;;  %v20610_v18 = vld [vmem:[%s26704_s2 + $0x664] ss:$156 sps:$4 sm:$0xff]   ;;  %v20605_v37 = vld [vmem:[%s26704_s2 + $0x658] ss:$156 sps:$4 sm:$0xff]  }
 0x3f5   : > { %v18071_v25 = vpop.f32.mrf.mxu0  ;;  %13188 = vmatmul.mubr.bf16.gmra.mxu0 %v20593_v59  ;;  %v18183_v32 = vpop.f32.mrf.mxu1  ;;  %13349 = vmatmul.mubr.bf16.gmra.mxu1 %v20596_v15  ;;  %v20608_v45 = vld [vmem:[%s26704_s2 + $0x660] ss:$156 sps:$4 sm:$0xff]  }
 0x3f6   : > { %v12605_v10 = vadd.f32 %v18070_v63, %v23866_v8  ;;  %13195 = vmatprep.mubr.bf16.mxu0 %v20601_v44  ;;  %13356 = vmatprep.mubr.bf16.mxu1 %v20604_v16  ;;  %v20607_v8 = vld [vmem:[%s26704_s2 + $0x65c] ss:$156 sps:$4 sm:$0xff]  }
 0x3f7   : > { %v18072_v38 = vpop.f32.mrf.mxu0  ;;  %18674 = vmatpush3.bf16.msra.mxu0 %v20697_v58  ;;  %v18184_v26 = vpop.f32.mrf.mxu1  ;;  %18786 = vmatpush3.bf16.msra.mxu1 %v20698_v55 }
 0x3f8   : > { %v24186_v4 = vadd.f32 %v18182_v5, %v12605_v10  ;;  %v18073_v34 = vadd.f32 %v18072_v38, %v18071_v25  ;;  %18675 = vmatprep.subr.bf16.mxu0 %v20699_v1  ;;  %v18185_v57 = vadd.f32 %v18184_v26, %v18183_v32  ;;  %18787 = vmatprep.subr.bf16.mxu1 %v20700_v43  ;;  %v20616_v10 = vld [vmem:[%s26704_s2 + $0x79c] ss:$156 sps:$4 sm:$0xff]  }
 0x3f9   : > { %v18074_v21 = vpop.f32.mrf.mxu0  ;;  %v18186_v39 = vpop.f32.mrf.mxu1 }
 0x3fa   : > { %v12610_v59 = vadd.f32 %v18073_v34, %v23878_v33 }
 0x3fb   : > { %v18075_v54 = vpop.f32.mrf.mxu0  ;;  %18676 = vmatpush3.bf16.msra.mxu0 %v20701_v50  ;;  %v18187_v47 = vpop.f32.mrf.mxu1  ;;  %18788 = vmatpush3.bf16.msra.mxu1 %v20702_v27 }
 0x3fc   : > { %v24198_v15 = vadd.f32 %v18185_v57, %v12610_v59  ;;  %v18076_v44 = vadd.f32 %v18075_v54, %v18074_v21  ;;  %v18188_v56 = vadd.f32 %v18187_v47, %v18186_v39  ;;  %v20614_v39 = vld [vmem:[%s26704_s2 + $0x798] ss:$156 sps:$4 sm:$0xff]  }
 0x3fd   : > { %v18077_v16 = vpop.f32.mrf.mxu0  ;;  %13196 = vmatmul.mubr.bf16.gmra.mxu0 %v20599_v11  ;;  %v18189_v28 = vpop.f32.mrf.mxu1  ;;  %13357 = vmatmul.mubr.bf16.gmra.mxu1 %v20602_v22 }
 0x3fe   : > { %v12613_v61 = vadd.f32 %v18076_v44, %v23884_v49  ;;  %13203 = vmatprep.mubr.bf16.mxu0 %v20607_v8  ;;  %13364 = vmatprep.mubr.bf16.mxu1 %v20610_v18  ;;  %v20613_v49 = vld [vmem:[%s26704_s2 + $0x794] ss:$156 sps:$4 sm:$0xff]  }
 0x3ff   : > { %v18078_v33 = vpop.f32.mrf.mxu0  ;;  %v18190_v63 = vpop.f32.mrf.mxu1 }
 0x400   : > { %v24204_v58 = vadd.f32 %v18188_v56, %v12613_v61  ;;  %v18079_v55 = vadd.f32 %v18078_v33, %v18077_v16  ;;  %v18191_v1 = vadd.f32 %v18190_v63, %v18189_v28  ;;  %v20622_v16 = vld [vmem:[%s26704_s2 + $0x8d4] ss:$156 sps:$4 sm:$0xff]  }
 0x401   : > { %v18080_v43 = vpop.f32.mrf.mxu0  ;;  %v18192_v25 = vpop.f32.mrf.mxu1 }
 0x402   : > { %v12618_v5 = vadd.f32 %v18079_v55, %v23896_v17  ;;  %v20611_v17 = vld [vmem:[%s26704_s2 + $0x790] ss:$156 sps:$4 sm:$0xff]  }
 0x403   : > { %v18081_v50 = vpop.f32.mrf.mxu0  ;;  %v18193_v38 = vpop.f32.mrf.mxu1 }
 0x404   : > { %v24216_v32 = vadd.f32 %v18191_v1, %v12618_v5  ;;  %v18082_v27 = vadd.f32 %v18081_v50, %v18080_v43  ;;  %v18194_v11 = vadd.f32 %v18193_v38, %v18192_v25  ;;  %v20620_v25 = vld [vmem:[%s26704_s2 + $0x8d0] ss:$156 sps:$4 sm:$0xff]  }
 0x405   : > { %v18083_v34 = vpop.f32.mrf.mxu0  ;;  %13204 = vmatmul.mubr.bf16.gmra.mxu0 %v20605_v37  ;;  %v18195_v22 = vpop.f32.mrf.mxu1  ;;  %13365 = vmatmul.mubr.bf16.gmra.mxu1 %v20608_v45 }
 0x406   : > { %v12621_v26 = vadd.f32 %v18082_v27, %v23902_v41  ;;  %13211 = vmatprep.mubr.bf16.mxu0 %v20613_v49  ;;  %13372 = vmatprep.mubr.bf16.mxu1 %v20616_v10  ;;  %v20619_v41 = vld [vmem:[%s26704_s2 + $0x8cc] ss:$156 sps:$4 sm:$0xff]  }
 0x407   : > { %v18084_v8 = vpop.f32.mrf.mxu0  ;;  %v18196_v59 = vpop.f32.mrf.mxu1 }
 0x408   : > { %v24222_v57 = vadd.f32 %v18194_v11, %v12621_v26  ;;  %v18085_v21 = vadd.f32 %v18084_v8, %v18083_v34  ;;  %v18197_v54 = vadd.f32 %v18196_v59, %v18195_v22  ;;  %v20628_v34 = vld [vmem:[%s26704_s2 + $0xa0c] ss:$156 sps:$4 sm:$0xff]  }
 0x409   : > { %v18086_v18 = vpop.f32.mrf.mxu0  ;;  %v18198_v47 = vpop.f32.mrf.mxu1 }
 0x40a   : > { %v12626_v44 = vadd.f32 %v18085_v21, %v23914_v24  ;;  %v20617_v24 = vld [vmem:[%s26704_s2 + $0x8c8] ss:$156 sps:$4 sm:$0xff]  }
 0x40b   : > { %v18087_v56 = vpop.f32.mrf.mxu0  ;;  %v18199_v33 = vpop.f32.mrf.mxu1 }
 0x40c   : > { %v24234_v61 = vadd.f32 %v18197_v54, %v12626_v44  ;;  %v18088_v28 = vadd.f32 %v18087_v56, %v18086_v18  ;;  %v18200_v37 = vadd.f32 %v18199_v33, %v18198_v47  ;;  %v20626_v47 = vld [vmem:[%s26704_s2 + $0xa08] ss:$156 sps:$4 sm:$0xff]  }
 0x40d   : > { %v18089_v55 = vpop.f32.mrf.mxu0  ;;  %13212 = vmatmul.mubr.bf16.gmra.mxu0 %v20611_v17  ;;  %v18201_v45 = vpop.f32.mrf.mxu1  ;;  %13373 = vmatmul.mubr.bf16.gmra.mxu1 %v20614_v39 }
 0x40e   : > { %v12629_v63 = vadd.f32 %v18088_v28, %v23920_v40  ;;  %13219 = vmatprep.mubr.bf16.mxu0 %v20619_v41  ;;  %13380 = vmatprep.mubr.bf16.mxu1 %v20622_v16  ;;  %v20625_v40 = vld [vmem:[%s26704_s2 + $0xa04] ss:$156 sps:$4 sm:$0xff]  }
 0x40f   : > { %v18090_v49 = vpop.f32.mrf.mxu0  ;;  %v18202_v5 = vpop.f32.mrf.mxu1 }
 0x410   : > { %v24240_v1 = vadd.f32 %v18200_v37, %v12629_v63  ;;  %v18091_v43 = vadd.f32 %v18090_v49, %v18089_v55  ;;  %v18203_v50 = vadd.f32 %v18202_v5, %v18201_v45  ;;  %v20634_v55 = vld [vmem:[%s26704_s2 + $0xb44] ss:$156 sps:$4 sm:$0xff]  }
 0x411   : > { %v18092_v10 = vpop.f32.mrf.mxu0  ;;  %v18204_v38 = vpop.f32.mrf.mxu1 }
 0x412   : > { %v12634_v27 = vadd.f32 %v18091_v43, %v23932_v2  ;;  %v20623_v2 = vld [vmem:[%s26704_s2 + $0xa00] ss:$156 sps:$4 sm:$0xff]  }
 0x413   : > { %v18093_v11 = vpop.f32.mrf.mxu0  ;;  %v18205_v8 = vpop.f32.mrf.mxu1 }
 0x414   : > { %v24252_v26 = vadd.f32 %v18203_v50, %v12634_v27  ;;  %v18094_v22 = vadd.f32 %v18093_v11, %v18092_v10  ;;  %v18206_v17 = vadd.f32 %v18205_v8, %v18204_v38  ;;  %v20632_v38 = vld [vmem:[%s26704_s2 + $0xb40] ss:$156 sps:$4 sm:$0xff]  }
 0x415   : > { %v18095_v21 = vpop.f32.mrf.mxu0  ;;  %13220 = vmatmul.mubr.bf16.gmra.mxu0 %v20617_v24  ;;  %v18207_v39 = vpop.f32.mrf.mxu1  ;;  %13381 = vmatmul.mubr.bf16.gmra.mxu1 %v20620_v25 }
 0x416   : > { %v12637_v59 = vadd.f32 %v18094_v22, %v23938_v48  ;;  %13227 = vmatprep.mubr.bf16.mxu0 %v20625_v40  ;;  %13388 = vmatprep.mubr.bf16.mxu1 %v20628_v34  ;;  %v20631_v48 = vld [vmem:[%s26704_s2 + $0xb3c] ss:$156 sps:$4 sm:$0xff]  }
 0x417   : > { %v18096_v41 = vpop.f32.mrf.mxu0  ;;  %v18208_v44 = vpop.f32.mrf.mxu1 }
 0x418   : > { %v24258_v54 = vadd.f32 %v18206_v17, %v12637_v59  ;;  %v18097_v18 = vadd.f32 %v18096_v41, %v18095_v21  ;;  %v18209_v56 = vadd.f32 %v18208_v44, %v18207_v39  ;;  %v20640_v21 = vld [vmem:[%s26704_s2 + $0xc7c] ss:$156 sps:$4 sm:$0xff]  }
 0x419   : > { %v18098_v16 = vpop.f32.mrf.mxu0  ;;  %v18210_v33 = vpop.f32.mrf.mxu1 }
 0x41a   : > { %v12642_v28 = vadd.f32 %v18097_v18, %v23950_v14  ;;  %v20629_v14 = vld [vmem:[%s26704_s2 + $0xb38] ss:$156 sps:$4 sm:$0xff]  }
 0x41b   : > { %v18099_v37 = vpop.f32.mrf.mxu0  ;;  %v18211_v49 = vpop.f32.mrf.mxu1 }
 0x41c   : > { %v24270_v63 = vadd.f32 %v18209_v56, %v12642_v28  ;;  %v18100_v45 = vadd.f32 %v18099_v37, %v18098_v16  ;;  %v18212_v24 = vadd.f32 %v18211_v49, %v18210_v33  ;;  %v20638_v33 = vld [vmem:[%s26704_s2 + $0xc78] ss:$156 sps:$4 sm:$0xff]  }
 0x41d   : > { %v18229_v43 = vpop.f32.mrf.mxu0  ;;  %13228 = vmatmul.mubr.bf16.gmra.mxu0 %v20623_v2  ;;  %v18341_v25 = vpop.f32.mrf.mxu1  ;;  %13389 = vmatmul.mubr.bf16.gmra.mxu1 %v20626_v47 }
 0x41e   : > { %v12645_v5 = vadd.f32 %v18100_v45, %v23956_v62  ;;  %13235 = vmatprep.mubr.bf16.mxu0 %v20631_v48  ;;  %13396 = vmatprep.mubr.bf16.mxu1 %v20634_v55  ;;  %v20637_v62 = vld [vmem:[%s26704_s2 + $0xc74] ss:$156 sps:$4 sm:$0xff]  }
 0x41f   : > { %v18230_v40 = vpop.f32.mrf.mxu0  ;;  %v18342_v27 = vpop.f32.mrf.mxu1 }
 0x420   : > { %v24276_v50 = vadd.f32 %v18212_v24, %v12645_v5  ;;  %v18231_v10 = vadd.f32 %v18230_v40, %v18229_v43  ;;  %v18343_v11 = vadd.f32 %v18342_v27, %v18341_v25  ;;  %v20648_v43 = vld [vmem:[%s26704_s2 + $0xdb4] ss:$156 sps:$4 sm:$0xff]  }
 0x421   : > { %v18232_v34 = vpop.f32.mrf.mxu0  ;;  %v18344_v8 = vpop.f32.mrf.mxu1 }
 0x422   : > { %v12844_v22 = vadd.f32 %v18231_v10, %v23968_v12  ;;  %v20635_v12 = vld [vmem:[%s26704_s2 + $0xc70] ss:$156 sps:$4 sm:$0xff]  }
 0x423   : > { %v18233_v17 = vpop.f32.mrf.mxu0  ;;  %v18345_v41 = vpop.f32.mrf.mxu1 }
 0x424   : > { %v24288_v59 = vadd.f32 %v18343_v11, %v12844_v22  ;;  %v18234_v39 = vadd.f32 %v18233_v17, %v18232_v34  ;;  %v18346_v2 = vadd.f32 %v18345_v41, %v18344_v8  ;;  %v20646_v8 = vld [vmem:[%s26704_s2 + $0xdb0] ss:$156 sps:$4 sm:$0xff]   ;;  %v20769_v17 = vld [vmem:[%s22823_s27 + $0x678] sm:$0xff]  }
 0x425   : > { %v18235_v18 = vpop.f32.mrf.mxu0  ;;  %13236 = vmatmul.mubr.bf16.gmra.mxu0 %v20629_v14  ;;  %v18347_v47 = vpop.f32.mrf.mxu1  ;;  %13397 = vmatmul.mubr.bf16.gmra.mxu1 %v20632_v38 }
 0x426   : > { %v12847_v44 = vadd.f32 %v18234_v39, %v23974_v30  ;;  %13243 = vmatprep.mubr.bf16.mxu0 %v20637_v62  ;;  %13404 = vmatprep.mubr.bf16.mxu1 %v20640_v21  ;;  %v20645_v30 = vld [vmem:[%s26704_s2 + $0xdac] ss:$156 sps:$4 sm:$0xff]  }
 0x427   : > { %v18236_v48 = vpop.f32.mrf.mxu0  ;;  %v18348_v28 = vpop.f32.mrf.mxu1  ;;  %v20643_v62 = vld [vmem:[%s26704_s2 + $0xda8] ss:$156 sps:$4 sm:$0xff]   ;;  %18885 = vmatprep.subr.bf16.mxu0 %v20769_v17 }
 0x428   : > { %v24294_v56 = vadd.f32 %v18346_v2, %v12847_v44  ;;  %v18237_v16 = vadd.f32 %v18236_v48, %v18235_v18  ;;  %v18349_v37 = vadd.f32 %v18348_v28, %v18347_v47  ;;  %v20651_v2 = vld [vmem:[%s26704_s2 + $0xee4] ss:$156 sps:$4 sm:$0xff]   ;;  %v20654_v44 = vld [vmem:[%s26704_s2 + $0xeec] ss:$156 sps:$4 sm:$0xff]  }
 0x429   : > { %v18238_v55 = vpop.f32.mrf.mxu0  ;;  %v18350_v49 = vpop.f32.mrf.mxu1 }
 0x42a   : > { %v12852_v45 = vadd.f32 %v18237_v16, %v23986_v60 }
 0x42b   : > { %v18239_v24 = vpop.f32.mrf.mxu0  ;;  %v18351_v40 = vpop.f32.mrf.mxu1 }
 0x42c   : > { %v24306_v5 = vadd.f32 %v18349_v37, %v12852_v45  ;;  %v18240_v25 = vadd.f32 %v18239_v24, %v18238_v55  ;;  %v18352_v14 = vadd.f32 %v18351_v40, %v18350_v49 }
 0x42d   : > { %v18241_v10 = vpop.f32.mrf.mxu0  ;;  %13244 = vmatmul.mubr.bf16.gmra.mxu0 %v20635_v12  ;;  %v18353_v38 = vpop.f32.mrf.mxu1  ;;  %13405 = vmatmul.mubr.bf16.gmra.mxu1 %v20638_v33 }
 0x42e   : > { %v12855_v27 = vadd.f32 %v18240_v25, %v23992_v3  ;;  %13251 = vmatprep.mubr.bf16.mxu0 %v20645_v30  ;;  %13412 = vmatprep.mubr.bf16.mxu1 %v20648_v43  ;;  %v20649_v43 = vld [vmem:[%s26704_s2 + $0xee0] ss:$156 sps:$4 sm:$0xff]  }
 0x42f   : > { %v18242_v60 = vpop.f32.mrf.mxu0  ;;  %v18354_v22 = vpop.f32.mrf.mxu1 }
 0x430   : > { %v24312_v11 = vadd.f32 %v18352_v14, %v12855_v27  ;;  %v18243_v34 = vadd.f32 %v18242_v60, %v18241_v10  ;;  %v18355_v21 = vadd.f32 %v18354_v22, %v18353_v38  ;;  %v20663_v14 = vld [vmem:[%s26704_s2 + $0x101c] ss:$156 sps:$4 sm:$0xff]   ;;  %v20666_v27 = vld [vmem:[%s26704_s2 + $0x1024] ss:$156 sps:$4 sm:$0xff]  }
 0x431   : > { %v18244_v3 = vpop.f32.mrf.mxu0  ;;  %v18356_v41 = vpop.f32.mrf.mxu1 }
 0x432   : > { %v12860_v39 = vadd.f32 %v18243_v34, %v24005_v51  ;;  %v20784_v34 = vld [vmem:[%s22823_s27 + $0x6f8] sm:$0xff]  }
 0x433   : > { %v18245_v18 = vpop.f32.mrf.mxu0  ;;  %v18357_v12 = vpop.f32.mrf.mxu1  ;;  %18997 = vmatprep.subr.bf16.mxu1 %v20784_v34  ;;  %v20691_v34 = vld [vmem:[%s26704_s2 + $0x128c] ss:$156 sps:$4 sm:$0xff]  }
 0x434   : > { %v24325_v47 = vadd.f32 %v18355_v21, %v12860_v39  ;;  %v18246_v48 = vadd.f32 %v18245_v18, %v18244_v3  ;;  %v18358_v16 = vadd.f32 %v18357_v12, %v18356_v41 }
 0x435   : > { %v18247_v28 = vpop.f32.mrf.mxu0  ;;  %13252 = vmatmul.mubr.bf16.gmra.mxu0 %v20643_v62  ;;  %v18359_v33 = vpop.f32.mrf.mxu1  ;;  %13413 = vmatmul.mubr.bf16.gmra.mxu1 %v20646_v8 }
 0x436   : > { %v12863_v51 = vadd.f32 %v18246_v48, %v24011_v36  ;;  %13259 = vmatprep.mubr.bf16.mxu0 %v20651_v2  ;;  %13420 = vmatprep.mubr.bf16.mxu1 %v20654_v44  ;;  %v20652_v36 = vld [vmem:[%s26704_s2 + $0xee8] ss:$156 sps:$4 sm:$0xff]   ;;  %v20661_v44 = vld [vmem:[%s26704_s2 + $0x1018] ss:$156 sps:$4 sm:$0xff]  }
 0x437   : > { %v18248_v30 = vpop.f32.mrf.mxu0  ;;  %v18360_v45 = vpop.f32.mrf.mxu1 }
 0x438   : > { %v24328_v37 = vadd.f32 %v18358_v16, %v12863_v51  ;;  %v18249_v55 = vadd.f32 %v18248_v30, %v18247_v28  ;;  %v18361_v49 = vadd.f32 %v18360_v45, %v18359_v33  ;;  %v20677_v16 = vld [vmem:[%s26704_s2 + $0x1154] ss:$156 sps:$4 sm:$0xff]   ;;  %v20680_v51 = vld [vmem:[%s26704_s2 + $0x115c] ss:$156 sps:$4 sm:$0xff]  }
 0x439   : > { %v18250_v24 = vpop.f32.mrf.mxu0  ;;  %v18362_v40 = vpop.f32.mrf.mxu1 }
 0x43a   : > { %v12868_v25 = vadd.f32 %v18249_v55, %v24023_v29 }
 0x43b   : > { %v18251_v10 = vpop.f32.mrf.mxu0  ;;  %v18363_v62 = vpop.f32.mrf.mxu1 }
 0x43c   : > { %v24343_v38 = vadd.f32 %v18361_v49, %v12868_v25  ;;  %v18252_v60 = vadd.f32 %v18251_v10, %v18250_v24  ;;  %v18364_v29 = vadd.f32 %v18363_v62, %v18362_v40 }
 0x43d   : > { %v18253_v22 = vpop.f32.mrf.mxu0  ;;  %13260 = vmatmul.mubr.bf16.gmra.mxu0 %v20649_v43  ;;  %v18365_v17 = vpop.f32.mrf.mxu1  ;;  %13421 = vmatmul.mubr.bf16.gmra.mxu1 %v20652_v36 }
 0x43e   : > { %v12871_v8 = vadd.f32 %v18252_v60, %v24027_v13  ;;  %13267 = vmatprep.mubr.bf16.mxu0 %v20663_v14  ;;  %13428 = vmatprep.mubr.bf16.mxu1 %v20666_v27  ;;  %v20664_v13 = vld [vmem:[%s26704_s2 + $0x1020] ss:$156 sps:$4 sm:$0xff]   ;;  %v20675_v27 = vld [vmem:[%s26704_s2 + $0x1150] ss:$156 sps:$4 sm:$0xff]  }
 0x43f   : > { %v18254_v21 = vpop.f32.mrf.mxu0  ;;  %v18366_v41 = vpop.f32.mrf.mxu1 }
 0x440   : > { %v24347_v3 = vadd.f32 %v18364_v29, %v12871_v8  ;;  %v18255_v39 = vadd.f32 %v18254_v21, %v18253_v22  ;;  %v18367_v2 = vadd.f32 %v18366_v41, %v18365_v17  ;;  %v20694_v22 = vld [vmem:[%s26704_s2 + $0x1294] ss:$156 sps:$4 sm:$0xff]  }
 0x441   : > { %v18256_v18 = vpop.f32.mrf.mxu0  ;;  %v18368_v12 = vpop.f32.mrf.mxu1 }
 0x442   : > { %v12876_v48 = vadd.f32 %v18255_v39, %v24042_v31 }
 0x443   : > { %v18257_v28 = vpop.f32.mrf.mxu0  ;;  %v18369_v55 = vpop.f32.mrf.mxu1 }
 0x444   : > { %v24362_v33 = vadd.f32 %v18367_v2, %v12876_v48  ;;  %v18258_v30 = vadd.f32 %v18257_v28, %v18256_v18  ;;  %v18370_v45 = vadd.f32 %v18369_v55, %v18368_v12  ;;  %v20689_v28 = vld [vmem:[%s26704_s2 + $0x1288] ss:$156 sps:$4 sm:$0xff]   ;;  %v20705_v55 = vld [vmem:[%s26704_s2 + $0x54] ss:$156 sps:$4 sm:$0xff]  }
 0x445   : > { %v18259_v31 = vpop.f32.mrf.mxu0  ;;  %13268 = vmatmul.mubr.bf16.gmra.mxu0 %v20661_v44  ;;  %v18371_v24 = vpop.f32.mrf.mxu1  ;;  %13429 = vmatmul.mubr.bf16.gmra.mxu1 %v20664_v13 }
 0x446   : > { %v12879_v49 = vadd.f32 %v18258_v30, %v24045_v35  ;;  %13275 = vmatprep.mubr.bf16.mxu0 %v20677_v16  ;;  %13436 = vmatprep.mubr.bf16.mxu1 %v20680_v51  ;;  %v20678_v35 = vld [vmem:[%s26704_s2 + $0x1158] ss:$156 sps:$4 sm:$0xff]  }
 0x447   : > { %v18260_v43 = vpop.f32.mrf.mxu0  ;;  %v18372_v36 = vpop.f32.mrf.mxu1 }
 0x448   : > { %v24365_v25 = vadd.f32 %v18370_v45, %v12879_v49  ;;  %v18261_v40 = vadd.f32 %v18260_v43, %v18259_v31  ;;  %v18373_v14 = vadd.f32 %v18372_v36, %v18371_v24  ;;  %v20708_v31 = vld [vmem:[%s26704_s2 + $0x5c] ss:$156 sps:$4 sm:$0xff]  }
 0x449   : > { %v18262_v10 = vpop.f32.mrf.mxu0  ;;  %v18374_v62 = vpop.f32.mrf.mxu1 }
 0x44a   : > { %v12884_v60 = vadd.f32 %v18261_v40, %v24060_v19 }
 0x44b   : > { %v18263_v29 = vpop.f32.mrf.mxu0  ;;  %v18375_v21 = vpop.f32.mrf.mxu1 }
 0x44c   : > { %v24380_v8 = vadd.f32 %v18373_v14, %v12884_v60  ;;  %v18264_v17 = vadd.f32 %v18263_v29, %v18262_v10  ;;  %v18376_v39 = vadd.f32 %v18375_v21, %v18374_v62  ;;  %v20703_v29 = vld [vmem:[%s26704_s2 + $0x50] ss:$156 sps:$4 sm:$0xff]  }
 0x44d   : > { %v18265_v19 = vpop.f32.mrf.mxu0  ;;  %13276 = vmatmul.mubr.bf16.gmra.mxu0 %v20675_v27  ;;  %v18377_v2 = vpop.f32.mrf.mxu1  ;;  %13437 = vmatmul.mubr.bf16.gmra.mxu1 %v20678_v35  ;;  %v20711_v21 = vld [vmem:[%s26704_s2 + $0x18c] ss:$156 sps:$4 sm:$0xff]  }
 0x44e   : > { %v12887_v41 = vadd.f32 %v18264_v17, %v24063_v6  ;;  %13283 = vmatprep.mubr.bf16.mxu0 %v20691_v34  ;;  %13444 = vmatprep.mubr.bf16.mxu1 %v20694_v22  ;;  %v20692_v6 = vld [vmem:[%s26704_s2 + $0x1290] ss:$156 sps:$4 sm:$0xff]   ;;  %v20706_v17 = vld [vmem:[%s26704_s2 + $0x58] ss:$156 sps:$4 sm:$0xff]  }
 0x44f   : > { %v18266_v18 = vpop.f32.mrf.mxu0  ;;  %v18378_v12 = vpop.f32.mrf.mxu1 }
 0x450   : > { %v24383_v44 = vadd.f32 %v18376_v39, %v12887_v41  ;;  %v18267_v48 = vadd.f32 %v18266_v18, %v18265_v19  ;;  %v18379_v13 = vadd.f32 %v18378_v12, %v18377_v2  ;;  %v20714_v19 = vld [vmem:[%s26704_s2 + $0x194] ss:$156 sps:$4 sm:$0xff]   ;;  %v20770_v41 = vld [vmem:[%s22823_s27 + $0x638] sm:$0xff]  }
 0x451   : > { %v18268_v16 = vpop.f32.mrf.mxu0  ;;  %v18380_v30 = vpop.f32.mrf.mxu1  ;;  %v20786_v12 = vld [vmem:[%s22823_s27 + $0x6b8] sm:$0xff]  }
 0x452   : > { %v12892_v51 = vadd.f32 %v18267_v48, %v24078_v52  ;;  %v20783_v48 = vld [vmem:[%s22823_s27 + $0x670] sm:$0xff]  }
 0x453   : > { %v18269_v45 = vpop.f32.mrf.mxu0  ;;  %v18381_v43 = vpop.f32.mrf.mxu1 }
 0x454   : > { %v24398_v49 = vadd.f32 %v18379_v13, %v12892_v51  ;;  %v18270_v24 = vadd.f32 %v18269_v45, %v18268_v16  ;;  %v18382_v40 = vadd.f32 %v18381_v43, %v18380_v30  ;;  %v20788_v43 = vld [vmem:[%s22823_s27 + $0x6b0] sm:$0xff]  }
 0x455   : > { %v18271_v52 = vpop.f32.mrf.mxu0  ;;  %13284 = vmatmul.mubr.bf16.gmra.mxu0 %v20689_v28  ;;  %v18383_v14 = vpop.f32.mrf.mxu1  ;;  %13445 = vmatmul.mubr.bf16.gmra.mxu1 %v20692_v6  ;;  %v20787_v28 = vld [vmem:[%s22823_s27 + $0x6f0] sm:$0xff]  }
 0x456   : > { %v12895_v36 = vadd.f32 %v18270_v24, %v24081_v23  ;;  %13485 = vmatprep.mubr.bf16.mxu0 %v20705_v55  ;;  %13646 = vmatprep.mubr.bf16.mxu1 %v20708_v31  ;;  %v20785_v55 = vld [vmem:[%s22823_s27 + $0x630] sm:$0xff]  }
 0x457   : > { %v18272_v10 = vpop.f32.mrf.mxu0  ;;  %v18384_v62 = vpop.f32.mrf.mxu1 }
 0x458   : > { %v24401_v27 = vadd.f32 %v18382_v40, %v12895_v36  ;;  %v18273_v60 = vadd.f32 %v18272_v10, %v18271_v52  ;;  %v18385_v35 = vadd.f32 %v18384_v62, %v18383_v14  ;;  %v20795_v40 = vld [vmem:[%s22823_s27 + $0x668] sm:$0xff]  }
 0x459   : > { %v18274_v34 = vpop.f32.mrf.mxu0  ;;  %v18386_v22 = vpop.f32.mrf.mxu1  ;;  %v20796_v14 = vld [vmem:[%s22823_s27 + $0x6e8] sm:$0xff]  }
 0x45a   : > { %v12900_v23 = vadd.f32 %v18273_v60, %v24098_v9  ;;  %v20712_v62 = vld [vmem:[%s26704_s2 + $0x190] ss:$156 sps:$4 sm:$0xff]  }
 0x45b   : > { %v18275_v39 = vpop.f32.mrf.mxu0  ;;  %v18387_v9 = vpop.f32.mrf.mxu1 }
 0x45c   : > { %v24417_v2 = vadd.f32 %v18385_v35, %v12900_v23  ;;  %v18276_v18 = vadd.f32 %v18275_v39, %v18274_v34  ;;  %v18388_v13 = vadd.f32 %v18387_v9, %v18386_v22  ;;  %v20717_v35 = vld [vmem:[%s26704_s2 + $0x2c4] ss:$156 sps:$4 sm:$0xff]   ;;  %v20797_v23 = vld [vmem:[%s22823_s27 + $0x628] sm:$0xff]  }
 0x45d   : > { %v18277_v16 = vpop.f32.mrf.mxu0  ;;  %13486 = vmatmul.mubr.bf16.vlgmr.msra.gmra.mxu0 %v20703_v29  ;;  %v18389_v30 = vpop.f32.mrf.mxu1  ;;  %13647 = vmatmul.mubr.bf16.vlgmr.msra.gmra.mxu1 %v20706_v17  ;;  %v20720_v29 = vld [vmem:[%s26704_s2 + $0x2cc] ss:$156 sps:$4 sm:$0xff]   ;;  %v20799_v39 = vld [vmem:[%s22823_s27 + $0x660] sm:$0xff]  }
 0x45e   : > { %v12903_v51 = vadd.f32 %v18276_v18, %v24110_v20  ;;  %13493 = vmatprep.mubr.bf16.mxu0 %v20711_v21  ;;  %13654 = vmatprep.mubr.bf16.mxu1 %v20714_v19  ;;  %v20709_v20 = vld [vmem:[%s26704_s2 + $0x188] ss:$156 sps:$4 sm:$0xff]  }
 0x45f   : > { %v18278_v6 = vpop.f32.mrf.mxu0  ;;  %18886 = vmatpush3.bf16.msra.mxu0 %v20770_v41  ;;  %v18390_v24 = vpop.f32.mrf.mxu1  ;;  %18998 = vmatpush3.bf16.msra.mxu1 %v20786_v12  ;;  %v20798_v21 = vld [vmem:[%s22823_s27 + $0x6a8] sm:$0xff]   ;;  %v20800_v18 = vld [vmem:[%s22823_s27 + $0x6e0] sm:$0xff]  }
 0x460   : > { %v24424_v45 = vadd.f32 %v18388_v13, %v12903_v51  ;;  %v18279_v31 = vadd.f32 %v18278_v6, %v18277_v16  ;;  %18887 = vmatprep.subr.bf16.mxu0 %v20783_v48  ;;  %v18391_v52 = vadd.f32 %v18390_v24, %v18389_v30  ;;  %18999 = vmatprep.subr.bf16.mxu1 %v20787_v28  ;;  %v20801_v13 = vld [vmem:[%s22823_s27 + $0x620] sm:$0xff]   ;;  %v20809_v6 = vld [vmem:[%s22823_s27 + $0x658] sm:$0xff]  }
 0x461   : > { %v18280_v36 = vpop.f32.mrf.mxu0  ;;  %v18392_v60 = vpop.f32.mrf.mxu1  ;;  %v20802_v30 = vld [vmem:[%s22823_s27 + $0x6a0] sm:$0xff]   ;;  %v20810_v24 = vld [vmem:[%s22823_s27 + $0x6d8] sm:$0xff]  }
 0x462   : > { %v12908_v10 = vadd.f32 %v18279_v31, %v24124_v7 }
 0x463   : > { %v18281_v34 = vpop.f32.mrf.mxu0  ;;  %18888 = vmatpush3.bf16.msra.mxu0 %v20785_v55  ;;  %v18393_v17 = vpop.f32.mrf.mxu1  ;;  %19000 = vmatpush3.bf16.msra.mxu1 %v20788_v43 }
 0x464   : > { %v24443_v22 = vadd.f32 %v18391_v52, %v12908_v10  ;;  %v18282_v7 = vadd.f32 %v18281_v34, %v18280_v36  ;;  %18889 = vmatprep.subr.bf16.mxu0 %v20795_v40  ;;  %v18394_v19 = vadd.f32 %v18393_v17, %v18392_v60  ;;  %19001 = vmatprep.subr.bf16.mxu1 %v20796_v14  ;;  %v20718_v52 = vld [vmem:[%s26704_s2 + $0x2c8] ss:$156 sps:$4 sm:$0xff]   ;;  %v20723_v36 = vld [vmem:[%s26704_s2 + $0x3fc] ss:$156 sps:$4 sm:$0xff]   ;;  %v20813_v34 = vld [vmem:[%s22823_s27 + $0x650] sm:$0xff]  }
 0x465   : > { %v18283_v41 = vpop.f32.mrf.mxu0  ;;  %13494 = vmatmul.mubr.bf16.gmra.mxu0 %v20709_v20  ;;  %v18395_v48 = vpop.f32.mrf.mxu1  ;;  %13655 = vmatmul.mubr.bf16.gmra.mxu1 %v20712_v62  ;;  %v20726_v14 = vld [vmem:[%s26704_s2 + $0x404] ss:$156 sps:$4 sm:$0xff]   ;;  %v20811_v10 = vld [vmem:[%s22823_s27 + $0x618] sm:$0xff]  }
 0x466   : > { %v12911_v9 = vadd.f32 %v18282_v7, %v24136_v42  ;;  %13501 = vmatprep.mubr.bf16.mxu0 %v20717_v35  ;;  %13662 = vmatprep.mubr.bf16.mxu1 %v20720_v29  ;;  %v20715_v42 = vld [vmem:[%s26704_s2 + $0x2c0] ss:$156 sps:$4 sm:$0xff]   ;;  %v20814_v7 = vld [vmem:[%s22823_s27 + $0x6d0] sm:$0xff]  }
 0x467   : > { %v18284_v12 = vpop.f32.mrf.mxu0  ;;  %18890 = vmatpush3.bf16.msra.mxu0 %v20797_v23  ;;  %v18396_v51 = vpop.f32.mrf.mxu1  ;;  %19002 = vmatpush3.bf16.msra.mxu1 %v20798_v21  ;;  %v20812_v35 = vld [vmem:[%s22823_s27 + $0x698] sm:$0xff]  }
 0x468   : > { %v24450_v16 = vadd.f32 %v18394_v19, %v12911_v9  ;;  %v18285_v28 = vadd.f32 %v18284_v12, %v18283_v41  ;;  %18891 = vmatprep.subr.bf16.mxu0 %v20799_v39  ;;  %v18397_v55 = vadd.f32 %v18396_v51, %v18395_v48  ;;  %19003 = vmatprep.subr.bf16.mxu1 %v20800_v18  ;;  %v20815_v19 = vld [vmem:[%s22823_s27 + $0x610] sm:$0xff]   ;;  %v20823_v12 = vld [vmem:[%s22823_s27 + $0x648] sm:$0xff]  }
 0x469   : > { %v18286_v31 = vpop.f32.mrf.mxu0  ;;  %v18398_v40 = vpop.f32.mrf.mxu1  ;;  %v20816_v48 = vld [vmem:[%s22823_s27 + $0x690] sm:$0xff]   ;;  %v20824_v51 = vld [vmem:[%s22823_s27 + $0x6c8] sm:$0xff]  }
 0x46a   : > { %v12916_v43 = vadd.f32 %v18285_v28, %v24150_v46 }
 0x46b   : > { %v18287_v20 = vpop.f32.mrf.mxu0  ;;  %18892 = vmatpush3.bf16.msra.mxu0 %v20801_v13  ;;  %v18399_v62 = vpop.f32.mrf.mxu1  ;;  %19004 = vmatpush3.bf16.msra.mxu1 %v20802_v30 }
 0x46c   : > { %v24469_v60 = vadd.f32 %v18397_v55, %v12916_v43  ;;  %v18288_v46 = vadd.f32 %v18287_v20, %v18286_v31  ;;  %18893 = vmatprep.subr.bf16.mxu0 %v20809_v6  ;;  %v18400_v29 = vadd.f32 %v18399_v62, %v18398_v40  ;;  %19005 = vmatprep.subr.bf16.mxu1 %v20810_v24  ;;  %v20724_v55 = vld [vmem:[%s26704_s2 + $0x400] ss:$156 sps:$4 sm:$0xff]   ;;  %v20729_v31 = vld [vmem:[%s26704_s2 + $0x534] ss:$156 sps:$4 sm:$0xff]   ;;  %v20825_v43 = vld [vmem:[%s22823_s27 + $0x608] sm:$0xff]  }
 0x46d   : > { %v18289_v23 = vpop.f32.mrf.mxu0  ;;  %13502 = vmatmul.mubr.bf16.gmra.mxu0 %v20715_v42  ;;  %v18401_v21 = vpop.f32.mrf.mxu1  ;;  %13663 = vmatmul.mubr.bf16.gmra.mxu1 %v20718_v52  ;;  %v20732_v24 = vld [vmem:[%s26704_s2 + $0x53c] ss:$156 sps:$4 sm:$0xff]   ;;  %v20827_v20 = vld [vmem:[%s22823_s27 + $0x640] sm:$0xff]  }
 0x46e   : > { %v12919_v17 = vadd.f32 %v18288_v46, %v24162_v53  ;;  %13509 = vmatprep.mubr.bf16.mxu0 %v20723_v36  ;;  %13670 = vmatprep.mubr.bf16.mxu1 %v20726_v14  ;;  %v20721_v53 = vld [vmem:[%s26704_s2 + $0x3f8] ss:$156 sps:$4 sm:$0xff]   ;;  %v20826_v36 = vld [vmem:[%s22823_s27 + $0x688] sm:$0xff]   ;;  %v20828_v46 = vld [vmem:[%s22823_s27 + $0x6c0] sm:$0xff]  }
 0x46f   : > { %v18290_v39 = vpop.f32.mrf.mxu0  ;;  %18894 = vmatpush3.bf16.msra.mxu0 %v20811_v10  ;;  %v18402_v9 = vpop.f32.mrf.mxu1  ;;  %19006 = vmatpush3.bf16.msra.mxu1 %v20812_v35 }
 0x470   : > { %v24476_v41 = vadd.f32 %v18400_v29, %v12919_v17  ;;  %v18291_v18 = vadd.f32 %v18290_v39, %v18289_v23  ;;  %18895 = vmatprep.subr.bf16.mxu0 %v20813_v34  ;;  %v18403_v13 = vadd.f32 %v18402_v9, %v18401_v21  ;;  %19007 = vmatprep.subr.bf16.mxu1 %v20814_v7  ;;  %v20829_v29 = vld [vmem:[%s22823_s27 + $0x600] sm:$0xff]  }
 0x471   : > { %v18292_v28 = vpop.f32.mrf.mxu0  ;;  %v18404_v6 = vpop.f32.mrf.mxu1  ;;  %v20830_v21 = vld [vmem:[%s22823_s27 + $0x680] sm:$0xff]  }
 0x472   : > { %v12924_v30 = vadd.f32 %v18291_v18, %v24176_v0 }
 0x473   : > { %v18293_v42 = vpop.f32.mrf.mxu0  ;;  %18896 = vmatpush3.bf16.msra.mxu0 %v20815_v19  ;;  %v18405_v52 = vpop.f32.mrf.mxu1  ;;  %19008 = vmatpush3.bf16.msra.mxu1 %v20816_v48  ;;  %v20730_v48 = vld [vmem:[%s26704_s2 + $0x538] ss:$156 sps:$4 sm:$0xff]  }
 0x474   : > { %v24495_v40 = vadd.f32 %v18403_v13, %v12924_v30  ;;  %v18294_v0 = vadd.f32 %v18293_v42, %v18292_v28  ;;  %18897 = vmatprep.subr.bf16.mxu0 %v20823_v12  ;;  %v18406_v14 = vadd.f32 %v18405_v52, %v18404_v6  ;;  %19009 = vmatprep.subr.bf16.mxu1 %v20824_v51  ;;  %v20735_v12 = vld [vmem:[%s26704_s2 + $0x66c] ss:$156 sps:$4 sm:$0xff]   ;;  %v20738_v28 = vld [vmem:[%s26704_s2 + $0x674] ss:$156 sps:$4 sm:$0xff]  }
 0x475   : > { %v18295_v10 = vpop.f32.mrf.mxu0  ;;  %13510 = vmatmul.mubr.bf16.gmra.mxu0 %v20721_v53  ;;  %v18407_v35 = vpop.f32.mrf.mxu1  ;;  %13671 = vmatmul.mubr.bf16.gmra.mxu1 %v20724_v55 }
 0x476   : > { %v12927_v62 = vadd.f32 %v18294_v0, %v24186_v4  ;;  %13517 = vmatprep.mubr.bf16.mxu0 %v20729_v31  ;;  %13678 = vmatprep.mubr.bf16.mxu1 %v20732_v24  ;;  %v20727_v4 = vld [vmem:[%s26704_s2 + $0x530] ss:$156 sps:$4 sm:$0xff]  }
 0x477   : > { %v18296_v34 = vpop.f32.mrf.mxu0  ;;  %18898 = vmatpush3.bf16.msra.mxu0 %v20825_v43  ;;  %v18408_v17 = vpop.f32.mrf.mxu1  ;;  %19010 = vmatpush3.bf16.msra.mxu1 %v20826_v36 }
 0x478   : > { %v24502_v23 = vadd.f32 %v18406_v14, %v12927_v62  ;;  %v18297_v7 = vadd.f32 %v18296_v34, %v18295_v10  ;;  %18899 = vmatprep.subr.bf16.mxu0 %v20827_v20  ;;  %v18409_v39 = vadd.f32 %v18408_v17, %v18407_v35  ;;  %19011 = vmatprep.subr.bf16.mxu1 %v20828_v46  ;;  %v20733_v20 = vld [vmem:[%s26704_s2 + $0x668] ss:$156 sps:$4 sm:$0xff]  }
 0x479   : > { %v18298_v19 = vpop.f32.mrf.mxu0  ;;  %v18410_v9 = vpop.f32.mrf.mxu1  ;;  %v20741_v46 = vld [vmem:[%s26704_s2 + $0x7a4] ss:$156 sps:$4 sm:$0xff]   ;;  %v20744_v35 = vld [vmem:[%s26704_s2 + $0x7ac] ss:$156 sps:$4 sm:$0xff]  }
 0x47a   : > { %v12932_v18 = vadd.f32 %v18297_v7, %v24198_v15 }
 0x47b   : > { %v18299_v13 = vpop.f32.mrf.mxu0  ;;  %18900 = vmatpush3.bf16.msra.mxu0 %v20829_v29  ;;  %v18411_v30 = vpop.f32.mrf.mxu1  ;;  %19012 = vmatpush3.bf16.msra.mxu1 %v20830_v21 }
 0x47c   : > { %v24518_v53 = vadd.f32 %v18409_v39, %v12932_v18  ;;  %v18300_v51 = vadd.f32 %v18299_v13, %v18298_v19  ;;  %v18412_v15 = vadd.f32 %v18411_v30, %v18410_v9  ;;  %v20739_v13 = vld [vmem:[%s26704_s2 + $0x7a0] ss:$156 sps:$4 sm:$0xff]  }
 0x47d   : > { %v18301_v6 = vpop.f32.mrf.mxu0  ;;  %13518 = vmatmul.mubr.bf16.gmra.mxu0 %v20727_v4  ;;  %v18413_v31 = vpop.f32.mrf.mxu1  ;;  %13679 = vmatmul.mubr.bf16.gmra.mxu1 %v20730_v48  ;;  %v20747_v30 = vld [vmem:[%s26704_s2 + $0x8dc] ss:$156 sps:$4 sm:$0xff]  }
 0x47e   : > { %v12935_v55 = vadd.f32 %v18300_v51, %v24204_v58  ;;  %13525 = vmatprep.mubr.bf16.mxu0 %v20735_v12  ;;  %13686 = vmatprep.mubr.bf16.mxu1 %v20738_v28  ;;  %v20736_v58 = vld [vmem:[%s26704_s2 + $0x670] ss:$156 sps:$4 sm:$0xff]  }
 0x47f   : > { %v18302_v42 = vpop.f32.mrf.mxu0  ;;  %v18414_v0 = vpop.f32.mrf.mxu1 }
 0x480   : > { %v24521_v24 = vadd.f32 %v18412_v15, %v12935_v55  ;;  %v18303_v43 = vadd.f32 %v18302_v42, %v18301_v6  ;;  %v18415_v52 = vadd.f32 %v18414_v0, %v18413_v31  ;;  %v20750_v6 = vld [vmem:[%s26704_s2 + $0x8e4] ss:$156 sps:$4 sm:$0xff]  }
 0x481   : > { %v18304_v36 = vpop.f32.mrf.mxu0  ;;  %v18416_v10 = vpop.f32.mrf.mxu1 }
 0x482   : > { %v12940_v14 = vadd.f32 %v18303_v43, %v24216_v32 }
 0x483   : > { %v18305_v62 = vpop.f32.mrf.mxu0  ;;  %v18417_v7 = vpop.f32.mrf.mxu1 }
 0x484   : > { %v24536_v34 = vadd.f32 %v18415_v52, %v12940_v14  ;;  %v18306_v29 = vadd.f32 %v18305_v62, %v18304_v36  ;;  %v18418_v17 = vadd.f32 %v18417_v7, %v18416_v10  ;;  %v20745_v62 = vld [vmem:[%s26704_s2 + $0x8d8] ss:$156 sps:$4 sm:$0xff]  }
 0x485   : > { %v18307_v32 = vpop.f32.mrf.mxu0  ;;  %13526 = vmatmul.mubr.bf16.gmra.mxu0 %v20733_v20  ;;  %v18419_v39 = vpop.f32.mrf.mxu1  ;;  %13687 = vmatmul.mubr.bf16.gmra.mxu1 %v20736_v58  ;;  %v20753_v7 = vld [vmem:[%s26704_s2 + $0xa14] ss:$156 sps:$4 sm:$0xff]  }
 0x486   : > { %v12943_v21 = vadd.f32 %v18306_v29, %v24222_v57  ;;  %13533 = vmatprep.mubr.bf16.mxu0 %v20741_v46  ;;  %13694 = vmatprep.mubr.bf16.mxu1 %v20744_v35  ;;  %v20742_v57 = vld [vmem:[%s26704_s2 + $0x7a8] ss:$156 sps:$4 sm:$0xff]  }
 0x487   : > { %v18308_v19 = vpop.f32.mrf.mxu0  ;;  %v18420_v9 = vpop.f32.mrf.mxu1 }
 0x488   : > { %v24539_v4 = vadd.f32 %v18418_v17, %v12943_v21  ;;  %v18309_v18 = vadd.f32 %v18308_v19, %v18307_v32  ;;  %v18421_v48 = vadd.f32 %v18420_v9, %v18419_v39  ;;  %v20756_v32 = vld [vmem:[%s26704_s2 + $0xa1c] ss:$156 sps:$4 sm:$0xff]  }
 0x489   : > { %v18310_v12 = vpop.f32.mrf.mxu0  ;;  %v18422_v51 = vpop.f32.mrf.mxu1 }
 0x48a   : > { %v12948_v28 = vadd.f32 %v18309_v18, %v24234_v61 }
 0x48b   : > { %v18311_v15 = vpop.f32.mrf.mxu0  ;;  %v18423_v42 = vpop.f32.mrf.mxu1 }
 0x48c   : > { %v24554_v55 = vadd.f32 %v18421_v48, %v12948_v28  ;;  %v18312_v31 = vadd.f32 %v18311_v15, %v18310_v12  ;;  %v18424_v43 = vadd.f32 %v18423_v42, %v18422_v51  ;;  %v20751_v15 = vld [vmem:[%s26704_s2 + $0xa10] ss:$156 sps:$4 sm:$0xff]  }
 0x48d   : > { %v18313_v61 = vpop.f32.mrf.mxu0  ;;  %13534 = vmatmul.mubr.bf16.gmra.mxu0 %v20739_v13  ;;  %v18425_v52 = vpop.f32.mrf.mxu1  ;;  %13695 = vmatmul.mubr.bf16.gmra.mxu1 %v20742_v57  ;;  %v20759_v42 = vld [vmem:[%s26704_s2 + $0xb4c] ss:$156 sps:$4 sm:$0xff]  }
 0x48e   : > { %v12951_v0 = vadd.f32 %v18312_v31, %v24240_v1  ;;  %13541 = vmatprep.mubr.bf16.mxu0 %v20747_v30  ;;  %13702 = vmatprep.mubr.bf16.mxu1 %v20750_v6  ;;  %v20748_v1 = vld [vmem:[%s26704_s2 + $0x8e0] ss:$156 sps:$4 sm:$0xff]  }
 0x48f   : > { %v18314_v36 = vpop.f32.mrf.mxu0  ;;  %v18426_v10 = vpop.f32.mrf.mxu1 }
 0x490   : > { %v24557_v20 = vadd.f32 %v18424_v43, %v12951_v0  ;;  %v18315_v14 = vadd.f32 %v18314_v36, %v18313_v61  ;;  %v18427_v58 = vadd.f32 %v18426_v10, %v18425_v52  ;;  %v20762_v61 = vld [vmem:[%s26704_s2 + $0xb54] ss:$156 sps:$4 sm:$0xff]  }
 0x491   : > { %v18316_v46 = vpop.f32.mrf.mxu0  ;;  %v18428_v29 = vpop.f32.mrf.mxu1 }
 0x492   : > { %v12956_v35 = vadd.f32 %v18315_v14, %v24252_v26 }
 0x493   : > { %v18317_v17 = vpop.f32.mrf.mxu0  ;;  %v18429_v19 = vpop.f32.mrf.mxu1 }
 0x494   : > { %v24572_v21 = vadd.f32 %v18427_v58, %v12956_v35  ;;  %v18318_v39 = vadd.f32 %v18317_v17, %v18316_v46  ;;  %v18430_v18 = vadd.f32 %v18429_v19, %v18428_v29  ;;  %v20757_v17 = vld [vmem:[%s26704_s2 + $0xb48] ss:$156 sps:$4 sm:$0xff]  }
 0x495   : > { %v18319_v26 = vpop.f32.mrf.mxu0  ;;  %13542 = vmatmul.mubr.bf16.gmra.mxu0 %v20745_v62  ;;  %v18431_v48 = vpop.f32.mrf.mxu1  ;;  %13703 = vmatmul.mubr.bf16.gmra.mxu1 %v20748_v1  ;;  %v20765_v19 = vld [vmem:[%s26704_s2 + $0xc84] ss:$156 sps:$4 sm:$0xff]  }
 0x496   : > { %v12959_v9 = vadd.f32 %v18318_v39, %v24258_v54  ;;  %13549 = vmatprep.mubr.bf16.mxu0 %v20753_v7  ;;  %13710 = vmatprep.mubr.bf16.mxu1 %v20756_v32  ;;  %v20754_v54 = vld [vmem:[%s26704_s2 + $0xa18] ss:$156 sps:$4 sm:$0xff]  }
 0x497   : > { %v18320_v12 = vpop.f32.mrf.mxu0  ;;  %v18432_v51 = vpop.f32.mrf.mxu1 }
 0x498   : > { %v24575_v13 = vadd.f32 %v18430_v18, %v12959_v9  ;;  %v18321_v28 = vadd.f32 %v18320_v12, %v18319_v26  ;;  %v18433_v57 = vadd.f32 %v18432_v51, %v18431_v48  ;;  %v20768_v26 = vld [vmem:[%s26704_s2 + $0xc8c] ss:$156 sps:$4 sm:$0xff]  }
 0x499   : > { %v18322_v30 = vpop.f32.mrf.mxu0  ;;  %v18434_v31 = vpop.f32.mrf.mxu1 }
 0x49a   : > { %v12964_v6 = vadd.f32 %v18321_v28, %v24270_v63 }
 0x49b   : > { %v18323_v43 = vpop.f32.mrf.mxu0  ;;  %v18435_v36 = vpop.f32.mrf.mxu1 }
 0x49c   : > { %v24590_v0 = vadd.f32 %v18433_v57, %v12964_v6  ;;  %v18324_v52 = vadd.f32 %v18323_v43, %v18322_v30  ;;  %v18436_v14 = vadd.f32 %v18435_v36, %v18434_v31  ;;  %v20763_v43 = vld [vmem:[%s26704_s2 + $0xc80] ss:$156 sps:$4 sm:$0xff]  }
 0x49d   : > { %v18453_v63 = vpop.f32.mrf.mxu0  ;;  %13550 = vmatmul.mubr.bf16.gmra.mxu0 %v20751_v15  ;;  %v18565_v58 = vpop.f32.mrf.mxu1  ;;  %13711 = vmatmul.mubr.bf16.gmra.mxu1 %v20754_v54  ;;  %v20773_v36 = vld [vmem:[%s26704_s2 + $0xdbc] ss:$156 sps:$4 sm:$0xff]  }
 0x49e   : > { %v12967_v10 = vadd.f32 %v18324_v52, %v24276_v50  ;;  %13557 = vmatprep.mubr.bf16.mxu0 %v20759_v42  ;;  %13718 = vmatprep.mubr.bf16.mxu1 %v20762_v61  ;;  %v20760_v50 = vld [vmem:[%s26704_s2 + $0xb50] ss:$156 sps:$4 sm:$0xff]  }
 0x49f   : > { %v18454_v46 = vpop.f32.mrf.mxu0  ;;  %v18566_v29 = vpop.f32.mrf.mxu1 }
 0x4a0   : > { %v24593_v62 = vadd.f32 %v18436_v14, %v12967_v10  ;;  %v18455_v35 = vadd.f32 %v18454_v46, %v18453_v63  ;;  %v18567_v1 = vadd.f32 %v18566_v29, %v18565_v58  ;;  %v20776_v63 = vld [vmem:[%s26704_s2 + $0xdc4] ss:$156 sps:$4 sm:$0xff]  }
 0x4a1   : > { %v18456_v7 = vpop.f32.mrf.mxu0  ;;  %v18568_v39 = vpop.f32.mrf.mxu1 }
 0x4a2   : > { %v13166_v32 = vadd.f32 %v18455_v35, %v24288_v59 }
 0x4a3   : > { %v18457_v18 = vpop.f32.mrf.mxu0  ;;  %v18569_v12 = vpop.f32.mrf.mxu1 }
 0x4a4   : > { %v24608_v9 = vadd.f32 %v18567_v1, %v13166_v32  ;;  %v18458_v48 = vadd.f32 %v18457_v18, %v18456_v7  ;;  %v18570_v28 = vadd.f32 %v18569_v12, %v18568_v39 }
 0x4a5   : > { %v18459_v59 = vpop.f32.mrf.mxu0  ;;  %13558 = vmatmul.mubr.bf16.gmra.mxu0 %v20757_v17  ;;  %v18571_v57 = vpop.f32.mrf.mxu1  ;;  %13719 = vmatmul.mubr.bf16.gmra.mxu1 %v20760_v50  ;;  %v20897_v50 = vld [vmem:[%s22823_s27 + $0x778] sm:$0xff]  }
 0x4a6   : > { %v13169_v51 = vadd.f32 %v18458_v48, %v24294_v56  ;;  %13565 = vmatprep.mubr.bf16.mxu0 %v20765_v19  ;;  %13726 = vmatprep.mubr.bf16.mxu1 %v20768_v26  ;;  %v20766_v56 = vld [vmem:[%s26704_s2 + $0xc88] ss:$156 sps:$4 sm:$0xff]   ;;  %v20771_v26 = vld [vmem:[%s26704_s2 + $0xdb8] ss:$156 sps:$4 sm:$0xff]  }
 0x4a7   : > { %v18460_v30 = vpop.f32.mrf.mxu0  ;;  %v18572_v31 = vpop.f32.mrf.mxu1  ;;  %19109 = vmatprep.subr.bf16.mxu0 %v20897_v50 }
 0x4a8   : > { %v24611_v15 = vadd.f32 %v18570_v28, %v13169_v51  ;;  %v18461_v6 = vadd.f32 %v18460_v30, %v18459_v59  ;;  %v18573_v54 = vadd.f32 %v18572_v31, %v18571_v57  ;;  %v20779_v28 = vld [vmem:[%s26704_s2 + $0xef4] ss:$156 sps:$4 sm:$0xff]   ;;  %v20782_v51 = vld [vmem:[%s26704_s2 + $0xefc] ss:$156 sps:$4 sm:$0xff]  }
 0x4a9   : > { %v18462_v42 = vpop.f32.mrf.mxu0  ;;  %v18574_v52 = vpop.f32.mrf.mxu1 }
 0x4aa   : > { %v13174_v61 = vadd.f32 %v18461_v6, %v24306_v5 }
 0x4ab   : > { %v18463_v14 = vpop.f32.mrf.mxu0  ;;  %v18575_v46 = vpop.f32.mrf.mxu1 }
 0x4ac   : > { %v24626_v10 = vadd.f32 %v18573_v54, %v13174_v61  ;;  %v18464_v58 = vadd.f32 %v18463_v14, %v18462_v42  ;;  %v18576_v5 = vadd.f32 %v18575_v46, %v18574_v52 }
 0x4ad   : > { %v18465_v35 = vpop.f32.mrf.mxu0  ;;  %13566 = vmatmul.mubr.bf16.gmra.mxu0 %v20763_v43  ;;  %v18577_v1 = vpop.f32.mrf.mxu1  ;;  %13727 = vmatmul.mubr.bf16.gmra.mxu1 %v20766_v56 }
 0x4ae   : > { %v13177_v29 = vadd.f32 %v18464_v58, %v24312_v11  ;;  %13573 = vmatprep.mubr.bf16.mxu0 %v20773_v36  ;;  %13734 = vmatprep.mubr.bf16.mxu1 %v20776_v63  ;;  %v20774_v11 = vld [vmem:[%s26704_s2 + $0xdc0] ss:$156 sps:$4 sm:$0xff]   ;;  %v20777_v63 = vld [vmem:[%s26704_s2 + $0xef0] ss:$156 sps:$4 sm:$0xff]  }
 0x4af   : > { %v18466_v7 = vpop.f32.mrf.mxu0  ;;  %v18578_v39 = vpop.f32.mrf.mxu1 }
 0x4b0   : > { %v24629_v17 = vadd.f32 %v18576_v5, %v13177_v29  ;;  %v18467_v32 = vadd.f32 %v18466_v7, %v18465_v35  ;;  %v18579_v19 = vadd.f32 %v18578_v39, %v18577_v1  ;;  %v20791_v5 = vld [vmem:[%s26704_s2 + $0x102c] ss:$156 sps:$4 sm:$0xff]   ;;  %v20794_v29 = vld [vmem:[%s26704_s2 + $0x1034] ss:$156 sps:$4 sm:$0xff]   ;;  %v20912_v39 = vld [vmem:[%s22823_s27 + $0x7f8] sm:$0xff]  }
 0x4b1   : > { %v18468_v18 = vpop.f32.mrf.mxu0  ;;  %v18580_v12 = vpop.f32.mrf.mxu1  ;;  %19221 = vmatprep.subr.bf16.mxu1 %v20912_v39  ;;  %v20819_v39 = vld [vmem:[%s26704_s2 + $0x129c] ss:$156 sps:$4 sm:$0xff]  }
 0x4b2   : > { %v13182_v48 = vadd.f32 %v18467_v32, %v24325_v47 }
 0x4b3   : > { %v18469_v59 = vpop.f32.mrf.mxu0  ;;  %v18581_v6 = vpop.f32.mrf.mxu1 }
 0x4b4   : > { %v24645_v57 = vadd.f32 %v18579_v19, %v13182_v48  ;;  %v18470_v30 = vadd.f32 %v18469_v59, %v18468_v18  ;;  %v18582_v47 = vadd.f32 %v18581_v6, %v18580_v12 }
 0x4b5   : > { %v18471_v31 = vpop.f32.mrf.mxu0  ;;  %13574 = vmatmul.mubr.bf16.gmra.mxu0 %v20771_v26  ;;  %v18583_v42 = vpop.f32.mrf.mxu1  ;;  %13735 = vmatmul.mubr.bf16.gmra.mxu1 %v20774_v11 }
 0x4b6   : > { %v13185_v54 = vadd.f32 %v18470_v30, %v24328_v37  ;;  %13581 = vmatprep.mubr.bf16.mxu0 %v20779_v28  ;;  %13742 = vmatprep.mubr.bf16.mxu1 %v20782_v51  ;;  %v20780_v37 = vld [vmem:[%s26704_s2 + $0xef8] ss:$156 sps:$4 sm:$0xff]   ;;  %v20789_v51 = vld [vmem:[%s26704_s2 + $0x1028] ss:$156 sps:$4 sm:$0xff]  }
 0x4b7   : > { %v18472_v43 = vpop.f32.mrf.mxu0  ;;  %v18584_v56 = vpop.f32.mrf.mxu1 }
 0x4b8   : > { %v24648_v61 = vadd.f32 %v18582_v47, %v13185_v54  ;;  %v18473_v52 = vadd.f32 %v18472_v43, %v18471_v31  ;;  %v18585_v36 = vadd.f32 %v18584_v56, %v18583_v42  ;;  %v20805_v47 = vld [vmem:[%s26704_s2 + $0x1164] ss:$156 sps:$4 sm:$0xff]   ;;  %v20808_v54 = vld [vmem:[%s26704_s2 + $0x116c] ss:$156 sps:$4 sm:$0xff]  }
 0x4b9   : > { %v18474_v14 = vpop.f32.mrf.mxu0  ;;  %v18586_v46 = vpop.f32.mrf.mxu1 }
 0x4ba   : > { %v13190_v58 = vadd.f32 %v18473_v52, %v24343_v38 }
 0x4bb   : > { %v18475_v35 = vpop.f32.mrf.mxu0  ;;  %v18587_v32 = vpop.f32.mrf.mxu1 }
 0x4bc   : > { %v24663_v1 = vadd.f32 %v18585_v36, %v13190_v58  ;;  %v18476_v7 = vadd.f32 %v18475_v35, %v18474_v14  ;;  %v18588_v38 = vadd.f32 %v18587_v32, %v18586_v46 }
 0x4bd   : > { %v18477_v50 = vpop.f32.mrf.mxu0  ;;  %13582 = vmatmul.mubr.bf16.gmra.mxu0 %v20777_v63  ;;  %v18589_v18 = vpop.f32.mrf.mxu1  ;;  %13743 = vmatmul.mubr.bf16.gmra.mxu1 %v20780_v37 }
 0x4be   : > { %v13193_v19 = vadd.f32 %v18476_v7, %v24347_v3  ;;  %13589 = vmatprep.mubr.bf16.mxu0 %v20791_v5  ;;  %13750 = vmatprep.mubr.bf16.mxu1 %v20794_v29  ;;  %v20792_v3 = vld [vmem:[%s26704_s2 + $0x1030] ss:$156 sps:$4 sm:$0xff]   ;;  %v20803_v29 = vld [vmem:[%s26704_s2 + $0x1160] ss:$156 sps:$4 sm:$0xff]  }
 0x4bf   : > { %v18478_v26 = vpop.f32.mrf.mxu0  ;;  %v18590_v11 = vpop.f32.mrf.mxu1 }
 0x4c0   : > { %v24667_v48 = vadd.f32 %v18588_v38, %v13193_v19  ;;  %v18479_v12 = vadd.f32 %v18478_v26, %v18477_v50  ;;  %v18591_v28 = vadd.f32 %v18590_v11, %v18589_v18  ;;  %v20822_v50 = vld [vmem:[%s26704_s2 + $0x12a4] ss:$156 sps:$4 sm:$0xff]  }
 0x4c1   : > { %v18480_v59 = vpop.f32.mrf.mxu0  ;;  %v18592_v6 = vpop.f32.mrf.mxu1 }
 0x4c2   : > { %v13198_v30 = vadd.f32 %v18479_v12, %v24362_v33 }
 0x4c3   : > { %v18481_v31 = vpop.f32.mrf.mxu0  ;;  %v18593_v52 = vpop.f32.mrf.mxu1 }
 0x4c4   : > { %v24682_v42 = vadd.f32 %v18591_v28, %v13198_v30  ;;  %v18482_v43 = vadd.f32 %v18481_v31, %v18480_v59  ;;  %v18594_v56 = vadd.f32 %v18593_v52, %v18592_v6  ;;  %v20817_v31 = vld [vmem:[%s26704_s2 + $0x1298] ss:$156 sps:$4 sm:$0xff]   ;;  %v20833_v52 = vld [vmem:[%s26704_s2 + $0x64] ss:$156 sps:$4 sm:$0xff]  }
 0x4c5   : > { %v18483_v33 = vpop.f32.mrf.mxu0  ;;  %13590 = vmatmul.mubr.bf16.gmra.mxu0 %v20789_v51  ;;  %v18595_v14 = vpop.f32.mrf.mxu1  ;;  %13751 = vmatmul.mubr.bf16.gmra.mxu1 %v20792_v3 }
 0x4c6   : > { %v13201_v36 = vadd.f32 %v18482_v43, %v24365_v25  ;;  %13597 = vmatprep.mubr.bf16.mxu0 %v20805_v47  ;;  %13758 = vmatprep.mubr.bf16.mxu1 %v20808_v54  ;;  %v20806_v25 = vld [vmem:[%s26704_s2 + $0x1168] ss:$156 sps:$4 sm:$0xff]  }
 0x4c7   : > { %v18484_v63 = vpop.f32.mrf.mxu0  ;;  %v18596_v37 = vpop.f32.mrf.mxu1 }
 0x4c8   : > { %v24685_v58 = vadd.f32 %v18594_v56, %v13201_v36  ;;  %v18485_v46 = vadd.f32 %v18484_v63, %v18483_v33  ;;  %v18597_v5 = vadd.f32 %v18596_v37, %v18595_v14  ;;  %v20836_v33 = vld [vmem:[%s26704_s2 + $0x6c] ss:$156 sps:$4 sm:$0xff]  }
 0x4c9   : > { %v18486_v35 = vpop.f32.mrf.mxu0  ;;  %v18598_v32 = vpop.f32.mrf.mxu1 }
 0x4ca   : > { %v13206_v7 = vadd.f32 %v18485_v46, %v24380_v8 }
 0x4cb   : > { %v18487_v38 = vpop.f32.mrf.mxu0  ;;  %v18599_v26 = vpop.f32.mrf.mxu1 }
 0x4cc   : > { %v24700_v19 = vadd.f32 %v18597_v5, %v13206_v7  ;;  %v18488_v18 = vadd.f32 %v18487_v38, %v18486_v35  ;;  %v18600_v12 = vadd.f32 %v18599_v26, %v18598_v32  ;;  %v20831_v38 = vld [vmem:[%s26704_s2 + $0x60] ss:$156 sps:$4 sm:$0xff]  }
 0x4cd   : > { %v18489_v8 = vpop.f32.mrf.mxu0  ;;  %13598 = vmatmul.mubr.bf16.gmra.mxu0 %v20803_v29  ;;  %v18601_v28 = vpop.f32.mrf.mxu1  ;;  %13759 = vmatmul.mubr.bf16.gmra.mxu1 %v20806_v25  ;;  %v20839_v26 = vld [vmem:[%s26704_s2 + $0x19c] ss:$156 sps:$4 sm:$0xff]  }
 0x4ce   : > { %v13209_v11 = vadd.f32 %v18488_v18, %v24383_v44  ;;  %13605 = vmatprep.mubr.bf16.mxu0 %v20819_v39  ;;  %13766 = vmatprep.mubr.bf16.mxu1 %v20822_v50  ;;  %v20820_v44 = vld [vmem:[%s26704_s2 + $0x12a0] ss:$156 sps:$4 sm:$0xff]   ;;  %v20834_v18 = vld [vmem:[%s26704_s2 + $0x68] ss:$156 sps:$4 sm:$0xff]  }
 0x4cf   : > { %v18490_v59 = vpop.f32.mrf.mxu0  ;;  %v18602_v6 = vpop.f32.mrf.mxu1 }
 0x4d0   : > { %v24703_v51 = vadd.f32 %v18600_v12, %v13209_v11  ;;  %v18491_v30 = vadd.f32 %v18490_v59, %v18489_v8  ;;  %v18603_v3 = vadd.f32 %v18602_v6, %v18601_v28  ;;  %v20842_v8 = vld [vmem:[%s26704_s2 + $0x1a4] ss:$156 sps:$4 sm:$0xff]   ;;  %v20898_v11 = vld [vmem:[%s22823_s27 + $0x738] sm:$0xff]  }
 0x4d1   : > { %v18492_v47 = vpop.f32.mrf.mxu0  ;;  %v18604_v43 = vpop.f32.mrf.mxu1  ;;  %v20914_v6 = vld [vmem:[%s22823_s27 + $0x7b8] sm:$0xff]  }
 0x4d2   : > { %v13214_v54 = vadd.f32 %v18491_v30, %v24398_v49  ;;  %v20911_v30 = vld [vmem:[%s22823_s27 + $0x770] sm:$0xff]  }
 0x4d3   : > { %v18493_v56 = vpop.f32.mrf.mxu0  ;;  %v18605_v63 = vpop.f32.mrf.mxu1 }
 0x4d4   : > { %v24718_v36 = vadd.f32 %v18603_v3, %v13214_v54  ;;  %v18494_v14 = vadd.f32 %v18493_v56, %v18492_v47  ;;  %v18606_v46 = vadd.f32 %v18605_v63, %v18604_v43  ;;  %v20916_v63 = vld [vmem:[%s22823_s27 + $0x7b0] sm:$0xff]  }
 0x4d5   : > { %v18495_v49 = vpop.f32.mrf.mxu0  ;;  %13606 = vmatmul.mubr.bf16.gmra.mxu0 %v20817_v31  ;;  %v18607_v5 = vpop.f32.mrf.mxu1  ;;  %13767 = vmatmul.mubr.bf16.gmra.mxu1 %v20820_v44  ;;  %v20915_v31 = vld [vmem:[%s22823_s27 + $0x7f0] sm:$0xff]  }
 0x4d6   : > { %v13217_v37 = vadd.f32 %v18494_v14, %v24401_v27  ;;  %13807 = vmatprep.mubr.bf16.mxu0 %v20833_v52  ;;  %13968 = vmatprep.mubr.bf16.mxu1 %v20836_v33  ;;  %v20913_v52 = vld [vmem:[%s22823_s27 + $0x730] sm:$0xff]  }
 0x4d7   : > { %v18496_v35 = vpop.f32.mrf.mxu0  ;;  %v18608_v32 = vpop.f32.mrf.mxu1 }
 0x4d8   : > { %v24721_v29 = vadd.f32 %v18606_v46, %v13217_v37  ;;  %v18497_v7 = vadd.f32 %v18496_v35, %v18495_v49  ;;  %v18609_v25 = vadd.f32 %v18608_v32, %v18607_v5  ;;  %v20923_v46 = vld [vmem:[%s22823_s27 + $0x768] sm:$0xff]   ;;  %v20840_v32 = vld [vmem:[%s26704_s2 + $0x1a0] ss:$156 sps:$4 sm:$0xff]  }
 0x4d9   : > { %v18498_v39 = vpop.f32.mrf.mxu0  ;;  %v18610_v50 = vpop.f32.mrf.mxu1  ;;  %v20924_v5 = vld [vmem:[%s22823_s27 + $0x7e8] sm:$0xff]  }
 0x4da   : > { %v13222_v27 = vadd.f32 %v18497_v7, %v24417_v2 }
 0x4db   : > { %v18499_v12 = vpop.f32.mrf.mxu0  ;;  %v18611_v2 = vpop.f32.mrf.mxu1 }
 0x4dc   : > { %v24737_v28 = vadd.f32 %v18609_v25, %v13222_v27  ;;  %v18500_v59 = vadd.f32 %v18499_v12, %v18498_v39  ;;  %v18612_v3 = vadd.f32 %v18611_v2, %v18610_v50  ;;  %v20845_v25 = vld [vmem:[%s26704_s2 + $0x2d4] ss:$156 sps:$4 sm:$0xff]   ;;  %v20925_v27 = vld [vmem:[%s22823_s27 + $0x728] sm:$0xff]   ;;  %v20927_v12 = vld [vmem:[%s22823_s27 + $0x760] sm:$0xff]  }
 0x4dd   : > { %v18501_v47 = vpop.f32.mrf.mxu0  ;;  %13808 = vmatmul.mubr.bf16.vlgmr.msra.gmra.mxu0 %v20831_v38  ;;  %v18613_v43 = vpop.f32.mrf.mxu1  ;;  %13969 = vmatmul.mubr.bf16.vlgmr.msra.gmra.mxu1 %v20834_v18  ;;  %v20848_v38 = vld [vmem:[%s26704_s2 + $0x2dc] ss:$156 sps:$4 sm:$0xff]  }
 0x4de   : > { %v13225_v54 = vadd.f32 %v18500_v59, %v24424_v45  ;;  %13815 = vmatprep.mubr.bf16.mxu0 %v20839_v26  ;;  %13976 = vmatprep.mubr.bf16.mxu1 %v20842_v8  ;;  %v20837_v45 = vld [vmem:[%s26704_s2 + $0x198] ss:$156 sps:$4 sm:$0xff]   ;;  %v20926_v26 = vld [vmem:[%s22823_s27 + $0x7a8] sm:$0xff]   ;;  %v20928_v59 = vld [vmem:[%s22823_s27 + $0x7e0] sm:$0xff]  }
 0x4df   : > { %v18502_v44 = vpop.f32.mrf.mxu0  ;;  %19110 = vmatpush3.bf16.msra.mxu0 %v20898_v11  ;;  %v18614_v14 = vpop.f32.mrf.mxu1  ;;  %19222 = vmatpush3.bf16.msra.mxu1 %v20914_v6 }
 0x4e0   : > { %v24744_v56 = vadd.f32 %v18612_v3, %v13225_v54  ;;  %v18503_v33 = vadd.f32 %v18502_v44, %v18501_v47  ;;  %19111 = vmatprep.subr.bf16.mxu0 %v20911_v30  ;;  %v18615_v49 = vadd.f32 %v18614_v14, %v18613_v43  ;;  %19223 = vmatprep.subr.bf16.mxu1 %v20915_v31  ;;  %v20929_v3 = vld [vmem:[%s22823_s27 + $0x720] sm:$0xff]   ;;  %v20937_v44 = vld [vmem:[%s22823_s27 + $0x758] sm:$0xff]  }
 0x4e1   : > { %v18504_v37 = vpop.f32.mrf.mxu0  ;;  %v18616_v7 = vpop.f32.mrf.mxu1  ;;  %v20930_v43 = vld [vmem:[%s22823_s27 + $0x7a0] sm:$0xff]   ;;  %v20938_v14 = vld [vmem:[%s22823_s27 + $0x7d8] sm:$0xff]  }
 0x4e2   : > { %v13230_v35 = vadd.f32 %v18503_v33, %v24443_v22 }
 0x4e3   : > { %v18505_v39 = vpop.f32.mrf.mxu0  ;;  %19112 = vmatpush3.bf16.msra.mxu0 %v20913_v52  ;;  %v18617_v18 = vpop.f32.mrf.mxu1  ;;  %19224 = vmatpush3.bf16.msra.mxu1 %v20916_v63 }
 0x4e4   : > { %v24763_v50 = vadd.f32 %v18615_v49, %v13230_v35  ;;  %v18506_v22 = vadd.f32 %v18505_v39, %v18504_v37  ;;  %19113 = vmatprep.subr.bf16.mxu0 %v20923_v46  ;;  %v18618_v8 = vadd.f32 %v18617_v18, %v18616_v7  ;;  %19225 = vmatprep.subr.bf16.mxu1 %v20924_v5  ;;  %v20846_v49 = vld [vmem:[%s26704_s2 + $0x2d8] ss:$156 sps:$4 sm:$0xff]   ;;  %v20851_v37 = vld [vmem:[%s26704_s2 + $0x40c] ss:$156 sps:$4 sm:$0xff]  }
 0x4e5   : > { %v18507_v11 = vpop.f32.mrf.mxu0  ;;  %13816 = vmatmul.mubr.bf16.gmra.mxu0 %v20837_v45  ;;  %v18619_v30 = vpop.f32.mrf.mxu1  ;;  %13977 = vmatmul.mubr.bf16.gmra.mxu1 %v20840_v32  ;;  %v20854_v5 = vld [vmem:[%s26704_s2 + $0x414] ss:$156 sps:$4 sm:$0xff]   ;;  %v20939_v35 = vld [vmem:[%s22823_s27 + $0x718] sm:$0xff]  }
 0x4e6   : > { %v13233_v2 = vadd.f32 %v18506_v22, %v24450_v16  ;;  %13823 = vmatprep.mubr.bf16.mxu0 %v20845_v25  ;;  %13984 = vmatprep.mubr.bf16.mxu1 %v20848_v38  ;;  %v20843_v16 = vld [vmem:[%s26704_s2 + $0x2d0] ss:$156 sps:$4 sm:$0xff]   ;;  %v20940_v25 = vld [vmem:[%s22823_s27 + $0x798] sm:$0xff]  }
 0x4e7   : > { %v18508_v6 = vpop.f32.mrf.mxu0  ;;  %19114 = vmatpush3.bf16.msra.mxu0 %v20925_v27  ;;  %v18620_v54 = vpop.f32.mrf.mxu1  ;;  %19226 = vmatpush3.bf16.msra.mxu1 %v20926_v26  ;;  %v20941_v39 = vld [vmem:[%s22823_s27 + $0x750] sm:$0xff]  }
 0x4e8   : > { %v24770_v47 = vadd.f32 %v18618_v8, %v13233_v2  ;;  %v18509_v31 = vadd.f32 %v18508_v6, %v18507_v11  ;;  %19115 = vmatprep.subr.bf16.mxu0 %v20927_v12  ;;  %v18621_v52 = vadd.f32 %v18620_v54, %v18619_v30  ;;  %19227 = vmatprep.subr.bf16.mxu1 %v20928_v59  ;;  %v20942_v22 = vld [vmem:[%s22823_s27 + $0x7d0] sm:$0xff]   ;;  %v20951_v6 = vld [vmem:[%s22823_s27 + $0x748] sm:$0xff]  }
 0x4e9   : > { %v18510_v33 = vpop.f32.mrf.mxu0  ;;  %v18622_v46 = vpop.f32.mrf.mxu1  ;;  %v20943_v8 = vld [vmem:[%s22823_s27 + $0x710] sm:$0xff]   ;;  %v20952_v54 = vld [vmem:[%s22823_s27 + $0x7c8] sm:$0xff]  }
 0x4ea   : > { %v13238_v63 = vadd.f32 %v18509_v31, %v24469_v60  ;;  %v20944_v30 = vld [vmem:[%s22823_s27 + $0x790] sm:$0xff]  }
 0x4eb   : > { %v18511_v45 = vpop.f32.mrf.mxu0  ;;  %19116 = vmatpush3.bf16.msra.mxu0 %v20929_v3  ;;  %v18623_v32 = vpop.f32.mrf.mxu1  ;;  %19228 = vmatpush3.bf16.msra.mxu1 %v20930_v43 }
 0x4ec   : > { %v24789_v7 = vadd.f32 %v18621_v52, %v13238_v63  ;;  %v18512_v60 = vadd.f32 %v18511_v45, %v18510_v33  ;;  %19117 = vmatprep.subr.bf16.mxu0 %v20937_v44  ;;  %v18624_v38 = vadd.f32 %v18623_v32, %v18622_v46  ;;  %19229 = vmatprep.subr.bf16.mxu1 %v20938_v14  ;;  %v20852_v52 = vld [vmem:[%s26704_s2 + $0x410] ss:$156 sps:$4 sm:$0xff]   ;;  %v20857_v33 = vld [vmem:[%s26704_s2 + $0x544] ss:$156 sps:$4 sm:$0xff]  }
 0x4ed   : > { %v18513_v27 = vpop.f32.mrf.mxu0  ;;  %13824 = vmatmul.mubr.bf16.gmra.mxu0 %v20843_v16  ;;  %v18625_v26 = vpop.f32.mrf.mxu1  ;;  %13985 = vmatmul.mubr.bf16.gmra.mxu1 %v20846_v49  ;;  %v20860_v14 = vld [vmem:[%s26704_s2 + $0x54c] ss:$156 sps:$4 sm:$0xff]   ;;  %v20955_v45 = vld [vmem:[%s22823_s27 + $0x740] sm:$0xff]  }
 0x4ee   : > { %v13241_v18 = vadd.f32 %v18512_v60, %v24476_v41  ;;  %13831 = vmatprep.mubr.bf16.mxu0 %v20851_v37  ;;  %13992 = vmatprep.mubr.bf16.mxu1 %v20854_v5  ;;  %v20849_v41 = vld [vmem:[%s26704_s2 + $0x408] ss:$156 sps:$4 sm:$0xff]  }
 0x4ef   : > { %v18514_v12 = vpop.f32.mrf.mxu0  ;;  %19118 = vmatpush3.bf16.msra.mxu0 %v20939_v35  ;;  %v18626_v2 = vpop.f32.mrf.mxu1  ;;  %19230 = vmatpush3.bf16.msra.mxu1 %v20940_v25  ;;  %v20953_v63 = vld [vmem:[%s22823_s27 + $0x708] sm:$0xff]   ;;  %v20956_v60 = vld [vmem:[%s22823_s27 + $0x7c0] sm:$0xff]  }
 0x4f0   : > { %v24796_v11 = vadd.f32 %v18624_v38, %v13241_v18  ;;  %v18515_v59 = vadd.f32 %v18514_v12, %v18513_v27  ;;  %19119 = vmatprep.subr.bf16.mxu0 %v20941_v39  ;;  %v18627_v3 = vadd.f32 %v18626_v2, %v18625_v26  ;;  %19231 = vmatprep.subr.bf16.mxu1 %v20942_v22  ;;  %v20954_v37 = vld [vmem:[%s22823_s27 + $0x788] sm:$0xff]   ;;  %v20957_v38 = vld [vmem:[%s22823_s27 + $0x700] sm:$0xff]  }
 0x4f1   : > { %v18516_v31 = vpop.f32.mrf.mxu0  ;;  %v18628_v44 = vpop.f32.mrf.mxu1  ;;  %v20958_v26 = vld [vmem:[%s22823_s27 + $0x780] sm:$0xff]  }
 0x4f2   : > { %v13246_v43 = vadd.f32 %v18515_v59, %v24495_v40 }
 0x4f3   : > { %v18517_v16 = vpop.f32.mrf.mxu0  ;;  %19120 = vmatpush3.bf16.msra.mxu0 %v20943_v8  ;;  %v18629_v49 = vpop.f32.mrf.mxu1  ;;  %19232 = vmatpush3.bf16.msra.mxu1 %v20944_v30  ;;  %v20858_v30 = vld [vmem:[%s26704_s2 + $0x548] ss:$156 sps:$4 sm:$0xff]  }
 0x4f4   : > { %v24815_v46 = vadd.f32 %v18627_v3, %v13246_v43  ;;  %v18518_v40 = vadd.f32 %v18517_v16, %v18516_v31  ;;  %19121 = vmatprep.subr.bf16.mxu0 %v20951_v6  ;;  %v18630_v5 = vadd.f32 %v18629_v49, %v18628_v44  ;;  %19233 = vmatprep.subr.bf16.mxu1 %v20952_v54  ;;  %v20863_v6 = vld [vmem:[%s26704_s2 + $0x67c] ss:$156 sps:$4 sm:$0xff]   ;;  %v20866_v31 = vld [vmem:[%s26704_s2 + $0x684] ss:$156 sps:$4 sm:$0xff]  }
 0x4f5   : > { %v18519_v35 = vpop.f32.mrf.mxu0  ;;  %13832 = vmatmul.mubr.bf16.gmra.mxu0 %v20849_v41  ;;  %v18631_v25 = vpop.f32.mrf.mxu1  ;;  %13993 = vmatmul.mubr.bf16.gmra.mxu1 %v20852_v52 }
 0x4f6   : > { %v13249_v32 = vadd.f32 %v18518_v40, %v24502_v23  ;;  %13839 = vmatprep.mubr.bf16.mxu0 %v20857_v33  ;;  %14000 = vmatprep.mubr.bf16.mxu1 %v20860_v14  ;;  %v20855_v23 = vld [vmem:[%s26704_s2 + $0x540] ss:$156 sps:$4 sm:$0xff]  }
 0x4f7   : > { %v18520_v39 = vpop.f32.mrf.mxu0  ;;  %19122 = vmatpush3.bf16.msra.mxu0 %v20953_v63  ;;  %v18632_v18 = vpop.f32.mrf.mxu1  ;;  %19234 = vmatpush3.bf16.msra.mxu1 %v20954_v37 }
 0x4f8   : > { %v24822_v27 = vadd.f32 %v18630_v5, %v13249_v32  ;;  %v18521_v22 = vadd.f32 %v18520_v39, %v18519_v35  ;;  %19123 = vmatprep.subr.bf16.mxu0 %v20955_v45  ;;  %v18633_v12 = vadd.f32 %v18632_v18, %v18631_v25  ;;  %19235 = vmatprep.subr.bf16.mxu1 %v20956_v60  ;;  %v20861_v45 = vld [vmem:[%s26704_s2 + $0x678] ss:$156 sps:$4 sm:$0xff]  }
 0x4f9   : > { %v18522_v8 = vpop.f32.mrf.mxu0  ;;  %v18634_v2 = vpop.f32.mrf.mxu1  ;;  %v20869_v60 = vld [vmem:[%s26704_s2 + $0x7b4] ss:$156 sps:$4 sm:$0xff]   ;;  %v20872_v25 = vld [vmem:[%s26704_s2 + $0x7bc] ss:$156 sps:$4 sm:$0xff]  }
 0x4fa   : > { %v13254_v59 = vadd.f32 %v18521_v22, %v24518_v53 }
 0x4fb   : > { %v18523_v3 = vpop.f32.mrf.mxu0  ;;  %19124 = vmatpush3.bf16.msra.mxu0 %v20957_v38  ;;  %v18635_v43 = vpop.f32.mrf.mxu1  ;;  %19236 = vmatpush3.bf16.msra.mxu1 %v20958_v26 }
 0x4fc   : > { %v24838_v41 = vadd.f32 %v18633_v12, %v13254_v59  ;;  %v18524_v54 = vadd.f32 %v18523_v3, %v18522_v8  ;;  %v18636_v53 = vadd.f32 %v18635_v43, %v18634_v2  ;;  %v20867_v3 = vld [vmem:[%s26704_s2 + $0x7b0] ss:$156 sps:$4 sm:$0xff]  }
 0x4fd   : > { %v18525_v44 = vpop.f32.mrf.mxu0  ;;  %13840 = vmatmul.mubr.bf16.gmra.mxu0 %v20855_v23  ;;  %v18637_v33 = vpop.f32.mrf.mxu1  ;;  %14001 = vmatmul.mubr.bf16.gmra.mxu1 %v20858_v30  ;;  %v20875_v43 = vld [vmem:[%s26704_s2 + $0x8ec] ss:$156 sps:$4 sm:$0xff]  }
 0x4fe   : > { %v13257_v52 = vadd.f32 %v18524_v54, %v24521_v24  ;;  %13847 = vmatprep.mubr.bf16.mxu0 %v20863_v6  ;;  %14008 = vmatprep.mubr.bf16.mxu1 %v20866_v31  ;;  %v20864_v24 = vld [vmem:[%s26704_s2 + $0x680] ss:$156 sps:$4 sm:$0xff]  }
 0x4ff   : > { %v18526_v16 = vpop.f32.mrf.mxu0  ;;  %v18638_v40 = vpop.f32.mrf.mxu1 }
 0x500   : > { %v24841_v14 = vadd.f32 %v18636_v53, %v13257_v52  ;;  %v18527_v63 = vadd.f32 %v18526_v16, %v18525_v44  ;;  %v18639_v49 = vadd.f32 %v18638_v40, %v18637_v33  ;;  %v20878_v44 = vld [vmem:[%s26704_s2 + $0x8f4] ss:$156 sps:$4 sm:$0xff]  }
 0x501   : > { %v18528_v37 = vpop.f32.mrf.mxu0  ;;  %v18640_v35 = vpop.f32.mrf.mxu1 }
 0x502   : > { %v13262_v5 = vadd.f32 %v18527_v63, %v24536_v34 }
 0x503   : > { %v18529_v32 = vpop.f32.mrf.mxu0  ;;  %v18641_v22 = vpop.f32.mrf.mxu1 }
 0x504   : > { %v24856_v39 = vadd.f32 %v18639_v49, %v13262_v5  ;;  %v18530_v38 = vadd.f32 %v18529_v32, %v18528_v37  ;;  %v18642_v18 = vadd.f32 %v18641_v22, %v18640_v35  ;;  %v20873_v32 = vld [vmem:[%s26704_s2 + $0x8e8] ss:$156 sps:$4 sm:$0xff]  }
 0x505   : > { %v18531_v34 = vpop.f32.mrf.mxu0  ;;  %13848 = vmatmul.mubr.bf16.gmra.mxu0 %v20861_v45  ;;  %v18643_v12 = vpop.f32.mrf.mxu1  ;;  %14009 = vmatmul.mubr.bf16.gmra.mxu1 %v20864_v24  ;;  %v20881_v22 = vld [vmem:[%s26704_s2 + $0xa24] ss:$156 sps:$4 sm:$0xff]  }
 0x506   : > { %v13265_v26 = vadd.f32 %v18530_v38, %v24539_v4  ;;  %13855 = vmatprep.mubr.bf16.mxu0 %v20869_v60  ;;  %14016 = vmatprep.mubr.bf16.mxu1 %v20872_v25  ;;  %v20870_v4 = vld [vmem:[%s26704_s2 + $0x7b8] ss:$156 sps:$4 sm:$0xff]  }
 0x507   : > { %v18532_v8 = vpop.f32.mrf.mxu0  ;;  %v18644_v2 = vpop.f32.mrf.mxu1 }
 0x508   : > { %v24859_v23 = vadd.f32 %v18642_v18, %v13265_v26  ;;  %v18533_v59 = vadd.f32 %v18532_v8, %v18531_v34  ;;  %v18645_v30 = vadd.f32 %v18644_v2, %v18643_v12  ;;  %v20884_v34 = vld [vmem:[%s26704_s2 + $0xa2c] ss:$156 sps:$4 sm:$0xff]  }
 0x509   : > { %v18534_v6 = vpop.f32.mrf.mxu0  ;;  %v18646_v54 = vpop.f32.mrf.mxu1 }
 0x50a   : > { %v13270_v31 = vadd.f32 %v18533_v59, %v24554_v55 }
 0x50b   : > { %v18535_v53 = vpop.f32.mrf.mxu0  ;;  %v18647_v16 = vpop.f32.mrf.mxu1 }
 0x50c   : > { %v24874_v52 = vadd.f32 %v18645_v30, %v13270_v31  ;;  %v18536_v33 = vadd.f32 %v18535_v53, %v18534_v6  ;;  %v18648_v63 = vadd.f32 %v18647_v16, %v18646_v54  ;;  %v20879_v53 = vld [vmem:[%s26704_s2 + $0xa20] ss:$156 sps:$4 sm:$0xff]  }
 0x50d   : > { %v18537_v55 = vpop.f32.mrf.mxu0  ;;  %13856 = vmatmul.mubr.bf16.gmra.mxu0 %v20867_v3  ;;  %v18649_v49 = vpop.f32.mrf.mxu1  ;;  %14017 = vmatmul.mubr.bf16.gmra.mxu1 %v20870_v4  ;;  %v20887_v16 = vld [vmem:[%s26704_s2 + $0xb5c] ss:$156 sps:$4 sm:$0xff]  }
 0x50e   : > { %v13273_v40 = vadd.f32 %v18536_v33, %v24557_v20  ;;  %13863 = vmatprep.mubr.bf16.mxu0 %v20875_v43  ;;  %14024 = vmatprep.mubr.bf16.mxu1 %v20878_v44  ;;  %v20876_v20 = vld [vmem:[%s26704_s2 + $0x8f0] ss:$156 sps:$4 sm:$0xff]  }
 0x50f   : > { %v18538_v37 = vpop.f32.mrf.mxu0  ;;  %v18650_v35 = vpop.f32.mrf.mxu1 }
 0x510   : > { %v24877_v45 = vadd.f32 %v18648_v63, %v13273_v40  ;;  %v18539_v5 = vadd.f32 %v18538_v37, %v18537_v55  ;;  %v18651_v24 = vadd.f32 %v18650_v35, %v18649_v49  ;;  %v20890_v55 = vld [vmem:[%s26704_s2 + $0xb64] ss:$156 sps:$4 sm:$0xff]  }
 0x511   : > { %v18540_v60 = vpop.f32.mrf.mxu0  ;;  %v18652_v38 = vpop.f32.mrf.mxu1 }
 0x512   : > { %v13278_v25 = vadd.f32 %v18539_v5, %v24572_v21 }
 0x513   : > { %v18541_v18 = vpop.f32.mrf.mxu0  ;;  %v18653_v8 = vpop.f32.mrf.mxu1 }
 0x514   : > { %v24892_v26 = vadd.f32 %v18651_v24, %v13278_v25  ;;  %v18542_v12 = vadd.f32 %v18541_v18, %v18540_v60  ;;  %v18654_v59 = vadd.f32 %v18653_v8, %v18652_v38  ;;  %v20885_v18 = vld [vmem:[%s26704_s2 + $0xb58] ss:$156 sps:$4 sm:$0xff]  }
 0x515   : > { %v18543_v21 = vpop.f32.mrf.mxu0  ;;  %13864 = vmatmul.mubr.bf16.gmra.mxu0 %v20873_v32  ;;  %v18655_v30 = vpop.f32.mrf.mxu1  ;;  %14025 = vmatmul.mubr.bf16.gmra.mxu1 %v20876_v20  ;;  %v20893_v8 = vld [vmem:[%s26704_s2 + $0xc94] ss:$156 sps:$4 sm:$0xff]  }
 0x516   : > { %v13281_v2 = vadd.f32 %v18542_v12, %v24575_v13  ;;  %13871 = vmatprep.mubr.bf16.mxu0 %v20881_v22  ;;  %14032 = vmatprep.mubr.bf16.mxu1 %v20884_v34  ;;  %v20882_v13 = vld [vmem:[%s26704_s2 + $0xa28] ss:$156 sps:$4 sm:$0xff]  }
 0x517   : > { %v18544_v6 = vpop.f32.mrf.mxu0  ;;  %v18656_v54 = vpop.f32.mrf.mxu1 }
 0x518   : > { %v24895_v3 = vadd.f32 %v18654_v59, %v13281_v2  ;;  %v18545_v31 = vadd.f32 %v18544_v6, %v18543_v21  ;;  %v18657_v4 = vadd.f32 %v18656_v54, %v18655_v30  ;;  %v20896_v21 = vld [vmem:[%s26704_s2 + $0xc9c] ss:$156 sps:$4 sm:$0xff]  }
 0x519   : > { %v18546_v43 = vpop.f32.mrf.mxu0  ;;  %v18658_v33 = vpop.f32.mrf.mxu1 }
 0x51a   : > { %v13286_v44 = vadd.f32 %v18545_v31, %v24590_v0 }
 0x51b   : > { %v18547_v63 = vpop.f32.mrf.mxu0  ;;  %v18659_v37 = vpop.f32.mrf.mxu1 }
 0x51c   : > { %v24910_v40 = vadd.f32 %v18657_v4, %v13286_v44  ;;  %v18548_v49 = vadd.f32 %v18547_v63, %v18546_v43  ;;  %v18660_v5 = vadd.f32 %v18659_v37, %v18658_v33  ;;  %v20891_v63 = vld [vmem:[%s26704_s2 + $0xc90] ss:$156 sps:$4 sm:$0xff]  }
 0x51d   : > { %v18677_v0 = vpop.f32.mrf.mxu0  ;;  %13872 = vmatmul.mubr.bf16.gmra.mxu0 %v20879_v53  ;;  %v18789_v24 = vpop.f32.mrf.mxu1  ;;  %14033 = vmatmul.mubr.bf16.gmra.mxu1 %v20882_v13  ;;  %v20901_v37 = vld [vmem:[%s26704_s2 + $0xdcc] ss:$156 sps:$4 sm:$0xff]  }
 0x51e   : > { %v13289_v35 = vadd.f32 %v18548_v49, %v24593_v62  ;;  %13879 = vmatprep.mubr.bf16.mxu0 %v20887_v16  ;;  %14040 = vmatprep.mubr.bf16.mxu1 %v20890_v55  ;;  %v20888_v62 = vld [vmem:[%s26704_s2 + $0xb60] ss:$156 sps:$4 sm:$0xff]  }
 0x51f   : > { %v18678_v60 = vpop.f32.mrf.mxu0  ;;  %v18790_v38 = vpop.f32.mrf.mxu1 }
 0x520   : > { %v24913_v32 = vadd.f32 %v18660_v5, %v13289_v35  ;;  %v18679_v25 = vadd.f32 %v18678_v60, %v18677_v0  ;;  %v18791_v20 = vadd.f32 %v18790_v38, %v18789_v24  ;;  %v20904_v0 = vld [vmem:[%s26704_s2 + $0xdd4] ss:$156 sps:$4 sm:$0xff]  }
 0x521   : > { %v18680_v22 = vpop.f32.mrf.mxu0  ;;  %v18792_v12 = vpop.f32.mrf.mxu1 }
 0x522   : > { %v13488_v34 = vadd.f32 %v18679_v25, %v24608_v9 }
 0x523   : > { %v18681_v59 = vpop.f32.mrf.mxu0  ;;  %v18793_v6 = vpop.f32.mrf.mxu1 }
 0x524   : > { %v24928_v2 = vadd.f32 %v18791_v20, %v13488_v34  ;;  %v18682_v30 = vadd.f32 %v18681_v59, %v18680_v22  ;;  %v18794_v31 = vadd.f32 %v18793_v6, %v18792_v12 }
 0x525   : > { %v18683_v9 = vpop.f32.mrf.mxu0  ;;  %13880 = vmatmul.mubr.bf16.gmra.mxu0 %v20885_v18  ;;  %v18795_v4 = vpop.f32.mrf.mxu1  ;;  %14041 = vmatmul.mubr.bf16.gmra.mxu1 %v20888_v62  ;;  %v21025_v62 = vld [vmem:[%s22823_s27 + $0x878] sm:$0xff]  }
 0x526   : > { %v13491_v54 = vadd.f32 %v18682_v30, %v24611_v15  ;;  %13887 = vmatprep.mubr.bf16.mxu0 %v20893_v8  ;;  %14048 = vmatprep.mubr.bf16.mxu1 %v20896_v21  ;;  %v20894_v15 = vld [vmem:[%s26704_s2 + $0xc98] ss:$156 sps:$4 sm:$0xff]   ;;  %v20899_v21 = vld [vmem:[%s26704_s2 + $0xdc8] ss:$156 sps:$4 sm:$0xff]  }
 0x527   : > { %v18684_v43 = vpop.f32.mrf.mxu0  ;;  %v18796_v33 = vpop.f32.mrf.mxu1  ;;  %19333 = vmatprep.subr.bf16.mxu0 %v21025_v62 }
 0x528   : > { %v24931_v53 = vadd.f32 %v18794_v31, %v13491_v54  ;;  %v18685_v44 = vadd.f32 %v18684_v43, %v18683_v9  ;;  %v18797_v13 = vadd.f32 %v18796_v33, %v18795_v4  ;;  %v20907_v31 = vld [vmem:[%s26704_s2 + $0xf04] ss:$156 sps:$4 sm:$0xff]   ;;  %v20910_v54 = vld [vmem:[%s26704_s2 + $0xf0c] ss:$156 sps:$4 sm:$0xff]  }
 0x529   : > { %v18686_v16 = vpop.f32.mrf.mxu0  ;;  %v18798_v49 = vpop.f32.mrf.mxu1 }
 0x52a   : > { %v13496_v55 = vadd.f32 %v18685_v44, %v24626_v10 }
 0x52b   : > { %v18687_v5 = vpop.f32.mrf.mxu0  ;;  %v18799_v60 = vpop.f32.mrf.mxu1 }
 0x52c   : > { %v24946_v35 = vadd.f32 %v18797_v13, %v13496_v55  ;;  %v18688_v24 = vadd.f32 %v18687_v5, %v18686_v16  ;;  %v18800_v10 = vadd.f32 %v18799_v60, %v18798_v49 }
 0x52d   : > { %v18689_v25 = vpop.f32.mrf.mxu0  ;;  %13888 = vmatmul.mubr.bf16.gmra.mxu0 %v20891_v63  ;;  %v18801_v20 = vpop.f32.mrf.mxu1  ;;  %14049 = vmatmul.mubr.bf16.gmra.mxu1 %v20894_v15 }
 0x52e   : > { %v13499_v38 = vadd.f32 %v18688_v24, %v24629_v17  ;;  %13895 = vmatprep.mubr.bf16.mxu0 %v20901_v37  ;;  %14056 = vmatprep.mubr.bf16.mxu1 %v20904_v0  ;;  %v20902_v17 = vld [vmem:[%s26704_s2 + $0xdd0] ss:$156 sps:$4 sm:$0xff]   ;;  %v20905_v0 = vld [vmem:[%s26704_s2 + $0xf00] ss:$156 sps:$4 sm:$0xff]  }
 0x52f   : > { %v18690_v22 = vpop.f32.mrf.mxu0  ;;  %v18802_v12 = vpop.f32.mrf.mxu1 }
 0x530   : > { %v24949_v18 = vadd.f32 %v18800_v10, %v13499_v38  ;;  %v18691_v34 = vadd.f32 %v18690_v22, %v18689_v25  ;;  %v18803_v8 = vadd.f32 %v18802_v12, %v18801_v20  ;;  %v20919_v10 = vld [vmem:[%s26704_s2 + $0x103c] ss:$156 sps:$4 sm:$0xff]   ;;  %v20922_v38 = vld [vmem:[%s26704_s2 + $0x1044] ss:$156 sps:$4 sm:$0xff]  }
 0x531   : > { %v18692_v59 = vpop.f32.mrf.mxu0  ;;  %v18804_v6 = vpop.f32.mrf.mxu1  ;;  %v21040_v12 = vld [vmem:[%s22823_s27 + $0x8f8] sm:$0xff]  }
 0x532   : > { %v13504_v30 = vadd.f32 %v18691_v34, %v24645_v57  ;;  %19445 = vmatprep.subr.bf16.mxu1 %v21040_v12  ;;  %v20947_v12 = vld [vmem:[%s26704_s2 + $0x12ac] ss:$156 sps:$4 sm:$0xff]  }
 0x533   : > { %v18693_v9 = vpop.f32.mrf.mxu0  ;;  %v18805_v44 = vpop.f32.mrf.mxu1 }
 0x534   : > { %v24965_v4 = vadd.f32 %v18803_v8, %v13504_v30  ;;  %v18694_v43 = vadd.f32 %v18693_v9, %v18692_v59  ;;  %v18806_v57 = vadd.f32 %v18805_v44, %v18804_v6 }
 0x535   : > { %v18695_v33 = vpop.f32.mrf.mxu0  ;;  %13896 = vmatmul.mubr.bf16.gmra.mxu0 %v20899_v21  ;;  %v18807_v16 = vpop.f32.mrf.mxu1  ;;  %14057 = vmatmul.mubr.bf16.gmra.mxu1 %v20902_v17 }
 0x536   : > { %v13507_v13 = vadd.f32 %v18694_v43, %v24648_v61  ;;  %13903 = vmatprep.mubr.bf16.mxu0 %v20907_v31  ;;  %14064 = vmatprep.mubr.bf16.mxu1 %v20910_v54  ;;  %v20908_v61 = vld [vmem:[%s26704_s2 + $0xf08] ss:$156 sps:$4 sm:$0xff]   ;;  %v20917_v54 = vld [vmem:[%s26704_s2 + $0x1038] ss:$156 sps:$4 sm:$0xff]  }
 0x537   : > { %v18696_v63 = vpop.f32.mrf.mxu0  ;;  %v18808_v15 = vpop.f32.mrf.mxu1 }
 0x538   : > { %v24968_v55 = vadd.f32 %v18806_v57, %v13507_v13  ;;  %v18697_v49 = vadd.f32 %v18696_v63, %v18695_v33  ;;  %v18809_v37 = vadd.f32 %v18808_v15, %v18807_v16  ;;  %v20933_v57 = vld [vmem:[%s26704_s2 + $0x1174] ss:$156 sps:$4 sm:$0xff]   ;;  %v20936_v13 = vld [vmem:[%s26704_s2 + $0x117c] ss:$156 sps:$4 sm:$0xff]  }
 0x539   : > { %v18698_v5 = vpop.f32.mrf.mxu0  ;;  %v18810_v60 = vpop.f32.mrf.mxu1 }
 0x53a   : > { %v13512_v24 = vadd.f32 %v18697_v49, %v24663_v1 }
 0x53b   : > { %v18699_v25 = vpop.f32.mrf.mxu0  ;;  %v18811_v34 = vpop.f32.mrf.mxu1 }
 0x53c   : > { %v24983_v20 = vadd.f32 %v18809_v37, %v13512_v24  ;;  %v18700_v22 = vadd.f32 %v18699_v25, %v18698_v5  ;;  %v18812_v1 = vadd.f32 %v18811_v34, %v18810_v60 }
 0x53d   : > { %v18701_v62 = vpop.f32.mrf.mxu0  ;;  %13904 = vmatmul.mubr.bf16.gmra.mxu0 %v20905_v0  ;;  %v18813_v59 = vpop.f32.mrf.mxu1  ;;  %14065 = vmatmul.mubr.bf16.gmra.mxu1 %v20908_v61 }
 0x53e   : > { %v13515_v8 = vadd.f32 %v18700_v22, %v24667_v48  ;;  %13911 = vmatprep.mubr.bf16.mxu0 %v20919_v10  ;;  %14072 = vmatprep.mubr.bf16.mxu1 %v20922_v38  ;;  %v20920_v48 = vld [vmem:[%s26704_s2 + $0x1040] ss:$156 sps:$4 sm:$0xff]   ;;  %v20931_v38 = vld [vmem:[%s26704_s2 + $0x1170] ss:$156 sps:$4 sm:$0xff]  }
 0x53f   : > { %v18702_v21 = vpop.f32.mrf.mxu0  ;;  %v18814_v17 = vpop.f32.mrf.mxu1 }
 0x540   : > { %v24987_v30 = vadd.f32 %v18812_v1, %v13515_v8  ;;  %v18703_v6 = vadd.f32 %v18702_v21, %v18701_v62  ;;  %v18815_v31 = vadd.f32 %v18814_v17, %v18813_v59  ;;  %v20950_v62 = vld [vmem:[%s26704_s2 + $0x12b4] ss:$156 sps:$4 sm:$0xff]  }
 0x541   : > { %v18704_v9 = vpop.f32.mrf.mxu0  ;;  %v18816_v44 = vpop.f32.mrf.mxu1 }
 0x542   : > { %v13520_v43 = vadd.f32 %v18703_v6, %v24682_v42 }
 0x543   : > { %v18705_v33 = vpop.f32.mrf.mxu0  ;;  %v18817_v49 = vpop.f32.mrf.mxu1 }
 0x544   : > { %v25002_v16 = vadd.f32 %v18815_v31, %v13520_v43  ;;  %v18706_v63 = vadd.f32 %v18705_v33, %v18704_v9  ;;  %v18818_v15 = vadd.f32 %v18817_v49, %v18816_v44  ;;  %v20945_v33 = vld [vmem:[%s26704_s2 + $0x12a8] ss:$156 sps:$4 sm:$0xff]   ;;  %v20961_v49 = vld [vmem:[%s26704_s2 + $0x74] ss:$156 sps:$4 sm:$0xff]  }
 0x545   : > { %v18707_v42 = vpop.f32.mrf.mxu0  ;;  %13912 = vmatmul.mubr.bf16.gmra.mxu0 %v20917_v54  ;;  %v18819_v5 = vpop.f32.mrf.mxu1  ;;  %14073 = vmatmul.mubr.bf16.gmra.mxu1 %v20920_v48 }
 0x546   : > { %v13523_v37 = vadd.f32 %v18706_v63, %v24685_v58  ;;  %13919 = vmatprep.mubr.bf16.mxu0 %v20933_v57  ;;  %14080 = vmatprep.mubr.bf16.mxu1 %v20936_v13  ;;  %v20934_v58 = vld [vmem:[%s26704_s2 + $0x1178] ss:$156 sps:$4 sm:$0xff]  }
 0x547   : > { %v18708_v0 = vpop.f32.mrf.mxu0  ;;  %v18820_v61 = vpop.f32.mrf.mxu1 }
 0x548   : > { %v25005_v24 = vadd.f32 %v18818_v15, %v13523_v37  ;;  %v18709_v60 = vadd.f32 %v18708_v0, %v18707_v42  ;;  %v18821_v10 = vadd.f32 %v18820_v61, %v18819_v5  ;;  %v20964_v42 = vld [vmem:[%s26704_s2 + $0x7c] ss:$156 sps:$4 sm:$0xff]  }
 0x549   : > { %v18710_v25 = vpop.f32.mrf.mxu0  ;;  %v18822_v34 = vpop.f32.mrf.mxu1 }
 0x54a   : > { %v13528_v22 = vadd.f32 %v18709_v60, %v24700_v19 }
 0x54b   : > { %v18711_v1 = vpop.f32.mrf.mxu0  ;;  %v18823_v21 = vpop.f32.mrf.mxu1 }
 0x54c   : > { %v25020_v8 = vadd.f32 %v18821_v10, %v13528_v22  ;;  %v18712_v59 = vadd.f32 %v18711_v1, %v18710_v25  ;;  %v18824_v6 = vadd.f32 %v18823_v21, %v18822_v34  ;;  %v20959_v1 = vld [vmem:[%s26704_s2 + $0x70] ss:$156 sps:$4 sm:$0xff]  }
 0x54d   : > { %v18713_v19 = vpop.f32.mrf.mxu0  ;;  %13920 = vmatmul.mubr.bf16.gmra.mxu0 %v20931_v38  ;;  %v18825_v31 = vpop.f32.mrf.mxu1  ;;  %14081 = vmatmul.mubr.bf16.gmra.mxu1 %v20934_v58  ;;  %v20967_v21 = vld [vmem:[%s26704_s2 + $0x1ac] ss:$156 sps:$4 sm:$0xff]  }
 0x54e   : > { %v13531_v17 = vadd.f32 %v18712_v59, %v24703_v51  ;;  %13927 = vmatprep.mubr.bf16.mxu0 %v20947_v12  ;;  %14088 = vmatprep.mubr.bf16.mxu1 %v20950_v62  ;;  %v20948_v51 = vld [vmem:[%s26704_s2 + $0x12b0] ss:$156 sps:$4 sm:$0xff]   ;;  %v20962_v59 = vld [vmem:[%s26704_s2 + $0x78] ss:$156 sps:$4 sm:$0xff]  }
 0x54f   : > { %v18714_v9 = vpop.f32.mrf.mxu0  ;;  %v18826_v44 = vpop.f32.mrf.mxu1 }
 0x550   : > { %v25023_v54 = vadd.f32 %v18824_v6, %v13531_v17  ;;  %v18715_v43 = vadd.f32 %v18714_v9, %v18713_v19  ;;  %v18827_v48 = vadd.f32 %v18826_v44, %v18825_v31  ;;  %v20970_v19 = vld [vmem:[%s26704_s2 + $0x1b4] ss:$156 sps:$4 sm:$0xff]   ;;  %v21026_v17 = vld [vmem:[%s22823_s27 + $0x838] sm:$0xff]  }
 0x551   : > { %v18716_v57 = vpop.f32.mrf.mxu0  ;;  %v18828_v63 = vpop.f32.mrf.mxu1  ;;  %v21042_v44 = vld [vmem:[%s22823_s27 + $0x8b8] sm:$0xff]  }
 0x552   : > { %v13536_v13 = vadd.f32 %v18715_v43, %v24718_v36  ;;  %v21039_v43 = vld [vmem:[%s22823_s27 + $0x870] sm:$0xff]  }
 0x553   : > { %v18717_v15 = vpop.f32.mrf.mxu0  ;;  %v18829_v0 = vpop.f32.mrf.mxu1 }
 0x554   : > { %v25038_v37 = vadd.f32 %v18827_v48, %v13536_v13  ;;  %v18718_v5 = vadd.f32 %v18717_v15, %v18716_v57  ;;  %v18830_v60 = vadd.f32 %v18829_v0, %v18828_v63  ;;  %v21044_v0 = vld [vmem:[%s22823_s27 + $0x8b0] sm:$0xff]  }
 0x555   : > { %v18719_v36 = vpop.f32.mrf.mxu0  ;;  %13928 = vmatmul.mubr.bf16.gmra.mxu0 %v20945_v33  ;;  %v18831_v10 = vpop.f32.mrf.mxu1  ;;  %14089 = vmatmul.mubr.bf16.gmra.mxu1 %v20948_v51  ;;  %v21043_v33 = vld [vmem:[%s22823_s27 + $0x8f0] sm:$0xff]  }
 0x556   : > { %v13539_v61 = vadd.f32 %v18718_v5, %v24721_v29  ;;  %14129 = vmatprep.mubr.bf16.mxu0 %v20961_v49  ;;  %14290 = vmatprep.mubr.bf16.mxu1 %v20964_v42  ;;  %v21041_v49 = vld [vmem:[%s22823_s27 + $0x830] sm:$0xff]  }
 0x557   : > { %v18720_v25 = vpop.f32.mrf.mxu0  ;;  %v18832_v34 = vpop.f32.mrf.mxu1 }
 0x558   : > { %v25041_v38 = vadd.f32 %v18830_v60, %v13539_v61  ;;  %v18721_v22 = vadd.f32 %v18720_v25, %v18719_v36  ;;  %v18833_v58 = vadd.f32 %v18832_v34, %v18831_v10  ;;  %v21051_v60 = vld [vmem:[%s22823_s27 + $0x868] sm:$0xff]  }
 0x559   : > { %v18722_v12 = vpop.f32.mrf.mxu0  ;;  %v18834_v62 = vpop.f32.mrf.mxu1  ;;  %v21052_v10 = vld [vmem:[%s22823_s27 + $0x8e8] sm:$0xff]  }
 0x55a   : > { %v13544_v29 = vadd.f32 %v18721_v22, %v24737_v28  ;;  %v20968_v34 = vld [vmem:[%s26704_s2 + $0x1b0] ss:$156 sps:$4 sm:$0xff]  }
 0x55b   : > { %v18723_v6 = vpop.f32.mrf.mxu0  ;;  %v18835_v28 = vpop.f32.mrf.mxu1 }
 0x55c   : > { %v25057_v31 = vadd.f32 %v18833_v58, %v13544_v29  ;;  %v18724_v9 = vadd.f32 %v18723_v6, %v18722_v12  ;;  %v18836_v48 = vadd.f32 %v18835_v28, %v18834_v62  ;;  %v20973_v58 = vld [vmem:[%s26704_s2 + $0x2e4] ss:$156 sps:$4 sm:$0xff]   ;;  %v21053_v29 = vld [vmem:[%s22823_s27 + $0x828] sm:$0xff]  }
 0x55d   : > { %v18725_v57 = vpop.f32.mrf.mxu0  ;;  %14130 = vmatmul.mubr.bf16.vlgmr.msra.gmra.mxu0 %v20959_v1  ;;  %v18837_v63 = vpop.f32.mrf.mxu1  ;;  %14291 = vmatmul.mubr.bf16.vlgmr.msra.gmra.mxu1 %v20962_v59  ;;  %v20976_v1 = vld [vmem:[%s26704_s2 + $0x2ec] ss:$156 sps:$4 sm:$0xff]   ;;  %v21055_v6 = vld [vmem:[%s22823_s27 + $0x860] sm:$0xff]  }
 0x55e   : > { %v13547_v13 = vadd.f32 %v18724_v9, %v24744_v56  ;;  %14137 = vmatprep.mubr.bf16.mxu0 %v20967_v21  ;;  %14298 = vmatprep.mubr.bf16.mxu1 %v20970_v19  ;;  %v20965_v56 = vld [vmem:[%s26704_s2 + $0x1a8] ss:$156 sps:$4 sm:$0xff]  }
 0x55f   : > { %v18726_v51 = vpop.f32.mrf.mxu0  ;;  %19334 = vmatpush3.bf16.msra.mxu0 %v21026_v17  ;;  %v18838_v5 = vpop.f32.mrf.mxu1  ;;  %19446 = vmatpush3.bf16.msra.mxu1 %v21042_v44  ;;  %v21054_v21 = vld [vmem:[%s22823_s27 + $0x8a8] sm:$0xff]   ;;  %v21056_v9 = vld [vmem:[%s22823_s27 + $0x8e0] sm:$0xff]  }
 0x560   : > { %v25064_v15 = vadd.f32 %v18836_v48, %v13547_v13  ;;  %v18727_v42 = vadd.f32 %v18726_v51, %v18725_v57  ;;  %19335 = vmatprep.subr.bf16.mxu0 %v21039_v43  ;;  %v18839_v36 = vadd.f32 %v18838_v5, %v18837_v63  ;;  %19447 = vmatprep.subr.bf16.mxu1 %v21043_v33  ;;  %v21057_v48 = vld [vmem:[%s22823_s27 + $0x820] sm:$0xff]   ;;  %v21065_v51 = vld [vmem:[%s22823_s27 + $0x858] sm:$0xff]  }
 0x561   : > { %v18728_v61 = vpop.f32.mrf.mxu0  ;;  %v18840_v22 = vpop.f32.mrf.mxu1  ;;  %v21058_v63 = vld [vmem:[%s22823_s27 + $0x8a0] sm:$0xff]   ;;  %v21066_v5 = vld [vmem:[%s22823_s27 + $0x8d8] sm:$0xff]  }
 0x562   : > { %v13552_v25 = vadd.f32 %v18727_v42, %v24763_v50 }
 0x563   : > { %v18729_v12 = vpop.f32.mrf.mxu0  ;;  %19336 = vmatpush3.bf16.msra.mxu0 %v21041_v49  ;;  %v18841_v59 = vpop.f32.mrf.mxu1  ;;  %19448 = vmatpush3.bf16.msra.mxu1 %v21044_v0 }
 0x564   : > { %v25083_v62 = vadd.f32 %v18839_v36, %v13552_v25  ;;  %v18730_v50 = vadd.f32 %v18729_v12, %v18728_v61  ;;  %19337 = vmatprep.subr.bf16.mxu0 %v21051_v60  ;;  %v18842_v19 = vadd.f32 %v18841_v59, %v18840_v22  ;;  %19449 = vmatprep.subr.bf16.mxu1 %v21052_v10  ;;  %v20974_v36 = vld [vmem:[%s26704_s2 + $0x2e8] ss:$156 sps:$4 sm:$0xff]   ;;  %v20979_v61 = vld [vmem:[%s26704_s2 + $0x41c] ss:$156 sps:$4 sm:$0xff]   ;;  %v21069_v12 = vld [vmem:[%s22823_s27 + $0x850] sm:$0xff]  }
 0x565   : > { %v18731_v17 = vpop.f32.mrf.mxu0  ;;  %14138 = vmatmul.mubr.bf16.gmra.mxu0 %v20965_v56  ;;  %v18843_v43 = vpop.f32.mrf.mxu1  ;;  %14299 = vmatmul.mubr.bf16.gmra.mxu1 %v20968_v34  ;;  %v20982_v10 = vld [vmem:[%s26704_s2 + $0x424] ss:$156 sps:$4 sm:$0xff]   ;;  %v21067_v25 = vld [vmem:[%s22823_s27 + $0x818] sm:$0xff]  }
 0x566   : > { %v13555_v28 = vadd.f32 %v18730_v50, %v24770_v47  ;;  %14145 = vmatprep.mubr.bf16.mxu0 %v20973_v58  ;;  %14306 = vmatprep.mubr.bf16.mxu1 %v20976_v1  ;;  %v20971_v47 = vld [vmem:[%s26704_s2 + $0x2e0] ss:$156 sps:$4 sm:$0xff]   ;;  %v21070_v50 = vld [vmem:[%s22823_s27 + $0x8d0] sm:$0xff]  }
 0x567   : > { %v18732_v44 = vpop.f32.mrf.mxu0  ;;  %19338 = vmatpush3.bf16.msra.mxu0 %v21053_v29  ;;  %v18844_v13 = vpop.f32.mrf.mxu1  ;;  %19450 = vmatpush3.bf16.msra.mxu1 %v21054_v21  ;;  %v21068_v58 = vld [vmem:[%s22823_s27 + $0x898] sm:$0xff]  }
 0x568   : > { %v25090_v57 = vadd.f32 %v18842_v19, %v13555_v28  ;;  %v18733_v33 = vadd.f32 %v18732_v44, %v18731_v17  ;;  %19339 = vmatprep.subr.bf16.mxu0 %v21055_v6  ;;  %v18845_v49 = vadd.f32 %v18844_v13, %v18843_v43  ;;  %19451 = vmatprep.subr.bf16.mxu1 %v21056_v9  ;;  %v21071_v19 = vld [vmem:[%s22823_s27 + $0x810] sm:$0xff]   ;;  %v21079_v44 = vld [vmem:[%s22823_s27 + $0x848] sm:$0xff]  }
 0x569   : > { %v18734_v42 = vpop.f32.mrf.mxu0  ;;  %v18846_v60 = vpop.f32.mrf.mxu1  ;;  %v21072_v43 = vld [vmem:[%s22823_s27 + $0x890] sm:$0xff]   ;;  %v21080_v13 = vld [vmem:[%s22823_s27 + $0x8c8] sm:$0xff]  }
 0x56a   : > { %v13560_v0 = vadd.f32 %v18733_v33, %v24789_v7 }
 0x56b   : > { %v18735_v56 = vpop.f32.mrf.mxu0  ;;  %19340 = vmatpush3.bf16.msra.mxu0 %v21057_v48  ;;  %v18847_v34 = vpop.f32.mrf.mxu1  ;;  %19452 = vmatpush3.bf16.msra.mxu1 %v21058_v63 }
 0x56c   : > { %v25109_v22 = vadd.f32 %v18845_v49, %v13560_v0  ;;  %v18736_v7 = vadd.f32 %v18735_v56, %v18734_v42  ;;  %19341 = vmatprep.subr.bf16.mxu0 %v21065_v51  ;;  %v18848_v1 = vadd.f32 %v18847_v34, %v18846_v60  ;;  %19453 = vmatprep.subr.bf16.mxu1 %v21066_v5  ;;  %v20980_v49 = vld [vmem:[%s26704_s2 + $0x420] ss:$156 sps:$4 sm:$0xff]   ;;  %v20985_v42 = vld [vmem:[%s26704_s2 + $0x554] ss:$156 sps:$4 sm:$0xff]   ;;  %v21081_v0 = vld [vmem:[%s22823_s27 + $0x808] sm:$0xff]  }
 0x56d   : > { %v18737_v29 = vpop.f32.mrf.mxu0  ;;  %14146 = vmatmul.mubr.bf16.gmra.mxu0 %v20971_v47  ;;  %v18849_v21 = vpop.f32.mrf.mxu1  ;;  %14307 = vmatmul.mubr.bf16.gmra.mxu1 %v20974_v36  ;;  %v20988_v5 = vld [vmem:[%s26704_s2 + $0x55c] ss:$156 sps:$4 sm:$0xff]   ;;  %v21083_v56 = vld [vmem:[%s22823_s27 + $0x840] sm:$0xff]  }
 0x56e   : > { %v13563_v59 = vadd.f32 %v18736_v7, %v24796_v11  ;;  %14153 = vmatprep.mubr.bf16.mxu0 %v20979_v61  ;;  %14314 = vmatprep.mubr.bf16.mxu1 %v20982_v10  ;;  %v20977_v11 = vld [vmem:[%s26704_s2 + $0x418] ss:$156 sps:$4 sm:$0xff]   ;;  %v21082_v61 = vld [vmem:[%s22823_s27 + $0x888] sm:$0xff]   ;;  %v21084_v7 = vld [vmem:[%s22823_s27 + $0x8c0] sm:$0xff]  }
 0x56f   : > { %v18738_v6 = vpop.f32.mrf.mxu0  ;;  %19342 = vmatpush3.bf16.msra.mxu0 %v21067_v25  ;;  %v18850_v28 = vpop.f32.mrf.mxu1  ;;  %19454 = vmatpush3.bf16.msra.mxu1 %v21068_v58 }
 0x570   : > { %v25116_v17 = vadd.f32 %v18848_v1, %v13563_v59  ;;  %v18739_v9 = vadd.f32 %v18738_v6, %v18737_v29  ;;  %19343 = vmatprep.subr.bf16.mxu0 %v21069_v12  ;;  %v18851_v48 = vadd.f32 %v18850_v28, %v18849_v21  ;;  %19455 = vmatprep.subr.bf16.mxu1 %v21070_v50  ;;  %v21085_v1 = vld [vmem:[%s22823_s27 + $0x800] sm:$0xff]  }
 0x571   : > { %v18740_v33 = vpop.f32.mrf.mxu0  ;;  %v18852_v51 = vpop.f32.mrf.mxu1  ;;  %v21086_v21 = vld [vmem:[%s22823_s27 + $0x880] sm:$0xff]  }
 0x572   : > { %v13568_v63 = vadd.f32 %v18739_v9, %v24815_v46 }
 0x573   : > { %v18741_v47 = vpop.f32.mrf.mxu0  ;;  %19344 = vmatpush3.bf16.msra.mxu0 %v21071_v19  ;;  %v18853_v36 = vpop.f32.mrf.mxu1  ;;  %19456 = vmatpush3.bf16.msra.mxu1 %v21072_v43  ;;  %v20986_v43 = vld [vmem:[%s26704_s2 + $0x558] ss:$156 sps:$4 sm:$0xff]  }
 0x574   : > { %v25135_v60 = vadd.f32 %v18851_v48, %v13568_v63  ;;  %v18742_v46 = vadd.f32 %v18741_v47, %v18740_v33  ;;  %19345 = vmatprep.subr.bf16.mxu0 %v21079_v44  ;;  %v18854_v10 = vadd.f32 %v18853_v36, %v18852_v51  ;;  %19457 = vmatprep.subr.bf16.mxu1 %v21080_v13  ;;  %v20991_v44 = vld [vmem:[%s26704_s2 + $0x68c] ss:$156 sps:$4 sm:$0xff]   ;;  %v20994_v33 = vld [vmem:[%s26704_s2 + $0x694] ss:$156 sps:$4 sm:$0xff]  }
 0x575   : > { %v18743_v25 = vpop.f32.mrf.mxu0  ;;  %14154 = vmatmul.mubr.bf16.gmra.mxu0 %v20977_v11  ;;  %v18855_v58 = vpop.f32.mrf.mxu1  ;;  %14315 = vmatmul.mubr.bf16.gmra.mxu1 %v20980_v49 }
 0x576   : > { %v13571_v34 = vadd.f32 %v18742_v46, %v24822_v27  ;;  %14161 = vmatprep.mubr.bf16.mxu0 %v20985_v42  ;;  %14322 = vmatprep.mubr.bf16.mxu1 %v20988_v5  ;;  %v20983_v27 = vld [vmem:[%s26704_s2 + $0x550] ss:$156 sps:$4 sm:$0xff]  }
 0x577   : > { %v18744_v12 = vpop.f32.mrf.mxu0  ;;  %19346 = vmatpush3.bf16.msra.mxu0 %v21081_v0  ;;  %v18856_v59 = vpop.f32.mrf.mxu1  ;;  %19458 = vmatpush3.bf16.msra.mxu1 %v21082_v61 }
 0x578   : > { %v25142_v29 = vadd.f32 %v18854_v10, %v13571_v34  ;;  %v18745_v50 = vadd.f32 %v18744_v12, %v18743_v25  ;;  %19347 = vmatprep.subr.bf16.mxu0 %v21083_v56  ;;  %v18857_v6 = vadd.f32 %v18856_v59, %v18855_v58  ;;  %19459 = vmatprep.subr.bf16.mxu1 %v21084_v7  ;;  %v20989_v56 = vld [vmem:[%s26704_s2 + $0x688] ss:$156 sps:$4 sm:$0xff]  }
 0x579   : > { %v18746_v19 = vpop.f32.mrf.mxu0  ;;  %v18858_v28 = vpop.f32.mrf.mxu1  ;;  %v20997_v7 = vld [vmem:[%s26704_s2 + $0x7c4] ss:$156 sps:$4 sm:$0xff]   ;;  %v21000_v58 = vld [vmem:[%s26704_s2 + $0x7cc] ss:$156 sps:$4 sm:$0xff]  }
 0x57a   : > { %v13576_v9 = vadd.f32 %v18745_v50, %v24838_v41 }
 0x57b   : > { %v18747_v48 = vpop.f32.mrf.mxu0  ;;  %19348 = vmatpush3.bf16.msra.mxu0 %v21085_v1  ;;  %v18859_v63 = vpop.f32.mrf.mxu1  ;;  %19460 = vmatpush3.bf16.msra.mxu1 %v21086_v21 }
 0x57c   : > { %v25158_v11 = vadd.f32 %v18857_v6, %v13576_v9  ;;  %v18748_v13 = vadd.f32 %v18747_v48, %v18746_v19  ;;  %v18860_v41 = vadd.f32 %v18859_v63, %v18858_v28  ;;  %v20995_v48 = vld [vmem:[%s26704_s2 + $0x7c0] ss:$156 sps:$4 sm:$0xff]  }
 0x57d   : > { %v18749_v51 = vpop.f32.mrf.mxu0  ;;  %14162 = vmatmul.mubr.bf16.gmra.mxu0 %v20983_v27  ;;  %v18861_v42 = vpop.f32.mrf.mxu1  ;;  %14323 = vmatmul.mubr.bf16.gmra.mxu1 %v20986_v43  ;;  %v21003_v63 = vld [vmem:[%s26704_s2 + $0x8fc] ss:$156 sps:$4 sm:$0xff]  }
 0x57e   : > { %v13579_v49 = vadd.f32 %v18748_v13, %v24841_v14  ;;  %14169 = vmatprep.mubr.bf16.mxu0 %v20991_v44  ;;  %14330 = vmatprep.mubr.bf16.mxu1 %v20994_v33  ;;  %v20992_v14 = vld [vmem:[%s26704_s2 + $0x690] ss:$156 sps:$4 sm:$0xff]  }
 0x57f   : > { %v18750_v47 = vpop.f32.mrf.mxu0  ;;  %v18862_v46 = vpop.f32.mrf.mxu1 }
 0x580   : > { %v25161_v5 = vadd.f32 %v18860_v41, %v13579_v49  ;;  %v18751_v0 = vadd.f32 %v18750_v47, %v18749_v51  ;;  %v18863_v36 = vadd.f32 %v18862_v46, %v18861_v42  ;;  %v21006_v51 = vld [vmem:[%s26704_s2 + $0x904] ss:$156 sps:$4 sm:$0xff]  }
 0x581   : > { %v18752_v61 = vpop.f32.mrf.mxu0  ;;  %v18864_v25 = vpop.f32.mrf.mxu1 }
 0x582   : > { %v13584_v10 = vadd.f32 %v18751_v0, %v24856_v39 }
 0x583   : > { %v18753_v34 = vpop.f32.mrf.mxu0  ;;  %v18865_v50 = vpop.f32.mrf.mxu1 }
 0x584   : > { %v25176_v12 = vadd.f32 %v18863_v36, %v13584_v10  ;;  %v18754_v1 = vadd.f32 %v18753_v34, %v18752_v61  ;;  %v18866_v59 = vadd.f32 %v18865_v50, %v18864_v25  ;;  %v21001_v34 = vld [vmem:[%s26704_s2 + $0x8f8] ss:$156 sps:$4 sm:$0xff]  }
 0x585   : > { %v18755_v39 = vpop.f32.mrf.mxu0  ;;  %14170 = vmatmul.mubr.bf16.gmra.mxu0 %v20989_v56  ;;  %v18867_v6 = vpop.f32.mrf.mxu1  ;;  %14331 = vmatmul.mubr.bf16.gmra.mxu1 %v20992_v14  ;;  %v21009_v50 = vld [vmem:[%s26704_s2 + $0xa34] ss:$156 sps:$4 sm:$0xff]  }
 0x586   : > { %v13587_v21 = vadd.f32 %v18754_v1, %v24859_v23  ;;  %14177 = vmatprep.mubr.bf16.mxu0 %v20997_v7  ;;  %14338 = vmatprep.mubr.bf16.mxu1 %v21000_v58  ;;  %v20998_v23 = vld [vmem:[%s26704_s2 + $0x7c8] ss:$156 sps:$4 sm:$0xff]  }
 0x587   : > { %v18756_v19 = vpop.f32.mrf.mxu0  ;;  %v18868_v28 = vpop.f32.mrf.mxu1 }
 0x588   : > { %v25179_v27 = vadd.f32 %v18866_v59, %v13587_v21  ;;  %v18757_v9 = vadd.f32 %v18756_v19, %v18755_v39  ;;  %v18869_v43 = vadd.f32 %v18868_v28, %v18867_v6  ;;  %v21012_v39 = vld [vmem:[%s26704_s2 + $0xa3c] ss:$156 sps:$4 sm:$0xff]  }
 0x589   : > { %v18758_v44 = vpop.f32.mrf.mxu0  ;;  %v18870_v13 = vpop.f32.mrf.mxu1 }
 0x58a   : > { %v13592_v33 = vadd.f32 %v18757_v9, %v24874_v52 }
 0x58b   : > { %v18759_v41 = vpop.f32.mrf.mxu0  ;;  %v18871_v47 = vpop.f32.mrf.mxu1 }
 0x58c   : > { %v25194_v49 = vadd.f32 %v18869_v43, %v13592_v33  ;;  %v18760_v42 = vadd.f32 %v18759_v41, %v18758_v44  ;;  %v18872_v0 = vadd.f32 %v18871_v47, %v18870_v13  ;;  %v21007_v41 = vld [vmem:[%s26704_s2 + $0xa30] ss:$156 sps:$4 sm:$0xff]  }
 0x58d   : > { %v18761_v52 = vpop.f32.mrf.mxu0  ;;  %14178 = vmatmul.mubr.bf16.gmra.mxu0 %v20995_v48  ;;  %v18873_v36 = vpop.f32.mrf.mxu1  ;;  %14339 = vmatmul.mubr.bf16.gmra.mxu1 %v20998_v23  ;;  %v21015_v47 = vld [vmem:[%s26704_s2 + $0xb6c] ss:$156 sps:$4 sm:$0xff]  }
 0x58e   : > { %v13595_v46 = vadd.f32 %v18760_v42, %v24877_v45  ;;  %14185 = vmatprep.mubr.bf16.mxu0 %v21003_v63  ;;  %14346 = vmatprep.mubr.bf16.mxu1 %v21006_v51  ;;  %v21004_v45 = vld [vmem:[%s26704_s2 + $0x900] ss:$156 sps:$4 sm:$0xff]  }
 0x58f   : > { %v18762_v61 = vpop.f32.mrf.mxu0  ;;  %v18874_v25 = vpop.f32.mrf.mxu1 }
 0x590   : > { %v25197_v56 = vadd.f32 %v18872_v0, %v13595_v46  ;;  %v18763_v10 = vadd.f32 %v18762_v61, %v18761_v52  ;;  %v18875_v14 = vadd.f32 %v18874_v25, %v18873_v36  ;;  %v21018_v52 = vld [vmem:[%s26704_s2 + $0xb74] ss:$156 sps:$4 sm:$0xff]  }
 0x591   : > { %v18764_v7 = vpop.f32.mrf.mxu0  ;;  %v18876_v1 = vpop.f32.mrf.mxu1 }
 0x592   : > { %v13600_v58 = vadd.f32 %v18763_v10, %v24892_v26 }
 0x593   : > { %v18765_v59 = vpop.f32.mrf.mxu0  ;;  %v18877_v19 = vpop.f32.mrf.mxu1 }
 0x594   : > { %v25212_v21 = vadd.f32 %v18875_v14, %v13600_v58  ;;  %v18766_v6 = vadd.f32 %v18765_v59, %v18764_v7  ;;  %v18878_v9 = vadd.f32 %v18877_v19, %v18876_v1  ;;  %v21013_v59 = vld [vmem:[%s26704_s2 + $0xb68] ss:$156 sps:$4 sm:$0xff]  }
 0x595   : > { %v18767_v26 = vpop.f32.mrf.mxu0  ;;  %14186 = vmatmul.mubr.bf16.gmra.mxu0 %v21001_v34  ;;  %v18879_v43 = vpop.f32.mrf.mxu1  ;;  %14347 = vmatmul.mubr.bf16.gmra.mxu1 %v21004_v45  ;;  %v21021_v19 = vld [vmem:[%s26704_s2 + $0xca4] ss:$156 sps:$4 sm:$0xff]  }
 0x596   : > { %v13603_v28 = vadd.f32 %v18766_v6, %v24895_v3  ;;  %14193 = vmatprep.mubr.bf16.mxu0 %v21009_v50  ;;  %14354 = vmatprep.mubr.bf16.mxu1 %v21012_v39  ;;  %v21010_v3 = vld [vmem:[%s26704_s2 + $0xa38] ss:$156 sps:$4 sm:$0xff]  }
 0x597   : > { %v18768_v44 = vpop.f32.mrf.mxu0  ;;  %v18880_v13 = vpop.f32.mrf.mxu1 }
 0x598   : > { %v25215_v48 = vadd.f32 %v18878_v9, %v13603_v28  ;;  %v18769_v33 = vadd.f32 %v18768_v44, %v18767_v26  ;;  %v18881_v23 = vadd.f32 %v18880_v13, %v18879_v43  ;;  %v21024_v26 = vld [vmem:[%s26704_s2 + $0xcac] ss:$156 sps:$4 sm:$0xff]  }
 0x599   : > { %v18770_v63 = vpop.f32.mrf.mxu0  ;;  %v18882_v42 = vpop.f32.mrf.mxu1 }
 0x59a   : > { %v13608_v51 = vadd.f32 %v18769_v33, %v24910_v40 }
 0x59b   : > { %v18771_v0 = vpop.f32.mrf.mxu0  ;;  %v18883_v61 = vpop.f32.mrf.mxu1 }
 0x59c   : > { %v25230_v46 = vadd.f32 %v18881_v23, %v13608_v51  ;;  %v18772_v36 = vadd.f32 %v18771_v0, %v18770_v63  ;;  %v18884_v10 = vadd.f32 %v18883_v61, %v18882_v42  ;;  %v21019_v0 = vld [vmem:[%s26704_s2 + $0xca0] ss:$156 sps:$4 sm:$0xff]  }
 0x59d   : > { %v18901_v40 = vpop.f32.mrf.mxu0  ;;  %14194 = vmatmul.mubr.bf16.gmra.mxu0 %v21007_v41  ;;  %v19013_v14 = vpop.f32.mrf.mxu1  ;;  %14355 = vmatmul.mubr.bf16.gmra.mxu1 %v21010_v3  ;;  %v21029_v61 = vld [vmem:[%s26704_s2 + $0xddc] ss:$156 sps:$4 sm:$0xff]  }
 0x59e   : > { %v13611_v25 = vadd.f32 %v18772_v36, %v24913_v32  ;;  %14201 = vmatprep.mubr.bf16.mxu0 %v21015_v47  ;;  %14362 = vmatprep.mubr.bf16.mxu1 %v21018_v52  ;;  %v21016_v32 = vld [vmem:[%s26704_s2 + $0xb70] ss:$156 sps:$4 sm:$0xff]  }
 0x59f   : > { %v18902_v7 = vpop.f32.mrf.mxu0  ;;  %v19014_v1 = vpop.f32.mrf.mxu1 }
 0x5a0   : > { %v25233_v34 = vadd.f32 %v18884_v10, %v13611_v25  ;;  %v18903_v58 = vadd.f32 %v18902_v7, %v18901_v40  ;;  %v19015_v45 = vadd.f32 %v19014_v1, %v19013_v14  ;;  %v21032_v40 = vld [vmem:[%s26704_s2 + $0xde4] ss:$156 sps:$4 sm:$0xff]  }
 0x5a1   : > { %v18904_v50 = vpop.f32.mrf.mxu0  ;;  %v19016_v6 = vpop.f32.mrf.mxu1 }
 0x5a2   : > { %v13810_v39 = vadd.f32 %v18903_v58, %v24928_v2 }
 0x5a3   : > { %v18905_v9 = vpop.f32.mrf.mxu0  ;;  %v19017_v44 = vpop.f32.mrf.mxu1 }
 0x5a4   : > { %v25248_v28 = vadd.f32 %v19015_v45, %v13810_v39  ;;  %v18906_v43 = vadd.f32 %v18905_v9, %v18904_v50  ;;  %v19018_v33 = vadd.f32 %v19017_v44, %v19016_v6 }
 0x5a5   : > { %v18907_v2 = vpop.f32.mrf.mxu0  ;;  %14202 = vmatmul.mubr.bf16.gmra.mxu0 %v21013_v59  ;;  %v19019_v23 = vpop.f32.mrf.mxu1  ;;  %14363 = vmatmul.mubr.bf16.gmra.mxu1 %v21016_v32  ;;  %v21153_v32 = vld [vmem:[%s22823_s27 + $0x978] sm:$0xff]  }
 0x5a6   : > { %v13813_v13 = vadd.f32 %v18906_v43, %v24931_v53  ;;  %14209 = vmatprep.mubr.bf16.mxu0 %v21021_v19  ;;  %14370 = vmatprep.mubr.bf16.mxu1 %v21024_v26  ;;  %v21022_v53 = vld [vmem:[%s26704_s2 + $0xca8] ss:$156 sps:$4 sm:$0xff]   ;;  %v21027_v26 = vld [vmem:[%s26704_s2 + $0xdd8] ss:$156 sps:$4 sm:$0xff]  }
 0x5a7   : > { %v18908_v63 = vpop.f32.mrf.mxu0  ;;  %v19020_v42 = vpop.f32.mrf.mxu1  ;;  %19557 = vmatprep.subr.bf16.mxu0 %v21153_v32  ;;  %19953 = vmatprep.subr.bf16.mxu1 %v21153_v32 }
 0x5a8   : > { %v25251_v41 = vadd.f32 %v19018_v33, %v13813_v13  ;;  %v18909_v51 = vadd.f32 %v18908_v63, %v18907_v2  ;;  %v19021_v3 = vadd.f32 %v19020_v42, %v19019_v23  ;;  %v21035_v33 = vld [vmem:[%s26704_s2 + $0xf14] ss:$156 sps:$4 sm:$0xff]   ;;  %v21038_v13 = vld [vmem:[%s26704_s2 + $0xf1c] ss:$156 sps:$4 sm:$0xff]  }
 0x5a9   : > { %v18910_v47 = vpop.f32.mrf.mxu0  ;;  %v19022_v36 = vpop.f32.mrf.mxu1 }
 0x5aa   : > { %v13818_v52 = vadd.f32 %v18909_v51, %v24946_v35 }
 0x5ab   : > { %v18911_v10 = vpop.f32.mrf.mxu0  ;;  %v19023_v7 = vpop.f32.mrf.mxu1 }
 0x5ac   : > { %v25266_v25 = vadd.f32 %v19021_v3, %v13818_v52  ;;  %v18912_v14 = vadd.f32 %v18911_v10, %v18910_v47  ;;  %v19024_v35 = vadd.f32 %v19023_v7, %v19022_v36 }
 0x5ad   : > { %v18913_v58 = vpop.f32.mrf.mxu0  ;;  %14210 = vmatmul.mubr.bf16.gmra.mxu0 %v21019_v0  ;;  %v19025_v45 = vpop.f32.mrf.mxu1  ;;  %14371 = vmatmul.mubr.bf16.gmra.mxu1 %v21022_v53 }
 0x5ae   : > { %v13821_v1 = vadd.f32 %v18912_v14, %v24949_v18  ;;  %14217 = vmatprep.mubr.bf16.mxu0 %v21029_v61  ;;  %14378 = vmatprep.mubr.bf16.mxu1 %v21032_v40  ;;  %v21030_v18 = vld [vmem:[%s26704_s2 + $0xde0] ss:$156 sps:$4 sm:$0xff]   ;;  %v21033_v40 = vld [vmem:[%s26704_s2 + $0xf10] ss:$156 sps:$4 sm:$0xff]  }
 0x5af   : > { %v18914_v50 = vpop.f32.mrf.mxu0  ;;  %v19026_v6 = vpop.f32.mrf.mxu1 }
 0x5b0   : > { %v25269_v59 = vadd.f32 %v19024_v35, %v13821_v1  ;;  %v18915_v39 = vadd.f32 %v18914_v50, %v18913_v58  ;;  %v19027_v19 = vadd.f32 %v19026_v6, %v19025_v45  ;;  %v21047_v35 = vld [vmem:[%s26704_s2 + $0x104c] ss:$156 sps:$4 sm:$0xff]   ;;  %v21050_v1 = vld [vmem:[%s26704_s2 + $0x1054] ss:$156 sps:$4 sm:$0xff]  }
 0x5b1   : > { %v18916_v9 = vpop.f32.mrf.mxu0  ;;  %v19028_v44 = vpop.f32.mrf.mxu1 }
 0x5b2   : > { %v13826_v43 = vadd.f32 %v18915_v39, %v24965_v4 }
 0x5b3   : > { %v18917_v2 = vpop.f32.mrf.mxu0  ;;  %v19029_v4 = vpop.f32.mrf.mxu1 }
 0x5b4   : > { %v25285_v23 = vadd.f32 %v19027_v19, %v13826_v43  ;;  %v18918_v63 = vadd.f32 %v18917_v2, %v18916_v9  ;;  %v19030_v51 = vadd.f32 %v19029_v4, %v19028_v44  ;;  %v21045_v2 = vld [vmem:[%s26704_s2 + $0x1048] ss:$156 sps:$4 sm:$0xff]  }
 0x5b5   : > { %v18919_v42 = vpop.f32.mrf.mxu0  ;;  %14218 = vmatmul.mubr.bf16.gmra.mxu0 %v21027_v26  ;;  %v19031_v47 = vpop.f32.mrf.mxu1  ;;  %14379 = vmatmul.mubr.bf16.gmra.mxu1 %v21030_v18  ;;  %v21061_v4 = vld [vmem:[%s26704_s2 + $0x1184] ss:$156 sps:$4 sm:$0xff]  }
 0x5b6   : > { %v13829_v3 = vadd.f32 %v18918_v63, %v24968_v55  ;;  %14225 = vmatprep.mubr.bf16.mxu0 %v21035_v33  ;;  %14386 = vmatprep.mubr.bf16.mxu1 %v21038_v13  ;;  %v21036_v55 = vld [vmem:[%s26704_s2 + $0xf18] ss:$156 sps:$4 sm:$0xff]  }
 0x5b7   : > { %v18920_v0 = vpop.f32.mrf.mxu0  ;;  %v19032_v53 = vpop.f32.mrf.mxu1 }
 0x5b8   : > { %v25288_v52 = vadd.f32 %v19030_v51, %v13829_v3  ;;  %v18921_v36 = vadd.f32 %v18920_v0, %v18919_v42  ;;  %v19033_v61 = vadd.f32 %v19032_v53, %v19031_v47  ;;  %v21064_v42 = vld [vmem:[%s26704_s2 + $0x118c] ss:$156 sps:$4 sm:$0xff]  }
 0x5b9   : > { %v18922_v10 = vpop.f32.mrf.mxu0  ;;  %v19034_v7 = vpop.f32.mrf.mxu1 }
 0x5ba   : > { %v13834_v14 = vadd.f32 %v18921_v36, %v24983_v20 }
 0x5bb   : > { %v18923_v58 = vpop.f32.mrf.mxu0  ;;  %v19035_v39 = vpop.f32.mrf.mxu1 }
 0x5bc   : > { %v25303_v45 = vadd.f32 %v19033_v61, %v13834_v14  ;;  %v18924_v50 = vadd.f32 %v18923_v58, %v18922_v10  ;;  %v19036_v6 = vadd.f32 %v19035_v39, %v19034_v7  ;;  %v21059_v58 = vld [vmem:[%s26704_s2 + $0x1180] ss:$156 sps:$4 sm:$0xff]  }
 0x5bd   : > { %v18925_v20 = vpop.f32.mrf.mxu0  ;;  %14226 = vmatmul.mubr.bf16.gmra.mxu0 %v21033_v40  ;;  %v19037_v19 = vpop.f32.mrf.mxu1  ;;  %14387 = vmatmul.mubr.bf16.gmra.mxu1 %v21036_v55  ;;  %v21075_v39 = vld [vmem:[%s26704_s2 + $0x12bc] ss:$156 sps:$4 sm:$0xff]  }
 0x5be   : > { %v13837_v32 = vadd.f32 %v18924_v50, %v24987_v30  ;;  %14233 = vmatprep.mubr.bf16.mxu0 %v21047_v35  ;;  %14394 = vmatprep.mubr.bf16.mxu1 %v21050_v1  ;;  %v21048_v30 = vld [vmem:[%s26704_s2 + $0x1050] ss:$156 sps:$4 sm:$0xff]  }
 0x5bf   : > { %v18926_v9 = vpop.f32.mrf.mxu0  ;;  %v19038_v44 = vpop.f32.mrf.mxu1 }
 0x5c0   : > { %v25306_v26 = vadd.f32 %v19036_v6, %v13837_v32  ;;  %v18927_v43 = vadd.f32 %v18926_v9, %v18925_v20  ;;  %v19039_v18 = vadd.f32 %v19038_v44, %v19037_v19  ;;  %v21078_v20 = vld [vmem:[%s26704_s2 + $0x12c4] ss:$156 sps:$4 sm:$0xff]  }
 0x5c1   : > { %v18928_v33 = vpop.f32.mrf.mxu0  ;;  %v19040_v63 = vpop.f32.mrf.mxu1 }
 0x5c2   : > { %v13842_v13 = vadd.f32 %v18927_v43, %v25002_v16 }
 0x5c3   : > { %v18929_v51 = vpop.f32.mrf.mxu0  ;;  %v19041_v0 = vpop.f32.mrf.mxu1 }
 0x5c4   : > { %v25321_v3 = vadd.f32 %v19039_v18, %v13842_v13  ;;  %v18930_v47 = vadd.f32 %v18929_v51, %v18928_v33  ;;  %v19042_v36 = vadd.f32 %v19041_v0, %v19040_v63  ;;  %v21073_v51 = vld [vmem:[%s26704_s2 + $0x12b8] ss:$156 sps:$4 sm:$0xff]   ;;  %v21089_v0 = vld [vmem:[%s26704_s2 + $0x84] ss:$156 sps:$4 sm:$0xff]  }
 0x5c5   : > { %v18931_v16 = vpop.f32.mrf.mxu0  ;;  %14234 = vmatmul.mubr.bf16.gmra.mxu0 %v21045_v2  ;;  %v19043_v61 = vpop.f32.mrf.mxu1  ;;  %14395 = vmatmul.mubr.bf16.gmra.mxu1 %v21048_v30 }
 0x5c6   : > { %v13845_v53 = vadd.f32 %v18930_v47, %v25005_v24  ;;  %14241 = vmatprep.mubr.bf16.mxu0 %v21061_v4  ;;  %14402 = vmatprep.mubr.bf16.mxu1 %v21064_v42  ;;  %v21062_v24 = vld [vmem:[%s26704_s2 + $0x1188] ss:$156 sps:$4 sm:$0xff]  }
 0x5c7   : > { %v18932_v10 = vpop.f32.mrf.mxu0  ;;  %v19044_v7 = vpop.f32.mrf.mxu1 }
 0x5c8   : > { %v25324_v40 = vadd.f32 %v19042_v36, %v13845_v53  ;;  %v18933_v14 = vadd.f32 %v18932_v10, %v18931_v16  ;;  %v19045_v55 = vadd.f32 %v19044_v7, %v19043_v61  ;;  %v21092_v16 = vld [vmem:[%s26704_s2 + $0x8c] ss:$156 sps:$4 sm:$0xff]  }
 0x5c9   : > { %v18934_v35 = vpop.f32.mrf.mxu0  ;;  %v19046_v50 = vpop.f32.mrf.mxu1 }
 0x5ca   : > { %v13850_v1 = vadd.f32 %v18933_v14, %v25020_v8 }
 0x5cb   : > { %v18935_v6 = vpop.f32.mrf.mxu0  ;;  %v19047_v9 = vpop.f32.mrf.mxu1 }
 0x5cc   : > { %v25339_v32 = vadd.f32 %v19045_v55, %v13850_v1  ;;  %v18936_v19 = vadd.f32 %v18935_v6, %v18934_v35  ;;  %v19048_v43 = vadd.f32 %v19047_v9, %v19046_v50  ;;  %v21087_v6 = vld [vmem:[%s26704_s2 + $0x80] ss:$156 sps:$4 sm:$0xff]  }
 0x5cd   : > { %v18937_v8 = vpop.f32.mrf.mxu0  ;;  %14242 = vmatmul.mubr.bf16.gmra.mxu0 %v21059_v58  ;;  %v19049_v18 = vpop.f32.mrf.mxu1  ;;  %14403 = vmatmul.mubr.bf16.gmra.mxu1 %v21062_v24  ;;  %v21095_v9 = vld [vmem:[%s26704_s2 + $0x1bc] ss:$156 sps:$4 sm:$0xff]  }
 0x5ce   : > { %v13853_v44 = vadd.f32 %v18936_v19, %v25023_v54  ;;  %14249 = vmatprep.mubr.bf16.mxu0 %v21075_v39  ;;  %14410 = vmatprep.mubr.bf16.mxu1 %v21078_v20  ;;  %v21076_v54 = vld [vmem:[%s26704_s2 + $0x12c0] ss:$156 sps:$4 sm:$0xff]   ;;  %v21090_v19 = vld [vmem:[%s26704_s2 + $0x88] ss:$156 sps:$4 sm:$0xff]  }
 0x5cf   : > { %v18938_v33 = vpop.f32.mrf.mxu0  ;;  %v19050_v63 = vpop.f32.mrf.mxu1 }
 0x5d0   : > { %v25342_v2 = vadd.f32 %v19048_v43, %v13853_v44  ;;  %v18939_v13 = vadd.f32 %v18938_v33, %v18937_v8  ;;  %v19051_v30 = vadd.f32 %v19050_v63, %v19049_v18  ;;  %v21098_v8 = vld [vmem:[%s26704_s2 + $0x1c4] ss:$156 sps:$4 sm:$0xff]   ;;  %v21154_v44 = vld [vmem:[%s22823_s27 + $0x938] sm:$0xff]  }
 0x5d1   : > { %v18940_v4 = vpop.f32.mrf.mxu0  ;;  %v19052_v47 = vpop.f32.mrf.mxu1 }
 0x5d2   : > { %v13858_v42 = vadd.f32 %v18939_v13, %v25038_v37  ;;  %v21167_v13 = vld [vmem:[%s22823_s27 + $0x970] sm:$0xff]  }
 0x5d3   : > { %v18941_v36 = vpop.f32.mrf.mxu0  ;;  %v19053_v10 = vpop.f32.mrf.mxu1 }
 0x5d4   : > { %v25357_v53 = vadd.f32 %v19051_v30, %v13858_v42  ;;  %v18942_v61 = vadd.f32 %v18941_v36, %v18940_v4  ;;  %v19054_v14 = vadd.f32 %v19053_v10, %v19052_v47  ;;  %v21168_v47 = vld [vmem:[%s22823_s27 + $0x930] sm:$0xff]  }
 0x5d5   : > { %v18943_v37 = vpop.f32.mrf.mxu0  ;;  %14250 = vmatmul.mubr.bf16.gmra.mxu0 %v21073_v51  ;;  %v19055_v55 = vpop.f32.mrf.mxu1  ;;  %14411 = vmatmul.mubr.bf16.gmra.mxu1 %v21076_v54 }
 0x5d6   : > { %v13861_v7 = vadd.f32 %v18942_v61, %v25041_v38  ;;  %14451 = vmatprep.mubr.bf16.mxu0 %v21089_v0  ;;  %14612 = vmatprep.mubr.bf16.mxu1 %v21092_v16  ;;  %v21175_v16 = vld [vmem:[%s22823_s27 + $0x968] sm:$0xff]  }
 0x5d7   : > { %v18944_v35 = vpop.f32.mrf.mxu0  ;;  %v19056_v50 = vpop.f32.mrf.mxu1 }
 0x5d8   : > { %v25360_v58 = vadd.f32 %v19054_v14, %v13861_v7  ;;  %v18945_v1 = vadd.f32 %v18944_v35, %v18943_v37  ;;  %v19057_v24 = vadd.f32 %v19056_v50, %v19055_v55  ;;  %v21096_v7 = vld [vmem:[%s26704_s2 + $0x1c0] ss:$156 sps:$4 sm:$0xff]   ;;  %v21101_v55 = vld [vmem:[%s26704_s2 + $0x2f4] ss:$156 sps:$4 sm:$0xff]   ;;  %v21176_v50 = vld [vmem:[%s22823_s27 + $0x928] sm:$0xff]  }
 0x5d9   : > { %v18946_v39 = vpop.f32.mrf.mxu0  ;;  %v19058_v38 = vpop.f32.mrf.mxu1 }
 0x5da   : > { %v13866_v20 = vadd.f32 %v18945_v1, %v25057_v31  ;;  %v21104_v1 = vld [vmem:[%s26704_s2 + $0x2fc] ss:$156 sps:$4 sm:$0xff]  }
 0x5db   : > { %v18947_v43 = vpop.f32.mrf.mxu0  ;;  %v19059_v31 = vpop.f32.mrf.mxu1 }
 0x5dc   : > { %v25376_v18 = vadd.f32 %v19057_v24, %v13866_v20  ;;  %v18948_v33 = vadd.f32 %v18947_v43, %v18946_v39  ;;  %v19060_v63 = vadd.f32 %v19059_v31, %v19058_v38 }
 0x5dd   : > { %v18949_v30 = vpop.f32.mrf.mxu0  ;;  %14452 = vmatmul.mubr.bf16.vlgmr.msra.gmra.mxu0 %v21087_v6  ;;  %v19061_v51 = vpop.f32.mrf.mxu1  ;;  %14613 = vmatmul.mubr.bf16.vlgmr.msra.gmra.mxu1 %v21090_v19  ;;  %v21177_v6 = vld [vmem:[%s22823_s27 + $0x960] sm:$0xff]  }
 0x5de   : > { %v13869_v4 = vadd.f32 %v18948_v33, %v25064_v15  ;;  %14459 = vmatprep.mubr.bf16.mxu0 %v21095_v9  ;;  %14620 = vmatprep.mubr.bf16.mxu1 %v21098_v8  ;;  %v21093_v15 = vld [vmem:[%s26704_s2 + $0x1b8] ss:$156 sps:$4 sm:$0xff]   ;;  %v21178_v8 = vld [vmem:[%s22823_s27 + $0x920] sm:$0xff]  }
 0x5df   : > { %v18950_v42 = vpop.f32.mrf.mxu0  ;;  %19558 = vmatpush3.bf16.msra.mxu0 %v21154_v44  ;;  %v19062_v36 = vpop.f32.mrf.mxu1  ;;  %19961 = vmatpush3.bf16.msra.mxu1 %v21154_v44 }
 0x5e0   : > { %v25381_v54 = vadd.f32 %v19060_v63, %v13869_v4  ;;  %v18951_v0 = vadd.f32 %v18950_v42, %v18949_v30  ;;  %19559 = vmatprep.subr.bf16.mxu0 %v21167_v13  ;;  %v19063_v61 = vadd.f32 %v19062_v36, %v19061_v51  ;;  %19954 = vmatprep.subr.bf16.mxu1 %v21167_v13  ;;  %v21185_v13 = vld [vmem:[%s22823_s27 + $0x958] sm:$0xff]   ;;  %v21110_v36 = vld [vmem:[%s26704_s2 + $0x434] ss:$156 sps:$4 sm:$0xff]  }
 0x5e1   : > { %v18952_v10 = vpop.f32.mrf.mxu0  ;;  %v19064_v37 = vpop.f32.mrf.mxu1  ;;  %v21102_v42 = vld [vmem:[%s26704_s2 + $0x2f8] ss:$156 sps:$4 sm:$0xff]  }
 0x5e2   : > { %v13874_v14 = vadd.f32 %v18951_v0, %v25083_v62 }
 0x5e3   : > { %v18953_v35 = vpop.f32.mrf.mxu0  ;;  %19560 = vmatpush3.bf16.msra.mxu0 %v21168_v47  ;;  %v19065_v62 = vpop.f32.mrf.mxu1  ;;  %19962 = vmatpush3.bf16.msra.mxu1 %v21168_v47  ;;  %v21107_v47 = vld [vmem:[%s26704_s2 + $0x42c] ss:$156 sps:$4 sm:$0xff]  }
 0x5e4   : > { %v25398_v24 = vadd.f32 %v19063_v61, %v13874_v14  ;;  %v18954_v39 = vadd.f32 %v18953_v35, %v18952_v10  ;;  %19561 = vmatprep.subr.bf16.mxu0 %v21175_v16  ;;  %v19066_v20 = vadd.f32 %v19065_v62, %v19064_v37  ;;  %19955 = vmatprep.subr.bf16.mxu1 %v21175_v16  ;;  %v21186_v16 = vld [vmem:[%s22823_s27 + $0x918] sm:$0xff]  }
 0x5e5   : > { %v18955_v38 = vpop.f32.mrf.mxu0  ;;  %14460 = vmatmul.mubr.bf16.gmra.mxu0 %v21093_v15  ;;  %v19067_v9 = vpop.f32.mrf.mxu1  ;;  %14621 = vmatmul.mubr.bf16.gmra.mxu1 %v21096_v7  ;;  %v21187_v15 = vld [vmem:[%s22823_s27 + $0x950] sm:$0xff]   ;;  %v15174_v35 = vld [vmem:[%s26706_s4 + $0xf8] sm:$0xff] }
 0x5e6   : > { %v13877_v19 = vadd.f32 %v18954_v39, %v25090_v57  ;;  %14467 = vmatprep.mubr.bf16.mxu0 %v21101_v55  ;;  %14628 = vmatprep.mubr.bf16.mxu1 %v21104_v1  ;;  %v21099_v57 = vld [vmem:[%s26704_s2 + $0x2f0] ss:$156 sps:$4 sm:$0xff]  }
 0x5e7   : > { %v18956_v43 = vpop.f32.mrf.mxu0  ;;  %19562 = vmatpush3.bf16.msra.mxu0 %v21176_v50  ;;  %v19068_v31 = vpop.f32.mrf.mxu1  ;;  %19963 = vmatpush3.bf16.msra.mxu1 %v21176_v50  ;;  %v21188_v50 = vld [vmem:[%s22823_s27 + $0x910] sm:$0xff]  }
 0x5e8   : > { %v25403_v44 = vadd.f32 %v19066_v20, %v13877_v19  ;;  %v18957_v33 = vadd.f32 %v18956_v43, %v18955_v38  ;;  %19563 = vmatprep.subr.bf16.mxu0 %v21177_v6  ;;  %v19069_v63 = vadd.f32 %v19068_v31, %v19067_v9  ;;  %19956 = vmatprep.subr.bf16.mxu1 %v21177_v6  ;;  %v15173_v39 = vld [vmem:[%s26706_s4 + $0xf0] sm:$0xff]  ;;  %v21105_v9 = vld [vmem:[%s26704_s2 + $0x428] ss:$156 sps:$4 sm:$0xff]  }
 0x5e9   : > { %v18958_v30 = vpop.f32.mrf.mxu0  ;;  %v19070_v51 = vpop.f32.mrf.mxu1  ;;  %15332 = vperm.xlu1 %20030, %v15174_v35   ;;  %v21113_v31 = vld [vmem:[%s26704_s2 + $0x564] ss:$156 sps:$4 sm:$0xff]   ;;  %15327 = vperm.xlu0 %20029, %v15173_v39  }
 0x5ea   : > { %v13882_v4 = vadd.f32 %v18957_v33, %v25109_v22  ;;  %v21108_v33 = vld [vmem:[%s26704_s2 + $0x430] ss:$156 sps:$4 sm:$0xff]   ;;  %v21111_v35 = vld [vmem:[%s26704_s2 + $0x560] ss:$156 sps:$4 sm:$0xff]  }
 0x5eb   : > { %v18959_v0 = vpop.f32.mrf.mxu0  ;;  %19564 = vmatpush3.bf16.msra.mxu0 %v21178_v8  ;;  %v19071_v22 = vpop.f32.mrf.mxu1  ;;  %19964 = vmatpush3.bf16.msra.mxu1 %v21178_v8 }
 0x5ec   : > { %v25420_v61 = vadd.f32 %v19069_v63, %v13882_v4  ;;  %v18960_v10 = vadd.f32 %v18959_v0, %v18958_v30  ;;  %19565 = vmatprep.subr.bf16.mxu0 %v21185_v13  ;;  %v19072_v14 = vadd.f32 %v19071_v22, %v19070_v51  ;;  %19957 = vmatprep.subr.bf16.mxu1 %v21185_v13  ;;  %v21116_v63 = vld [vmem:[%s26704_s2 + $0x56c] ss:$156 sps:$4 sm:$0xff]   ;;  %v21197_v51 = vld [vmem:[%s22823_s27 + $0x940] sm:$0xff]  }
 0x5ed   : > { %v18961_v37 = vpop.f32.mrf.mxu0  ;;  %14468 = vmatmul.mubr.bf16.gmra.mxu0 %v21099_v57  ;;  %v19073_v55 = vpop.f32.mrf.mxu1  ;;  %14629 = vmatmul.mubr.bf16.gmra.mxu1 %v21102_v42  ;;  %v21196_v30 = vld [vmem:[%s22823_s27 + $0x908] sm:$0xff]   ;;  %v21198_v22 = vld [vmem:[%s22823_s27 + $0x900] sm:$0xff]  }
 0x5ee   : > { %v13885_v7 = vadd.f32 %v18960_v10, %v25116_v17  ;;  %14475 = vmatprep.mubr.bf16.mxu0 %v21107_v47  ;;  %14636 = vmatprep.mubr.bf16.mxu1 %v21110_v36  ;;  %v21195_v17 = vld [vmem:[%s22823_s27 + $0x948] sm:$0xff]  }
 0x5ef   : > { %v18962_v1 = vpop.f32.mrf.mxu0  ;;  %19566 = vmatpush3.bf16.msra.mxu0 %v21186_v16  ;;  %v19074_v20 = vpop.f32.mrf.mxu1  ;;  %19965 = vmatpush3.bf16.msra.mxu1 %v21186_v16  ;;  %v15158_v16 = vld [vmem:[%s26706_s4 + $0x78] sm:$0xff] }
 0x5f0   : > { %v25431_v62 = vadd.f32 %v19072_v14, %v13885_v7  ;;  %v18963_v6 = vadd.f32 %v18962_v1, %v18961_v37  ;;  %19567 = vmatprep.subr.bf16.mxu0 %v21187_v15  ;;  %v19075_v38 = vadd.f32 %v19074_v20, %v19073_v55  ;;  %19958 = vmatprep.subr.bf16.mxu1 %v21187_v15  ;;  %v15157_v15 = vld [vmem:[%s26706_s4 + $0x70] sm:$0xff]  ;;  %v25465_v1 = vld [vmem:[%s22823_s27 + $0x998] sm:$0xff]  }
 0x5f1   : > { %v18964_v19 = vpop.f32.mrf.mxu0  ;;  %v19076_v8 = vpop.f32.mrf.mxu1  ;;  %15252 = vperm.xlu1 %20030, %v15158_v16   ;;  %v21119_v20 = vld [vmem:[%s26704_s2 + $0x69c] ss:$156 sps:$4 sm:$0xff]   ;;  %15247 = vperm.xlu0 %20029, %v15157_v15   ;;  %v21125_v15 = vld [vmem:[%s26704_s2 + $0x7d4] ss:$156 sps:$4 sm:$0xff]  }
 0x5f2   : > { %v13890_v43 = vadd.f32 %v18963_v6, %v25135_v60  ;;  %v21114_v6 = vld [vmem:[%s26704_s2 + $0x568] ss:$156 sps:$4 sm:$0xff]  }
 0x5f3   : > { %v18965_v13 = vpop.f32.mrf.mxu0  ;;  %19568 = vmatpush3.bf16.msra.mxu0 %v21188_v50  ;;  %v19077_v4 = vpop.f32.mrf.mxu1  ;;  %19966 = vmatpush3.bf16.msra.mxu1 %v21188_v50 }
 0x5f4   : > { %v25448_v57 = vadd.f32 %v19075_v38, %v13890_v43  ;;  %v18966_v60 = vadd.f32 %v18965_v13, %v18964_v19  ;;  %19569 = vmatprep.subr.bf16.mxu0 %v21195_v17  ;;  %v19078_v42 = vadd.f32 %v19077_v4, %v19076_v8  ;;  %19959 = vmatprep.subr.bf16.mxu1 %v21195_v17  ;;  %v21122_v38 = vld [vmem:[%s26704_s2 + $0x6a4] ss:$156 sps:$4 sm:$0xff]   ;;  %v15172_v43 = vld [vmem:[%s26706_s4 + $0xe8] sm:$0xff] }
 0x5f5   : > { %v18967_v47 = vpop.f32.mrf.mxu0  ;;  %14476 = vmatmul.mubr.bf16.gmra.mxu0 %v21105_v9  ;;  %v19079_v36 = vpop.f32.mrf.mxu1  ;;  %14637 = vmatmul.mubr.bf16.gmra.mxu1 %v21108_v33 }
 0x5f6   : > { %v13893_v0 = vadd.f32 %v18966_v60, %v25142_v29  ;;  %14483 = vmatprep.mubr.bf16.mxu0 %v21113_v31  ;;  %14644 = vmatprep.mubr.bf16.mxu1 %v21116_v63  ;;  %v15171_v31 = vld [vmem:[%s26706_s4 + $0xe0] sm:$0xff] }
 0x5f7   : > { %v18968_v10 = vpop.f32.mrf.mxu0  ;;  %19570 = vmatpush3.bf16.msra.mxu0 %v21196_v30  ;;  %v19080_v29 = vpop.f32.mrf.mxu1  ;;  %19967 = vmatpush3.bf16.msra.mxu1 %v21196_v30 }
 0x5f8   : > { %v25459_v14 = vadd.f32 %v19078_v42, %v13893_v0  ;;  %v18969_v37 = vadd.f32 %v18968_v10, %v18967_v47  ;;  %19571 = vmatprep.subr.bf16.mxu0 %v21197_v51  ;;  %v19081_v7 = vadd.f32 %v19080_v29, %v19079_v36  ;;  %19960 = vmatprep.subr.bf16.mxu1 %v21197_v51  ;;  %v15156_v42 = vld [vmem:[%s26706_s4 + $0x68] sm:$0xff]  ;;  %v15155_v36 = vld [vmem:[%s26706_s4 + $0x60] sm:$0xff]  ;;  %v21128_v29 = vld [vmem:[%s26704_s2 + $0x7dc] ss:$156 sps:$4 sm:$0xff]  }
 0x5f9   : > { %v18970_v55 = vpop.f32.mrf.mxu0  ;;  %v19082_v39 = vpop.f32.mrf.mxu1  ;;  %15322 = vperm.xlu1 %20030, %v15172_v43   ;;  %15317 = vperm.xlu0 %20029, %v15171_v31  }
 0x5fa   : > { %v13898_v50 = vadd.f32 %v18969_v37, %v25158_v11 }
 0x5fb   : > { %v18971_v17 = vpop.f32.mrf.mxu0  ;;  %19572 = vmatpush3.bf16.msra.mxu0 %v21198_v22  ;;  %v19083_v11 = vpop.f32.mrf.mxu1  ;;  %19968 = vmatpush3.bf16.msra.mxu1 %v21198_v22  ;;  %v21120_v22 = vld [vmem:[%s26704_s2 + $0x6a0] ss:$156 sps:$4 sm:$0xff]  }
 0x5fc   : > { %v25477_v19 = vadd.f32 %v19081_v7, %v13898_v50  ;;  %v18972_v9 = vadd.f32 %v18971_v17, %v18970_v55  ;;  %v19084_v8 = vadd.f32 %v19083_v11, %v19082_v39  ;;  %19881 = vmatprep.subr.bf16.mxu1 %v25465_v1 }
 0x5fd   : > { %v18973_v33 = vpop.f32.mrf.mxu0  ;;  %14484 = vmatmul.mubr.bf16.gmra.mxu0 %v21111_v35  ;;  %v19085_v63 = vpop.f32.mrf.mxu1  ;;  %14645 = vmatmul.mubr.bf16.gmra.mxu1 %v21114_v6  ;;  %v15169_v6 = vld [vmem:[%s26706_s4 + $0xd0] sm:$0xff] }
 0x5fe   : > { %v13901_v13 = vadd.f32 %v18972_v9, %v25161_v5  ;;  %14491 = vmatprep.mubr.bf16.mxu0 %v21119_v20  ;;  %14652 = vmatprep.mubr.bf16.mxu1 %v21122_v38  ;;  %v21117_v5 = vld [vmem:[%s26704_s2 + $0x698] ss:$156 sps:$4 sm:$0xff]  }
 0x5ff   : > { %v18974_v30 = vpop.f32.mrf.mxu0  ;;  %v19086_v51 = vpop.f32.mrf.mxu1  ;;  %15242 = vperm.xlu1 %20030, %v15156_v42   ;;  %15237 = vperm.xlu0 %20029, %v15155_v36  }
 0x600   : > { %v25487_v60 = vadd.f32 %v19084_v8, %v13901_v13  ;;  %v18975_v4 = vadd.f32 %v18974_v30, %v18973_v33  ;;  %v19087_v47 = vadd.f32 %v19086_v51, %v19085_v63  ;;  %v15154_v8 = vld [vmem:[%s26706_s4 + $0x58] sm:$0xff]  ;;  %v15153_v13 = vld [vmem:[%s26706_s4 + $0x50] sm:$0xff]  ;;  %v21131_v51 = vld [vmem:[%s26704_s2 + $0x90c] ss:$156 sps:$4 sm:$0xff]  }
 0x601   : > { %v18976_v0 = vpop.f32.mrf.mxu0  ;;  %v19088_v10 = vpop.f32.mrf.mxu1 }
 0x602   : > { %v13906_v16 = vadd.f32 %v18975_v4, %v25176_v12  ;;  %v15170_v12 = vld [vmem:[%s26706_s4 + $0xd8] sm:$0xff] }
 0x603   : > { %v18977_v37 = vpop.f32.mrf.mxu0  ;;  %v19089_v35 = vpop.f32.mrf.mxu1  ;;  %15312 = vperm.xlu1 %20030, %v15170_v12   ;;  %15307 = vperm.xlu0 %20029, %v15169_v6   ;;  %v21126_v4 = vld [vmem:[%s26704_s2 + $0x7d8] ss:$156 sps:$4 sm:$0xff]  }
 0x604   : > { %v25508_v7 = vadd.f32 %v19087_v47, %v13906_v16  ;;  %v18978_v55 = vadd.f32 %v18977_v37, %v18976_v0  ;;  %v19090_v50 = vadd.f32 %v19089_v35, %v19088_v10  ;;  %v21134_v47 = vld [vmem:[%s26704_s2 + $0x914] ss:$156 sps:$4 sm:$0xff]  }
 0x605   : > { %v18979_v39 = vpop.f32.mrf.mxu0  ;;  %14492 = vmatmul.mubr.bf16.gmra.mxu0 %v21117_v5  ;;  %v19091_v17 = vpop.f32.mrf.mxu1  ;;  %14653 = vmatmul.mubr.bf16.gmra.mxu1 %v21120_v22  ;;  %v15167_v22 = vld [vmem:[%s26706_s4 + $0xc0] sm:$0xff] }
 0x606   : > { %v13909_v20 = vadd.f32 %v18978_v55, %v25179_v27  ;;  %14499 = vmatprep.mubr.bf16.mxu0 %v21125_v15  ;;  %14660 = vmatprep.mubr.bf16.mxu1 %v21128_v29  ;;  %v21123_v27 = vld [vmem:[%s26704_s2 + $0x7d0] ss:$156 sps:$4 sm:$0xff]  }
 0x607   : > { %v18980_v38 = vpop.f32.mrf.mxu0  ;;  %v19092_v43 = vpop.f32.mrf.mxu1  ;;  %15232 = vperm.xlu1 %20030, %v15154_v8   ;;  %15227 = vperm.xlu0 %20029, %v15153_v13  }
 0x608   : > { %v25517_v9 = vadd.f32 %v19090_v50, %v13909_v20  ;;  %v18981_v11 = vadd.f32 %v18980_v38, %v18979_v39  ;;  %v19093_v33 = vadd.f32 %v19092_v43, %v19091_v17  ;;  %v15152_v50 = vld [vmem:[%s26706_s4 + $0x48] sm:$0xff]  ;;  %v15151_v20 = vld [vmem:[%s26706_s4 + $0x40] sm:$0xff] }
 0x609   : > { %v18982_v31 = vpop.f32.mrf.mxu0  ;;  %v19094_v30 = vpop.f32.mrf.mxu1  ;;  %v21137_v43 = vld [vmem:[%s26704_s2 + $0xa44] ss:$156 sps:$4 sm:$0xff]  }
 0x60a   : > { %v13914_v63 = vadd.f32 %v18981_v11, %v25194_v49  ;;  %v15168_v49 = vld [vmem:[%s26706_s4 + $0xc8] sm:$0xff] }
 0x60b   : > { %v18983_v42 = vpop.f32.mrf.mxu0  ;;  %v19095_v36 = vpop.f32.mrf.mxu1  ;;  %15302 = vperm.xlu1 %20030, %v15168_v49   ;;  %15297 = vperm.xlu0 %20029, %v15167_v22   ;;  %v21132_v11 = vld [vmem:[%s26704_s2 + $0x910] ss:$156 sps:$4 sm:$0xff]  }
 0x60c   : > { %v25538_v0 = vadd.f32 %v19093_v33, %v13914_v63  ;;  %v18984_v5 = vadd.f32 %v18983_v42, %v18982_v31  ;;  %v19096_v16 = vadd.f32 %v19095_v36, %v19094_v30  ;;  %v21140_v33 = vld [vmem:[%s26704_s2 + $0xa4c] ss:$156 sps:$4 sm:$0xff]  }
 0x60d   : > { %v18985_v10 = vpop.f32.mrf.mxu0  ;;  %14500 = vmatmul.mubr.bf16.gmra.mxu0 %v21123_v27  ;;  %v19097_v37 = vpop.f32.mrf.mxu1  ;;  %14661 = vmatmul.mubr.bf16.gmra.mxu1 %v21126_v4  ;;  %v15165_v4 = vld [vmem:[%s26706_s4 + $0xb0] sm:$0xff] }
 0x60e   : > { %v13917_v15 = vadd.f32 %v18984_v5, %v25197_v56  ;;  %14507 = vmatprep.mubr.bf16.mxu0 %v21131_v51  ;;  %14668 = vmatprep.mubr.bf16.mxu1 %v21134_v47  ;;  %v21129_v56 = vld [vmem:[%s26704_s2 + $0x908] ss:$156 sps:$4 sm:$0xff]  }
 0x60f   : > { %v18986_v29 = vpop.f32.mrf.mxu0  ;;  %v19098_v12 = vpop.f32.mrf.mxu1  ;;  %15222 = vperm.xlu1 %20030, %v15152_v50   ;;  %15217 = vperm.xlu0 %20029, %v15151_v20  }
 0x610   : > { %v25547_v55 = vadd.f32 %v19096_v16, %v13917_v15  ;;  %v18987_v35 = vadd.f32 %v18986_v29, %v18985_v10  ;;  %v19099_v39 = vadd.f32 %v19098_v12, %v19097_v37  ;;  %v15150_v16 = vld [vmem:[%s26706_s4 + $0x38] sm:$0xff]  ;;  %v15149_v15 = vld [vmem:[%s26706_s4 + $0x30] sm:$0xff] }
 0x611   : > { %v18988_v6 = vpop.f32.mrf.mxu0  ;;  %v19100_v38 = vpop.f32.mrf.mxu1  ;;  %v21143_v12 = vld [vmem:[%s26704_s2 + $0xb7c] ss:$156 sps:$4 sm:$0xff]  }
 0x612   : > { %v13922_v17 = vadd.f32 %v18987_v35, %v25212_v21  ;;  %v15166_v21 = vld [vmem:[%s26706_s4 + $0xb8] sm:$0xff]  ;;  %v21138_v35 = vld [vmem:[%s26704_s2 + $0xa48] ss:$156 sps:$4 sm:$0xff]  }
 0x613   : > { %v18989_v8 = vpop.f32.mrf.mxu0  ;;  %v19101_v13 = vpop.f32.mrf.mxu1  ;;  %15292 = vperm.xlu1 %20030, %v15166_v21   ;;  %15287 = vperm.xlu0 %20029, %v15165_v4  }
 0x614   : > { %v25568_v31 = vadd.f32 %v19099_v39, %v13922_v17  ;;  %v18990_v27 = vadd.f32 %v18989_v8, %v18988_v6  ;;  %v19102_v63 = vadd.f32 %v19101_v13, %v19100_v38  ;;  %v21146_v39 = vld [vmem:[%s26704_s2 + $0xb84] ss:$156 sps:$4 sm:$0xff]  }
 0x615   : > { %v18991_v30 = vpop.f32.mrf.mxu0  ;;  %14508 = vmatmul.mubr.bf16.gmra.mxu0 %v21129_v56  ;;  %v19103_v42 = vpop.f32.mrf.mxu1  ;;  %14669 = vmatmul.mubr.bf16.gmra.mxu1 %v21132_v11  ;;  %v15163_v11 = vld [vmem:[%s26706_s4 + $0xa0] sm:$0xff] }
 0x616   : > { %v13925_v51 = vadd.f32 %v18990_v27, %v25215_v48  ;;  %14515 = vmatprep.mubr.bf16.mxu0 %v21137_v43  ;;  %14676 = vmatprep.mubr.bf16.mxu1 %v21140_v33  ;;  %v21135_v48 = vld [vmem:[%s26704_s2 + $0xa40] ss:$156 sps:$4 sm:$0xff]  }
 0x617   : > { %v18992_v47 = vpop.f32.mrf.mxu0  ;;  %v19104_v49 = vpop.f32.mrf.mxu1  ;;  %15212 = vperm.xlu1 %20030, %v15150_v16   ;;  %15207 = vperm.xlu0 %20029, %v15149_v15  }
 0x618   : > { %v25577_v5 = vadd.f32 %v19102_v63, %v13925_v51  ;;  %v18993_v36 = vadd.f32 %v18992_v47, %v18991_v30  ;;  %v19105_v10 = vadd.f32 %v19104_v49, %v19103_v42  ;;  %v15148_v63 = vld [vmem:[%s26706_s4 + $0x28] sm:$0xff]  ;;  %v15147_v51 = vld [vmem:[%s26706_s4 + $0x20] sm:$0xff]  ;;  %v21149_v49 = vld [vmem:[%s26704_s2 + $0xcb4] ss:$156 sps:$4 sm:$0xff]  }
 0x619   : > { %v18994_v22 = vpop.f32.mrf.mxu0  ;;  %v19106_v29 = vpop.f32.mrf.mxu1 }
 0x61a   : > { %v13930_v37 = vadd.f32 %v18993_v36, %v25230_v46  ;;  %v15164_v46 = vld [vmem:[%s26706_s4 + $0xa8] sm:$0xff]  ;;  %v21144_v36 = vld [vmem:[%s26704_s2 + $0xb80] ss:$156 sps:$4 sm:$0xff]  }
 0x61b   : > { %v18995_v50 = vpop.f32.mrf.mxu0  ;;  %v19107_v20 = vpop.f32.mrf.mxu1  ;;  %15282 = vperm.xlu1 %20030, %v15164_v46   ;;  %15277 = vperm.xlu0 %20029, %v15163_v11  }
 0x61c   : > { %v25598_v6 = vadd.f32 %v19105_v10, %v13930_v37  ;;  %v18996_v56 = vadd.f32 %v18995_v50, %v18994_v22  ;;  %v19108_v17 = vadd.f32 %v19107_v20, %v19106_v29  ;;  %v21152_v10 = vld [vmem:[%s26704_s2 + $0xcbc] ss:$156 sps:$4 sm:$0xff]  }
 0x61d   : > { %v19125_v38 = vpop.f32.mrf.mxu0  ;;  %14516 = vmatmul.mubr.bf16.gmra.mxu0 %v21135_v48  ;;  %v19237_v8 = vpop.f32.mrf.mxu1  ;;  %14677 = vmatmul.mubr.bf16.gmra.mxu1 %v21138_v35  ;;  %v15161_v35 = vld [vmem:[%s26706_s4 + $0x90] sm:$0xff] }
 0x61e   : > { %v13933_v43 = vadd.f32 %v18996_v56, %v25233_v34  ;;  %14523 = vmatprep.mubr.bf16.mxu0 %v21143_v12  ;;  %14684 = vmatprep.mubr.bf16.mxu1 %v21146_v39  ;;  %v21141_v34 = vld [vmem:[%s26704_s2 + $0xb78] ss:$156 sps:$4 sm:$0xff]  }
 0x61f   : > { %v19126_v33 = vpop.f32.mrf.mxu0  ;;  %v19238_v21 = vpop.f32.mrf.mxu1  ;;  %15202 = vperm.xlu1 %20030, %v15148_v63   ;;  %15197 = vperm.xlu0 %20029, %v15147_v51  }
 0x620   : > { %v25607_v27 = vadd.f32 %v19108_v17, %v13933_v43  ;;  %v19127_v13 = vadd.f32 %v19126_v33, %v19125_v38  ;;  %v19239_v30 = vadd.f32 %v19238_v21, %v19237_v8  ;;  %v15146_v17 = vld [vmem:[%s26706_s4 + $0x18] sm:$0xff]  ;;  %v15145_v43 = vld [vmem:[%s26706_s4 + $0x10] sm:$0xff]  ;;  %v21157_v21 = vld [vmem:[%s26704_s2 + $0xdec] ss:$156 sps:$4 sm:$0xff]  }
 0x621   : > { %v19128_v4 = vpop.f32.mrf.mxu0  ;;  %v19240_v47 = vpop.f32.mrf.mxu1 }
 0x622   : > { %v14132_v42 = vadd.f32 %v19127_v13, %v25248_v28  ;;  %v15162_v28 = vld [vmem:[%s26706_s4 + $0x98] sm:$0xff] }
 0x623   : > { %v19129_v16 = vpop.f32.mrf.mxu0  ;;  %v19241_v15 = vpop.f32.mrf.mxu1  ;;  %15272 = vperm.xlu1 %20030, %v15162_v28   ;;  %15267 = vperm.xlu0 %20029, %v15161_v35   ;;  %v21150_v13 = vld [vmem:[%s26704_s2 + $0xcb8] ss:$156 sps:$4 sm:$0xff]  }
 0x624   : > { %v25628_v22 = vadd.f32 %v19239_v30, %v14132_v42  ;;  %v19130_v48 = vadd.f32 %v19129_v16, %v19128_v4  ;;  %v19242_v37 = vadd.f32 %v19241_v15, %v19240_v47  ;;  %v21160_v30 = vld [vmem:[%s26704_s2 + $0xdf4] ss:$156 sps:$4 sm:$0xff]  }
 0x625   : > { %v19131_v29 = vpop.f32.mrf.mxu0  ;;  %14524 = vmatmul.mubr.bf16.gmra.mxu0 %v21141_v34  ;;  %v19243_v50 = vpop.f32.mrf.mxu1  ;;  %14685 = vmatmul.mubr.bf16.gmra.mxu1 %v21144_v36  ;;  %v15159_v36 = vld [vmem:[%s26706_s4 + $0x80] sm:$0xff] }
 0x626   : > { %v14135_v12 = vadd.f32 %v19130_v48, %v25251_v41  ;;  %14531 = vmatprep.mubr.bf16.mxu0 %v21149_v49  ;;  %14692 = vmatprep.mubr.bf16.mxu1 %v21152_v10  ;;  %v21147_v41 = vld [vmem:[%s26704_s2 + $0xcb0] ss:$156 sps:$4 sm:$0xff]  }
 0x627   : > { %v19132_v39 = vpop.f32.mrf.mxu0  ;;  %v19244_v46 = vpop.f32.mrf.mxu1  ;;  %15192 = vperm.xlu1 %20030, %v15146_v17   ;;  %15187 = vperm.xlu0 %20029, %v15145_v43  }
 0x628   : > { %v25637_v56 = vadd.f32 %v19242_v37, %v14135_v12  ;;  %v19133_v20 = vadd.f32 %v19132_v39, %v19131_v29  ;;  %v19245_v38 = vadd.f32 %v19244_v46, %v19243_v50  ;;  %v15144_v37 = vld [vmem:[%s26706_s4 + $0x8] sm:$0xff]  ;;  %v15143_v12 = vld [vmem:[%s26706_s4] sm:$0xff] }
 0x629   : > { %v19134_v11 = vpop.f32.mrf.mxu0  ;;  %v19246_v33 = vpop.f32.mrf.mxu1  ;;  %v21163_v46 = vld [vmem:[%s26704_s2 + $0xf24] ss:$156 sps:$4 sm:$0xff]  }
 0x62a   : > { %v14140_v8 = vadd.f32 %v19133_v20, %v25266_v25  ;;  %v15160_v25 = vld [vmem:[%s26706_s4 + $0x88] sm:$0xff] }
 0x62b   : > { %v19135_v63 = vpop.f32.mrf.mxu0  ;;  %v19247_v51 = vpop.f32.mrf.mxu1  ;;  %15262 = vperm.xlu1 %20030, %v15160_v25   ;;  %15257 = vperm.xlu0 %20029, %v15159_v36   ;;  %v21158_v20 = vld [vmem:[%s26704_s2 + $0xdf0] ss:$156 sps:$4 sm:$0xff]  }
 0x62c   : > { %v25658_v4 = vadd.f32 %v19245_v38, %v14140_v8  ;;  %v19136_v34 = vadd.f32 %v19135_v63, %v19134_v11  ;;  %v19248_v42 = vadd.f32 %v19247_v51, %v19246_v33  ;;  %v21166_v38 = vld [vmem:[%s26704_s2 + $0xf2c] ss:$156 sps:$4 sm:$0xff]  }
 0x62d   : > { %v19137_v47 = vpop.f32.mrf.mxu0  ;;  %14532 = vmatmul.mubr.bf16.gmra.mxu0 %v21147_v41  ;;  %v19249_v16 = vpop.f32.mrf.mxu1  ;;  %14693 = vmatmul.mubr.bf16.gmra.mxu1 %v21150_v13  ;;  %v15720_v13 = vld [vmem:[%s26708_s6] sm:$0xff] }
 0x62e   : > { %v14143_v49 = vadd.f32 %v19136_v34, %v25269_v59  ;;  %14539 = vmatprep.mubr.bf16.mxu0 %v21157_v21  ;;  %14700 = vmatprep.mubr.bf16.mxu1 %v21160_v30  ;;  %v21155_v59 = vld [vmem:[%s26704_s2 + $0xde8] ss:$156 sps:$4 sm:$0xff]  }
 0x62f   : > { %v19138_v10 = vpop.f32.mrf.mxu0  ;;  %v19250_v28 = vpop.f32.mrf.mxu1  ;;  %15182 = vperm.xlu1 %20030, %v15144_v37   ;;  %15177 = vperm.xlu0 %20029, %v15143_v12  }
 0x630   : > { %v25667_v48 = vadd.f32 %v19248_v42, %v14143_v49  ;;  %v19139_v15 = vadd.f32 %v19138_v10, %v19137_v47  ;;  %v19251_v29 = vadd.f32 %v19250_v28, %v19249_v16  ;;  %v15723_v42 = vld [vmem:[%s26708_s6 + $0x18] sm:$0xff]  ;;  %v15722_v49 = vld [vmem:[%s26708_s6 + $0x10] sm:$0xff] }
 0x631   : > { %v19140_v35 = vpop.f32.mrf.mxu0  ;;  %v19252_v39 = vpop.f32.mrf.mxu1  ;;  %v21171_v28 = vld [vmem:[%s26704_s2 + $0x105c] ss:$156 sps:$4 sm:$0xff]  }
 0x632   : > { %v14148_v50 = vadd.f32 %v19139_v15, %v25285_v23  ;;  %v15721_v23 = vld [vmem:[%s26708_s6 + $0x8] sm:$0xff] }
 0x633   : > { %v19141_v17 = vpop.f32.mrf.mxu0  ;;  %v19253_v43 = vpop.f32.mrf.mxu1  ;;  %15743 = vperm.xlu1 %20030, %v15721_v23   ;;  %15738 = vperm.xlu0 %20029, %v15720_v13   ;;  %v21164_v15 = vld [vmem:[%s26704_s2 + $0xf28] ss:$156 sps:$4 sm:$0xff]  }
 0x634   : > { %v25688_v11 = vadd.f32 %v19251_v29, %v14148_v50  ;;  %v19142_v41 = vadd.f32 %v19141_v17, %v19140_v35  ;;  %v19254_v8 = vadd.f32 %v19253_v43, %v19252_v39  ;;  %v21174_v29 = vld [vmem:[%s26704_s2 + $0x1064] ss:$156 sps:$4 sm:$0xff]  }
 0x635   : > { %v19143_v33 = vpop.f32.mrf.mxu0  ;;  %14540 = vmatmul.mubr.bf16.gmra.mxu0 %v21155_v59  ;;  %v19255_v63 = vpop.f32.mrf.mxu1  ;;  %14701 = vmatmul.mubr.bf16.gmra.mxu1 %v21158_v20  ;;  %v15724_v20 = vld [vmem:[%s26708_s6 + $0x20] sm:$0xff] }
 0x636   : > { %v14151_v21 = vadd.f32 %v19142_v41, %v25288_v52  ;;  %14547 = vmatprep.mubr.bf16.mxu0 %v21163_v46  ;;  %14708 = vmatprep.mubr.bf16.mxu1 %v21166_v38  ;;  %v21161_v52 = vld [vmem:[%s26704_s2 + $0xf20] ss:$156 sps:$4 sm:$0xff]  }
 0x637   : > { %v19144_v30 = vpop.f32.mrf.mxu0  ;;  %v19256_v25 = vpop.f32.mrf.mxu1  ;;  %15753 = vperm.xlu1 %20030, %v15723_v42   ;;  %15748 = vperm.xlu0 %20029, %v15722_v49  }
 0x638   : > { %v25697_v34 = vadd.f32 %v19254_v8, %v14151_v21  ;;  %v19145_v51 = vadd.f32 %v19144_v30, %v19143_v33  ;;  %v19257_v47 = vadd.f32 %v19256_v25, %v19255_v63  ;;  %v15727_v8 = vld [vmem:[%s26708_s6 + $0x38] sm:$0xff]  ;;  %v15726_v21 = vld [vmem:[%s26708_s6 + $0x30] sm:$0xff] }
 0x639   : > { %v19146_v36 = vpop.f32.mrf.mxu0  ;;  %v19258_v10 = vpop.f32.mrf.mxu1  ;;  %v21181_v25 = vld [vmem:[%s26704_s2 + $0x1194] ss:$156 sps:$4 sm:$0xff]  }
 0x63a   : > { %v14156_v16 = vadd.f32 %v19145_v51, %v25303_v45  ;;  %v15725_v45 = vld [vmem:[%s26708_s6 + $0x28] sm:$0xff]  ;;  %v21172_v51 = vld [vmem:[%s26704_s2 + $0x1060] ss:$156 sps:$4 sm:$0xff]  }
 0x63b   : > { %v19147_v37 = vpop.f32.mrf.mxu0  ;;  %v19259_v12 = vpop.f32.mrf.mxu1  ;;  %15763 = vperm.xlu1 %20030, %v15725_v45   ;;  %15758 = vperm.xlu0 %20029, %v15724_v20  }
 0x63c   : > { %v25718_v35 = vadd.f32 %v19257_v47, %v14156_v16  ;;  %v19148_v59 = vadd.f32 %v19147_v37, %v19146_v36  ;;  %v19260_v50 = vadd.f32 %v19259_v12, %v19258_v10  ;;  %v21184_v47 = vld [vmem:[%s26704_s2 + $0x119c] ss:$156 sps:$4 sm:$0xff]  }
 0x63d   : > { %v19149_v39 = vpop.f32.mrf.mxu0  ;;  %14548 = vmatmul.mubr.bf16.gmra.mxu0 %v21161_v52  ;;  %v19261_v17 = vpop.f32.mrf.mxu1  ;;  %14709 = vmatmul.mubr.bf16.gmra.mxu1 %v21164_v15  ;;  %v15728_v15 = vld [vmem:[%s26708_s6 + $0x40] sm:$0xff] }
 0x63e   : > { %v14159_v46 = vadd.f32 %v19148_v59, %v25306_v26  ;;  %14555 = vmatprep.mubr.bf16.mxu0 %v21171_v28  ;;  %14716 = vmatprep.mubr.bf16.mxu1 %v21174_v29  ;;  %v21169_v26 = vld [vmem:[%s26704_s2 + $0x1058] ss:$156 sps:$4 sm:$0xff]  }
 0x63f   : > { %v19150_v38 = vpop.f32.mrf.mxu0  ;;  %v19262_v23 = vpop.f32.mrf.mxu1  ;;  %15773 = vperm.xlu1 %20030, %v15727_v8   ;;  %15768 = vperm.xlu0 %20029, %v15726_v21  }
 0x640   : > { %v25727_v41 = vadd.f32 %v19260_v50, %v14159_v46  ;;  %v19151_v43 = vadd.f32 %v19150_v38, %v19149_v39  ;;  %v19263_v33 = vadd.f32 %v19262_v23, %v19261_v17  ;;  %v15731_v50 = vld [vmem:[%s26708_s6 + $0x58] sm:$0xff]  ;;  %v15730_v46 = vld [vmem:[%s26708_s6 + $0x50] sm:$0xff]  ;;  %v21191_v23 = vld [vmem:[%s26704_s2 + $0x12cc] ss:$156 sps:$4 sm:$0xff]  }
 0x641   : > { %v19152_v13 = vpop.f32.mrf.mxu0  ;;  %v19264_v30 = vpop.f32.mrf.mxu1 }
 0x642   : > { %v14164_v63 = vadd.f32 %v19151_v43, %v25321_v3  ;;  %v15729_v3 = vld [vmem:[%s26708_s6 + $0x48] sm:$0xff]  ;;  %v21182_v43 = vld [vmem:[%s26704_s2 + $0x1198] ss:$156 sps:$4 sm:$0xff]  }
 0x643   : > { %v19153_v42 = vpop.f32.mrf.mxu0  ;;  %v19265_v49 = vpop.f32.mrf.mxu1  ;;  %15783 = vperm.xlu1 %20030, %v15729_v3   ;;  %15778 = vperm.xlu0 %20029, %v15728_v15  }
 0x644   : > { %v25748_v36 = vadd.f32 %v19263_v33, %v14164_v63  ;;  %v19154_v52 = vadd.f32 %v19153_v42, %v19152_v13  ;;  %v19266_v16 = vadd.f32 %v19265_v49, %v19264_v30  ;;  %v21194_v33 = vld [vmem:[%s26704_s2 + $0x12d4] ss:$156 sps:$4 sm:$0xff]  }
 0x645   : > { %v19155_v10 = vpop.f32.mrf.mxu0  ;;  %14556 = vmatmul.mubr.bf16.gmra.mxu0 %v21169_v26  ;;  %v19267_v37 = vpop.f32.mrf.mxu1  ;;  %14717 = vmatmul.mubr.bf16.gmra.mxu1 %v21172_v51  ;;  %v15732_v51 = vld [vmem:[%s26708_s6 + $0x60] sm:$0xff] }
 0x646   : > { %v14167_v28 = vadd.f32 %v19154_v52, %v25324_v40  ;;  %14563 = vmatprep.mubr.bf16.mxu0 %v21181_v25  ;;  %14724 = vmatprep.mubr.bf16.mxu1 %v21184_v47  ;;  %v21179_v40 = vld [vmem:[%s26704_s2 + $0x1190] ss:$156 sps:$4 sm:$0xff]  }
 0x647   : > { %v19156_v29 = vpop.f32.mrf.mxu0  ;;  %v19268_v45 = vpop.f32.mrf.mxu1  ;;  %15793 = vperm.xlu1 %20030, %v15731_v50   ;;  %15788 = vperm.xlu0 %20029, %v15730_v46  }
 0x648   : > { %v25757_v59 = vadd.f32 %v19266_v16, %v14167_v28  ;;  %v19157_v12 = vadd.f32 %v19156_v29, %v19155_v10  ;;  %v19269_v39 = vadd.f32 %v19268_v45, %v19267_v37  ;;  %v15735_v16 = vld [vmem:[%s26708_s6 + $0x78] sm:$0xff]  ;;  %v15734_v28 = vld [vmem:[%s26708_s6 + $0x70] sm:$0xff] }
 0x649   : > { %v19158_v20 = vpop.f32.mrf.mxu0  ;;  %v19270_v38 = vpop.f32.mrf.mxu1  ;;  %v21201_v45 = vld [vmem:[%s26704_s2 + $0x94] ss:$156 sps:$4 sm:$0xff]  }
 0x64a   : > { %v14172_v17 = vadd.f32 %v19157_v12, %v25339_v32  ;;  %v15733_v32 = vld [vmem:[%s26708_s6 + $0x68] sm:$0xff] }
 0x64b   : > { %v19159_v8 = vpop.f32.mrf.mxu0  ;;  %v19271_v21 = vpop.f32.mrf.mxu1  ;;  %15803 = vperm.xlu1 %20030, %v15733_v32   ;;  %15798 = vperm.xlu0 %20029, %v15732_v51   ;;  %v21192_v12 = vld [vmem:[%s26704_s2 + $0x12d0] ss:$156 sps:$4 sm:$0xff]  }
 0x64c   : > { %v25778_v13 = vadd.f32 %v19269_v39, %v14172_v17  ;;  %v19160_v26 = vadd.f32 %v19159_v8, %v19158_v20  ;;  %v19272_v63 = vadd.f32 %v19271_v21, %v19270_v38  ;;  %v21204_v39 = vld [vmem:[%s26704_s2 + $0x11a4] ss:$156 sps:$4 sm:$0xff]  }
 0x64d   : > { %v19161_v30 = vpop.f32.mrf.mxu0  ;;  %14564 = vmatmul.mubr.bf16.gmra.mxu0 %v21179_v40  ;;  %v19273_v42 = vpop.f32.mrf.mxu1  ;;  %14725 = vmatmul.mubr.bf16.gmra.mxu1 %v21182_v43 }
 0x64e   : > { %v14175_v25 = vadd.f32 %v19160_v26, %v25342_v2  ;;  %14571 = vmatprep.mubr.bf16.mxu0 %v21191_v23  ;;  %14732 = vmatprep.mubr.bf16.mxu1 %v21194_v33  ;;  %v21189_v2 = vld [vmem:[%s26704_s2 + $0x12c8] ss:$156 sps:$4 sm:$0xff]  }
 0x64f   : > { %v19162_v47 = vpop.f32.mrf.mxu0  ;;  %v19274_v3 = vpop.f32.mrf.mxu1  ;;  %15813 = vperm.xlu1 %20030, %v15735_v16   ;;  %15808 = vperm.xlu0 %20029, %v15734_v28  }
 0x650   : > { %v25787_v52 = vadd.f32 %v19272_v63, %v14175_v25  ;;  %v19163_v49 = vadd.f32 %v19162_v47, %v19161_v30  ;;  %v19275_v10 = vadd.f32 %v19274_v3, %v19273_v42  ;;  %v21199_v63 = vld [vmem:[%s26704_s2 + $0x90] ss:$156 sps:$4 sm:$0xff]   ;;  %v21212_v47 = vld [vmem:[%s26704_s2 + $0x12dc] ss:$156 sps:$4 sm:$0xff]  }
 0x651   : > { %v19164_v15 = vpop.f32.mrf.mxu0  ;;  %v19276_v29 = vpop.f32.mrf.mxu1  ;;  %v21209_v25 = vld [vmem:[%s26704_s2 + $0x1cc] ss:$156 sps:$4 sm:$0xff]  }
 0x652   : > { %v14180_v37 = vadd.f32 %v19163_v49, %v25357_v53 }
 0x653   : > { %v19165_v50 = vpop.f32.mrf.mxu0  ;;  %v19277_v46 = vpop.f32.mrf.mxu1 }
 0x654   : > { %v25808_v20 = vadd.f32 %v19275_v10, %v14180_v37  ;;  %v19166_v40 = vadd.f32 %v19165_v50, %v19164_v15  ;;  %v19278_v53 = vadd.f32 %v19277_v46, %v19276_v29  ;;  %v21213_v50 = vld [vmem:[%s22823_s27 + $0x988] sm:$0xff]  }
 0x655   : > { %v19167_v17 = vpop.f32.mrf.mxu0  ;;  %14572 = vmatmul.mubr.bf16.gmra.mxu0 %v21189_v2  ;;  %v19279_v43 = vpop.f32.mrf.mxu1  ;;  %14733 = vmatmul.mubr.bf16.gmra.mxu1 %v21192_v12 }
 0x656   : > { %v14183_v38 = vadd.f32 %v19166_v40, %v25360_v58  ;;  %14773 = vmatprep.mubr.bf16.mxu0 %v21201_v45  ;;  %14885 = vmatprep.mubr.bf16.mxu1 %v21204_v39  ;;  %v21202_v58 = vld [vmem:[%s26704_s2 + $0x11a0] ss:$156 sps:$4 sm:$0xff]  }
 0x657   : > { %v19168_v23 = vpop.f32.mrf.mxu0  ;;  %v19280_v26 = vpop.f32.mrf.mxu1 }
 0x658   : > { %v25811_v8 = vadd.f32 %v19278_v53, %v14183_v38  ;;  %v19169_v33 = vadd.f32 %v19168_v23, %v19167_v17  ;;  %v19281_v21 = vadd.f32 %v19280_v26, %v19279_v43  ;;  %v21217_v17 = vld [vmem:[%s26704_s2 + $0x304] ss:$156 sps:$4 sm:$0xff]   ;;  %v21218_v43 = vld [vmem:[%s26704_s2 + $0x98] ss:$156 sps:$4 sm:$0xff]  }
 0x659   : > { %v19170_v32 = vpop.f32.mrf.mxu0  ;;  %v19282_v51 = vpop.f32.mrf.mxu1 }
 0x65a   : > { %v14188_v30 = vadd.f32 %v19169_v33, %v25376_v18  ;;  %v21206_v18 = vld [vmem:[%s22823_s27 + $0x990] sm:$0xff]  }
 0x65b   : > { %v19171_v42 = vpop.f32.mrf.mxu0  ;;  %v19283_v16 = vpop.f32.mrf.mxu1 }
 0x65c   : > { %v25826_v49 = vadd.f32 %v19281_v21, %v14188_v30  ;;  %v19172_v3 = vadd.f32 %v19171_v42, %v19170_v32  ;;  %v19284_v10 = vadd.f32 %v19283_v16, %v19282_v51  ;;  %v21215_v16 = vld [vmem:[%s26704_s2 + $0x300] ss:$156 sps:$4 sm:$0xff]  }
 0x65d   : > { %v19173_v15 = vpop.f32.mrf.mxu0  ;;  %14774 = vmatmul.mubr.bf16.vlgmr.msra.gmra.mxu0 %v21199_v63  ;;  %v19285_v28 = vpop.f32.mrf.mxu1  ;;  %14886 = vmatmul.mubr.bf16.vlgmr.msra.gmra.mxu1 %v21202_v58 }
 0x65e   : > { %v14191_v2 = vadd.f32 %v19172_v3, %v25381_v54  ;;  %14781 = vmatprep.mubr.bf16.mxu0 %v21209_v25  ;;  %19882 = vmatpush3.bf16.msra.mxu1 %v25465_v1  ;;  %v21207_v54 = vld [vmem:[%s26704_s2 + $0x1c8] ss:$156 sps:$4 sm:$0xff]   ;;  %v21210_v1 = vld [vmem:[%s26704_s2 + $0x12d8] ss:$156 sps:$4 sm:$0xff]  }
 0x65f   : > { %v19174_v37 = vpop.f32.mrf.mxu0  ;;  %14893 = vmatprep.mubr.bf16.mxu1 %v21212_v47  ;;  %v19286_v45 = vpop.f32.mrf.mxu1  ;;  %19883 = vmatprep.subr.bf16.mxu1 %v21206_v18 }
 0x660   : > { %v25831_v29 = vadd.f32 %v19284_v10, %v14191_v2  ;;  %v19175_v12 = vadd.f32 %v19174_v37, %v19173_v15  ;;  %v19287_v39 = vadd.f32 %v19286_v45, %v19285_v28  ;;  %v21219_v10 = vld [vmem:[%s26704_s2 + $0x1d0] ss:$156 sps:$4 sm:$0xff]   ;;  %v21222_v15 = vld [vmem:[%s26704_s2 + $0x43c] ss:$156 sps:$4 sm:$0xff]   ;;  %v21223_v28 = vld [vmem:[%s26704_s2 + $0x308] ss:$156 sps:$4 sm:$0xff]  }
 0x661   : > { %v19176_v40 = vpop.f32.mrf.mxu0  ;;  %v19288_v53 = vpop.f32.mrf.mxu1 }
 0x662   : > { %v14196_v46 = vadd.f32 %v19175_v12, %v25398_v24  ;;  %19884 = vmatpush3.bf16.msra.mxu1 %v21206_v18  ;;  %v21214_v24 = vld [vmem:[%s22823_s27 + $0x980] sm:$0xff]   ;;  %s5373_s27 = sadd.s32 %s16531_s24, %s26727_s23 }
 0x663   : > { %v19177_v38 = vpop.f32.mrf.mxu0  ;;  %v19289_v26 = vpop.f32.mrf.mxu1  ;;  %19885 = vmatprep.subr.bf16.mxu1 %v21213_v50  ;;  %s16532_s25 = sshll.u32 %s5373_s27, 3 }
 0x664   : > { %v25847_v23 = vadd.f32 %v19287_v39, %v14196_v46  ;;  %v19178_v33 = vadd.f32 %v19177_v38, %v19176_v40  ;;  %v19290_v21 = vadd.f32 %v19289_v26, %v19288_v53  ;;  %v21224_v26 = vld [vmem:[%s26704_s2 + $0x440] ss:$156 sps:$4 sm:$0xff]   ;;  %s26631_s28 = scalar_lea.vmem %s26711_s9, %s16532_s25 }
 0x665   : > { %v19179_v32 = vpop.f32.mrf.mxu0  ;;  %14782 = vmatmul.mubr.bf16.gmra.mxu0 %v21207_v54  ;;  %v19291_v30 = vpop.f32.mrf.mxu1  ;;  %14894 = vmatmul.mubr.bf16.gmra.mxu1 %v21210_v1 }
 0x666   : > { %v14199_v63 = vadd.f32 %v19178_v33, %v25403_v44  ;;  %14789 = vmatprep.mubr.bf16.mxu0 %v21217_v17  ;;  %19886 = vmatpush3.bf16.msra.mxu1 %v21213_v50 }
 0x667   : > { %v19180_v51 = vpop.f32.mrf.mxu0  ;;  %19889 = vmatprep.mubr.msk.bf16.mxu1 %vm11794_vm0, %v21218_v43  ;;  %v19292_v42 = vpop.f32.mrf.mxu1  ;;  %19887 = vmatprep.subr.bf16.mxu1 %v21214_v24  ;;  %v21220_v43 = vld [vmem:[%s26704_s2 + $0x438] ss:$156 sps:$4 sm:$0xff]  }
 0x668   : > { %v25852_v58 = vadd.f32 %v19290_v21, %v14199_v63  ;;  %v19181_v25 = vadd.f32 %v19180_v51, %v19179_v32  ;;  %v19293_v47 = vadd.f32 %v19292_v42, %v19291_v30  ;;  %v21228_v32 = vld [vmem:[%s26704_s2 + $0x578] ss:$156 sps:$4 sm:$0xff]  }
 0x669   : > { %v19182_v3 = vpop.f32.mrf.mxu0  ;;  %v19294_v18 = vpop.f32.mrf.mxu1 }
 0x66a   : > { %v14204_v44 = vadd.f32 %v19181_v25, %v25420_v61  ;;  %19888 = vmatpush3.bf16.msra.mxu1 %v21214_v24  ;;  %v21227_v24 = vld [vmem:[%s26704_s2 + $0x574] ss:$156 sps:$4 sm:$0xff]  }
 0x66b   : > { %v19183_v2 = vpop.f32.mrf.mxu0  ;;  %v19295_v45 = vpop.f32.mrf.mxu1 }
 0x66c   : > { %v25867_v37 = vadd.f32 %v19293_v47, %v14204_v44  ;;  %v19184_v12 = vadd.f32 %v19183_v2, %v19182_v3  ;;  %v19296_v61 = vadd.f32 %v19295_v45, %v19294_v18  ;;  %v21225_v2 = vld [vmem:[%s26704_s2 + $0x570] ss:$156 sps:$4 sm:$0xff]  }
 0x66d   : > { %v19185_v50 = vpop.f32.mrf.mxu0  ;;  %14790 = vmatmul.mubr.bf16.gmra.mxu0 %v21215_v16  ;;  %v19297_v40 = vpop.f32.mrf.mxu1  ;;  %19890 = vmatmul.mubr.msk.bf16.vlgmr.msra.gmra.mxu1 %vm11794_vm0, %v21219_v10  ;;  %v21232_v45 = vld [vmem:[%s26704_s2 + $0x6ac] ss:$156 sps:$4 sm:$0xff]  }
 0x66e   : > { %v14207_v39 = vadd.f32 %v19184_v12, %v25431_v62  ;;  %14797 = vmatprep.mubr.bf16.mxu0 %v21222_v15  ;;  %19893 = vmatprep.mubr.msk.bf16.mxu1 %vm11794_vm0, %v21223_v28  ;;  %v21229_v12 = vld [vmem:[%s26704_s2 + $0x6b0] ss:$156 sps:$4 sm:$0xff]  }
 0x66f   : > { %v19186_v54 = vpop.f32.mrf.mxu0  ;;  %v19298_v1 = vpop.f32.mrf.mxu1 }
 0x670   : > { %v25872_v46 = vadd.f32 %v19296_v61, %v14207_v39  ;;  %v19187_v53 = vadd.f32 %v19186_v54, %v19185_v50  ;;  %v19299_v17 = vadd.f32 %v19298_v1, %v19297_v40  ;;  %v21233_v50 = vld [vmem:[%s26704_s2 + $0x7e8] ss:$156 sps:$4 sm:$0xff]  }
 0x671   : > { %v19188_v38 = vpop.f32.mrf.mxu0  ;;  %v19300_v62 = vpop.f32.mrf.mxu1 }
 0x672   : > { %v14212_v33 = vadd.f32 %v19187_v53, %v25448_v57 }
 0x673   : > { %v19189_v21 = vpop.f32.mrf.mxu0  ;;  %v19301_v51 = vpop.f32.mrf.mxu1 }
 0x674   : > { %v25887_v63 = vadd.f32 %v19299_v17, %v14212_v33  ;;  %v19190_v30 = vadd.f32 %v19189_v21, %v19188_v38  ;;  %v19302_v25 = vadd.f32 %v19301_v51, %v19300_v62  ;;  %v21230_v21 = vld [vmem:[%s26704_s2 + $0x6a8] ss:$156 sps:$4 sm:$0xff]  }
 0x675   : > { %v19191_v57 = vpop.f32.mrf.mxu0  ;;  %14798 = vmatmul.mubr.bf16.gmra.mxu0 %v21220_v43  ;;  %v19303_v47 = vpop.f32.mrf.mxu1  ;;  %19894 = vmatmul.mubr.msk.bf16.gmra.mxu1 %vm11794_vm0, %v21224_v26  ;;  %v21237_v51 = vld [vmem:[%s26704_s2 + $0x7e4] ss:$156 sps:$4 sm:$0xff]  }
 0x676   : > { %v14215_v42 = vadd.f32 %v19190_v30, %v25459_v14  ;;  %14805 = vmatprep.mubr.bf16.mxu0 %v21227_v24  ;;  %19897 = vmatprep.mubr.msk.bf16.mxu1 %vm11794_vm0, %v21228_v32  ;;  %v21234_v30 = vld [vmem:[%s26704_s2 + $0x920] ss:$156 sps:$4 sm:$0xff]  }
 0x677   : > { %v19192_v3 = vpop.f32.mrf.mxu0  ;;  %v19304_v18 = vpop.f32.mrf.mxu1 }
 0x678   : > { %v25892_v16 = vadd.f32 %v19302_v25, %v14215_v42  ;;  %v19193_v44 = vadd.f32 %v19192_v3, %v19191_v57  ;;  %v19305_v10 = vadd.f32 %v19304_v18, %v19303_v47  ;;  %v21238_v57 = vld [vmem:[%s26704_s2 + $0xa58] ss:$156 sps:$4 sm:$0xff]  }
 0x679   : > { %v19194_v15 = vpop.f32.mrf.mxu0  ;;  %v19306_v14 = vpop.f32.mrf.mxu1 }
 0x67a   : > { %v14220_v28 = vadd.f32 %v19193_v44, %v25477_v19 }
 0x67b   : > { %v19195_v61 = vpop.f32.mrf.mxu0  ;;  %v19307_v54 = vpop.f32.mrf.mxu1 }
 0x67c   : > { %v25907_v39 = vadd.f32 %v19305_v10, %v14220_v28  ;;  %v19196_v40 = vadd.f32 %v19195_v61, %v19194_v15  ;;  %v19308_v53 = vadd.f32 %v19307_v54, %v19306_v14  ;;  %v21235_v61 = vld [vmem:[%s26704_s2 + $0x7e0] ss:$156 sps:$4 sm:$0xff]  }
 0x67d   : > { %v19197_v19 = vpop.f32.mrf.mxu0  ;;  %14806 = vmatmul.mubr.bf16.gmra.mxu0 %v21225_v2  ;;  %v19309_v17 = vpop.f32.mrf.mxu1  ;;  %19898 = vmatmul.mubr.msk.bf16.gmra.mxu1 %vm11794_vm0, %v21229_v12  ;;  %v21242_v54 = vld [vmem:[%s26704_s2 + $0x91c] ss:$156 sps:$4 sm:$0xff]  }
 0x67e   : > { %v14223_v1 = vadd.f32 %v19196_v40, %v25487_v60  ;;  %14813 = vmatprep.mubr.bf16.mxu0 %v21232_v45  ;;  %19901 = vmatprep.mubr.msk.bf16.mxu1 %vm11794_vm0, %v21233_v50  ;;  %v21239_v40 = vld [vmem:[%s26704_s2 + $0xb90] ss:$156 sps:$4 sm:$0xff]  }
 0x67f   : > { %v19198_v38 = vpop.f32.mrf.mxu0  ;;  %v19310_v62 = vpop.f32.mrf.mxu1 }
 0x680   : > { %v25912_v43 = vadd.f32 %v19308_v53, %v14223_v1  ;;  %v19199_v33 = vadd.f32 %v19198_v38, %v19197_v19  ;;  %v19311_v26 = vadd.f32 %v19310_v62, %v19309_v17  ;;  %v21243_v19 = vld [vmem:[%s26704_s2 + $0xcc8] ss:$156 sps:$4 sm:$0xff]  }
 0x681   : > { %v19200_v24 = vpop.f32.mrf.mxu0  ;;  %v19312_v60 = vpop.f32.mrf.mxu1 }
 0x682   : > { %v14228_v32 = vadd.f32 %v19199_v33, %v25508_v7 }
 0x683   : > { %v19201_v25 = vpop.f32.mrf.mxu0  ;;  %v19313_v3 = vpop.f32.mrf.mxu1 }
 0x684   : > { %v25927_v42 = vadd.f32 %v19311_v26, %v14228_v32  ;;  %v19202_v47 = vadd.f32 %v19201_v25, %v19200_v24  ;;  %v19314_v44 = vadd.f32 %v19313_v3, %v19312_v60  ;;  %v21240_v25 = vld [vmem:[%s26704_s2 + $0x918] ss:$156 sps:$4 sm:$0xff]  }
 0x685   : > { %v19203_v7 = vpop.f32.mrf.mxu0  ;;  %14814 = vmatmul.mubr.bf16.gmra.mxu0 %v21230_v21  ;;  %v19315_v10 = vpop.f32.mrf.mxu1  ;;  %19902 = vmatmul.mubr.msk.bf16.gmra.mxu1 %vm11794_vm0, %v21234_v30  ;;  %v21247_v3 = vld [vmem:[%s26704_s2 + $0xa54] ss:$156 sps:$4 sm:$0xff]  }
 0x686   : > { %v14231_v18 = vadd.f32 %v19202_v47, %v25517_v9  ;;  %14821 = vmatprep.mubr.bf16.mxu0 %v21237_v51  ;;  %19905 = vmatprep.mubr.msk.bf16.mxu1 %vm11794_vm0, %v21238_v57  ;;  %v21244_v47 = vld [vmem:[%s26704_s2 + $0xe00] ss:$156 sps:$4 sm:$0xff]  }
 0x687   : > { %v19204_v15 = vpop.f32.mrf.mxu0  ;;  %v19316_v14 = vpop.f32.mrf.mxu1 }
 0x688   : > { %v25932_v2 = vadd.f32 %v19314_v44, %v14231_v18  ;;  %v19205_v28 = vadd.f32 %v19204_v15, %v19203_v7  ;;  %v19317_v12 = vadd.f32 %v19316_v14, %v19315_v10  ;;  %v21248_v7 = vld [vmem:[%s26704_s2 + $0xf38] ss:$156 sps:$4 sm:$0xff]  }
 0x689   : > { %v19206_v45 = vpop.f32.mrf.mxu0  ;;  %v19318_v9 = vpop.f32.mrf.mxu1 }
 0x68a   : > { %v14236_v50 = vadd.f32 %v19205_v28, %v25538_v0 }
 0x68b   : > { %v19207_v53 = vpop.f32.mrf.mxu0  ;;  %v19319_v38 = vpop.f32.mrf.mxu1 }
 0x68c   : > { %v25947_v1 = vadd.f32 %v19317_v12, %v14236_v50  ;;  %v19208_v17 = vadd.f32 %v19207_v53, %v19206_v45  ;;  %v19320_v33 = vadd.f32 %v19319_v38, %v19318_v9  ;;  %v21245_v53 = vld [vmem:[%s26704_s2 + $0xa50] ss:$156 sps:$4 sm:$0xff]  }
 0x68d   : > { %v19209_v0 = vpop.f32.mrf.mxu0  ;;  %14822 = vmatmul.mubr.bf16.gmra.mxu0 %v21235_v61  ;;  %v19321_v26 = vpop.f32.mrf.mxu1  ;;  %19906 = vmatmul.mubr.msk.bf16.gmra.mxu1 %vm11794_vm0, %v21239_v40  ;;  %v21252_v38 = vld [vmem:[%s26704_s2 + $0xb8c] ss:$156 sps:$4 sm:$0xff]  }
 0x68e   : > { %v14239_v62 = vadd.f32 %v19208_v17, %v25547_v55  ;;  %14829 = vmatprep.mubr.bf16.mxu0 %v21242_v54  ;;  %19909 = vmatprep.mubr.msk.bf16.mxu1 %vm11794_vm0, %v21243_v19  ;;  %v21249_v17 = vld [vmem:[%s26704_s2 + $0x1070] ss:$156 sps:$4 sm:$0xff]  }
 0x68f   : > { %v19210_v24 = vpop.f32.mrf.mxu0  ;;  %v19322_v60 = vpop.f32.mrf.mxu1 }
 0x690   : > { %v25952_v21 = vadd.f32 %v19320_v33, %v14239_v62  ;;  %v19211_v32 = vadd.f32 %v19210_v24, %v19209_v0  ;;  %v19323_v30 = vadd.f32 %v19322_v60, %v19321_v26  ;;  %v21253_v0 = vld [vmem:[%s26704_s2 + $0x11a8] ss:$156 sps:$4 sm:$0xff]  }
 0x691   : > { %v19212_v51 = vpop.f32.mrf.mxu0  ;;  %v19324_v55 = vpop.f32.mrf.mxu1 }
 0x692   : > { %v14244_v57 = vadd.f32 %v19211_v32, %v25568_v31 }
 0x693   : > { %v19213_v44 = vpop.f32.mrf.mxu0  ;;  %v19325_v15 = vpop.f32.mrf.mxu1 }
 0x694   : > { %v25967_v18 = vadd.f32 %v19323_v30, %v14244_v57  ;;  %v19214_v10 = vadd.f32 %v19213_v44, %v19212_v51  ;;  %v19326_v28 = vadd.f32 %v19325_v15, %v19324_v55  ;;  %v21250_v44 = vld [vmem:[%s26704_s2 + $0xb88] ss:$156 sps:$4 sm:$0xff]  }
 0x695   : > { %v19215_v31 = vpop.f32.mrf.mxu0  ;;  %14830 = vmatmul.mubr.bf16.gmra.mxu0 %v21240_v25  ;;  %v19327_v12 = vpop.f32.mrf.mxu1  ;;  %19910 = vmatmul.mubr.msk.bf16.gmra.mxu1 %vm11794_vm0, %v21244_v47  ;;  %v21257_v15 = vld [vmem:[%s26704_s2 + $0xcc4] ss:$156 sps:$4 sm:$0xff]  }
 0x696   : > { %v14247_v14 = vadd.f32 %v19214_v10, %v25577_v5  ;;  %14837 = vmatprep.mubr.bf16.mxu0 %v21247_v3  ;;  %19913 = vmatprep.mubr.msk.bf16.mxu1 %vm11794_vm0, %v21248_v7  ;;  %v21254_v10 = vld [vmem:[%s26704_s2 + $0x12e0] ss:$156 sps:$4 sm:$0xff]  }
 0x697   : > { %v19216_v45 = vpop.f32.mrf.mxu0  ;;  %v19328_v9 = vpop.f32.mrf.mxu1 }
 0x698   : > { %v25972_v61 = vadd.f32 %v19326_v28, %v14247_v14  ;;  %v19217_v50 = vadd.f32 %v19216_v45, %v19215_v31  ;;  %v19329_v40 = vadd.f32 %v19328_v9, %v19327_v12 }
 0x699   : > { %v19218_v54 = vpop.f32.mrf.mxu0  ;;  %v19330_v5 = vpop.f32.mrf.mxu1 }
 0x69a   : > { %v14252_v19 = vadd.f32 %v19217_v50, %v25598_v6 }
 0x69b   : > { %v19219_v33 = vpop.f32.mrf.mxu0  ;;  %v19331_v24 = vpop.f32.mrf.mxu1 }
 0x69c   : > { %v25987_v62 = vadd.f32 %v19329_v40, %v14252_v19  ;;  %v19220_v26 = vadd.f32 %v19219_v33, %v19218_v54  ;;  %v19332_v32 = vadd.f32 %v19331_v24, %v19330_v5 }
 0x69d   : > { %v19349_v6 = vpop.f32.mrf.mxu0  ;;  %14838 = vmatmul.mubr.bf16.gmra.mxu0 %v21245_v53  ;;  %v19461_v30 = vpop.f32.mrf.mxu1  ;;  %19914 = vmatmul.mubr.msk.bf16.gmra.mxu1 %vm11794_vm0, %v21249_v17 }
 0x69e   : > { %v14255_v60 = vadd.f32 %v19220_v26, %v25607_v27  ;;  %14845 = vmatprep.mubr.bf16.mxu0 %v21252_v38  ;;  %19917 = vmatprep.mubr.msk.bf16.mxu1 %vm11794_vm0, %v21253_v0  ;;  %v21255_v38 = vld [vmem:[%s26704_s2 + $0xcc0] ss:$156 sps:$4 sm:$0xff]  }
 0x69f   : > { %v19350_v51 = vpop.f32.mrf.mxu0  ;;  %v19462_v55 = vpop.f32.mrf.mxu1 }
 0x6a0   : > { %v25992_v25 = vadd.f32 %v19332_v32, %v14255_v60  ;;  %v19351_v57 = vadd.f32 %v19350_v51, %v19349_v6  ;;  %v19463_v47 = vadd.f32 %v19462_v55, %v19461_v30 }
 0x6a1   : > { %v19352_v3 = vpop.f32.mrf.mxu0  ;;  %v19464_v27 = vpop.f32.mrf.mxu1 }
 0x6a2   : > { %v14454_v7 = vadd.f32 %v19351_v57, %v25628_v22 }
 0x6a3   : > { %v19353_v28 = vpop.f32.mrf.mxu0  ;;  %v19465_v12 = vpop.f32.mrf.mxu1 }
 0x6a4   : > { %v26004_v31 = vadd.f32 %v19463_v47, %v14454_v7  ;;  %v19354_v14 = vadd.f32 %v19353_v28, %v19352_v3  ;;  %v19466_v45 = vadd.f32 %v19465_v12, %v19464_v27  ;;  %v21258_v27 = vld [vmem:[%s26704_s2 + $0xdf8] ss:$156 sps:$4 sm:$0xff]  }
 0x6a5   : > { %v19355_v50 = vpop.f32.mrf.mxu0  ;;  %14846 = vmatmul.mubr.bf16.gmra.mxu0 %v21250_v44  ;;  %v19467_v22 = vpop.f32.mrf.mxu1  ;;  %19918 = vmatmul.mubr.msk.bf16.gmra.mxu1 %vm11794_vm0, %v21254_v10 }
 0x6a6   : > { %v14457_v9 = vadd.f32 %v19354_v14, %v25637_v56  ;;  %14853 = vmatprep.mubr.bf16.mxu0 %v21257_v15  ;;  %v21260_v56 = vld [vmem:[%s26704_s2 + $0xdfc] ss:$156 sps:$4 sm:$0xff]  }
 0x6a7   : > { %v19356_v40 = vpop.f32.mrf.mxu0  ;;  %v19468_v19 = vpop.f32.mrf.mxu1 }
 0x6a8   : > { %v26008_v54 = vadd.f32 %v19466_v45, %v14457_v9  ;;  %v19357_v53 = vadd.f32 %v19356_v40, %v19355_v50  ;;  %v19469_v5 = vadd.f32 %v19468_v19, %v19467_v22 }
 0x6a9   : > { %v19358_v17 = vpop.f32.mrf.mxu0  ;;  %v19470_v0 = vpop.f32.mrf.mxu1 }
 0x6aa   : > { %v14462_v33 = vadd.f32 %v19357_v53, %v25658_v4 }
 0x6ab   : > { %v19359_v26 = vpop.f32.mrf.mxu0  ;;  %v19471_v6 = vpop.f32.mrf.mxu1 }
 0x6ac   : > { %v26017_v24 = vadd.f32 %v19469_v5, %v14462_v33  ;;  %v19360_v32 = vadd.f32 %v19359_v26, %v19358_v17  ;;  %v19472_v60 = vadd.f32 %v19471_v6, %v19470_v0  ;;  %v21261_v33 = vld [vmem:[%s26704_s2 + $0xf30] ss:$156 sps:$4 sm:$0xff]  }
 0x6ad   : > { %v19361_v30 = vpop.f32.mrf.mxu0  ;;  %14854 = vmatmul.mubr.bf16.gmra.mxu0 %v21255_v38  ;;  %v19473_v57 = vpop.f32.mrf.mxu1 }
 0x6ae   : > { %v14465_v51 = vadd.f32 %v19360_v32, %v25667_v48  ;;  %14861 = vmatprep.mubr.bf16.mxu0 %v21260_v56  ;;  %v21263_v48 = vld [vmem:[%s26704_s2 + $0xf34] ss:$156 sps:$4 sm:$0xff]  }
 0x6af   : > { %v19362_v55 = vpop.f32.mrf.mxu0  ;;  %v19474_v3 = vpop.f32.mrf.mxu1 }
 0x6b0   : > { %v26020_v47 = vadd.f32 %v19472_v60, %v14465_v51  ;;  %v19363_v4 = vadd.f32 %v19362_v55, %v19361_v30  ;;  %v19475_v44 = vadd.f32 %v19474_v3, %v19473_v57 }
 0x6b1   : > { %v19364_v7 = vpop.f32.mrf.mxu0  ;;  %v19476_v15 = vpop.f32.mrf.mxu1 }
 0x6b2   : > { %v14470_v10 = vadd.f32 %v19363_v4, %v25688_v11 }
 0x6b3   : > { %v19365_v28 = vpop.f32.mrf.mxu0  ;;  %v19477_v45 = vpop.f32.mrf.mxu1 }
 0x6b4   : > { %v26029_v14 = vadd.f32 %v19475_v44, %v14470_v10  ;;  %v19366_v12 = vadd.f32 %v19365_v28, %v19364_v7  ;;  %v19478_v50 = vadd.f32 %v19477_v45, %v19476_v15  ;;  %v21264_v10 = vld [vmem:[%s26704_s2 + $0x1068] ss:$156 sps:$4 sm:$0xff]  }
 0x6b5   : > { %v19367_v9 = vpop.f32.mrf.mxu0  ;;  %14862 = vmatmul.mubr.bf16.gmra.mxu0 %v21258_v27  ;;  %v19479_v40 = vpop.f32.mrf.mxu1 }
 0x6b6   : > { %v14473_v22 = vadd.f32 %v19366_v12, %v25697_v34  ;;  %14869 = vmatprep.mubr.bf16.mxu0 %v21263_v48  ;;  %v21266_v34 = vld [vmem:[%s26704_s2 + $0x106c] ss:$156 sps:$4 sm:$0xff]  }
 0x6b7   : > { %v19368_v53 = vpop.f32.mrf.mxu0  ;;  %v19480_v5 = vpop.f32.mrf.mxu1 }
 0x6b8   : > { %v26032_v19 = vadd.f32 %v19478_v50, %v14473_v22  ;;  %v19369_v11 = vadd.f32 %v19368_v53, %v19367_v9  ;;  %v19481_v17 = vadd.f32 %v19480_v5, %v19479_v40 }
 0x6b9   : > { %v19370_v38 = vpop.f32.mrf.mxu0  ;;  %v19482_v56 = vpop.f32.mrf.mxu1 }
 0x6ba   : > { %v14478_v0 = vadd.f32 %v19369_v11, %v25718_v35 }
 0x6bb   : > { %v19371_v26 = vpop.f32.mrf.mxu0  ;;  %v19483_v60 = vpop.f32.mrf.mxu1 }
 0x6bc   : > { %v26041_v32 = vadd.f32 %v19481_v17, %v14478_v0  ;;  %v19372_v6 = vadd.f32 %v19371_v26, %v19370_v38  ;;  %v19484_v30 = vadd.f32 %v19483_v60, %v19482_v56 }
 0x6bd   : > { %v19373_v51 = vpop.f32.mrf.mxu0  ;;  %14870 = vmatmul.mubr.bf16.gmra.mxu0 %v21261_v33  ;;  %v19485_v55 = vpop.f32.mrf.mxu1 }
 0x6be   : > { %v14481_v57 = vadd.f32 %v19372_v6, %v25727_v41  ;;  %14877 = vmatprep.mubr.bf16.mxu0 %v21266_v34 }
 0x6bf   : > { %v19374_v4 = vpop.f32.mrf.mxu0  ;;  %v19486_v44 = vpop.f32.mrf.mxu1 }
 0x6c0   : > { %v26044_v3 = vadd.f32 %v19484_v30, %v14481_v57  ;;  %v19375_v35 = vadd.f32 %v19374_v4, %v19373_v51  ;;  %v19487_v7 = vadd.f32 %v19486_v44, %v19485_v55 }
 0x6c1   : > { %v19376_v27 = vpop.f32.mrf.mxu0  ;;  %v19488_v48 = vpop.f32.mrf.mxu1 }
 0x6c2   : > { %v14486_v15 = vadd.f32 %v19375_v35, %v25748_v36 }
 0x6c3   : > { %v19377_v28 = vpop.f32.mrf.mxu0  ;;  %v19489_v45 = vpop.f32.mrf.mxu1 }
 0x6c4   : > { %v26050_v12 = vadd.f32 %v19487_v7, %v14486_v15  ;;  %v19378_v41 = vadd.f32 %v19377_v28, %v19376_v27  ;;  %v19490_v50 = vadd.f32 %v19489_v45, %v19488_v48 }
 0x6c5   : > { %v19379_v9 = vpop.f32.mrf.mxu0  ;;  %14878 = vmatmul.mubr.bf16.gmra.mxu0 %v21264_v10  ;;  %v19491_v40 = vpop.f32.mrf.mxu1 }
 0x6c6   : > { %v14489_v22 = vadd.f32 %v19378_v41, %v25757_v59 }
 0x6c7   : > { %v19380_v53 = vpop.f32.mrf.mxu0  ;;  %v19492_v17 = vpop.f32.mrf.mxu1 }
 0x6c8   : > { %v26053_v11 = vadd.f32 %v19490_v50, %v14489_v22  ;;  %v19381_v5 = vadd.f32 %v19380_v53, %v19379_v9  ;;  %v19493_v38 = vadd.f32 %v19492_v17, %v19491_v40 }
 0x6c9   : > { %v19382_v33 = vpop.f32.mrf.mxu0  ;;  %v19494_v0 = vpop.f32.mrf.mxu1 }
 0x6ca   : > { %v14494_v36 = vadd.f32 %v19381_v5, %v25778_v13 }
 0x6cb   : > { %v19383_v56 = vpop.f32.mrf.mxu0  ;;  %v19495_v6 = vpop.f32.mrf.mxu1 }
 0x6cc   : > { %v26056_v34 = vadd.f32 %v19493_v38, %v14494_v36  ;;  %v19384_v26 = vadd.f32 %v19383_v56, %v19382_v33  ;;  %v19496_v60 = vadd.f32 %v19495_v6, %v19494_v0 }
 0x6cd   : > { %v19385_v30 = vpop.f32.mrf.mxu0  ;;  %v19497_v51 = vpop.f32.mrf.mxu1 }
 0x6ce   : > { %v14497_v59 = vadd.f32 %v19384_v26, %v25787_v52 }
 0x6cf   : > { %v19386_v57 = vpop.f32.mrf.mxu0  ;;  %v19498_v35 = vpop.f32.mrf.mxu1 }
 0x6d0   : > { %v26059_v55 = vadd.f32 %v19496_v60, %v14497_v59  ;;  %v19387_v4 = vadd.f32 %v19386_v57, %v19385_v30  ;;  %v19499_v44 = vadd.f32 %v19498_v35, %v19497_v51 }
 0x6d1   : > { %v19388_v7 = vpop.f32.mrf.mxu0  ;;  %v19500_v27 = vpop.f32.mrf.mxu1 }
 0x6d2   : > { %v14502_v13 = vadd.f32 %v19387_v4, %v25808_v20 }
 0x6d3   : > { %v19389_v10 = vpop.f32.mrf.mxu0  ;;  %v19501_v28 = vpop.f32.mrf.mxu1 }
 0x6d4   : > { %v26062_v15 = vadd.f32 %v19499_v44, %v14502_v13  ;;  %v19390_v48 = vadd.f32 %v19389_v10, %v19388_v7  ;;  %v19502_v41 = vadd.f32 %v19501_v28, %v19500_v27 }
 0x6d5   : > { %v19391_v45 = vpop.f32.mrf.mxu0  ;;  %v19503_v50 = vpop.f32.mrf.mxu1 }
 0x6d6   : > { %v14505_v52 = vadd.f32 %v19390_v48, %v25811_v8 }
 0x6d7   : > { %v19392_v9 = vpop.f32.mrf.mxu0  ;;  %v19504_v53 = vpop.f32.mrf.mxu1 }
 0x6d8   : > { %v26065_v22 = vadd.f32 %v19502_v41, %v14505_v52  ;;  %v19393_v40 = vadd.f32 %v19392_v9, %v19391_v45  ;;  %v19505_v5 = vadd.f32 %v19504_v53, %v19503_v50 }
 0x6d9   : > { %v19394_v17 = vpop.f32.mrf.mxu0  ;;  %v19506_v38 = vpop.f32.mrf.mxu1 }
 0x6da   : > { %v14510_v20 = vadd.f32 %v19393_v40, %v25826_v49 }
 0x6db   : > { %v19395_v33 = vpop.f32.mrf.mxu0  ;;  %v19507_v56 = vpop.f32.mrf.mxu1 }
 0x6dc   : > { %v26068_v36 = vadd.f32 %v19505_v5, %v14510_v20  ;;  %v19396_v0 = vadd.f32 %v19395_v33, %v19394_v17  ;;  %v19508_v26 = vadd.f32 %v19507_v56, %v19506_v38 }
 0x6dd   : > { %v19397_v6 = vpop.f32.mrf.mxu0  ;;  %v19509_v60 = vpop.f32.mrf.mxu1 }
 0x6de   : > { %v14513_v8 = vadd.f32 %v19396_v0, %v25831_v29 }
 0x6df   : > { %v19398_v30 = vpop.f32.mrf.mxu0  ;;  %v19510_v57 = vpop.f32.mrf.mxu1 }
 0x6e0   : > { %v26071_v59 = vadd.f32 %v19508_v26, %v14513_v8  ;;  %v19399_v51 = vadd.f32 %v19398_v30, %v19397_v6  ;;  %v19511_v4 = vadd.f32 %v19510_v57, %v19509_v60 }
 0x6e1   : > { %v19400_v35 = vpop.f32.mrf.mxu0  ;;  %v19512_v44 = vpop.f32.mrf.mxu1 }
 0x6e2   : > { %v14518_v49 = vadd.f32 %v19399_v51, %v25847_v23 }
 0x6e3   : > { %v19401_v7 = vpop.f32.mrf.mxu0  ;;  %v19513_v10 = vpop.f32.mrf.mxu1 }
 0x6e4   : > { %v26074_v13 = vadd.f32 %v19511_v4, %v14518_v49  ;;  %v19402_v27 = vadd.f32 %v19401_v7, %v19400_v35  ;;  %v19514_v48 = vadd.f32 %v19513_v10, %v19512_v44 }
 0x6e5   : > { %v19403_v28 = vpop.f32.mrf.mxu0  ;;  %v19515_v41 = vpop.f32.mrf.mxu1 }
 0x6e6   : > { %v14521_v29 = vadd.f32 %v19402_v27, %v25852_v58 }
 0x6e7   : > { %v19404_v45 = vpop.f32.mrf.mxu0  ;;  %v19516_v9 = vpop.f32.mrf.mxu1 }
 0x6e8   : > { %v26077_v52 = vadd.f32 %v19514_v48, %v14521_v29  ;;  %v19405_v50 = vadd.f32 %v19404_v45, %v19403_v28  ;;  %v19517_v40 = vadd.f32 %v19516_v9, %v19515_v41 }
 0x6e9   : > { %v19406_v53 = vpop.f32.mrf.mxu0  ;;  %v19518_v5 = vpop.f32.mrf.mxu1 }
 0x6ea   : > { %v14526_v23 = vadd.f32 %v19405_v50, %v25867_v37 }
 0x6eb   : > { %v19407_v17 = vpop.f32.mrf.mxu0  ;;  %v19519_v33 = vpop.f32.mrf.mxu1 }
 0x6ec   : > { %v26080_v20 = vadd.f32 %v19517_v40, %v14526_v23  ;;  %v19408_v38 = vadd.f32 %v19407_v17, %v19406_v53  ;;  %v19520_v0 = vadd.f32 %v19519_v33, %v19518_v5 }
 0x6ed   : > { %v19409_v56 = vpop.f32.mrf.mxu0  ;;  %v19521_v26 = vpop.f32.mrf.mxu1 }
 0x6ee   : > { %v14529_v58 = vadd.f32 %v19408_v38, %v25872_v46 }
 0x6ef   : > { %v19410_v6 = vpop.f32.mrf.mxu0  ;;  %v19522_v30 = vpop.f32.mrf.mxu1 }
 0x6f0   : > { %v26083_v8 = vadd.f32 %v19520_v0, %v14529_v58  ;;  %v19411_v60 = vadd.f32 %v19410_v6, %v19409_v56  ;;  %v19523_v51 = vadd.f32 %v19522_v30, %v19521_v26 }
 0x6f1   : > { %v19412_v57 = vpop.f32.mrf.mxu0  ;;  %v19524_v4 = vpop.f32.mrf.mxu1 }
 0x6f2   : > { %v14534_v37 = vadd.f32 %v19411_v60, %v25887_v63 }
 0x6f3   : > { %v19413_v35 = vpop.f32.mrf.mxu0  ;;  %v19525_v7 = vpop.f32.mrf.mxu1 }
 0x6f4   : > { %v26086_v49 = vadd.f32 %v19523_v51, %v14534_v37  ;;  %v19414_v44 = vadd.f32 %v19413_v35, %v19412_v57  ;;  %v19526_v27 = vadd.f32 %v19525_v7, %v19524_v4 }
 0x6f5   : > { %v19415_v10 = vpop.f32.mrf.mxu0  ;;  %v19527_v48 = vpop.f32.mrf.mxu1 }
 0x6f6   : > { %v14537_v46 = vadd.f32 %v19414_v44, %v25892_v16 }
 0x6f7   : > { %v19416_v28 = vpop.f32.mrf.mxu0  ;;  %v19528_v45 = vpop.f32.mrf.mxu1 }
 0x6f8   : > { %v26089_v29 = vadd.f32 %v19526_v27, %v14537_v46  ;;  %v19417_v41 = vadd.f32 %v19416_v28, %v19415_v10  ;;  %v19529_v50 = vadd.f32 %v19528_v45, %v19527_v48 }
 0x6f9   : > { %v19418_v9 = vpop.f32.mrf.mxu0  ;;  %v19530_v40 = vpop.f32.mrf.mxu1 }
 0x6fa   : > { %v14542_v63 = vadd.f32 %v19417_v41, %v25907_v39 }
 0x6fb   : > { %v19419_v53 = vpop.f32.mrf.mxu0  ;;  %v19531_v17 = vpop.f32.mrf.mxu1 }
 0x6fc   : > { %v26092_v23 = vadd.f32 %v19529_v50, %v14542_v63  ;;  %v19420_v5 = vadd.f32 %v19419_v53, %v19418_v9  ;;  %v19532_v38 = vadd.f32 %v19531_v17, %v19530_v40 }
 0x6fd   : > { %v19421_v33 = vpop.f32.mrf.mxu0  ;;  %v19533_v0 = vpop.f32.mrf.mxu1 }
 0x6fe   : > { %v14545_v16 = vadd.f32 %v19420_v5, %v25912_v43 }
 0x6ff   : > { %v19422_v56 = vpop.f32.mrf.mxu0  ;;  %v19534_v6 = vpop.f32.mrf.mxu1 }
 0x700   : > { %v26095_v58 = vadd.f32 %v19532_v38, %v14545_v16  ;;  %v19423_v26 = vadd.f32 %v19422_v56, %v19421_v33  ;;  %v19535_v60 = vadd.f32 %v19534_v6, %v19533_v0 }
 0x701   : > { %v19424_v30 = vpop.f32.mrf.mxu0  ;;  %v19536_v51 = vpop.f32.mrf.mxu1 }
 0x702   : > { %v14550_v39 = vadd.f32 %v19423_v26, %v25927_v42 }
 0x703   : > { %v19425_v57 = vpop.f32.mrf.mxu0  ;;  %v19537_v35 = vpop.f32.mrf.mxu1 }
 0x704   : > { %v26098_v37 = vadd.f32 %v19535_v60, %v14550_v39  ;;  %v19426_v4 = vadd.f32 %v19425_v57, %v19424_v30  ;;  %v19538_v44 = vadd.f32 %v19537_v35, %v19536_v51 }
 0x705   : > { %v19427_v7 = vpop.f32.mrf.mxu0  ;;  %v19539_v27 = vpop.f32.mrf.mxu1 }
 0x706   : > { %v14553_v43 = vadd.f32 %v19426_v4, %v25932_v2 }
 0x707   : > { %v19428_v10 = vpop.f32.mrf.mxu0  ;;  %v19540_v28 = vpop.f32.mrf.mxu1 }
 0x708   : > { %v26101_v46 = vadd.f32 %v19538_v44, %v14553_v43  ;;  %v19429_v48 = vadd.f32 %v19428_v10, %v19427_v7  ;;  %v19541_v41 = vadd.f32 %v19540_v28, %v19539_v27 }
 0x709   : > { %v19430_v45 = vpop.f32.mrf.mxu0  ;;  %v19542_v50 = vpop.f32.mrf.mxu1 }
 0x70a   : > { %v14558_v42 = vadd.f32 %v19429_v48, %v25947_v1 }
 0x70b   : > { %v19431_v9 = vpop.f32.mrf.mxu0  ;;  %v19543_v53 = vpop.f32.mrf.mxu1 }
 0x70c   : > { %v26104_v63 = vadd.f32 %v19541_v41, %v14558_v42  ;;  %v19432_v40 = vadd.f32 %v19431_v9, %v19430_v45  ;;  %v19544_v5 = vadd.f32 %v19543_v53, %v19542_v50 }
 0x70d   : > { %v19433_v17 = vpop.f32.mrf.mxu0  ;;  %v19545_v38 = vpop.f32.mrf.mxu1 }
 0x70e   : > { %v14561_v2 = vadd.f32 %v19432_v40, %v25952_v21 }
 0x70f   : > { %v19434_v33 = vpop.f32.mrf.mxu0  ;;  %v19546_v56 = vpop.f32.mrf.mxu1 }
 0x710   : > { %v26107_v16 = vadd.f32 %v19544_v5, %v14561_v2  ;;  %v19435_v0 = vadd.f32 %v19434_v33, %v19433_v17  ;;  %v19547_v26 = vadd.f32 %v19546_v56, %v19545_v38 }
 0x711   : > { %v19436_v6 = vpop.f32.mrf.mxu0  ;;  %v19548_v60 = vpop.f32.mrf.mxu1 }
 0x712   : > { %v14566_v1 = vadd.f32 %v19435_v0, %v25967_v18 }
 0x713   : > { %v19437_v30 = vpop.f32.mrf.mxu0  ;;  %v19549_v57 = vpop.f32.mrf.mxu1 }
 0x714   : > { %v14727_v39 = vadd.f32 %v19547_v26, %v14566_v1  ;;  %v19438_v51 = vadd.f32 %v19437_v30, %v19436_v6  ;;  %v19550_v4 = vadd.f32 %v19549_v57, %v19548_v60 }
 0x715   : > { %v19439_v35 = vpop.f32.mrf.mxu0  ;;  %v19551_v21 = vpop.f32.mrf.mxu1 }
 0x716   : > { %v14569_v44 = vadd.f32 %v19438_v51, %v25972_v61 }
 0x717   : > { %v19440_v7 = vpop.f32.mrf.mxu0  ;;  %v19552_v10 = vpop.f32.mrf.mxu1 }
 0x718   : > { %v14730_v43 = vadd.f32 %v19550_v4, %v14569_v44  ;;  %v19441_v27 = vadd.f32 %v19440_v7, %v19439_v35  ;;  %v19553_v48 = vadd.f32 %v19552_v10, %v19551_v21 }
 0x719   : > { %v19442_v28 = vpop.f32.mrf.mxu0  ;;  %v19554_v45 = vpop.f32.mrf.mxu1 }
 0x71a   : > { %v14574_v41 = vadd.f32 %v19441_v27, %v25987_v62 }
 0x71b   : > { %v19443_v18 = vpop.f32.mrf.mxu0  ;;  %v19555_v9 = vpop.f32.mrf.mxu1 }
 0x71c   : > { %v14735_v42 = vadd.f32 %v19553_v48, %v14574_v41  ;;  %v19444_v50 = vadd.f32 %v19443_v18, %v19442_v28  ;;  %v19556_v40 = vadd.f32 %v19555_v9, %v19554_v45  ;;  %v21269_v41 = vld [vmem:[%s26705_s3 + $0x4] ss:$8 sps:$4 sm:$0xff]  }
 0x71d   : > { %v19573_v53 = vpop.f32.mrf.mxu0  ;;  %v19657_v17 = vpop.f32.mrf.mxu1  ;;  %15527 = vmatprep.mubr.bf16.mxu1 %v21269_v41 }
 0x71e   : > { %v14577_v5 = vadd.f32 %v19444_v50, %v25992_v25 }
 0x71f   : > { %v19574_v61 = vpop.f32.mrf.mxu0  ;;  %v19658_v33 = vpop.f32.mrf.mxu1 }
 0x720   : > { %v26113_v2 = vadd.f32 %v19556_v40, %v14577_v5  ;;  %v19575_v38 = vadd.f32 %v19574_v61, %v19573_v53  ;;  %v19659_v0 = vadd.f32 %v19658_v33, %v19657_v17 }
 0x721   : > { %v19576_v56 = vpop.f32.mrf.mxu0  ;;  %v19660_v26 = vpop.f32.mrf.mxu1 }
 0x722   : > { %v14776_v62 = vadd.f32 %v19575_v38, %v26004_v31  ;;  %v26116_v1 = vadd.f32 %v19659_v0, %v14727_v39 }
 0x723   : > { %v19577_v6 = vpop.f32.mrf.mxu0  ;;  %v19661_v30 = vpop.f32.mrf.mxu1 }
 0x724   : > { %v19578_v60 = vadd.f32 %v19577_v6, %v19576_v56  ;;  %v19662_v51 = vadd.f32 %v19661_v30, %v19660_v26 }
 0x725   : > { %v19579_v57 = vpop.f32.mrf.mxu0  ;;  %v19663_v4 = vpop.f32.mrf.mxu1 }
 0x726   : > { %v14779_v25 = vadd.f32 %v19578_v60, %v26008_v54  ;;  %v26119_v44 = vadd.f32 %v19662_v51, %v14730_v43 }
 0x727   : > { %v19580_v35 = vpop.f32.mrf.mxu0  ;;  %v19664_v7 = vpop.f32.mrf.mxu1 }
 0x728   : > { %v19581_v21 = vadd.f32 %v19580_v35, %v19579_v57  ;;  %v19665_v27 = vadd.f32 %v19664_v7, %v19663_v4 }
 0x729   : > { %v19582_v10 = vpop.f32.mrf.mxu0  ;;  %v26121_v48 = vpop.f32.mrf.mxu1 }
 0x72a   : > { %v14784_v31 = vadd.f32 %v19581_v21, %v26017_v24  ;;  %v26124_v28 = vadd.f32 %v19665_v27, %v14735_v42 }
 0x72b   : > { %v19583_v39 = vpop.f32.mrf.mxu0  ;;  %v26129_v54 = vpop.f32.mrf.mxu1 }
 0x72c   : > { %v19584_v45 = vadd.f32 %v19583_v39, %v19582_v10 }
 0x72d   : > { %v19585_v43 = vpop.f32.mrf.mxu0  ;;  %v19891_v18 = vpop.f32.mrf.mxu1 }
 0x72e   : > { %v14787_v50 = vadd.f32 %v19584_v45, %v26020_v47  ;;  %v14945_v9 = vadd.f32 %v19891_v18, %v14784_v31 }
 0x72f   : > { %v19586_v40 = vpop.f32.mrf.mxu0  ;;  %v14936_v5 = vpop.f32.mrf.mxu1 }
 0x730   : > { %v19587_v53 = vadd.f32 %v19586_v40, %v19585_v43  ;;  %v14937_v24 = vadd.f32 %v14936_v5, %v14776_v62  ;;  %v15065_v26 = vmax.f32 %v14945_v9, 0.0 }
 0x731   : > { %v19588_v17 = vpop.f32.mrf.mxu0  ;;  %v19892_v42 = vpop.f32.mrf.mxu1 }
 0x732   : > { %v14792_v61 = vadd.f32 %v19587_v53, %v26029_v14  ;;  %v14948_v38 = vadd.f32 %v19892_v42, %v14787_v50  ;;  %v15063_v57 = vmax.f32 %v14937_v24, 0.0 }
 0x733   : > { %v19589_v33 = vpop.f32.mrf.mxu0  ;;  %v14939_v56 = vpop.f32.mrf.mxu1 }
 0x734   : > { %v19590_v0 = vadd.f32 %v19589_v33, %v19588_v17  ;;  %v15066_v6 = vmax.f32 %v14948_v38, 0.0  ;;  %v14940_v60 = vadd.f32 %v14939_v56, %v14779_v25 }
 0x735   : > { %v19591_v30 = vpop.f32.mrf.mxu0  ;;  %v19895_v51 = vpop.f32.mrf.mxu1 }
 0x736   : > { %v14795_v47 = vadd.f32 %v19590_v0, %v26032_v19  ;;  %v26134_v4 = vpack.c.bf16 %v15066_v6, %v15065_v26  ;;  %v15064_v35 = vmax.f32 %v14940_v60, 0.0 }
 0x737   : > { %v19592_v62 = vpop.f32.mrf.mxu0  ;;  %v14952_v7 = vpop.f32.mrf.mxu1 }
 0x738   : > { %v19593_v21 = vadd.f32 %v19592_v62, %v19591_v30  ;;  %v26136_v27 = vpack.c.bf16 %v15064_v35, %v15063_v57  ;;  %v14953_v14 = vadd.f32 %v14952_v7, %v14792_v61 }
 0x739   : > { %v19594_v10 = vpop.f32.mrf.mxu0  ;;  %v19896_v39 = vpop.f32.mrf.mxu1 }
 0x73a   : > { %v14800_v31 = vadd.f32 %v19593_v21, %v26041_v32  ;;  %v15067_v40 = vmax.f32 %v14953_v14, 0.0 }
 0x73b   : > { %v19595_v41 = vpop.f32.mrf.mxu0  ;;  %v14955_v43 = vpop.f32.mrf.mxu1 }
 0x73c   : > { %v14961_v25 = vadd.f32 %v19895_v51, %v14800_v31  ;;  %v19596_v45 = vadd.f32 %v19595_v41, %v19594_v10  ;;  %v14956_v18 = vadd.f32 %v14955_v43, %v14795_v47 }
 0x73d   : > { %v19597_v19 = vpop.f32.mrf.mxu0  ;;  %v19899_v9 = vpop.f32.mrf.mxu1 }
 0x73e   : > { %v14803_v50 = vadd.f32 %v19596_v45, %v26044_v3  ;;  %v15068_v53 = vmax.f32 %v14956_v18, 0.0  ;;  %v15069_v32 = vmax.f32 %v14961_v25, 0.0 }
 0x73f   : > { %v19598_v5 = vpop.f32.mrf.mxu0  ;;  %v14968_v42 = vpop.f32.mrf.mxu1 }
 0x740   : > { %v14964_v24 = vadd.f32 %v19896_v39, %v14803_v50  ;;  %v19599_v17 = vadd.f32 %v19598_v5, %v19597_v19  ;;  %v26140_v61 = vpack.c.bf16 %v15068_v53, %v15067_v40 }
 0x741   : > { %v19600_v38 = vpop.f32.mrf.mxu0  ;;  %v19900_v56 = vpop.f32.mrf.mxu1 }
 0x742   : > { %v15070_v33 = vmax.f32 %v14964_v24, 0.0  ;;  %v14808_v0 = vadd.f32 %v19599_v17, %v26050_v12 }
 0x743   : > { %v19601_v26 = vpop.f32.mrf.mxu0  ;;  %v14971_v30 = vpop.f32.mrf.mxu1 }
 0x744   : > { %v26143_v6 = vpack.c.bf16 %v15070_v33, %v15069_v32  ;;  %v14969_v60 = vadd.f32 %v14968_v42, %v14808_v0  ;;  %v19602_v3 = vadd.f32 %v19601_v26, %v19600_v38 }
 0x745   : > { %v19603_v51 = vpop.f32.mrf.mxu0  ;;  %v19903_v57 = vpop.f32.mrf.mxu1 }
 0x746   : > { %v14811_v47 = vadd.f32 %v19602_v3, %v26053_v11  ;;  %v15071_v10 = vmax.f32 %v14969_v60, 0.0 }
 0x747   : > { %v19604_v35 = vpop.f32.mrf.mxu0  ;;  %v14984_v7 = vpop.f32.mrf.mxu1 }
 0x748   : > { %v14972_v62 = vadd.f32 %v14971_v30, %v14811_v47  ;;  %v19605_v21 = vadd.f32 %v19604_v35, %v19603_v51 }
 0x749   : > { %v19606_v14 = vpop.f32.mrf.mxu0  ;;  %v19904_v39 = vpop.f32.mrf.mxu1 }
 0x74a   : > { %v15072_v31 = vmax.f32 %v14972_v62, 0.0  ;;  %v14816_v12 = vadd.f32 %v19605_v21, %v26056_v34 }
 0x74b   : > { %v19607_v41 = vpop.f32.mrf.mxu0  ;;  %v14987_v18 = vpop.f32.mrf.mxu1 }
 0x74c   : > { %v26147_v25 = vpack.c.bf16 %v15072_v31, %v15071_v10  ;;  %v14977_v45 = vadd.f32 %v19899_v9, %v14816_v12  ;;  %v19608_v43 = vadd.f32 %v19607_v41, %v19606_v14 }
 0x74d   : > { %v19609_v19 = vpop.f32.mrf.mxu0  ;;  %v26150_v50 = vpop.f32.mrf.mxu1 }
 0x74e   : > { %v14819_v11 = vadd.f32 %v19608_v43, %v26059_v55  ;;  %v15073_v42 = vmax.f32 %v14977_v45, 0.0 }
 0x74f   : > { %v19610_v40 = vpop.f32.mrf.mxu0  ;;  %v15000_v24 = vpop.f32.mrf.mxu1 }
 0x750   : > { %v14980_v53 = vadd.f32 %v19900_v56, %v14819_v11  ;;  %v19611_v5 = vadd.f32 %v19610_v40, %v19609_v19 }
 0x751   : > { %v19612_v17 = vpop.f32.mrf.mxu0  ;;  %v26153_v32 = vpop.f32.mrf.mxu1 }
 0x752   : > { %v15074_v38 = vmax.f32 %v14980_v53, 0.0  ;;  %v14824_v34 = vadd.f32 %v19611_v5, %v26062_v15 }
 0x753   : > { %v19613_v33 = vpop.f32.mrf.mxu0  ;;  %v15003_v26 = vpop.f32.mrf.mxu1 }
 0x754   : > { %v26155_v9 = vpack.c.bf16 %v15074_v38, %v15073_v42  ;;  %v19614_v0 = vadd.f32 %v19613_v33, %v19612_v17  ;;  %v14985_v55 = vadd.f32 %v14984_v7, %v14824_v34 }
 0x755   : > { %v19615_v60 = vpop.f32.mrf.mxu0  ;;  %v26158_v30 = vpop.f32.mrf.mxu1 }
 0x756   : > { %v14827_v3 = vadd.f32 %v19614_v0, %v26065_v22  ;;  %v15075_v15 = vmax.f32 %v14985_v55, 0.0 }
 0x757   : > { %v19616_v56 = vpop.f32.mrf.mxu0  ;;  %v26160_v35 = vpop.f32.mrf.mxu1 }
 0x758   : > { %v14988_v51 = vadd.f32 %v14987_v18, %v14827_v3  ;;  %v19617_v47 = vadd.f32 %v19616_v56, %v19615_v60 }
 0x759   : > { %v19618_v62 = vpop.f32.mrf.mxu0  ;;  %v26163_v10 = vpop.f32.mrf.mxu1 }
 0x75a   : > { %v15076_v21 = vmax.f32 %v14988_v51, 0.0  ;;  %v14832_v14 = vadd.f32 %v19617_v47, %v26068_v36 }
 0x75b   : > { %v19619_v31 = vpop.f32.mrf.mxu0  ;;  %v26167_v41 = vpop.f32.mrf.mxu1 }
 0x75c   : > { %v26165_v12 = vpack.c.bf16 %v15076_v21, %v15075_v15  ;;  %v19620_v7 = vadd.f32 %v19619_v31, %v19618_v62  ;;  %v14993_v45 = vadd.f32 %v19903_v57, %v14832_v14 }
 0x75d   : > { %v19621_v22 = vpop.f32.mrf.mxu0  ;;  %v26170_v18 = vpop.f32.mrf.mxu1 }
 0x75e   : > { %v14835_v43 = vadd.f32 %v19620_v7, %v26071_v59  ;;  %v15077_v5 = vmax.f32 %v14993_v45, 0.0  ;;  %v19668_v59 = vadd.f32 %v26129_v54, %v26121_v48 }
 0x75f   : > { %v19622_v19 = vpop.f32.mrf.mxu0  ;;  %v26172_v53 = vpop.f32.mrf.mxu1 }
 0x760   : > { %v14996_v11 = vadd.f32 %v19904_v39, %v14835_v43  ;;  %v19623_v40 = vadd.f32 %v19622_v19, %v19621_v22  ;;  %v14899_v21 = vadd.f32 %v19668_v59, %v26113_v2 }
 0x761   : > { %v19624_v36 = vpop.f32.mrf.mxu0  ;;  %v26175_v38 = vpop.f32.mrf.mxu1 }
 0x762   : > { %v15078_v17 = vmax.f32 %v14996_v11, 0.0  ;;  %v14840_v42 = vadd.f32 %v19623_v40, %v26074_v13 }
 0x763   : > { %v19625_v34 = vpop.f32.mrf.mxu0  ;;  %v26177_v60 = vpop.f32.mrf.mxu1 }
 0x764   : > { %v15102_v33 = vpack.c.bf16 %v15078_v17, %v15077_v5  ;;  %v15001_v0 = vadd.f32 %v15000_v24, %v14840_v42  ;;  %v19626_v57 = vadd.f32 %v19625_v34, %v19624_v36 }
 0x765   : > { %v19627_v39 = vpop.f32.mrf.mxu0  ;;  %v19919_v3 = vpop.f32.mrf.mxu1 }
 0x766   : > { %v14843_v55 = vadd.f32 %v19626_v57, %v26077_v52  ;;  %v15057_v13 = vadd.f32 %v19919_v3, %v26124_v28  ;;  %v15079_v24 = vmax.f32 %v15001_v0, 0.0 }
 0x767   : > { %v19628_v56 = vpop.f32.mrf.mxu0  ;;  %v15048_v62 = vpop.f32.mrf.mxu1 }
 0x768   : > { %v15004_v51 = vadd.f32 %v15003_v26, %v14843_v55  ;;  %v19629_v47 = vadd.f32 %v19628_v56, %v19627_v39  ;;  %v15049_v48 = vadd.f32 %v15048_v62, %v26116_v1  ;;  %v15093_v19 = vmax.f32 %v15057_v13, 0.0 }
 0x769   : > { %v19630_v15 = vpop.f32.mrf.mxu0  ;;  %v19920_v7 = vpop.f32.mrf.mxu1 }
 0x76a   : > { %v15080_v14 = vmax.f32 %v15004_v51, 0.0  ;;  %v14848_v31 = vadd.f32 %v19629_v47, %v26080_v20  ;;  %v15060_v54 = vadd.f32 %v19920_v7, %v14899_v21  ;;  %v15091_v36 = vmax.f32 %v15049_v48, 0.0 }
 0x76b   : > { %v19631_v22 = vpop.f32.mrf.mxu0  ;;  %v15051_v26 = vpop.f32.mrf.mxu1 }
 0x76c   : > { %v15009_v52 = vadd.f32 %v26150_v50, %v14848_v31  ;;  %v19632_v45 = vadd.f32 %v19631_v22, %v19630_v15  ;;  %v26187_v43 = vpack.c.bf16 %v15080_v14, %v15079_v24  ;;  %v15094_v28 = vmax.f32 %v15060_v54, 0.0 }
 0x76d   : > { %v15052_v11 = vadd.f32 %v15051_v26, %v26119_v44  ;;  %v19633_v2 = vpop.f32.mrf.mxu0 }
 0x76e   : > { %v14851_v40 = vadd.f32 %v19632_v45, %v26083_v8  ;;  %v15110_v20 = vpack.c.bf16 %v15094_v28, %v15093_v19  ;;  %v15081_v0 = vmax.f32 %v15009_v52, 0.0 }
 0x76f   : > { %v15092_v5 = vmax.f32 %v15052_v11, 0.0  ;;  %v19634_v17 = vpop.f32.mrf.mxu0 }
 0x770   : > { %v15012_v1 = vadd.f32 %v26153_v32, %v14851_v40  ;;  %v19635_v42 = vadd.f32 %v19634_v17, %v19633_v2  ;;  %19689 = vmatprep.subr.bf16.mxu1 %v15110_v20 }
 0x771   : > { %v15109_v34 = vpack.c.bf16 %v15092_v5, %v15091_v36  ;;  %v19636_v50 = vpop.f32.mrf.mxu0  ;;  %19690 = vmatpush3.bf16.msra.mxu1 %v15102_v33 }
 0x772   : > { %v15082_v57 = vmax.f32 %v15012_v1, 0.0  ;;  %v14856_v59 = vadd.f32 %v19635_v42, %v26086_v49 }
 0x773   : > { %19691 = vmatprep.subr.bf16.mxu1 %v15109_v34  ;;  %v19637_v44 = vpop.f32.mrf.mxu0 }
 0x774   : > { %v15017_v39 = vadd.f32 %v26160_v35, %v14856_v59  ;;  %v19638_v8 = vadd.f32 %v19637_v44, %v19636_v50  ;;  %v15104_v55 = vpack.c.bf16 %v15082_v57, %v15081_v0  ;;  %v21285_v50 = vld [vmem:[%s26705_s3 + $0x60] ss:$8 sps:$4 sm:$0xff]   ;;  %v21290_v0 = vld [vmem:[%s26705_s3 + $0x74] ss:$8 sps:$4 sm:$0xff]   ;;  %v21288_v57 = vld [vmem:[%s26705_s3 + $0x70] ss:$8 sps:$4 sm:$0xff]  }
 0x775   : > { %v19639_v3 = vpop.f32.mrf.mxu0  ;;  %19692 = vmatpush3.bf16.msra.mxu1 %v26165_v12  ;;  %v21293_v59 = vld [vmem:[%s26705_s3 + $0x84] ss:$8 sps:$4 sm:$0xff]   ;;  %v21291_v44 = vld [vmem:[%s26705_s3 + $0x80] ss:$8 sps:$4 sm:$0xff]  }
 0x776   : > { %v14859_v56 = vadd.f32 %v19638_v8, %v26089_v29  ;;  %v15083_v13 = vmax.f32 %v15017_v39, 0.0  ;;  %v21296_v39 = vld [vmem:[%s26705_s3 + $0x94] ss:$8 sps:$4 sm:$0xff]   ;;  %v21294_v8 = vld [vmem:[%s26705_s3 + $0x90] ss:$8 sps:$4 sm:$0xff]  }
 0x777   : > { %v19640_v32 = vpop.f32.mrf.mxu0 }
 0x778   : > { %v15020_v51 = vadd.f32 %v26167_v41, %v14859_v56  ;;  %v19641_v47 = vadd.f32 %v19640_v32, %v19639_v3  ;;  %v21297_v3 = vld [vmem:[%s26705_s3 + $0xa0] ss:$8 sps:$4 sm:$0xff]   ;;  %v21302_v56 = vld [vmem:[%s26705_s3 + $0xb4] ss:$8 sps:$4 sm:$0xff]   ;;  %v21300_v32 = vld [vmem:[%s26705_s3 + $0xb0] ss:$8 sps:$4 sm:$0xff]  }
 0x779   : > { %v19642_v62 = vpop.f32.mrf.mxu0 }
 0x77a   : > { %v15084_v15 = vmax.f32 %v15020_v51, 0.0  ;;  %v14864_v49 = vadd.f32 %v19641_v47, %v26092_v23  ;;  %v21305_v51 = vld [vmem:[%s26705_s3 + $0xc4] ss:$8 sps:$4 sm:$0xff]   ;;  %v21303_v47 = vld [vmem:[%s26705_s3 + $0xc0] ss:$8 sps:$4 sm:$0xff]  }
 0x77b   : > { %v19643_v33 = vpop.f32.mrf.mxu0 }
 0x77c   : > { %v19644_v21 = vadd.f32 %v19643_v33, %v19642_v62  ;;  %v15105_v24 = vpack.c.bf16 %v15084_v15, %v15083_v13  ;;  %v15025_v14 = vadd.f32 %v26158_v30, %v14864_v49  ;;  %v21308_v62 = vld [vmem:[%s26705_s3 + $0xd4] ss:$8 sps:$4 sm:$0xff]   ;;  %v21306_v13 = vld [vmem:[%s26705_s3 + $0xd0] ss:$8 sps:$4 sm:$0xff]   ;;  %v21311_v15 = vld [vmem:[%s26705_s3 + $0xe4] ss:$8 sps:$4 sm:$0xff]   ;;  %v26300_v49 = vpop.permute.xlu0 %15327 }
 0x77d   : > { %v19645_v35 = vpop.f32.mrf.mxu0  ;;  %v21309_v33 = vld [vmem:[%s26705_s3 + $0xe0] ss:$8 sps:$4 sm:$0xff]  }
 0x77e   : > { %v14867_v31 = vadd.f32 %v19644_v21, %v26095_v58  ;;  %v15085_v41 = vmax.f32 %v15025_v14, 0.0  ;;  %v21314_v21 = vld [vmem:[%s26705_s3 + $0xf4] ss:$8 sps:$4 sm:$0xff]  }
 0x77f   : > { %v19646_v29 = vpop.f32.mrf.mxu0 }
 0x780   : > { %v15028_v12 = vadd.f32 %v26163_v10, %v14867_v31  ;;  %v19647_v7 = vadd.f32 %v19646_v29, %v19645_v35  ;;  %v26310_v35 = vpop.permute.xlu0 %15247  ;;  %v21312_v31 = vld [vmem:[%s26705_s3 + $0xf0] ss:$8 sps:$4 sm:$0xff]  }
 0x781   : > { %v19648_v48 = vpop.f32.mrf.mxu0 }
 0x782   : > { %v15086_v54 = vmax.f32 %v15028_v12, 0.0  ;;  %v14872_v22 = vadd.f32 %v19647_v7, %v26098_v37 }
 0x783   : > { %v19649_v52 = vpop.f32.mrf.mxu0 }
 0x784   : > { %v19650_v45 = vadd.f32 %v19649_v52, %v19648_v48  ;;  %v15106_v23 = vpack.c.bf16 %v15086_v54, %v15085_v41  ;;  %v15033_v19 = vadd.f32 %v26172_v53, %v14872_v22  ;;  %v26317_v29 = vpop.permute.xlu0 %15317 }
 0x785   : > { %v19651_v26 = vpop.f32.mrf.mxu0 }
 0x786   : > { %v14875_v28 = vadd.f32 %v19650_v45, %v26101_v46  ;;  %v15087_v10 = vmax.f32 %v15033_v19, 0.0 }
 0x787   : > { %v19652_v30 = vpop.f32.mrf.mxu0 }
 0x788   : > { %v15036_v58 = vadd.f32 %v26177_v60, %v14875_v28  ;;  %v19653_v11 = vadd.f32 %v19652_v30, %v19651_v26  ;;  %v21282_v60 = vld [vmem:[%s26705_s3 + $0x50] ss:$8 sps:$4 sm:$0xff]   ;;  %v26321_v7 = vpop.permute.xlu0 %15237 }
 0x789   : > { %v19654_v2 = vpop.f32.mrf.mxu0 }
 0x78a   : > { %v15088_v40 = vmax.f32 %v15036_v58, 0.0  ;;  %v14880_v36 = vadd.f32 %v19653_v11, %v26104_v63  ;;  %v21267_v63 = vld [vmem:[%s26705_s3] ss:$8 sps:$4 sm:$0xff]  }
 0x78b   : > { %v19655_v20 = vpop.f32.mrf.mxu0 }
 0x78c   : > { %v19656_v5 = vadd.f32 %v19655_v20, %v19654_v2  ;;  %v15107_v37 = vpack.c.bf16 %v15088_v40, %v15087_v10  ;;  %v15041_v17 = vadd.f32 %v26170_v18, %v14880_v36  ;;  %v21279_v18 = vld [vmem:[%s26705_s3 + $0x40] ss:$8 sps:$4 sm:$0xff]   ;;  %v26325_v41 = vpop.permute.xlu0 %15307 }
 0x78e   : > { %v14883_v1 = vadd.f32 %v19656_v5, %v26107_v16  ;;  %v15089_v42 = vmax.f32 %v15041_v17, 0.0  ;;  %v21272_v16 = vld [vmem:[%s26705_s3 + $0x14] ss:$8 sps:$4 sm:$0xff]  }
 0x790   : > { %v15044_v53 = vadd.f32 %v26175_v38, %v14883_v1  ;;  %v21284_v38 = vld [vmem:[%s26705_s3 + $0x54] ss:$8 sps:$4 sm:$0xff]   ;;  %v26329_v22 = vpop.permute.xlu0 %15227 }
 0x792   : > { %v15090_v46 = vmax.f32 %v15044_v53, 0.0 }
 0x794   : > { %v15108_v34 = vpack.c.bf16 %v15090_v46, %v15089_v42  ;;  %v26333_v45 = vpop.permute.xlu0 %15297 }
 0x796   : > { %19693 = vmatprep.subr.bf16.mxu1 %v15108_v34 }
 0x797   : > { %19694 = vmatpush3.bf16.msra.mxu1 %v26155_v9  ;;  %v21281_v9 = vld [vmem:[%s26705_s3 + $0x44] ss:$8 sps:$4 sm:$0xff]  }
 0x798   : > { %19695 = vmatprep.subr.bf16.mxu1 %v15107_v37  ;;  %v26337_v26 = vpop.permute.xlu0 %15217 }
 0x79b   : > { %19696 = vmatpush3.bf16.msra.mxu1 %v26147_v25  ;;  %v21276_v25 = vld [vmem:[%s26705_s3 + $0x30] ss:$8 sps:$4 sm:$0xff]  }
 0x79c   : > { %19697 = vmatprep.subr.bf16.mxu1 %v15106_v23  ;;  %v26341_v28 = vpop.permute.xlu0 %15287 }
 0x79f   : > { %19698 = vmatpush3.bf16.msra.mxu1 %v26143_v6  ;;  %v21278_v6 = vld [vmem:[%s26705_s3 + $0x34] ss:$8 sps:$4 sm:$0xff]  }
 0x7a0   : > { %19699 = vmatprep.subr.bf16.mxu1 %v15105_v24  ;;  %v26308_v24 = vpop.permute.xlu1 %15332  ;;  %v15208_v58 = vpop.permute.xlu0 %15207 }
 0x7a3   : > { %19700 = vmatpush3.bf16.msra.mxu1 %v26140_v61  ;;  %v21270_v61 = vld [vmem:[%s26705_s3 + $0x10] ss:$8 sps:$4 sm:$0xff]  }
 0x7a4   : > { %19701 = vmatprep.subr.bf16.mxu1 %v15104_v55  ;;  %v21299_v55 = vld [vmem:[%s26705_s3 + $0xa4] ss:$8 sps:$4 sm:$0xff]   ;;  %v26312_v14 = vpop.permute.xlu1 %15252  ;;  %v26345_v2 = vpop.permute.xlu0 %15277 }
 0x7a7   : > { %19702 = vmatpush3.bf16.msra.mxu1 %v26134_v4  ;;  %v21275_v4 = vld [vmem:[%s26705_s3 + $0x24] ss:$8 sps:$4 sm:$0xff]  }
 0x7a8   : > { %19703 = vmatprep.subr.bf16.mxu1 %v26187_v43  ;;  %v21287_v43 = vld [vmem:[%s26705_s3 + $0x64] ss:$8 sps:$4 sm:$0xff]   ;;  %v26319_v12 = vpop.permute.xlu1 %15322  ;;  %v15198_v40 = vpop.permute.xlu0 %15197 }
 0x7ab   : > { %19704 = vmatpush3.bf16.msra.mxu1 %v26136_v27  ;;  %v21273_v27 = vld [vmem:[%s26705_s3 + $0x20] ss:$8 sps:$4 sm:$0xff]  }
 0x7ac   : > { %v26323_v48 = vpop.permute.xlu1 %15242  ;;  %v26349_v20 = vpop.permute.xlu0 %15267 }
 0x7ae   : > { %15528 = vmatmul.mubr.bf16.vlgmr.msra.gmra.mxu1 %v21267_v63 }
 0x7af   : > { %15535 = vmatprep.mubr.bf16.mxu1 %v21272_v16 }
 0x7b0   : > { %v26327_v54 = vpop.permute.xlu1 %15312  ;;  %v15188_v37 = vpop.permute.xlu0 %15187 }
 0x7b4   : > { %v26331_v52 = vpop.permute.xlu1 %15232  ;;  %v26353_v1 = vpop.permute.xlu0 %15257 }
 0x7b6   : > { %15536 = vmatmul.mubr.bf16.gmra.mxu1 %v21270_v61 }
 0x7b7   : > { %15543 = vmatprep.mubr.bf16.mxu1 %v21275_v4 }
 0x7b8   : > { %v26335_v23 = vpop.permute.xlu1 %15302  ;;  %v15178_v16 = vpop.permute.xlu0 %15177 }
 0x7bc   : > { %v26339_v19 = vpop.permute.xlu1 %15222 }
 0x7be   : > { %15544 = vmatmul.mubr.bf16.gmra.mxu1 %v21273_v27 }
 0x7bf   : > { %15551 = vmatprep.mubr.bf16.mxu1 %v21278_v6 }
 0x7c0   : > { %v26343_v30 = vpop.permute.xlu1 %15292 }
 0x7c4   : > { %v15213_v11 = vpop.permute.xlu1 %15212 }
 0x7c6   : > { %15552 = vmatmul.mubr.bf16.gmra.mxu1 %v21276_v25 }
 0x7c7   : > { %15559 = vmatprep.mubr.bf16.mxu1 %v21281_v9 }
 0x7c8   : > { %v26347_v10 = vpop.permute.xlu1 %15282 }
 0x7cc   : > { %v15203_v36 = vpop.permute.xlu1 %15202 }
 0x7ce   : > { %15560 = vmatmul.mubr.bf16.gmra.mxu1 %v21279_v18 }
 0x7cf   : > { %15567 = vmatprep.mubr.bf16.mxu1 %v21284_v38 }
 0x7d0   : > { %v26351_v5 = vpop.permute.xlu1 %15272 }
 0x7d4   : > { %v15193_v17 = vpop.permute.xlu1 %15192 }
 0x7d6   : > { %15568 = vmatmul.mubr.bf16.gmra.mxu1 %v21282_v60 }
 0x7d7   : > { %15575 = vmatprep.mubr.bf16.mxu1 %v21287_v43 }
 0x7d8   : > { %v26355_v42 = vpop.permute.xlu1 %15262 }
 0x7dc   : > { %v15183_v6 = vpop.permute.xlu1 %15182 }
 0x7de   : > { %15576 = vmatmul.mubr.bf16.gmra.mxu1 %v21285_v50 }
 0x7df   : > { %15583 = vmatprep.mubr.bf16.mxu1 %v21290_v0 }
 0x7e6   : > { %15584 = vmatmul.mubr.bf16.gmra.mxu1 %v21288_v57 }
 0x7e7   : > { %15591 = vmatprep.mubr.bf16.mxu1 %v21293_v59 }
 0x7ee   : > { %15592 = vmatmul.mubr.bf16.gmra.mxu1 %v21291_v44 }
 0x7ef   : > { %15599 = vmatprep.mubr.bf16.mxu1 %v21296_v39 }
 0x7f6   : > { %15600 = vmatmul.mubr.bf16.gmra.mxu1 %v21294_v8 }
 0x7f7   : > { %15607 = vmatprep.mubr.bf16.mxu1 %v21299_v55 }
 0x7fe   : > { %15608 = vmatmul.mubr.bf16.gmra.mxu1 %v21297_v3 }
 0x7ff   : > { %15615 = vmatprep.mubr.bf16.mxu1 %v21302_v56 }
 0x806   : > { %15616 = vmatmul.mubr.bf16.gmra.mxu1 %v21300_v32 }
 0x807   : > { %15623 = vmatprep.mubr.bf16.mxu1 %v21305_v51 }
 0x80e   : > { %15624 = vmatmul.mubr.bf16.gmra.mxu1 %v21303_v47 }
 0x80f   : > { %15631 = vmatprep.mubr.bf16.mxu1 %v21308_v62 }
 0x816   : > { %15632 = vmatmul.mubr.bf16.gmra.mxu1 %v21306_v13 }
 0x817   : > { %15639 = vmatprep.mubr.bf16.mxu1 %v21311_v15 }
 0x81e   : > { %15640 = vmatmul.mubr.bf16.gmra.mxu1 %v21309_v33 }
 0x81f   : > { %15647 = vmatprep.mubr.bf16.mxu1 %v21314_v21 }
 0x826   : > { %15648 = vmatmul.mubr.bf16.gmra.mxu1 %v21312_v31 }
 0x86e   : > { %v19705_v53 = vpop.f32.mrf.mxu1 }
 0x870   : > { %v19706_v46 = vpop.f32.mrf.mxu1 }
 0x871   : > { %v19707_v34 = vadd.f32 %v19706_v46, %v19705_v53 }
 0x872   : > { %v19708_v63 = vpop.f32.mrf.mxu1 }
 0x873   : > { %v15530_v4 = vadd.f32 %v19707_v34, %v15178_v16 }
 0x874   : > { %v19709_v61 = vpop.f32.mrf.mxu1 }
 0x875   : > { %v19710_v27 = vadd.f32 %v19709_v61, %v19708_v63  ;;  %v15656_v38 = vmax.f32 %v15530_v4, 0.0 }
 0x876   : > { %v19711_v25 = vpop.f32.mrf.mxu1 }
 0x877   : > { %v15533_v9 = vadd.f32 %v19710_v27, %v15183_v6 }
 0x878   : > { %v19712_v18 = vpop.f32.mrf.mxu1 }
 0x879   : > { %v15657_v60 = vmax.f32 %v15533_v9, 0.0  ;;  %v19713_v43 = vadd.f32 %v19712_v18, %v19711_v25 }
 0x87a   : > { %v19714_v50 = vpop.f32.mrf.mxu1 }
 0x87b   : > { %v26357_v0 = vpack.c.bf16 %v15657_v60, %v15656_v38  ;;  %v15538_v59 = vadd.f32 %v19713_v43, %v15188_v37 }
 0x87c   : > { %v19715_v57 = vpop.f32.mrf.mxu1 }
 0x87d   : > { %v19716_v44 = vadd.f32 %v19715_v57, %v19714_v50  ;;  %v15658_v3 = vmax.f32 %v15538_v59, 0.0 }
 0x87e   : > { %v19717_v39 = vpop.f32.mrf.mxu1 }
 0x87f   : > { %v15541_v8 = vadd.f32 %v19716_v44, %v15193_v17 }
 0x880   : > { %v19718_v55 = vpop.f32.mrf.mxu1 }
 0x881   : > { %v15659_v56 = vmax.f32 %v15541_v8, 0.0  ;;  %v19719_v32 = vadd.f32 %v19718_v55, %v19717_v39 }
 0x882   : > { %v19720_v51 = vpop.f32.mrf.mxu1 }
 0x883   : > { %v26359_v47 = vpack.c.bf16 %v15659_v56, %v15658_v3  ;;  %v15546_v13 = vadd.f32 %v19719_v32, %v15198_v40 }
 0x884   : > { %v19721_v62 = vpop.f32.mrf.mxu1 }
 0x885   : > { %v19722_v15 = vadd.f32 %v19721_v62, %v19720_v51  ;;  %v15660_v53 = vmax.f32 %v15546_v13, 0.0 }
 0x886   : > { %v19723_v33 = vpop.f32.mrf.mxu1 }
 0x887   : > { %v15549_v21 = vadd.f32 %v19722_v15, %v15203_v36  ;;  %v21317_v36 = vld [vmem:[%s26707_s5 + $0x4] ss:$8 sps:$4 sm:$0xff]  }
 0x888   : > { %v19724_v31 = vpop.f32.mrf.mxu1  ;;  %15928 = vmatprep.mubr.bf16.mxu0 %v21317_v36 }
 0x889   : > { %v15661_v46 = vmax.f32 %v15549_v21, 0.0  ;;  %v19725_v34 = vadd.f32 %v19724_v31, %v19723_v33 }
 0x88a   : > { %v19726_v37 = vpop.f32.mrf.mxu1 }
 0x88b   : > { %v26361_v63 = vpack.c.bf16 %v15661_v46, %v15660_v53  ;;  %v15554_v16 = vadd.f32 %v19725_v34, %v15208_v58 }
 0x88c   : > { %v19727_v17 = vpop.f32.mrf.mxu1 }
 0x88d   : > { %v19728_v61 = vadd.f32 %v19727_v17, %v19726_v37  ;;  %v15662_v25 = vmax.f32 %v15554_v16, 0.0 }
 0x88e   : > { %v19729_v4 = vpop.f32.mrf.mxu1 }
 0x88f   : > { %v15557_v27 = vadd.f32 %v19728_v61, %v15213_v11 }
 0x890   : > { %v19730_v6 = vpop.f32.mrf.mxu1 }
 0x891   : > { %v15663_v9 = vmax.f32 %v15557_v27, 0.0  ;;  %v19731_v18 = vadd.f32 %v19730_v6, %v19729_v4 }
 0x892   : > { %v19732_v40 = vpop.f32.mrf.mxu1 }
 0x893   : > { %v26366_v38 = vpack.c.bf16 %v15663_v9, %v15662_v25  ;;  %v15562_v43 = vadd.f32 %v19731_v18, %v26337_v26 }
 0x894   : > { %v19733_v60 = vpop.f32.mrf.mxu1 }
 0x895   : > { %v19734_v50 = vadd.f32 %v19733_v60, %v19732_v40  ;;  %v15664_v59 = vmax.f32 %v15562_v43, 0.0 }
 0x896   : > { %v19735_v58 = vpop.f32.mrf.mxu1 }
 0x897   : > { %v15565_v57 = vadd.f32 %v19734_v50, %v26339_v19 }
 0x898   : > { %v19736_v11 = vpop.f32.mrf.mxu1 }
 0x899   : > { %v15665_v44 = vmax.f32 %v15565_v57, 0.0  ;;  %v19737_v39 = vadd.f32 %v19736_v11, %v19735_v58 }
 0x89a   : > { %v19738_v8 = vpop.f32.mrf.mxu1 }
 0x89b   : > { %v26370_v55 = vpack.c.bf16 %v15665_v44, %v15664_v59  ;;  %v15570_v56 = vadd.f32 %v19737_v39, %v26329_v22 }
 0x89c   : > { %v19739_v3 = vpop.f32.mrf.mxu1 }
 0x89d   : > { %v19740_v32 = vadd.f32 %v19739_v3, %v19738_v8  ;;  %v15666_v26 = vmax.f32 %v15570_v56, 0.0 }
 0x89e   : > { %v19741_v51 = vpop.f32.mrf.mxu1 }
 0x89f   : > { %v15573_v62 = vadd.f32 %v19740_v32, %v26331_v52 }
 0x8a0   : > { %v19742_v13 = vpop.f32.mrf.mxu1 }
 0x8a1   : > { %v15667_v15 = vmax.f32 %v15573_v62, 0.0  ;;  %v19743_v33 = vadd.f32 %v19742_v13, %v19741_v51 }
 0x8a2   : > { %v19744_v21 = vpop.f32.mrf.mxu1 }
 0x8a3   : > { %v26374_v19 = vpack.c.bf16 %v15667_v15, %v15666_v26  ;;  %v15578_v53 = vadd.f32 %v19743_v33, %v26321_v7 }
 0x8a4   : > { %v19745_v31 = vpop.f32.mrf.mxu1 }
 0x8a5   : > { %v19746_v46 = vadd.f32 %v19745_v31, %v19744_v21  ;;  %v15668_v22 = vmax.f32 %v15578_v53, 0.0 }
 0x8a6   : > { %v19747_v34 = vpop.f32.mrf.mxu1 }
 0x8a7   : > { %v15581_v37 = vadd.f32 %v19746_v46, %v26323_v48 }
 0x8a8   : > { %v19748_v17 = vpop.f32.mrf.mxu1 }
 0x8a9   : > { %v15669_v16 = vmax.f32 %v15581_v37, 0.0  ;;  %v19749_v61 = vadd.f32 %v19748_v17, %v19747_v34 }
 0x8aa   : > { %v19750_v4 = vpop.f32.mrf.mxu1 }
 0x8ab   : > { %v26378_v52 = vpack.c.bf16 %v15669_v16, %v15668_v22  ;;  %v15586_v6 = vadd.f32 %v19749_v61, %v26310_v35 }
 0x8ac   : > { %v19751_v27 = vpop.f32.mrf.mxu1 }
 0x8ad   : > { %v19752_v25 = vadd.f32 %v19751_v27, %v19750_v4  ;;  %v15670_v7 = vmax.f32 %v15586_v6, 0.0 }
 0x8ae   : > { %v19753_v9 = vpop.f32.mrf.mxu1 }
 0x8af   : > { %v15589_v18 = vadd.f32 %v19752_v25, %v26312_v14 }
 0x8b0   : > { %v19754_v40 = vpop.f32.mrf.mxu1 }
 0x8b1   : > { %v15671_v36 = vmax.f32 %v15589_v18, 0.0  ;;  %v19755_v60 = vadd.f32 %v19754_v40, %v19753_v9 }
 0x8b2   : > { %v19756_v43 = vpop.f32.mrf.mxu1 }
 0x8b3   : > { %v26382_v48 = vpack.c.bf16 %v15671_v36, %v15670_v7  ;;  %v15594_v58 = vadd.f32 %v19755_v60, %v26353_v1 }
 0x8b4   : > { %v19757_v50 = vpop.f32.mrf.mxu1 }
 0x8b5   : > { %v19758_v57 = vadd.f32 %v19757_v50, %v19756_v43  ;;  %v15672_v35 = vmax.f32 %v15594_v58, 0.0 }
 0x8b6   : > { %v19759_v11 = vpop.f32.mrf.mxu1 }
 0x8b7   : > { %v15597_v59 = vadd.f32 %v19758_v57, %v26355_v42 }
 0x8b8   : > { %v19760_v44 = vpop.f32.mrf.mxu1 }
 0x8b9   : > { %v15673_v39 = vmax.f32 %v15597_v59, 0.0  ;;  %v19761_v8 = vadd.f32 %v19760_v44, %v19759_v11 }
 0x8ba   : > { %v19762_v3 = vpop.f32.mrf.mxu1 }
 0x8bb   : > { %v26386_v14 = vpack.c.bf16 %v15673_v39, %v15672_v35  ;;  %v15602_v32 = vadd.f32 %v19761_v8, %v26349_v20 }
 0x8bc   : > { %v19763_v56 = vpop.f32.mrf.mxu1 }
 0x8bd   : > { %v19764_v51 = vadd.f32 %v19763_v56, %v19762_v3  ;;  %v15674_v1 = vmax.f32 %v15602_v32, 0.0 }
 0x8be   : > { %v19765_v62 = vpop.f32.mrf.mxu1 }
 0x8bf   : > { %v15605_v13 = vadd.f32 %v19764_v51, %v26351_v5 }
 0x8c0   : > { %v19766_v26 = vpop.f32.mrf.mxu1 }
 0x8c1   : > { %v15675_v15 = vmax.f32 %v15605_v13, 0.0 }
 0x8c2   : > { %v19768_v33 = vpop.f32.mrf.mxu1 }
 0x8c3   : > { %v26390_v21 = vpack.c.bf16 %v15675_v15, %v15674_v1 }
 0x8c4   : > { %v19769_v42 = vpop.f32.mrf.mxu1 }
 0x8c6   : > { %v19771_v31 = vpop.f32.mrf.mxu1 }
 0x8c8   : > { %v19772_v53 = vpop.f32.mrf.mxu1 }
 0x8ca   : > { %v19774_v46 = vpop.f32.mrf.mxu1 }
 0x8cc   : > { %v19775_v34 = vpop.f32.mrf.mxu1 }
 0x8ce   : > { %v19777_v37 = vpop.f32.mrf.mxu1 }
 0x8d0   : > { %v19778_v17 = vpop.f32.mrf.mxu1 }
 0x8d1   : > { %v19779_v13 = vadd.f32 %v19778_v17, %v19777_v37 }
 0x8d2   : > { %v19780_v22 = vpop.f32.mrf.mxu1 }
 0x8d4   : > { %v19781_v16 = vpop.f32.mrf.mxu1 }
 0x8d5   : > { %v19782_v8 = vadd.f32 %v19781_v16, %v19780_v22  ;;  %v19770_v22 = vadd.f32 %v19769_v42, %v19768_v33 }
 0x8d6   : > { %v19783_v20 = vpop.f32.mrf.mxu1 }
 0x8d7   : > { %v15613_v16 = vadd.f32 %v19770_v22, %v26347_v10  ;;  %v21318_v10 = vld [vmem:[%s26707_s5 + $0x10] ss:$8 sps:$4 sm:$0xff]  }
 0x8d8   : > { %v19784_v61 = vpop.f32.mrf.mxu1 }
 0x8d9   : > { %v19785_v44 = vadd.f32 %v19784_v61, %v19783_v20  ;;  %v21338_v61 = vld [vmem:[%s26707_s5 + $0x74] ss:$8 sps:$4 sm:$0xff]  }
 0x8da   : > { %v19786_v4 = vpop.f32.mrf.mxu1 }
 0x8db   : > { %v15634_v1 = vadd.f32 %v19785_v44, %v26325_v41 }
 0x8dc   : > { %v19787_v27 = vpop.f32.mrf.mxu1 }
 0x8dd   : > { %v19788_v58 = vadd.f32 %v19787_v27, %v19786_v4 }
 0x8de   : > { %v19789_v5 = vpop.f32.mrf.mxu1 }
 0x8df   : > { %v15637_v3 = vadd.f32 %v19788_v58, %v26327_v54  ;;  %v15682_v54 = vmax.f32 %v15634_v1, 0.0 }
 0x8e0   : > { %v19790_v6 = vpop.f32.mrf.mxu1 }
 0x8e1   : > { %v19791_v43 = vadd.f32 %v19790_v6, %v19789_v5  ;;  %v15683_v27 = vmax.f32 %v15637_v3, 0.0  ;;  %v21336_v5 = vld [vmem:[%s26707_s5 + $0x70] ss:$8 sps:$4 sm:$0xff]  }
 0x8e2   : > { %v19792_v25 = vpop.f32.mrf.mxu1  ;;  %v21339_v6 = vld [vmem:[%s26709_s7 + $0x38] sm:$0xff]  }
 0x8e3   : > { %v15642_v35 = vadd.f32 %v19791_v43, %v26317_v29  ;;  %v15626_v29 = vadd.f32 %v19779_v13, %v26333_v45  ;;  %v15701_v41 = vpack.c.bf16 %v15683_v27, %v15682_v54 }
 0x8e4   : > { %v19793_v9 = vpop.f32.mrf.mxu1 }
 0x8e5   : > { %v19794_v7 = vadd.f32 %v19793_v9, %v19792_v25  ;;  %v15684_v15 = vmax.f32 %v15642_v35, 0.0  ;;  %v21340_v25 = vld [vmem:[%s26709_s7 + $0x30] sm:$0xff]   ;;  %v21341_v9 = vld [vmem:[%s26709_s7 + $0x28] sm:$0xff]   ;;  %v15744_v35 = vpop.permute.xlu1 %15743 }
 0x8e6   : > { %v19795_v18 = vpop.f32.mrf.mxu1 }
 0x8e7   : > { %v15645_v57 = vadd.f32 %v19794_v7, %v26319_v12  ;;  %v19776_v12 = vadd.f32 %v19775_v34, %v19774_v46  ;;  %v19767_v46 = vadd.f32 %v19766_v26, %v19765_v62  ;;  %v15680_v34 = vmax.f32 %v15626_v29, 0.0  ;;  %v21330_v26 = vld [vmem:[%s26707_s5 + $0x50] ss:$8 sps:$4 sm:$0xff]  }
 0x8e8   : > { %v19796_v40 = vpop.f32.mrf.mxu1  ;;  %v21344_v7 = vld [vmem:[%s26709_s7 + $0x10] sm:$0xff]  }
 0x8e9   : > { %v19797_v36 = vadd.f32 %v19796_v40, %v19795_v18  ;;  %v15685_v56 = vmax.f32 %v15645_v57, 0.0  ;;  %v15621_v37 = vadd.f32 %v19776_v12, %v26343_v30  ;;  %v15610_v45 = vadd.f32 %v19767_v46, %v26345_v2  ;;  %v21320_v2 = vld [vmem:[%s26707_s5 + $0x14] ss:$8 sps:$4 sm:$0xff]   ;;  %v21342_v18 = vld [vmem:[%s26709_s7 + $0x20] sm:$0xff]   ;;  %v15739_v57 = vpop.permute.xlu0 %15738 }
 0x8ea   : > { %v19798_v60 = vpop.f32.mrf.mxu1  ;;  %v15677_v30 = vmax.f32 %v15613_v16, 0.0  ;;  %v21343_v40 = vld [vmem:[%s26709_s7 + $0x18] sm:$0xff]  }
 0x8eb   : > { %v15650_v11 = vadd.f32 %v19797_v36, %v26300_v49  ;;  %v15629_v49 = vadd.f32 %v19782_v8, %v26335_v23  ;;  %v15702_v20 = vpack.c.bf16 %v15685_v56, %v15684_v15  ;;  %v21345_v36 = vld [vmem:[%s26709_s7 + $0x8] sm:$0xff]   ;;  %v21346_v15 = vld [vmem:[%s26709_s7] sm:$0xff]  }
 0x8ec   : > { %v19799_v50 = vpop.f32.mrf.mxu1 }
 0x8ed   : > { %v19800_v59 = vadd.f32 %v19799_v50, %v19798_v60  ;;  %v15686_v32 = vmax.f32 %v15650_v11, 0.0  ;;  %v15681_v17 = vmax.f32 %v15629_v49, 0.0 }
 0x8ef   : > { %v15653_v39 = vadd.f32 %v19800_v59, %v26308_v24  ;;  %v19773_v24 = vadd.f32 %v19772_v53, %v19771_v31  ;;  %v15700_v31 = vpack.c.bf16 %v15681_v17, %v15680_v34  ;;  %v21333_v53 = vld [vmem:[%s26707_s5 + $0x60] ss:$8 sps:$4 sm:$0xff]  }
 0x8f1   : > { %v15687_v51 = vmax.f32 %v15653_v39, 0.0  ;;  %v15618_v23 = vadd.f32 %v19773_v24, %v26341_v28  ;;  %v21315_v28 = vld [vmem:[%s26707_s5] ss:$8 sps:$4 sm:$0xff]  }
 0x8f3   : > { %v15703_v4 = vpack.c.bf16 %v15687_v51, %v15686_v32  ;;  %v15678_v33 = vmax.f32 %v15618_v23, 0.0 }
 0x8f5   : > { %19801 = vmatprep.subr.bf16.mxu0 %v15703_v4  ;;  %v15749_v4 = vpop.permute.xlu0 %15748 }
 0x8f6   : > { %19802 = vmatpush3.bf16.msra.mxu0 %v26382_v48  ;;  %v15679_v48 = vmax.f32 %v15621_v37, 0.0 }
 0x8f7   : > { %19803 = vmatprep.subr.bf16.mxu0 %v15702_v20  ;;  %v15754_v20 = vpop.permute.xlu1 %15753 }
 0x8f8   : > { %v15699_v42 = vpack.c.bf16 %v15679_v48, %v15678_v33 }
 0x8f9   : > { %v15759_v23 = vpop.permute.xlu0 %15758 }
 0x8fa   : > { %19804 = vmatpush3.bf16.msra.mxu0 %v26378_v52  ;;  %v15676_v52 = vmax.f32 %v15610_v45, 0.0 }
 0x8fb   : > { %19805 = vmatprep.subr.bf16.mxu0 %v15701_v41 }
 0x8fc   : > { %v15698_v62 = vpack.c.bf16 %v15677_v30, %v15676_v52 }
 0x8fe   : > { %19806 = vmatpush3.bf16.msra.mxu0 %v26374_v19  ;;  %v21327_v19 = vld [vmem:[%s26707_s5 + $0x40] ss:$8 sps:$4 sm:$0xff]  }
 0x8ff   : > { %19807 = vmatprep.subr.bf16.mxu0 %v15700_v31  ;;  %v15764_v31 = vpop.permute.xlu1 %15763 }
 0x902   : > { %19808 = vmatpush3.bf16.msra.mxu0 %v26370_v55  ;;  %v21329_v55 = vld [vmem:[%s26707_s5 + $0x44] ss:$8 sps:$4 sm:$0xff]  }
 0x903   : > { %19809 = vmatprep.subr.bf16.mxu0 %v15699_v42 }
 0x906   : > { %19810 = vmatpush3.bf16.msra.mxu0 %v26366_v38  ;;  %v21324_v38 = vld [vmem:[%s26707_s5 + $0x30] ss:$8 sps:$4 sm:$0xff]  }
 0x907   : > { %19811 = vmatprep.subr.bf16.mxu0 %v15698_v62 }
 0x90a   : > { %19812 = vmatpush3.bf16.msra.mxu0 %v26361_v63  ;;  %v21326_v63 = vld [vmem:[%s26707_s5 + $0x34] ss:$8 sps:$4 sm:$0xff]  }
 0x90b   : > { %19813 = vmatprep.subr.bf16.mxu0 %v26390_v21  ;;  %v21335_v21 = vld [vmem:[%s26707_s5 + $0x64] ss:$8 sps:$4 sm:$0xff]  }
 0x90e   : > { %19814 = vmatpush3.bf16.msra.mxu0 %v26359_v47  ;;  %v21323_v47 = vld [vmem:[%s26707_s5 + $0x24] ss:$8 sps:$4 sm:$0xff]  }
 0x90f   : > { %19815 = vmatprep.subr.bf16.mxu0 %v26386_v14  ;;  %v21332_v14 = vld [vmem:[%s26707_s5 + $0x54] ss:$8 sps:$4 sm:$0xff]  }
 0x912   : > { %19816 = vmatpush3.bf16.msra.mxu0 %v26357_v0  ;;  %v21321_v0 = vld [vmem:[%s26707_s5 + $0x20] ss:$8 sps:$4 sm:$0xff]  }
 0x913   : > { %19921 = vmatprep.subr.bf16.mxu0 %v21339_v6 }
 0x915   : > { %15929 = vmatmul.mubr.bf16.vlgmr.msra.gmra.mxu0 %v21315_v28 }
 0x916   : > { %15936 = vmatprep.mubr.bf16.mxu0 %v21320_v2  ;;  %19922 = vmatpush3.bf16.msra.mxu0 %v21339_v6 }
 0x917   : > { %19923 = vmatprep.subr.bf16.mxu0 %v21340_v25 }
 0x91a   : > { %19924 = vmatpush3.bf16.msra.mxu0 %v21340_v25 }
 0x91b   : > { %19925 = vmatprep.subr.bf16.mxu0 %v21341_v9 }
 0x91d   : > { %15937 = vmatmul.mubr.bf16.gmra.mxu0 %v21318_v10  ;;  %v15769_v10 = vpop.permute.xlu0 %15768 }
 0x91e   : > { %15944 = vmatprep.mubr.bf16.mxu0 %v21323_v47  ;;  %19926 = vmatpush3.bf16.msra.mxu0 %v21341_v9 }
 0x91f   : > { %19927 = vmatprep.subr.bf16.mxu0 %v21342_v18 }
 0x921   : > { %v15779_v6 = vpop.permute.xlu0 %15778 }
 0x922   : > { %19928 = vmatpush3.bf16.msra.mxu0 %v21342_v18 }
 0x923   : > { %19929 = vmatprep.subr.bf16.mxu0 %v21343_v40 }
 0x925   : > { %15945 = vmatmul.mubr.bf16.gmra.mxu0 %v21321_v0 }
 0x926   : > { %15952 = vmatprep.mubr.bf16.mxu0 %v21326_v63  ;;  %19930 = vmatpush3.bf16.msra.mxu0 %v21343_v40 }
 0x927   : > { %19931 = vmatprep.subr.bf16.mxu0 %v21344_v7 }
 0x92a   : > { %19932 = vmatpush3.bf16.msra.mxu0 %v21344_v7 }
 0x92b   : > { %19933 = vmatprep.subr.bf16.mxu0 %v21345_v36 }
 0x92d   : > { %15953 = vmatmul.mubr.bf16.gmra.mxu0 %v21324_v38  ;;  %v15774_v38 = vpop.permute.xlu1 %15773 }
 0x92e   : > { %15960 = vmatprep.mubr.bf16.mxu0 %v21329_v55  ;;  %19934 = vmatpush3.bf16.msra.mxu0 %v21345_v36 }
 0x92f   : > { %19935 = vmatprep.subr.bf16.mxu0 %v21346_v15 }
 0x931   : > { %v15784_v40 = vpop.permute.xlu1 %15783 }
 0x932   : > { %19936 = vmatpush3.bf16.msra.mxu0 %v21346_v15 }
 0x935   : > { %15961 = vmatmul.mubr.bf16.gmra.mxu0 %v21327_v19 }
 0x936   : > { %15968 = vmatprep.mubr.bf16.mxu0 %v21332_v14 }
 0x93d   : > { %15969 = vmatmul.mubr.bf16.gmra.mxu0 %v21330_v26 }
 0x93e   : > { %15976 = vmatprep.mubr.bf16.mxu0 %v21335_v21 }
 0x945   : > { %15977 = vmatmul.mubr.bf16.gmra.mxu0 %v21333_v53 }
 0x946   : > { %15984 = vmatprep.mubr.bf16.mxu0 %v21338_v61 }
 0x94d   : > { %15985 = vmatmul.mubr.bf16.gmra.mxu0 %v21336_v5 }
 0x9d5   : > { %v19817_v60 = vpop.f32.mrf.mxu0 }
 0x9d7   : > { %v19818_v43 = vpop.f32.mrf.mxu0 }
 0x9d8   : > { %v19819_v50 = vadd.f32 %v19818_v43, %v19817_v60 }
 0x9d9   : > { %v19820_v58 = vpop.f32.mrf.mxu0 }
 0x9da   : > { %v15931_v59 = vadd.f32 %v19819_v50, %v15739_v57 }
 0x9db   : > { %v19821_v11 = vpop.f32.mrf.mxu0 }
 0x9dc   : > { %v19822_v44 = vadd.f32 %v19821_v11, %v19820_v58  ;;  %v15993_v56 = vmax.f32 %v15931_v59, 0.0  ;;  %v15789_v59 = vpop.permute.xlu0 %15788 }
 0x9dd   : > { %v19823_v39 = vpop.f32.mrf.mxu0 }
 0x9de   : > { %v15934_v8 = vadd.f32 %v19822_v44, %v15744_v35 }
 0x9df   : > { %v19824_v3 = vpop.f32.mrf.mxu0 }
 0x9e0   : > { %v15994_v32 = vmax.f32 %v15934_v8, 0.0  ;;  %v19825_v51 = vadd.f32 %v19824_v3, %v19823_v39  ;;  %v15794_v8 = vpop.permute.xlu1 %15793 }
 0x9e1   : > { %v19826_v13 = vpop.f32.mrf.mxu0 }
 0x9e2   : > { %v16009_v1 = vpack.c.bf16 %v15994_v32, %v15993_v56  ;;  %v15939_v49 = vadd.f32 %v19825_v51, %v15749_v4 }
 0x9e3   : > { %v19827_v12 = vpop.f32.mrf.mxu0 }
 0x9e4   : > { %v19828_v27 = vadd.f32 %v19827_v12, %v19826_v13  ;;  %16040 = vxpose.xlu0.c.b16.start [1/8] %v16009_v1, 128  ;;  %v15995_v22 = vmax.f32 %v15939_v49, 0.0  ;;  %v15799_v12 = vpop.permute.xlu0 %15798 }
 0x9e5   : > { %v19829_v24 = vpop.f32.mrf.mxu0 }
 0x9e6   : > { %v15942_v29 = vadd.f32 %v19828_v27, %v15754_v20 }
 0x9e7   : > { %v19830_v54 = vpop.f32.mrf.mxu0 }
 0x9e8   : > { %v15996_v37 = vmax.f32 %v15942_v29, 0.0  ;;  %v19831_v17 = vadd.f32 %v19830_v54, %v19829_v24  ;;  %v15804_v24 = vpop.permute.xlu1 %15803 }
 0x9e9   : > { %v19832_v41 = vpop.f32.mrf.mxu0 }
 0x9ea   : > { %v16010_v46 = vpack.c.bf16 %v15996_v37, %v15995_v22  ;;  %v15947_v16 = vadd.f32 %v19831_v17, %v15759_v23 }
 0x9eb   : > { %v19833_v34 = vpop.f32.mrf.mxu0 }
 0x9ec   : > { %v19834_v48 = vadd.f32 %v19833_v34, %v19832_v41  ;;  %16041 = vxpose.xlu0.c.b16.cont [2/8] %v16010_v46, 128  ;;  %v15997_v42 = vmax.f32 %v15947_v16, 0.0  ;;  %v15809_v34 = vpop.permute.xlu0 %15808 }
 0x9ed   : > { %v19835_v45 = vpop.f32.mrf.mxu0 }
 0x9ee   : > { %v15950_v33 = vadd.f32 %v19834_v48, %v15764_v31 }
 0x9ef   : > { %v19836_v30 = vpop.f32.mrf.mxu0 }
 0x9f0   : > { %v15998_v52 = vmax.f32 %v15950_v33, 0.0  ;;  %v19837_v62 = vadd.f32 %v19836_v30, %v19835_v45  ;;  %v15814_v45 = vpop.permute.xlu1 %15813 }
 0x9f1   : > { %v19838_v28 = vpop.f32.mrf.mxu0 }
 0x9f2   : > { %v16011_v2 = vpack.c.bf16 %v15998_v52, %v15997_v42  ;;  %v15955_v0 = vadd.f32 %v19837_v62, %v15769_v10 }
 0x9f3   : > { %v19839_v47 = vpop.f32.mrf.mxu0 }
 0x9f4   : > { %v19840_v63 = vadd.f32 %v19839_v47, %v19838_v28  ;;  %16042 = vxpose.xlu0.c.b16.cont [3/8] %v16011_v2, 128  ;;  %v15999_v26 = vmax.f32 %v15955_v0, 0.0 }
 0x9f5   : > { %v19841_v55 = vpop.f32.mrf.mxu0 }
 0x9f6   : > { %v15958_v19 = vadd.f32 %v19840_v63, %v15774_v38 }
 0x9f7   : > { %v19842_v14 = vpop.f32.mrf.mxu0 }
 0x9f8   : > { %v16000_v21 = vmax.f32 %v15958_v19, 0.0  ;;  %v19843_v53 = vadd.f32 %v19842_v14, %v19841_v55  ;;  %v17529_v55 = vld [vmem:[%s26710_s8] ss:$0 sm:$0xff] }
 0x9f9   : > { %v19844_v61 = vpop.f32.mrf.mxu0 }
 0x9fa   : > { %v16012_v5 = vpack.c.bf16 %v16000_v21, %v15999_v26  ;;  %v15963_v9 = vadd.f32 %v19843_v53, %v15779_v6 }
 0x9fb   : > { %v19845_v25 = vpop.f32.mrf.mxu0 }
 0x9fc   : > { %v19846_v18 = vadd.f32 %v19845_v25, %v19844_v61  ;;  %16043 = vxpose.xlu0.c.b16.cont [4/8] %v16012_v5, 128  ;;  %v16001_v43 = vmax.f32 %v15963_v9, 0.0 }
 0x9fd   : > { %v19847_v7 = vpop.f32.mrf.mxu0 }
 0x9fe   : > { %v15966_v36 = vadd.f32 %v19846_v18, %v15784_v40 }
 0x9ff   : > { %v19848_v60 = vpop.f32.mrf.mxu0 }
 0xa00   : > { %v16002_v50 = vmax.f32 %v15966_v36, 0.0  ;;  %v19849_v58 = vadd.f32 %v19848_v60, %v19847_v7 }
 0xa01   : > { %v19850_v57 = vpop.f32.mrf.mxu0 }
 0xa02   : > { %v16013_v11 = vpack.c.bf16 %v16002_v50, %v16001_v43  ;;  %v15971_v35 = vadd.f32 %v19849_v58, %v15789_v59 }
 0xa03   : > { %v19851_v44 = vpop.f32.mrf.mxu0 }
 0xa04   : > { %v19852_v39 = vadd.f32 %v19851_v44, %v19850_v57  ;;  %16044 = vxpose.xlu0.c.b16.cont [5/8] %v16013_v11, 128  ;;  %v16003_v51 = vmax.f32 %v15971_v35, 0.0 }
 0xa05   : > { %v19853_v3 = vpop.f32.mrf.mxu0 }
 0xa06   : > { %v15974_v56 = vadd.f32 %v19852_v39, %v15794_v8 }
 0xa07   : > { %v19854_v32 = vpop.f32.mrf.mxu0 }
 0xa08   : > { %v16004_v13 = vmax.f32 %v15974_v56, 0.0  ;;  %v19855_v1 = vadd.f32 %v19854_v32, %v19853_v3 }
 0xa09   : > { %v19856_v15 = vpop.f32.mrf.mxu0 }
 0xa0a   : > { %v16014_v4 = vpack.c.bf16 %v16004_v13, %v16003_v51  ;;  %v15979_v27 = vadd.f32 %v19855_v1, %v15799_v12 }
 0xa0b   : > { %v19857_v49 = vpop.f32.mrf.mxu0 }
 0xa0c   : > { %v19858_v20 = vadd.f32 %v19857_v49, %v19856_v15  ;;  %16045 = vxpose.xlu0.c.b16.cont [6/8] %v16014_v4, 128  ;;  %v16005_v37 = vmax.f32 %v15979_v27, 0.0 }
 0xa0d   : > { %v19859_v29 = vpop.f32.mrf.mxu0 }
 0xa0e   : > { %v15982_v54 = vadd.f32 %v19858_v20, %v15804_v24 }
 0xa0f   : > { %v19860_v22 = vpop.f32.mrf.mxu0 }
 0xa10   : > { %v16006_v17 = vmax.f32 %v15982_v54, 0.0  ;;  %v19861_v41 = vadd.f32 %v19860_v22, %v19859_v29 }
 0xa11   : > { %v19862_v46 = vpop.f32.mrf.mxu0 }
 0xa12   : > { %v16015_v23 = vpack.c.bf16 %v16006_v17, %v16005_v37  ;;  %v15987_v48 = vadd.f32 %v19861_v41, %v15809_v34 }
 0xa13   : > { %v19863_v16 = vpop.f32.mrf.mxu0 }
 0xa14   : > { %v19864_v31 = vadd.f32 %v19863_v16, %v19862_v46  ;;  %16046 = vxpose.xlu0.c.b16.cont [7/8] %v16015_v23, 128  ;;  %v16007_v30 = vmax.f32 %v15987_v48, 0.0 }
 0xa16   : > { %v15990_v33 = vadd.f32 %v19864_v31, %v15814_v45 }
 0xa18   : > { %v16008_v42 = vmax.f32 %v15990_v33, 0.0 }
 0xa1a   : > { %v16016_v52 = vpack.c.bf16 %v16008_v42, %v16007_v30 }
 0xa1c   : > { %16047 = vxpose.xlu0.c.b16.end [8/8] %v16016_v52, 128 }
 0xa62   : > { %v16048_v62 = vpop.trf.xlu0 }
 0xa63   : > { %19937 = vmatprep.mubr.bf16.mxu0 %v16048_v62 }
 0xa66   : > { %v16049_v28 = vpop.trf.xlu0 }
 0xa67   : > { %19938 = vmatmul.mubr.bf16.vlgmr.msra.gmra.mxu0 %v16049_v28 }
 0xa6a   : > { %v16050_v2 = vpop.trf.xlu0 }
 0xa6b   : > { %19941 = vmatprep.mubr.bf16.mxu0 %v16050_v2 }
 0xa6e   : > { %v16051_v10 = vpop.trf.xlu0 }
 0xa6f   : > { %19942 = vmatmul.mubr.bf16.gmra.mxu0 %v16051_v10 }
 0xa72   : > { %v16052_v47 = vpop.trf.xlu0 }
 0xa73   : > { %19945 = vmatprep.mubr.bf16.mxu0 %v16052_v47 }
 0xa76   : > { %v16053_v0 = vpop.trf.xlu0 }
 0xa77   : > { %19946 = vmatmul.mubr.bf16.gmra.mxu0 %v16053_v0 }
 0xa7a   : > { %v16054_v63 = vpop.trf.xlu0 }
 0xa7b   : > { %19949 = vmatprep.mubr.bf16.mxu0 %v16054_v63 }
 0xa7e   : > { %v16055_v38 = vpop.trf.xlu0 }
 0xa7f   : > { %19950 = vmatmul.mubr.bf16.gmra.mxu0 %v16055_v38 }
 0xb27   : > { %v19939_v19 = vpop.f32.mrf.mxu0 }
 0xb28   : > { %v26486_v14 = vadd.f32 %v19939_v19, %v17529_v55 }
 0xb29   : > { %v16138_v26 = vpop.f32.mrf.mxu0 }
 0xb2a   : > { %v26488_v21 = vadd.f32 %v17529_v55, %v16138_v26  ;;  %v16207_v53 = vsel %vm11794_vm0, %v26486_v14, -inf }
 0xb2b   : > { %16208 = vmax.xlane.f32.xlu1 %v16207_v53  ;;  %v19940_v61 = vpop.f32.mrf.mxu0 }
 0xb2c   : > { %v26492_v6 = vadd.f32 %v19940_v61, %v17529_v55  ;;  %v16201_v25 = vsel %vm11794_vm0, %v26488_v21, -inf }
 0xb2d   : > { %v16141_v5 = vpop.f32.mrf.mxu0 }
 0xb2e   : > { %v26496_v40 = vadd.f32 %v17529_v55, %v16141_v5  ;;  %v16210_v7 = vsel %vm11794_vm0, %v26492_v6, -inf }
 0xb2f   : > { %16202 = vmax.xlane.f32.xlu1 %v16201_v25  ;;  %v19943_v9 = vpop.f32.mrf.mxu0 }
 0xb30   : > { %v26500_v60 = vadd.f32 %v19943_v9, %v17529_v55  ;;  %v16204_v58 = vsel %vm11794_vm0, %v26496_v40, -inf }
 0xb31   : > { %v16154_v18 = vpop.f32.mrf.mxu0 }
 0xb32   : > { %v16219_v59 = vsel %vm11794_vm0, %v26500_v60, -inf  ;;  %v26507_v35 = vadd.f32 %v17529_v55, %v16154_v18 }
 0xb33   : > { %16211 = vmax.xlane.f32.xlu1 %v16210_v7  ;;  %v19944_v36 = vpop.f32.mrf.mxu0 }
 0xb34   : > { %v16166_v43 = vadd.f32 %v19944_v36, %v17529_v55  ;;  %v16213_v32 = vsel %vm11794_vm0, %v26507_v35, -inf }
 0xb35   : > { %v16157_v50 = vpop.f32.mrf.mxu0 }
 0xb36   : > { %v16222_v57 = vsel %vm11794_vm0, %v16166_v43, -inf  ;;  %v26511_v56 = vadd.f32 %v17529_v55, %v16157_v50 }
 0xb37   : > { %16205 = vmax.xlane.f32.xlu1 %v16204_v58  ;;  %16223 = vmax.xlane.f32.xlu0 %v16222_v57  ;;  %v19947_v11 = vpop.f32.mrf.mxu0 }
 0xb38   : > { %v26517_v15 = vadd.f32 %v19947_v11, %v17529_v55  ;;  %v16216_v4 = vsel %vm11794_vm0, %v26511_v56, -inf }
 0xb39   : > { %v16170_v44 = vpop.f32.mrf.mxu0 }
 0xb3a   : > { %v26521_v27 = vadd.f32 %v17529_v55, %v16170_v44  ;;  %v16231_v29 = vsel %vm11794_vm0, %v26517_v15, -inf }
 0xb3b   : > { %16220 = vmax.xlane.f32.xlu1 %v16219_v59  ;;  %v19948_v39 = vpop.f32.mrf.mxu0 }
 0xb3c   : > { %v26509_v8 = vadd.f32 %v19948_v39, %v17529_v55  ;;  %v16225_v37 = vsel %vm11794_vm0, %v26521_v27, -inf }
 0xb3d   : > { %v16173_v3 = vpop.f32.mrf.mxu0 }
 0xb3e   : > { %v16234_v51 = vsel %vm11794_vm0, %v26509_v8, -inf  ;;  %v26531_v22 = vadd.f32 %v17529_v55, %v16173_v3 }
 0xb3f   : > { %16214 = vmax.xlane.f32.xlu1 %v16213_v32  ;;  %16235 = vmax.xlane.f32.xlu0 %v16234_v51  ;;  %v19951_v13 = vpop.f32.mrf.mxu0 }
 0xb40   : > { %v16228_v46 = vsel %vm11794_vm0, %v26531_v22, -inf  ;;  %v26541_v23 = vadd.f32 %v19951_v13, %v17529_v55 }
 0xb41   : > { %v16186_v1 = vpop.f32.mrf.mxu0 }
 0xb42   : > { %v26537_v41 = vadd.f32 %v17529_v55, %v16186_v1  ;;  %v16243_v16 = vsel %vm11794_vm0, %v26541_v23, -inf }
 0xb43   : > { %16217 = vmax.xlane.f32.xlu1 %v16216_v4  ;;  %v19952_v12 = vpop.f32.mrf.mxu0 }
 0xb44   : > { %v26523_v20 = vadd.f32 %v19952_v12, %v17529_v55  ;;  %v16237_v34 = vsel %vm11794_vm0, %v26537_v41, -inf }
 0xb45   : > { %v16189_v49 = vpop.f32.mrf.mxu0 }
 0xb46   : > { %v26525_v24 = vadd.f32 %v17529_v55, %v16189_v49  ;;  %v16246_v17 = vsel %vm11794_vm0, %v26523_v20, -inf }
 0xb47   : > { %16232 = vmax.xlane.f32.xlu1 %v16231_v29 }
 0xb48   : > { %v16240_v54 = vsel %vm11794_vm0, %v26525_v24, -inf }
 0xb49   : > { %16241 = vmax.xlane.f32.xlu0 %v16240_v54 }
 0xb4b   : > { %16226 = vmax.xlane.f32.xlu1 %v16225_v37 }
 0xb4d   : > { %16247 = vmax.xlane.f32.xlu0 %v16246_v17 }
 0xb4f   : > { %16229 = vmax.xlane.f32.xlu1 %v16228_v46 }
 0xb53   : > { %16238 = vmax.xlane.f32.xlu1 %v16237_v34 }
 0xb57   : > { %16244 = vmax.xlane.f32.xlu1 %v16243_v16 }
 0xbb4   : > { %v16209_v48 = vpop.xlane.xlu1 %16208 }
 0xbb5   : > { %v26548_v31 = vsub.f32 %v26486_v14, %v16209_v48 }
 0xbb7   : > { %v16269_v45 = vmul.f32 1.442695, %v26548_v31 }
 0xbb8   : > { %v16203_v33 = vpop.xlane.xlu1 %16202 }
 0xbb9   : > { %21347 = vpow2.f32 %v16269_v45  ;;  %v26552_v30 = vsub.f32 %v26488_v21, %v16203_v33 }
 0xbbb   : > { %v16265_v42 = vmul.f32 1.442695, %v26552_v30 }
 0xbbc   : > { %v16212_v52 = vpop.xlane.xlu1 %16211 }
 0xbbd   : > { %21349 = vpow2.f32 %v16265_v42  ;;  %v26556_v62 = vsub.f32 %v26492_v6, %v16212_v52 }
 0xbbf   : > { %v16271_v28 = vmul.f32 1.442695, %v26556_v62 }
 0xbc0   : > { %v16206_v2 = vpop.xlane.xlu1 %16205  ;;  %v16224_v10 = vpop.xlane.xlu0 %16223 }
 0xbc1   : > { %21351 = vpow2.f32 %v16271_v28  ;;  %v26560_v47 = vsub.f32 %v26496_v40, %v16206_v2  ;;  %v26562_v0 = vsub.f32 %v16166_v43, %v16224_v10 }
 0xbc3   : > { %v16267_v63 = vmul.f32 1.442695, %v26560_v47  ;;  %v16279_v38 = vmul.f32 1.442695, %v26562_v0 }
 0xbc4   : > { %v16221_v55 = vpop.xlane.xlu1 %16220 }
 0xbc5   : > { %21353 = vpow2.f32 %v16267_v63  ;;  %v26567_v19 = vsub.f32 %v26500_v60, %v16221_v55 }
 0xbc6   : > { %v21348_v14 = vpop.eup %21347  ;;  %21355 = vpow2.f32 %v16279_v38 }
 0xbc7   : > { %v16277_v26 = vmul.f32 1.442695, %v26567_v19  ;;  %v16303_v21 = vsel %vm11794_vm0, %v21348_v14, 0.0 }
 0xbc8   : > { %v16215_v53 = vpop.xlane.xlu1 %16214  ;;  %16304 = vadd.xlane.f32.xlu1 %v16303_v21  ;;  %v16236_v61 = vpop.xlane.xlu0 %16235 }
 0xbc9   : > { %21357 = vpow2.f32 %v16277_v26  ;;  %v26572_v5 = vsub.f32 %v26507_v35, %v16215_v53  ;;  %v26576_v9 = vsub.f32 %v26509_v8, %v16236_v61 }
 0xbca   : > { %v21350_v6 = vpop.eup %21349 }
 0xbcb   : > { %v16273_v25 = vmul.f32 1.442695, %v26572_v5  ;;  %v16297_v18 = vsel %vm11794_vm0, %v21350_v6, 0.0  ;;  %v16287_v60 = vmul.f32 1.442695, %v26576_v9 }
 0xbcc   : > { %v16218_v40 = vpop.xlane.xlu1 %16217  ;;  %16298 = vadd.xlane.f32.xlu1 %v16297_v18 }
 0xbcd   : > { %21359 = vpow2.f32 %v16273_v25  ;;  %v26580_v7 = vsub.f32 %v26511_v56, %v16218_v40 }
 0xbce   : > { %v21352_v36 = vpop.eup %21351 }
 0xbcf   : > { %v16275_v43 = vmul.f32 1.442695, %v26580_v7  ;;  %v16306_v50 = vsel %vm11794_vm0, %v21352_v36, 0.0 }
 0xbd0   : > { %v16233_v58 = vpop.xlane.xlu1 %16232  ;;  %16307 = vadd.xlane.f32.xlu0 %v16306_v50 }
 0xbd1   : > { %21361 = vpow2.f32 %v16275_v43  ;;  %v26586_v57 = vsub.f32 %v26517_v15, %v16233_v58 }
 0xbd2   : > { %v21354_v11 = vpop.eup %21353  ;;  %v16242_v59 = vpop.xlane.xlu0 %16241  ;;  %21363 = vpow2.f32 %v16287_v60 }
 0xbd3   : > { %v16285_v44 = vmul.f32 1.442695, %v26586_v57  ;;  %v16300_v35 = vsel %vm11794_vm0, %v21354_v11, 0.0  ;;  %v21356_v39 = vpop.eup %21355  ;;  %v26594_v32 = vsub.f32 %v26525_v24, %v16242_v59 }
 0xbd4   : > { %v16227_v8 = vpop.xlane.xlu1 %16226  ;;  %16301 = vadd.xlane.f32.xlu0 %v16300_v35  ;;  %v16318_v1 = vsel %vm11794_vm0, %v21356_v39, 0.0 }
 0xbd5   : > { %21365 = vpow2.f32 %v16285_v44  ;;  %v26591_v3 = vsub.f32 %v26521_v27, %v16227_v8  ;;  %v16291_v27 = vmul.f32 1.442695, %v26594_v32 }
 0xbd6   : > { %v21358_v56 = vpop.eup %21357  ;;  %v16248_v15 = vpop.xlane.xlu0 %16247 }
 0xbd7   : > { %v16281_v51 = vmul.f32 1.442695, %v26591_v3  ;;  %v16315_v13 = vsel %vm11794_vm0, %v21358_v56, 0.0  ;;  %v26604_v24 = vsub.f32 %v26523_v20, %v16248_v15 }
 0xbd8   : > { %v16230_v4 = vpop.xlane.xlu1 %16229  ;;  %16316 = vadd.xlane.f32.xlu1 %v16315_v13  ;;  %16319 = vadd.xlane.f32.xlu0 %v16318_v1 }
 0xbd9   : > { %21367 = vpow2.f32 %v16281_v51  ;;  %v26600_v12 = vsub.f32 %v26531_v22, %v16230_v4  ;;  %v16295_v22 = vmul.f32 1.442695, %v26604_v24 }
 0xbda   : > { %v21360_v49 = vpop.eup %21359 }
 0xbdb   : > { %v16283_v29 = vmul.f32 1.442695, %v26600_v12  ;;  %v16309_v54 = vsel %vm11794_vm0, %v21360_v49, 0.0 }
 0xbdc   : > { %16310 = vadd.xlane.f32.xlu1 %v16309_v54  ;;  %v16239_v37 = vpop.xlane.xlu1 %16238 }
 0xbdd   : > { %21369 = vpow2.f32 %v16283_v29  ;;  %v26609_v17 = vsub.f32 %v26537_v41, %v16239_v37 }
 0xbde   : > { %v21362_v46 = vpop.eup %21361  ;;  %21371 = vpow2.f32 %v16291_v27 }
 0xbdf   : > { %v16289_v34 = vmul.f32 1.442695, %v26609_v17  ;;  %v16312_v16 = vsel %vm11794_vm0, %v21362_v46, 0.0  ;;  %v21364_v20 = vpop.eup %21363 }
 0xbe0   : > { %v16245_v48 = vpop.xlane.xlu1 %16244  ;;  %16313 = vadd.xlane.f32.xlu0 %v16312_v16  ;;  %v16330_v52 = vsel %vm11794_vm0, %v21364_v20, 0.0 }
 0xbe1   : > { %21373 = vpow2.f32 %v16289_v34  ;;  %v26615_v45 = vsub.f32 %v26541_v23, %v16245_v48 }
 0xbe2   : > { %v21366_v33 = vpop.eup %21365  ;;  %21375 = vpow2.f32 %v16295_v22 }
 0xbe3   : > { %v16293_v41 = vmul.f32 1.442695, %v26615_v45  ;;  %v16327_v42 = vsel %vm11794_vm0, %v21366_v33, 0.0 }
 0xbe4   : > { %16328 = vadd.xlane.f32.xlu1 %v16327_v42  ;;  %16331 = vadd.xlane.f32.xlu0 %v16330_v52 }
 0xbe5   : > { %21377 = vpow2.f32 %v16293_v41 }
 0xbe6   : > { %v21368_v28 = vpop.eup %21367 }
 0xbe7   : > { %v16321_v2 = vsel %vm11794_vm0, %v21368_v28, 0.0 }
 0xbe8   : > { %16322 = vadd.xlane.f32.xlu1 %v16321_v2 }
 0xbea   : > { %v21370_v10 = vpop.eup %21369 }
 0xbeb   : > { %v16324_v23 = vsel %vm11794_vm0, %v21370_v10, 0.0  ;;  %v21372_v63 = vpop.eup %21371 }
 0xbec   : > { %16325 = vadd.xlane.f32.xlu0 %v16324_v23  ;;  %v16336_v14 = vsel %vm11794_vm0, %v21372_v63, 0.0 }
 0xbee   : > { %v21374_v38 = vpop.eup %21373 }
 0xbef   : > { %v16333_v55 = vsel %vm11794_vm0, %v21374_v38, 0.0  ;;  %v21376_v26 = vpop.eup %21375 }
 0xbf0   : > { %16334 = vadd.xlane.f32.xlu1 %v16333_v55  ;;  %16337 = vadd.xlane.f32.xlu0 %v16336_v14  ;;  %v16342_v61 = vsel %vm11794_vm0, %v21376_v26, 0.0 }
 0xbf2   : > { %v21378_v21 = vpop.eup %21377 }
 0xbf3   : > { %v16339_v53 = vsel %vm11794_vm0, %v21378_v21, 0.0 }
 0xbf4   : > { %16340 = vadd.xlane.f32.xlu1 %v16339_v53  ;;  %16343 = vadd.xlane.f32.xlu0 %v16342_v61 }
 0xc51   : > { %v16305_v6 = vpop.xlane.xlu1 %16304 }
 0xc52   : > { %21379 = vlog2.f32 %v16305_v6 }
 0xc55   : > { %v16299_v25 = vpop.xlane.xlu1 %16298 }
 0xc56   : > { %21381 = vlog2.f32 %v16299_v25 }
 0xc59   : > { %v16308_v18 = vpop.xlane.xlu0 %16307 }
 0xc5a   : > { %21383 = vlog2.f32 %v16308_v18 }
 0xc5d   : > { %v16302_v40 = vpop.xlane.xlu0 %16301 }
 0xc5e   : > { %21385 = vlog2.f32 %v16302_v40 }
 0xc5f   : > { %v21380_v36 = vpop.eup %21379 }
 0xc60   : > { %v16350_v60 = vmul.f32 0.6931472, %v21380_v36 }
 0xc61   : > { %v16317_v43 = vpop.xlane.xlu1 %16316  ;;  %v16320_v50 = vpop.xlane.xlu0 %16319 }
 0xc62   : > { %v16379_v58 = vsub.f32 %v26548_v31, %v16350_v60  ;;  %21387 = vlog2.f32 %v16317_v43 }
 0xc63   : > { %v21382_v11 = vpop.eup %21381  ;;  %21389 = vlog2.f32 %v16320_v50 }
 0xc64   : > { %16396 = vst.msk [vmem:[%s26631_s28 + $0x10] sm:$0xff] %vm16393_vm1, %v16379_v58  ;;  %v16346_v59 = vmul.f32 0.6931472, %v21382_v11 }
 0xc65   : > { %v16311_v44 = vpop.xlane.xlu1 %16310 }
 0xc66   : > { %v16377_v35 = vsub.f32 %v26552_v30, %v16346_v59  ;;  %21391 = vlog2.f32 %v16311_v44 }
 0xc67   : > { %v21384_v39 = vpop.eup %21383 }
 0xc68   : > { %16394 = vst.msk [vmem:[%s26631_s28] sm:$0xff] %vm16393_vm1, %v16377_v35  ;;  %v16352_v8 = vmul.f32 0.6931472, %v21384_v39 }
 0xc69   : > { %v16314_v56 = vpop.xlane.xlu0 %16313 }
 0xc6a   : > { %v16380_v51 = vsub.f32 %v26556_v62, %v16352_v8  ;;  %21393 = vlog2.f32 %v16314_v56 }
 0xc6b   : > { %v21386_v31 = vpop.eup %21385 }
 0xc6c   : > { %16397 = vst.msk [vmem:[%s26631_s28 + $0x18] sm:$0xff] %vm16393_vm1, %v16380_v51  ;;  %v16348_v13 = vmul.f32 0.6931472, %v21386_v31 }
 0xc6d   : > { %v16329_v1 = vpop.xlane.xlu1 %16328  ;;  %v16332_v15 = vpop.xlane.xlu0 %16331 }
 0xc6e   : > { %v16378_v30 = vsub.f32 %v26560_v47, %v16348_v13  ;;  %21395 = vlog2.f32 %v16329_v1 }
 0xc6f   : > { %v21388_v4 = vpop.eup %21387  ;;  %21397 = vlog2.f32 %v16332_v15 }
 0xc70   : > { %v21390_v49 = vpop.eup %21389  ;;  %16395 = vst.msk [vmem:[%s26631_s28 + $0x8] sm:$0xff] %vm16393_vm1, %v16378_v30  ;;  %v16358_v27 = vmul.f32 0.6931472, %v21388_v4 }
 0xc71   : > { %v16360_v62 = vmul.f32 0.6931472, %v21390_v49  ;;  %v16323_v29 = vpop.xlane.xlu1 %16322 }
 0xc72   : > { %v16383_v54 = vsub.f32 %v26567_v19, %v16358_v27  ;;  %21399 = vlog2.f32 %v16323_v29 }
 0xc73   : > { %v21392_v37 = vpop.eup %21391  ;;  %v16384_v46 = vsub.f32 %v26562_v0, %v16360_v62 }
 0xc74   : > { %16400 = vst.msk [vmem:[%s26631_s28 + $0x30] sm:$0xff] %vm16393_vm1, %v16383_v54  ;;  %v16354_v47 = vmul.f32 0.6931472, %v21392_v37 }
 0xc75   : > { %16401 = vst.msk [vmem:[%s26631_s28 + $0x38] sm:$0xff] %vm16393_vm1, %v16384_v46  ;;  %v16326_v22 = vpop.xlane.xlu0 %16325 }
 0xc76   : > { %v16381_v34 = vsub.f32 %v26572_v5, %v16354_v47  ;;  %21401 = vlog2.f32 %v16326_v22 }
 0xc77   : > { %v21394_v16 = vpop.eup %21393 }
 0xc78   : > { %16398 = vst.msk [vmem:[%s26631_s28 + $0x20] sm:$0xff] %vm16393_vm1, %v16381_v34  ;;  %v16356_v20 = vmul.f32 0.6931472, %v21394_v16 }
 0xc79   : > { %v16335_v48 = vpop.xlane.xlu1 %16334  ;;  %v16338_v19 = vpop.xlane.xlu0 %16337 }
 0xc7a   : > { %v16382_v33 = vsub.f32 %v26580_v7, %v16356_v20  ;;  %21403 = vlog2.f32 %v16335_v48 }
 0xc7b   : > { %v21396_v0 = vpop.eup %21395  ;;  %21405 = vlog2.f32 %v16338_v19 }
 0xc7c   : > { %v21398_v41 = vpop.eup %21397  ;;  %16399 = vst.msk [vmem:[%s26631_s28 + $0x28] sm:$0xff] %vm16393_vm1, %v16382_v33  ;;  %v16366_v42 = vmul.f32 0.6931472, %v21396_v0 }
 0xc7d   : > { %v16368_v5 = vmul.f32 0.6931472, %v21398_v41  ;;  %v16341_v52 = vpop.xlane.xlu1 %16340  ;;  %v16344_v28 = vpop.xlane.xlu0 %16343 }
 0xc7e   : > { %v16387_v2 = vsub.f32 %v26586_v57, %v16366_v42  ;;  %21407 = vlog2.f32 %v16341_v52 }
 0xc7f   : > { %v21400_v10 = vpop.eup %21399  ;;  %v16388_v23 = vsub.f32 %v26576_v9, %v16368_v5  ;;  %21409 = vlog2.f32 %v16344_v28 }
 0xc80   : > { %16404 = vst.msk [vmem:[%s26631_s28 + $0x50] sm:$0xff] %vm16393_vm1, %v16387_v2  ;;  %v16362_v7 = vmul.f32 0.6931472, %v21400_v10 }
 0xc81   : > { %16405 = vst.msk [vmem:[%s26631_s28 + $0x58] sm:$0xff] %vm16393_vm1, %v16388_v23 }
 0xc82   : > { %v16385_v63 = vsub.f32 %v26591_v3, %v16362_v7 }
 0xc83   : > { %v21402_v38 = vpop.eup %21401 }
 0xc84   : > { %16402 = vst.msk [vmem:[%s26631_s28 + $0x40] sm:$0xff] %vm16393_vm1, %v16385_v63  ;;  %v16364_v55 = vmul.f32 0.6931472, %v21402_v38 }
 0xc86   : > { %v16386_v57 = vsub.f32 %v26600_v12, %v16364_v55 }
 0xc87   : > { %v21404_v14 = vpop.eup %21403 }
 0xc88   : > { %v21406_v9 = vpop.eup %21405  ;;  %16403 = vst.msk [vmem:[%s26631_s28 + $0x48] sm:$0xff] %vm16393_vm1, %v16386_v57  ;;  %v16370_v26 = vmul.f32 0.6931472, %v21404_v14 }
 0xc89   : > { %v16372_v21 = vmul.f32 0.6931472, %v21406_v9 }
 0xc8a   : > { %v16389_v53 = vsub.f32 %v26609_v17, %v16370_v26 }
 0xc8b   : > { %v21408_v61 = vpop.eup %21407  ;;  %v16390_v3 = vsub.f32 %v26594_v32, %v16372_v21 }
 0xc8c   : > { %v21410_v6 = vpop.eup %21409  ;;  %16406 = vst.msk [vmem:[%s26631_s28 + $0x60] sm:$0xff] %vm16393_vm1, %v16389_v53  ;;  %v16374_v25 = vmul.f32 0.6931472, %v21408_v61 }
 0xc8d   : > { %16407 = vst.msk [vmem:[%s26631_s28 + $0x68] sm:$0xff] %vm16393_vm1, %v16390_v3  ;;  %v16376_v12 = vmul.f32 0.6931472, %v21410_v6 }
 0xc8e   : > { %v16391_v18 = vsub.f32 %v26615_v45, %v16374_v25 }
 0xc8f   : > { %v16392_v40 = vsub.f32 %v26604_v24, %v16376_v12 }
 0xc90   : > { %16408 = vst.msk [vmem:[%s26631_s28 + $0x70] sm:$0xff] %vm16393_vm1, %v16391_v18 }
 0xc91   : > { %16409 = vst.msk [vmem:[%s26631_s28 + $0x78] sm:$0xff] %vm16393_vm1, %v16392_v40 }
 0xc92 PF: > { %s19_s15 = sadd.s32 1, %s21465_s15   ;;  %s26712_s30 = smov %s21445_s10 }
 0xc93   : > { %p16_p12 = scmp.ge.s32.totalorder %s19_s15, 6   ;;  %s26713_s10 = smov %s21569_s22 }
 0xc94   : > { %s26714_s11 = smov %s21457_s13  ;;  %s26715_s12 = smov %s21461_s14 }
 0xc95   : > { %s26716_s13 = smov %s26719_s16  ;;  %s26717_s14 = smov %s26723_s17 }
 0xc96   :  { %18 = sbr.rel (!%p16_p12) target bundleno = 4 (0x4), region = 150 }

</bundles_post_ra>
